<compile_context>
chip_gen: v7x
topology: tpu7x:2x2x1
jax: 0.10.0
libtpu: 0.0.40
codegen_flags: <defaults>
</compile_context>

<pallas_src>
import functools

import jax
import jax.numpy as jnp
from jax.experimental import pallas as pl
from jax.experimental.pallas import tpu as pltpu

BN_EPS = 1e-3
MAX_HW_TILE = 2048  # keeps per-step VMEM bounded on v7x (64 MiB) as well


def _pick_hw_tile(hw, max_tile=MAX_HW_TILE):
    if hw <= max_tile:
        return hw
    for t in (2048, 1024, 512, 256, 128):
        if hw % t == 0:
            return t
    return hw  # fallback: single tile


def _fold_bn(b, gamma, beta, mean, var):
    scale = gamma / jnp.sqrt(var + BN_EPS)
    shift = beta + scale * (b - mean)
    return scale, shift


# --------------------------------------------------------------------------
# Kernel 1: mid 1x1 conv + BN + ReLU fused with attention-mul and b1-add.
#   out[n, o, hw] = attn[n, 0, hw] * relu(scale_o * (W x)[o, hw] + shift_o)
#                   + b1[n, o]
# Output layout (Cout, THW): spatial axis on lanes (lane-dense stores).
# --------------------------------------------------------------------------
def _mid_fused_kernel(x_ref, w_ref, s_ref, t_ref, a_ref, b1_ref, o_ref):
    acc = jnp.dot(w_ref[...], x_ref[0],
                  preferred_element_type=jnp.float32)          # (Cout, THW)
    y = jnp.maximum(acc * s_ref[...] + t_ref[...], 0.0)        # BN + ReLU
    o_ref[0] = (a_ref[0] * y + b1_ref[0]).astype(o_ref.dtype)  # attn * mid + b1


def mid_conv_fused(x, params, attn, b1):
    w, b, gamma, beta, mean, var = params          # w: (Cout, Cin, 1, 1)
    N, Cin, H, W = x.shape
    HW = H * W
    Cout = w.shape[0]

    scale, shift = _fold_bn(b, gamma, beta, mean, var)
    scale = scale.reshape(Cout, 1).astype(jnp.float32)
    shift = shift.reshape(Cout, 1).astype(jnp.float32)

    x3 = x.reshape(N, Cin, HW).astype(jnp.bfloat16)      # MXU-friendly inputs
    w2 = w.reshape(Cout, Cin).astype(jnp.bfloat16)
    a3 = attn.reshape(N, 1, HW).astype(jnp.float32)
    b13 = b1.reshape(N, Cout, 1).astype(jnp.float32)

    THW = _pick_hw_tile(HW)
    n_hw = HW // THW

    flops = 2 * N * HW * Cin * Cout + 4 * N * Cout * HW
    bytes_accessed = (x3.size * 2 + w2.size * 2 +
                      (a3.size + b13.size + N * Cout * HW + 2 * Cout) * 4)

    out = pl.pallas_call(
        _mid_fused_kernel,
        out_shape=jax.ShapeDtypeStruct((N, Cout, HW), jnp.float32),
        grid=(N, n_hw),
        in_specs=[
            pl.BlockSpec((1, Cin, THW), lambda n, t: (n, 0, t)),   # activations
            pl.BlockSpec((Cout, Cin), lambda n, t: (0, 0)),        # weights
            pl.BlockSpec((Cout, 1), lambda n, t: (0, 0)),          # BN scale
            pl.BlockSpec((Cout, 1), lambda n, t: (0, 0)),          # BN shift
            pl.BlockSpec((1, 1, THW), lambda n, t: (n, 0, t)),     # attention
            pl.BlockSpec((1, Cout, 1), lambda n, t: (n, 0, 0)),    # b1
        ],
        out_specs=pl.BlockSpec((1, Cout, THW), lambda n, t: (n, 0, t)),
        compiler_params=pltpu.CompilerParams(
            dimension_semantics=("parallel", "parallel")),
        cost_estimate=pl.CostEstimate(flops=flops, transcendentals=0,
                                      bytes_accessed=bytes_accessed),
    )(x3, w2, scale, shift, a3, b13)
    return out.reshape(N, Cout, H, W)


# --------------------------------------------------------------------------
# Kernel 2: branch1 = global average pool + 1x1 conv + BN + ReLU (fused).
# Tiled reduction over HW with a VMEM accumulator; GEMM on the final step.
# --------------------------------------------------------------------------
def _branch1_kernel(x_ref, w_ref, s_ref, t_ref, o_ref, acc_ref, *, inv_hw):
    @pl.when(pl.program_id(0) == 0)
    def _():
        acc_ref[...] = jnp.zeros_like(acc_ref)

    acc_ref[...] += jnp.sum(x_ref[...], axis=-1)          # (N, Cin)

    @pl.when(pl.program_id(0) == pl.num_programs(0) - 1)
    def _():
        pooled = acc_ref[...] * inv_hw                    # mean over H*W
        z = jnp.dot(pooled, w_ref[...],
                    preferred_element_type=jnp.float32)   # (N, Cout)
        o_ref[...] = jnp.maximum(z * s_ref[...] + t_ref[...], 0.0)


def branch1_pool_conv(x, params):
    w, b, gamma, beta, mean, var = params          # w: (Cout, Cin, 1, 1)
    N, Cin, H, W = x.shape
    HW = H * W
    Cout = w.shape[0]

    scale, shift = _fold_bn(b, gamma, beta, mean, var)
    x3 = x.reshape(N, Cin, HW)
    w2 = w.reshape(Cout, Cin).T                    # (Cin, Cout)

    THW = _pick_hw_tile(HW)
    n_hw = HW // THW
    kern = functools.partial(_branch1_kernel, inv_hw=1.0 / HW)

    return pl.pallas_call(
        kern,
        out_shape=jax.ShapeDtypeStruct((N, Cout), jnp.float32),
        grid=(n_hw,),
        in_specs=[
            pl.BlockSpec((N, Cin, THW), lambda t: (0, 0, t)),
            pl.BlockSpec((Cin, Cout), lambda t: (0, 0)),
            pl.BlockSpec((1, Cout), lambda t: (0, 0)),
            pl.BlockSpec((1, Cout), lambda t: (0, 0)),
        ],
        out_specs=pl.BlockSpec((N, Cout), lambda t: (0, 0)),
        scratch_shapes=[pltpu.VMEM((N, Cin), jnp.float32)],
        compiler_params=pltpu.CompilerParams(
            dimension_semantics=("arbitrary",)),       # reduction axis
    )(x3, w2, scale.reshape(1, Cout), shift.reshape(1, Cout))


# --------------------------------------------------------------------------
# Kernel 3: single-output-channel conv + BN + ReLU as a VPU stencil.
# Stride handled by a polyphase split in the wrapper -> the kernel only does
# contiguous static slices (no strided vector loads, no MXU, no im2col).
# --------------------------------------------------------------------------
def _make_stencil_kernel(Cin, k, s, Ho, Wo):
    def kernel(w_ref, sc_ref, sh_ref, ph_ref, o_ref):
        acc = jnp.zeros((Ho, Wo), jnp.float32)
        for c in range(Cin):
            for di in range(k):
                for dj in range(k):
                    pidx = c * s * s + (di % s) * s + (dj % s)
                    patch = ph_ref[0, pidx,
                                   di // s: di // s + Ho,
                                   dj // s: dj // s + Wo]
                    acc = acc + w_ref[c * k * k + di * k + dj] * patch
        o_ref[0, 0] = jnp.maximum(acc * sc_ref[0] + sh_ref[0], 0.0)
    return kernel


def conv_stencil_bn_relu(x, params, stride, pad):
    w, b, gamma, beta, mean, var = params          # w: (1, Cin, k, k)
    N, Cin, H, W = x.shape
    k = w.shape[2]
    s = stride
    Ho = (H + 2 * pad - k) // s + 1
    Wo = (W + 2 * pad - k) // s + 1
    Hp, Wp = H + 2 * pad, W + 2 * pad

    xpad = jnp.pad(x, ((0, 0), (0, 0), (pad, pad), (pad, pad)))
    if s == 1:
        Hh, Wh = Hp, Wp
        phases = xpad                              # (N, Cin, Hp, Wp); pidx == c
    else:
        Hh = -(-Hp // s)
        Wh = -(-Wp // s)
        xp2 = jnp.pad(xpad,
                      ((0, 0), (0, 0), (0, Hh * s - Hp), (0, Wh * s - Wp)))
        phases = xp2.reshape(N, Cin, Hh, s, Wh, s).transpose(0, 1, 3, 5, 2, 4)
        phases = phases.reshape(N, Cin * s * s, Hh, Wh)
    nphase = phases.shape[1]

    scale, shift = _fold_bn(b, gamma, beta, mean, var)   # shape (1,)
    wflat = w.reshape(Cin * k * k).astype(jnp.float32)

    kern = _make_stencil_kernel(Cin, k, s, Ho, Wo)
    return pl.pallas_call(
        kern,
        out_shape=jax.ShapeDtypeStruct((N, 1, Ho, Wo), jnp.float32),
        grid=(N,),
        in_specs=[
            pl.BlockSpec(memory_space=pltpu.MemorySpace.SMEM),   # weights
            pl.BlockSpec(memory_space=pltpu.MemorySpace.SMEM),   # BN scale
            pl.BlockSpec(memory_space=pltpu.MemorySpace.SMEM),   # BN shift
            pl.BlockSpec((1, nphase, Hh, Wh), lambda n: (n, 0, 0, 0)),
        ],
        out_specs=pl.BlockSpec((1, 1, Ho, Wo), lambda n: (n, 0, 0, 0)),
        compiler_params=pltpu.CompilerParams(
            dimension_semantics=("parallel",)),
    )(wflat, scale, shift, phases)


# --------------------------------------------------------------------------
# Bilinear resize (align_corners=True) for the tiny 1-channel pyramid maps.
# TODO(synk): kept in plain JAX/XLA (gather + lerp) — negligible vs. main path.
# --------------------------------------------------------------------------
def bilinear_resize_align_corners(x, out_h, out_w):
    N, C, H, W = x.shape

    def coords(out_size, in_size):
        if out_size == 1 or in_size == 1:
            z = jnp.zeros((out_size,), jnp.int32)
            return z, z, jnp.zeros((out_size,), jnp.float32)
        scale = (in_size - 1) / (out_size - 1)
        src = jnp.arange(out_size, dtype=jnp.float32) * scale
        i0 = jnp.clip(jnp.floor(src).astype(jnp.int32), 0, in_size - 1)
        i1 = jnp.clip(i0 + 1, 0, in_size - 1)
        return i0, i1, src - i0.astype(jnp.float32)

    h0, h1, fh = coords(out_h, H)
    w0, w1, fw = coords(out_w, W)
    xh = x[:, :, h0, :] * (1.0 - fh)[None, None, :, None] + \
         x[:, :, h1, :] * fh[None, None, :, None]
    return xh[:, :, :, w0] * (1.0 - fw) + xh[:, :, :, w1] * fw


# --------------------------------------------------------------------------
# APN module
# --------------------------------------------------------------------------
def init_conv_bn(key, in_ch, out_ch, k):
    kw_, kb_ = jax.random.split(key)
    w = jax.random.normal(kw_, (out_ch, in_ch, k, k), jnp.float32) * 0.1
    b = jax.random.normal(kb_, (out_ch,), jnp.float32) * 0.1
    gamma = jnp.ones((out_ch,), jnp.float32)
    beta = jnp.zeros((out_ch,), jnp.float32)
    mean = jnp.zeros((out_ch,), jnp.float32)
    var = jnp.ones((out_ch,), jnp.float32)
    return (w, b, gamma, beta, mean, var)


def init_apn_params(key, in_ch, out_ch):
    keys = jax.random.split(key, 8)
    return {
        "branch1": init_conv_bn(keys[0], in_ch, out_ch, 1),
        "mid":     init_conv_bn(keys[1], in_ch, out_ch, 1),
        "down1":   init_conv_bn(keys[2], in_ch, 1, 7),
        "down2":   init_conv_bn(keys[3], 1, 1, 5),
        "down3a":  init_conv_bn(keys[4], 1, 1, 3),
        "down3b":  init_conv_bn(keys[5], 1, 1, 3),
        "conv2":   init_conv_bn(keys[6], 1, 1, 5),
        "conv1":   init_conv_bn(keys[7], 1, 1, 7),
    }


def apn_forward(x, params):
    N, Cin, H, W = x.shape

    # pyramid attention path (VPU stencils)
    x1 = conv_stencil_bn_relu(x,  params["down1"],  stride=2, pad=3)  # (N,1,H/2,W/2)
    x2 = conv_stencil_bn_relu(x1, params["down2"],  stride=2, pad=2)  # (N,1,H/4,W/4)
    x3 = conv_stencil_bn_relu(x2, params["down3a"], stride=2, pad=1)  # (N,1,H/8,W/8)
    x3 = conv_stencil_bn_relu(x3, params["down3b"], stride=1, pad=1)  # (N,1,H/8,W/8)
    x3 = bilinear_resize_align_corners(x3, H // 4, W // 4)

    x2c = conv_stencil_bn_relu(x2, params["conv2"], stride=1, pad=2)  # (N,1,H/4,W/4)
    xm = bilinear_resize_align_corners(x2c + x3, H // 2, W // 2)

    x1c = conv_stencil_bn_relu(x1, params["conv1"], stride=1, pad=3)  # (N,1,H/2,W/2)
    xm = bilinear_resize_align_corners(xm + x1c, H, W)                # (N,1,H,W)

    # branch1: fused global pool + 1x1 conv + BN + ReLU  -> (N, Cout)
    # (its 1x1 -> HxW align_corners upsample is a pure broadcast, done in the
    # fused mid kernel)
    b1 = branch1_pool_conv(x, params["branch1"])

    # mid 1x1 conv + BN + ReLU, fused with attention multiply and b1 add
    return mid_conv_fused(x, params["mid"], xm, b1)                   # (N,Cout,H,W)


# --------------------------------------------------------------------------
if __name__ == "__main__":
    key = jax.random.PRNGKey(0)
    k_x, k_p = jax.random.split(key)

    N, in_ch, out_ch, H, W = 2, 4, 8, 16, 16
    x = jax.random.normal(k_x, (N, in_ch, H, W), jnp.float32)
    params = init_apn_params(k_p, in_ch, out_ch)

    fwd = jax.jit(apn_forward)
    out = jax.block_until_ready(fwd(x, params))

    assert out.shape == (N, out_ch, H, W), out.shape
    assert bool(jnp.all(jnp.isfinite(out)))
    print("KERNEL_OK")
</pallas_src>

<mosaic_0001>
module attributes {stable_mosaic.version = 11 : i64} {
  func.func @kernel(%arg0: i32, %arg1: memref<196xf32, #tpu.memory_space<smem>>, %arg2: memref<1xf32, #tpu.memory_space<smem>>, %arg3: memref<1xf32, #tpu.memory_space<smem>>, %arg4: memref<1x16x11x11xf32, #tpu.memory_space<vmem>>, %arg5: memref<1x1x8x8xf32, #tpu.memory_space<vmem>>) attributes {dimension_semantics = [#tpu.dimension_semantics<parallel>], iteration_bounds = array<i64: 2>, scalar_prefetch = 0 : i64, scratch_operands = 0 : i64, tpu.core_type = #tpu.core_type<tc>, window_params = [{transform_indices = @transform_0, window_bounds = array<i64: 196>}, {transform_indices = @transform_1, window_bounds = array<i64: 1>}, {transform_indices = @transform_2, window_bounds = array<i64: 1>}, {transform_indices = @transform_3, window_bounds = array<i64: 1, 16, 11, 11>}, {transform_indices = @transform_4, window_bounds = array<i64: 1, 1, 8, 8>}]} {
    %cst = arith.constant 0.000000e+00 : f32
    %0 = vector.broadcast %cst : f32 to vector<8x8xf32>
    %c0 = arith.constant 0 : index
    %c0_0 = arith.constant 0 : index
    %c0_1 = arith.constant 0 : index
    %c0_2 = arith.constant 0 : index
    %1 = vector.load %arg4[%c0, %c0_0, %c0_1, %c0_2] : memref<1x16x11x11xf32, #tpu.memory_space<vmem>>, vector<1x1x8x8xf32>
    %2 = vector.shape_cast %1 : vector<1x1x8x8xf32> to vector<8x8xf32>
    %c0_3 = arith.constant 0 : index
    %3 = memref.load %arg1[%c0_3] : memref<196xf32, #tpu.memory_space<smem>>
    %4 = vector.broadcast %3 : f32 to vector<8x8xf32>
    %5 = arith.mulf %4, %2 : vector<8x8xf32>
    %6 = arith.addf %0, %5 : vector<8x8xf32>
    %c0_4 = arith.constant 0 : index
    %c1 = arith.constant 1 : index
    %c0_5 = arith.constant 0 : index
    %c0_6 = arith.constant 0 : index
    %7 = vector.load %arg4[%c0_4, %c1, %c0_5, %c0_6] : memref<1x16x11x11xf32, #tpu.memory_space<vmem>>, vector<1x1x8x8xf32>
    %8 = vector.shape_cast %7 : vector<1x1x8x8xf32> to vector<8x8xf32>
    %c1_7 = arith.constant 1 : index
    %9 = memref.load %arg1[%c1_7] : memref<196xf32, #tpu.memory_space<smem>>
    %10 = vector.broadcast %9 : f32 to vector<8x8xf32>
    %11 = arith.mulf %10, %8 : vector<8x8xf32>
    %12 = arith.addf %6, %11 : vector<8x8xf32>
    %c0_8 = arith.constant 0 : index
    %c0_9 = arith.constant 0 : index
    %c0_10 = arith.constant 0 : index
    %c1_11 = arith.constant 1 : index
    %13 = vector.load %arg4[%c0_8, %c0_9, %c0_10, %c1_11] : memref<1x16x11x11xf32, #tpu.memory_space<vmem>>, vector<1x1x8x8xf32>
    %14 = vector.shape_cast %13 : vector<1x1x8x8xf32> to vector<8x8xf32>
    %c2 = arith.constant 2 : index
    %15 = memref.load %arg1[%c2] : memref<196xf32, #tpu.memory_space<smem>>
    %16 = vector.broadcast %15 : f32 to vector<8x8xf32>
    %17 = arith.mulf %16, %14 : vector<8x8xf32>
    %18 = arith.addf %12, %17 : vector<8x8xf32>
    %c0_12 = arith.constant 0 : index
    %c1_13 = arith.constant 1 : index
    %c0_14 = arith.constant 0 : index
    %c1_15 = arith.constant 1 : index
    %19 = vector.load %arg4[%c0_12, %c1_13, %c0_14, %c1_15] : memref<1x16x11x11xf32, #tpu.memory_space<vmem>>, vector<1x1x8x8xf32>
    %20 = vector.shape_cast %19 : vector<1x1x8x8xf32> to vector<8x8xf32>
    %c3 = arith.constant 3 : index
    %21 = memref.load %arg1[%c3] : memref<196xf32, #tpu.memory_space<smem>>
    %22 = vector.broadcast %21 : f32 to vector<8x8xf32>
    %23 = arith.mulf %22, %20 : vector<8x8xf32>
    %24 = arith.addf %18, %23 : vector<8x8xf32>
    %c0_16 = arith.constant 0 : index
    %c0_17 = arith.constant 0 : index
    %c0_18 = arith.constant 0 : index
    %c2_19 = arith.constant 2 : index
    %25 = vector.load %arg4[%c0_16, %c0_17, %c0_18, %c2_19] : memref<1x16x11x11xf32, #tpu.memory_space<vmem>>, vector<1x1x8x8xf32>
    %26 = vector.shape_cast %25 : vector<1x1x8x8xf32> to vector<8x8xf32>
    %c4 = arith.constant 4 : index
    %27 = memref.load %arg1[%c4] : memref<196xf32, #tpu.memory_space<smem>>
    %28 = vector.broadcast %27 : f32 to vector<8x8xf32>
    %29 = arith.mulf %28, %26 : vector<8x8xf32>
    %30 = arith.addf %24, %29 : vector<8x8xf32>
    %c0_20 = arith.constant 0 : index
    %c1_21 = arith.constant 1 : index
    %c0_22 = arith.constant 0 : index
    %c2_23 = arith.constant 2 : index
    %31 = vector.load %arg4[%c0_20, %c1_21, %c0_22, %c2_23] : memref<1x16x11x11xf32, #tpu.memory_space<vmem>>, vector<1x1x8x8xf32>
    %32 = vector.shape_cast %31 : vector<1x1x8x8xf32> to vector<8x8xf32>
    %c5 = arith.constant 5 : index
    %33 = memref.load %arg1[%c5] : memref<196xf32, #tpu.memory_space<smem>>
    %34 = vector.broadcast %33 : f32 to vector<8x8xf32>
    %35 = arith.mulf %34, %32 : vector<8x8xf32>
    %36 = arith.addf %30, %35 : vector<8x8xf32>
    %c0_24 = arith.constant 0 : index
    %c0_25 = arith.constant 0 : index
    %c0_26 = arith.constant 0 : index
    %c3_27 = arith.constant 3 : index
    %37 = vector.load %arg4[%c0_24, %c0_25, %c0_26, %c3_27] : memref<1x16x11x11xf32, #tpu.memory_space<vmem>>, vector<1x1x8x8xf32>
    %38 = vector.shape_cast %37 : vector<1x1x8x8xf32> to vector<8x8xf32>
    %c6 = arith.constant 6 : index
    %39 = memref.load %arg1[%c6] : memref<196xf32, #tpu.memory_space<smem>>
    %40 = vector.broadcast %39 : f32 to vector<8x8xf32>
    %41 = arith.mulf %40, %38 : vector<8x8xf32>
    %42 = arith.addf %36, %41 : vector<8x8xf32>
    %c0_28 = arith.constant 0 : index
    %c2_29 = arith.constant 2 : index
    %c0_30 = arith.constant 0 : index
    %c0_31 = arith.constant 0 : index
    %43 = vector.load %arg4[%c0_28, %c2_29, %c0_30, %c0_31] : memref<1x16x11x11xf32, #tpu.memory_space<vmem>>, vector<1x1x8x8xf32>
    %44 = vector.shape_cast %43 : vector<1x1x8x8xf32> to vector<8x8xf32>
    %c7 = arith.constant 7 : index
    %45 = memref.load %arg1[%c7] : memref<196xf32, #tpu.memory_space<smem>>
    %46 = vector.broadcast %45 : f32 to vector<8x8xf32>
    %47 = arith.mulf %46, %44 : vector<8x8xf32>
    %48 = arith.addf %42, %47 : vector<8x8xf32>
    %c0_32 = arith.constant 0 : index
    %c3_33 = arith.constant 3 : index
    %c0_34 = arith.constant 0 : index
    %c0_35 = arith.constant 0 : index
    %49 = vector.load %arg4[%c0_32, %c3_33, %c0_34, %c0_35] : memref<1x16x11x11xf32, #tpu.memory_space<vmem>>, vector<1x1x8x8xf32>
    %50 = vector.shape_cast %49 : vector<1x1x8x8xf32> to vector<8x8xf32>
    %c8 = arith.constant 8 : index
    %51 = memref.load %arg1[%c8] : memref<196xf32, #tpu.memory_space<smem>>
    %52 = vector.broadcast %51 : f32 to vector<8x8xf32>
    %53 = arith.mulf %52, %50 : vector<8x8xf32>
    %54 = arith.addf %48, %53 : vector<8x8xf32>
    %c0_36 = arith.constant 0 : index
    %c2_37 = arith.constant 2 : index
    %c0_38 = arith.constant 0 : index
    %c1_39 = arith.constant 1 : index
    %55 = vector.load %arg4[%c0_36, %c2_37, %c0_38, %c1_39] : memref<1x16x11x11xf32, #tpu.memory_space<vmem>>, vector<1x1x8x8xf32>
    %56 = vector.shape_cast %55 : vector<1x1x8x8xf32> to vector<8x8xf32>
    %c9 = arith.constant 9 : index
    %57 = memref.load %arg1[%c9] : memref<196xf32, #tpu.memory_space<smem>>
    %58 = vector.broadcast %57 : f32 to vector<8x8xf32>
    %59 = arith.mulf %58, %56 : vector<8x8xf32>
    %60 = arith.addf %54, %59 : vector<8x8xf32>
    %c0_40 = arith.constant 0 : index
    %c3_41 = arith.constant 3 : index
    %c0_42 = arith.constant 0 : index
    %c1_43 = arith.constant 1 : index
    %61 = vector.load %arg4[%c0_40, %c3_41, %c0_42, %c1_43] : memref<1x16x11x11xf32, #tpu.memory_space<vmem>>, vector<1x1x8x8xf32>
    %62 = vector.shape_cast %61 : vector<1x1x8x8xf32> to vector<8x8xf32>
    %c10 = arith.constant 10 : index
    %63 = memref.load %arg1[%c10] : memref<196xf32, #tpu.memory_space<smem>>
    %64 = vector.broadcast %63 : f32 to vector<8x8xf32>
    %65 = arith.mulf %64, %62 : vector<8x8xf32>
    %66 = arith.addf %60, %65 : vector<8x8xf32>
    %c0_44 = arith.constant 0 : index
    %c2_45 = arith.constant 2 : index
    %c0_46 = arith.constant 0 : index
    %c2_47 = arith.constant 2 : index
    %67 = vector.load %arg4[%c0_44, %c2_45, %c0_46, %c2_47] : memref<1x16x11x11xf32, #tpu.memory_space<vmem>>, vector<1x1x8x8xf32>
    %68 = vector.shape_cast %67 : vector<1x1x8x8xf32> to vector<8x8xf32>
    %c11 = arith.constant 11 : index
    %69 = memref.load %arg1[%c11] : memref<196xf32, #tpu.memory_space<smem>>
    %70 = vector.broadcast %69 : f32 to vector<8x8xf32>
    %71 = arith.mulf %70, %68 : vector<8x8xf32>
    %72 = arith.addf %66, %71 : vector<8x8xf32>
    %c0_48 = arith.constant 0 : index
    %c3_49 = arith.constant 3 : index
    %c0_50 = arith.constant 0 : index
    %c2_51 = arith.constant 2 : index
    %73 = vector.load %arg4[%c0_48, %c3_49, %c0_50, %c2_51] : memref<1x16x11x11xf32, #tpu.memory_space<vmem>>, vector<1x1x8x8xf32>
    %74 = vector.shape_cast %73 : vector<1x1x8x8xf32> to vector<8x8xf32>
    %c12 = arith.constant 12 : index
    %75 = memref.load %arg1[%c12] : memref<196xf32, #tpu.memory_space<smem>>
    %76 = vector.broadcast %75 : f32 to vector<8x8xf32>
    %77 = arith.mulf %76, %74 : vector<8x8xf32>
    %78 = arith.addf %72, %77 : vector<8x8xf32>
    %c0_52 = arith.constant 0 : index
    %c2_53 = arith.constant 2 : index
    %c0_54 = arith.constant 0 : index
    %c3_55 = arith.constant 3 : index
    %79 = vector.load %arg4[%c0_52, %c2_53, %c0_54, %c3_55] : memref<1x16x11x11xf32, #tpu.memory_space<vmem>>, vector<1x1x8x8xf32>
    %80 = vector.shape_cast %79 : vector<1x1x8x8xf32> to vector<8x8xf32>
    %c13 = arith.constant 13 : index
    %81 = memref.load %arg1[%c13] : memref<196xf32, #tpu.memory_space<smem>>
    %82 = vector.broadcast %81 : f32 to vector<8x8xf32>
    %83 = arith.mulf %82, %80 : vector<8x8xf32>
    %84 = arith.addf %78, %83 : vector<8x8xf32>
    %c0_56 = arith.constant 0 : index
    %c0_57 = arith.constant 0 : index
    %c1_58 = arith.constant 1 : index
    %c0_59 = arith.constant 0 : index
    %85 = vector.load %arg4[%c0_56, %c0_57, %c1_58, %c0_59] : memref<1x16x11x11xf32, #tpu.memory_space<vmem>>, vector<1x1x8x8xf32>
    %86 = vector.shape_cast %85 : vector<1x1x8x8xf32> to vector<8x8xf32>
    %c14 = arith.constant 14 : index
    %87 = memref.load %arg1[%c14] : memref<196xf32, #tpu.memory_space<smem>>
    %88 = vector.broadcast %87 : f32 to vector<8x8xf32>
    %89 = arith.mulf %88, %86 : vector<8x8xf32>
    %90 = arith.addf %84, %89 : vector<8x8xf32>
    %c0_60 = arith.constant 0 : index
    %c1_61 = arith.constant 1 : index
    %c1_62 = arith.constant 1 : index
    %c0_63 = arith.constant 0 : index
    %91 = vector.load %arg4[%c0_60, %c1_61, %c1_62, %c0_63] : memref<1x16x11x11xf32, #tpu.memory_space<vmem>>, vector<1x1x8x8xf32>
    %92 = vector.shape_cast %91 : vector<1x1x8x8xf32> to vector<8x8xf32>
    %c15 = arith.constant 15 : index
    %93 = memref.load %arg1[%c15] : memref<196xf32, #tpu.memory_space<smem>>
    %94 = vector.broadcast %93 : f32 to vector<8x8xf32>
    %95 = arith.mulf %94, %92 : vector<8x8xf32>
    %96 = arith.addf %90, %95 : vector<8x8xf32>
    %c0_64 = arith.constant 0 : index
    %c0_65 = arith.constant 0 : index
    %c1_66 = arith.constant 1 : index
    %c1_67 = arith.constant 1 : index
    %97 = vector.load %arg4[%c0_64, %c0_65, %c1_66, %c1_67] : memref<1x16x11x11xf32, #tpu.memory_space<vmem>>, vector<1x1x8x8xf32>
    %98 = vector.shape_cast %97 : vector<1x1x8x8xf32> to vector<8x8xf32>
    %c16 = arith.constant 16 : index
    %99 = memref.load %arg1[%c16] : memref<196xf32, #tpu.memory_space<smem>>
    %100 = vector.broadcast %99 : f32 to vector<8x8xf32>
    %101 = arith.mulf %100, %98 : vector<8x8xf32>
    %102 = arith.addf %96, %101 : vector<8x8xf32>
    %c0_68 = arith.constant 0 : index
    %c1_69 = arith.constant 1 : index
    %c1_70 = arith.constant 1 : index
    %c1_71 = arith.constant 1 : index
    %103 = vector.load %arg4[%c0_68, %c1_69, %c1_70, %c1_71] : memref<1x16x11x11xf32, #tpu.memory_space<vmem>>, vector<1x1x8x8xf32>
    %104 = vector.shape_cast %103 : vector<1x1x8x8xf32> to vector<8x8xf32>
    %c17 = arith.constant 17 : index
    %105 = memref.load %arg1[%c17] : memref<196xf32, #tpu.memory_space<smem>>
    %106 = vector.broadcast %105 : f32 to vector<8x8xf32>
    %107 = arith.mulf %106, %104 : vector<8x8xf32>
    %108 = arith.addf %102, %107 : vector<8x8xf32>
    %c0_72 = arith.constant 0 : index
    %c0_73 = arith.constant 0 : index
    %c1_74 = arith.constant 1 : index
    %c2_75 = arith.constant 2 : index
    %109 = vector.load %arg4[%c0_72, %c0_73, %c1_74, %c2_75] : memref<1x16x11x11xf32, #tpu.memory_space<vmem>>, vector<1x1x8x8xf32>
    %110 = vector.shape_cast %109 : vector<1x1x8x8xf32> to vector<8x8xf32>
    %c18 = arith.constant 18 : index
    %111 = memref.load %arg1[%c18] : memref<196xf32, #tpu.memory_space<smem>>
    %112 = vector.broadcast %111 : f32 to vector<8x8xf32>
    %113 = arith.mulf %112, %110 : vector<8x8xf32>
    %114 = arith.addf %108, %113 : vector<8x8xf32>
    %c0_76 = arith.constant 0 : index
    %c1_77 = arith.constant 1 : index
    %c1_78 = arith.constant 1 : index
    %c2_79 = arith.constant 2 : index
    %115 = vector.load %arg4[%c0_76, %c1_77, %c1_78, %c2_79] : memref<1x16x11x11xf32, #tpu.memory_space<vmem>>, vector<1x1x8x8xf32>
    %116 = vector.shape_cast %115 : vector<1x1x8x8xf32> to vector<8x8xf32>
    %c19 = arith.constant 19 : index
    %117 = memref.load %arg1[%c19] : memref<196xf32, #tpu.memory_space<smem>>
    %118 = vector.broadcast %117 : f32 to vector<8x8xf32>
    %119 = arith.mulf %118, %116 : vector<8x8xf32>
    %120 = arith.addf %114, %119 : vector<8x8xf32>
    %c0_80 = arith.constant 0 : index
    %c0_81 = arith.constant 0 : index
    %c1_82 = arith.constant 1 : index
    %c3_83 = arith.constant 3 : index
    %121 = vector.load %arg4[%c0_80, %c0_81, %c1_82, %c3_83] : memref<1x16x11x11xf32, #tpu.memory_space<vmem>>, vector<1x1x8x8xf32>
    %122 = vector.shape_cast %121 : vector<1x1x8x8xf32> to vector<8x8xf32>
    %c20 = arith.constant 20 : index
    %123 = memref.load %arg1[%c20] : memref<196xf32, #tpu.memory_space<smem>>
    %124 = vector.broadcast %123 : f32 to vector<8x8xf32>
    %125 = arith.mulf %124, %122 : vector<8x8xf32>
    %126 = arith.addf %120, %125 : vector<8x8xf32>
    %c0_84 = arith.constant 0 : index
    %c2_85 = arith.constant 2 : index
    %c1_86 = arith.constant 1 : index
    %c0_87 = arith.constant 0 : index
    %127 = vector.load %arg4[%c0_84, %c2_85, %c1_86, %c0_87] : memref<1x16x11x11xf32, #tpu.memory_space<vmem>>, vector<1x1x8x8xf32>
    %128 = vector.shape_cast %127 : vector<1x1x8x8xf32> to vector<8x8xf32>
    %c21 = arith.constant 21 : index
    %129 = memref.load %arg1[%c21] : memref<196xf32, #tpu.memory_space<smem>>
    %130 = vector.broadcast %129 : f32 to vector<8x8xf32>
    %131 = arith.mulf %130, %128 : vector<8x8xf32>
    %132 = arith.addf %126, %131 : vector<8x8xf32>
    %c0_88 = arith.constant 0 : index
    %c3_89 = arith.constant 3 : index
    %c1_90 = arith.constant 1 : index
    %c0_91 = arith.constant 0 : index
    %133 = vector.load %arg4[%c0_88, %c3_89, %c1_90, %c0_91] : memref<1x16x11x11xf32, #tpu.memory_space<vmem>>, vector<1x1x8x8xf32>
    %134 = vector.shape_cast %133 : vector<1x1x8x8xf32> to vector<8x8xf32>
    %c22 = arith.constant 22 : index
    %135 = memref.load %arg1[%c22] : memref<196xf32, #tpu.memory_space<smem>>
    %136 = vector.broadcast %135 : f32 to vector<8x8xf32>
    %137 = arith.mulf %136, %134 : vector<8x8xf32>
    %138 = arith.addf %132, %137 : vector<8x8xf32>
    %c0_92 = arith.constant 0 : index
    %c2_93 = arith.constant 2 : index
    %c1_94 = arith.constant 1 : index
    %c1_95 = arith.constant 1 : index
    %139 = vector.load %arg4[%c0_92, %c2_93, %c1_94, %c1_95] : memref<1x16x11x11xf32, #tpu.memory_space<vmem>>, vector<1x1x8x8xf32>
    %140 = vector.shape_cast %139 : vector<1x1x8x8xf32> to vector<8x8xf32>
    %c23 = arith.constant 23 : index
    %141 = memref.load %arg1[%c23] : memref<196xf32, #tpu.memory_space<smem>>
    %142 = vector.broadcast %141 : f32 to vector<8x8xf32>
    %143 = arith.mulf %142, %140 : vector<8x8xf32>
    %144 = arith.addf %138, %143 : vector<8x8xf32>
    %c0_96 = arith.constant 0 : index
    %c3_97 = arith.constant 3 : index
    %c1_98 = arith.constant 1 : index
    %c1_99 = arith.constant 1 : index
    %145 = vector.load %arg4[%c0_96, %c3_97, %c1_98, %c1_99] : memref<1x16x11x11xf32, #tpu.memory_space<vmem>>, vector<1x1x8x8xf32>
    %146 = vector.shape_cast %145 : vector<1x1x8x8xf32> to vector<8x8xf32>
    %c24 = arith.constant 24 : index
    %147 = memref.load %arg1[%c24] : memref<196xf32, #tpu.memory_space<smem>>
    %148 = vector.broadcast %147 : f32 to vector<8x8xf32>
    %149 = arith.mulf %148, %146 : vector<8x8xf32>
    %150 = arith.addf %144, %149 : vector<8x8xf32>
    %c0_100 = arith.constant 0 : index
    %c2_101 = arith.constant 2 : index
    %c1_102 = arith.constant 1 : index
    %c2_103 = arith.constant 2 : index
    %151 = vector.load %arg4[%c0_100, %c2_101, %c1_102, %c2_103] : memref<1x16x11x11xf32, #tpu.memory_space<vmem>>, vector<1x1x8x8xf32>
    %152 = vector.shape_cast %151 : vector<1x1x8x8xf32> to vector<8x8xf32>
    %c25 = arith.constant 25 : index
    %153 = memref.load %arg1[%c25] : memref<196xf32, #tpu.memory_space<smem>>
    %154 = vector.broadcast %153 : f32 to vector<8x8xf32>
    %155 = arith.mulf %154, %152 : vector<8x8xf32>
    %156 = arith.addf %150, %155 : vector<8x8xf32>
    %c0_104 = arith.constant 0 : index
    %c3_105 = arith.constant 3 : index
    %c1_106 = arith.constant 1 : index
    %c2_107 = arith.constant 2 : index
    %157 = vector.load %arg4[%c0_104, %c3_105, %c1_106, %c2_107] : memref<1x16x11x11xf32, #tpu.memory_space<vmem>>, vector<1x1x8x8xf32>
    %158 = vector.shape_cast %157 : vector<1x1x8x8xf32> to vector<8x8xf32>
    %c26 = arith.constant 26 : index
    %159 = memref.load %arg1[%c26] : memref<196xf32, #tpu.memory_space<smem>>
    %160 = vector.broadcast %159 : f32 to vector<8x8xf32>
    %161 = arith.mulf %160, %158 : vector<8x8xf32>
    %162 = arith.addf %156, %161 : vector<8x8xf32>
    %c0_108 = arith.constant 0 : index
    %c2_109 = arith.constant 2 : index
    %c1_110 = arith.constant 1 : index
    %c3_111 = arith.constant 3 : index
    %163 = vector.load %arg4[%c0_108, %c2_109, %c1_110, %c3_111] : memref<1x16x11x11xf32, #tpu.memory_space<vmem>>, vector<1x1x8x8xf32>
    %164 = vector.shape_cast %163 : vector<1x1x8x8xf32> to vector<8x8xf32>
    %c27 = arith.constant 27 : index
    %165 = memref.load %arg1[%c27] : memref<196xf32, #tpu.memory_space<smem>>
    %166 = vector.broadcast %165 : f32 to vector<8x8xf32>
    %167 = arith.mulf %166, %164 : vector<8x8xf32>
    %168 = arith.addf %162, %167 : vector<8x8xf32>
    %c0_112 = arith.constant 0 : index
    %c0_113 = arith.constant 0 : index
    %c2_114 = arith.constant 2 : index
    %c0_115 = arith.constant 0 : index
    %169 = vector.load %arg4[%c0_112, %c0_113, %c2_114, %c0_115] : memref<1x16x11x11xf32, #tpu.memory_space<vmem>>, vector<1x1x8x8xf32>
    %170 = vector.shape_cast %169 : vector<1x1x8x8xf32> to vector<8x8xf32>
    %c28 = arith.constant 28 : index
    %171 = memref.load %arg1[%c28] : memref<196xf32, #tpu.memory_space<smem>>
    %172 = vector.broadcast %171 : f32 to vector<8x8xf32>
    %173 = arith.mulf %172, %170 : vector<8x8xf32>
    %174 = arith.addf %168, %173 : vector<8x8xf32>
    %c0_116 = arith.constant 0 : index
    %c1_117 = arith.constant 1 : index
    %c2_118 = arith.constant 2 : index
    %c0_119 = arith.constant 0 : index
    %175 = vector.load %arg4[%c0_116, %c1_117, %c2_118, %c0_119] : memref<1x16x11x11xf32, #tpu.memory_space<vmem>>, vector<1x1x8x8xf32>
    %176 = vector.shape_cast %175 : vector<1x1x8x8xf32> to vector<8x8xf32>
    %c29 = arith.constant 29 : index
    %177 = memref.load %arg1[%c29] : memref<196xf32, #tpu.memory_space<smem>>
    %178 = vector.broadcast %177 : f32 to vector<8x8xf32>
    %179 = arith.mulf %178, %176 : vector<8x8xf32>
    %180 = arith.addf %174, %179 : vector<8x8xf32>
    %c0_120 = arith.constant 0 : index
    %c0_121 = arith.constant 0 : index
    %c2_122 = arith.constant 2 : index
    %c1_123 = arith.constant 1 : index
    %181 = vector.load %arg4[%c0_120, %c0_121, %c2_122, %c1_123] : memref<1x16x11x11xf32, #tpu.memory_space<vmem>>, vector<1x1x8x8xf32>
    %182 = vector.shape_cast %181 : vector<1x1x8x8xf32> to vector<8x8xf32>
    %c30 = arith.constant 30 : index
    %183 = memref.load %arg1[%c30] : memref<196xf32, #tpu.memory_space<smem>>
    %184 = vector.broadcast %183 : f32 to vector<8x8xf32>
    %185 = arith.mulf %184, %182 : vector<8x8xf32>
    %186 = arith.addf %180, %185 : vector<8x8xf32>
    %c0_124 = arith.constant 0 : index
    %c1_125 = arith.constant 1 : index
    %c2_126 = arith.constant 2 : index
    %c1_127 = arith.constant 1 : index
    %187 = vector.load %arg4[%c0_124, %c1_125, %c2_126, %c1_127] : memref<1x16x11x11xf32, #tpu.memory_space<vmem>>, vector<1x1x8x8xf32>
    %188 = vector.shape_cast %187 : vector<1x1x8x8xf32> to vector<8x8xf32>
    %c31 = arith.constant 31 : index
    %189 = memref.load %arg1[%c31] : memref<196xf32, #tpu.memory_space<smem>>
    %190 = vector.broadcast %189 : f32 to vector<8x8xf32>
    %191 = arith.mulf %190, %188 : vector<8x8xf32>
    %192 = arith.addf %186, %191 : vector<8x8xf32>
    %c0_128 = arith.constant 0 : index
    %c0_129 = arith.constant 0 : index
    %c2_130 = arith.constant 2 : index
    %c2_131 = arith.constant 2 : index
    %193 = vector.load %arg4[%c0_128, %c0_129, %c2_130, %c2_131] : memref<1x16x11x11xf32, #tpu.memory_space<vmem>>, vector<1x1x8x8xf32>
    %194 = vector.shape_cast %193 : vector<1x1x8x8xf32> to vector<8x8xf32>
    %c32 = arith.constant 32 : index
    %195 = memref.load %arg1[%c32] : memref<196xf32, #tpu.memory_space<smem>>
    %196 = vector.broadcast %195 : f32 to vector<8x8xf32>
    %197 = arith.mulf %196, %194 : vector<8x8xf32>
    %198 = arith.addf %192, %197 : vector<8x8xf32>
    %c0_132 = arith.constant 0 : index
    %c1_133 = arith.constant 1 : index
    %c2_134 = arith.constant 2 : index
    %c2_135 = arith.constant 2 : index
    %199 = vector.load %arg4[%c0_132, %c1_133, %c2_134, %c2_135] : memref<1x16x11x11xf32, #tpu.memory_space<vmem>>, vector<1x1x8x8xf32>
    %200 = vector.shape_cast %199 : vector<1x1x8x8xf32> to vector<8x8xf32>
    %c33 = arith.constant 33 : index
    %201 = memref.load %arg1[%c33] : memref<196xf32, #tpu.memory_space<smem>>
    %202 = vector.broadcast %201 : f32 to vector<8x8xf32>
    %203 = arith.mulf %202, %200 : vector<8x8xf32>
    %204 = arith.addf %198, %203 : vector<8x8xf32>
    %c0_136 = arith.constant 0 : index
    %c0_137 = arith.constant 0 : index
    %c2_138 = arith.constant 2 : index
    %c3_139 = arith.constant 3 : index
    %205 = vector.load %arg4[%c0_136, %c0_137, %c2_138, %c3_139] : memref<1x16x11x11xf32, #tpu.memory_space<vmem>>, vector<1x1x8x8xf32>
    %206 = vector.shape_cast %205 : vector<1x1x8x8xf32> to vector<8x8xf32>
    %c34 = arith.constant 34 : index
    %207 = memref.load %arg1[%c34] : memref<196xf32, #tpu.memory_space<smem>>
    %208 = vector.broadcast %207 : f32 to vector<8x8xf32>
    %209 = arith.mulf %208, %206 : vector<8x8xf32>
    %210 = arith.addf %204, %209 : vector<8x8xf32>
    %c0_140 = arith.constant 0 : index
    %c2_141 = arith.constant 2 : index
    %c2_142 = arith.constant 2 : index
    %c0_143 = arith.constant 0 : index
    %211 = vector.load %arg4[%c0_140, %c2_141, %c2_142, %c0_143] : memref<1x16x11x11xf32, #tpu.memory_space<vmem>>, vector<1x1x8x8xf32>
    %212 = vector.shape_cast %211 : vector<1x1x8x8xf32> to vector<8x8xf32>
    %c35 = arith.constant 35 : index
    %213 = memref.load %arg1[%c35] : memref<196xf32, #tpu.memory_space<smem>>
    %214 = vector.broadcast %213 : f32 to vector<8x8xf32>
    %215 = arith.mulf %214, %212 : vector<8x8xf32>
    %216 = arith.addf %210, %215 : vector<8x8xf32>
    %c0_144 = arith.constant 0 : index
    %c3_145 = arith.constant 3 : index
    %c2_146 = arith.constant 2 : index
    %c0_147 = arith.constant 0 : index
    %217 = vector.load %arg4[%c0_144, %c3_145, %c2_146, %c0_147] : memref<1x16x11x11xf32, #tpu.memory_space<vmem>>, vector<1x1x8x8xf32>
    %218 = vector.shape_cast %217 : vector<1x1x8x8xf32> to vector<8x8xf32>
    %c36 = arith.constant 36 : index
    %219 = memref.load %arg1[%c36] : memref<196xf32, #tpu.memory_space<smem>>
    %220 = vector.broadcast %219 : f32 to vector<8x8xf32>
    %221 = arith.mulf %220, %218 : vector<8x8xf32>
    %222 = arith.addf %216, %221 : vector<8x8xf32>
    %c0_148 = arith.constant 0 : index
    %c2_149 = arith.constant 2 : index
    %c2_150 = arith.constant 2 : index
    %c1_151 = arith.constant 1 : index
    %223 = vector.load %arg4[%c0_148, %c2_149, %c2_150, %c1_151] : memref<1x16x11x11xf32, #tpu.memory_space<vmem>>, vector<1x1x8x8xf32>
    %224 = vector.shape_cast %223 : vector<1x1x8x8xf32> to vector<8x8xf32>
    %c37 = arith.constant 37 : index
    %225 = memref.load %arg1[%c37] : memref<196xf32, #tpu.memory_space<smem>>
    %226 = vector.broadcast %225 : f32 to vector<8x8xf32>
    %227 = arith.mulf %226, %224 : vector<8x8xf32>
    %228 = arith.addf %222, %227 : vector<8x8xf32>
    %c0_152 = arith.constant 0 : index
    %c3_153 = arith.constant 3 : index
    %c2_154 = arith.constant 2 : index
    %c1_155 = arith.constant 1 : index
    %229 = vector.load %arg4[%c0_152, %c3_153, %c2_154, %c1_155] : memref<1x16x11x11xf32, #tpu.memory_space<vmem>>, vector<1x1x8x8xf32>
    %230 = vector.shape_cast %229 : vector<1x1x8x8xf32> to vector<8x8xf32>
    %c38 = arith.constant 38 : index
    %231 = memref.load %arg1[%c38] : memref<196xf32, #tpu.memory_space<smem>>
    %232 = vector.broadcast %231 : f32 to vector<8x8xf32>
    %233 = arith.mulf %232, %230 : vector<8x8xf32>
    %234 = arith.addf %228, %233 : vector<8x8xf32>
    %c0_156 = arith.constant 0 : index
    %c2_157 = arith.constant 2 : index
    %c2_158 = arith.constant 2 : index
    %c2_159 = arith.constant 2 : index
    %235 = vector.load %arg4[%c0_156, %c2_157, %c2_158, %c2_159] : memref<1x16x11x11xf32, #tpu.memory_space<vmem>>, vector<1x1x8x8xf32>
    %236 = vector.shape_cast %235 : vector<1x1x8x8xf32> to vector<8x8xf32>
    %c39 = arith.constant 39 : index
    %237 = memref.load %arg1[%c39] : memref<196xf32, #tpu.memory_space<smem>>
    %238 = vector.broadcast %237 : f32 to vector<8x8xf32>
    %239 = arith.mulf %238, %236 : vector<8x8xf32>
    %240 = arith.addf %234, %239 : vector<8x8xf32>
    %c0_160 = arith.constant 0 : index
    %c3_161 = arith.constant 3 : index
    %c2_162 = arith.constant 2 : index
    %c2_163 = arith.constant 2 : index
    %241 = vector.load %arg4[%c0_160, %c3_161, %c2_162, %c2_163] : memref<1x16x11x11xf32, #tpu.memory_space<vmem>>, vector<1x1x8x8xf32>
    %242 = vector.shape_cast %241 : vector<1x1x8x8xf32> to vector<8x8xf32>
    %c40 = arith.constant 40 : index
    %243 = memref.load %arg1[%c40] : memref<196xf32, #tpu.memory_space<smem>>
    %244 = vector.broadcast %243 : f32 to vector<8x8xf32>
    %245 = arith.mulf %244, %242 : vector<8x8xf32>
    %246 = arith.addf %240, %245 : vector<8x8xf32>
    %c0_164 = arith.constant 0 : index
    %c2_165 = arith.constant 2 : index
    %c2_166 = arith.constant 2 : index
    %c3_167 = arith.constant 3 : index
    %247 = vector.load %arg4[%c0_164, %c2_165, %c2_166, %c3_167] : memref<1x16x11x11xf32, #tpu.memory_space<vmem>>, vector<1x1x8x8xf32>
    %248 = vector.shape_cast %247 : vector<1x1x8x8xf32> to vector<8x8xf32>
    %c41 = arith.constant 41 : index
    %249 = memref.load %arg1[%c41] : memref<196xf32, #tpu.memory_space<smem>>
    %250 = vector.broadcast %249 : f32 to vector<8x8xf32>
    %251 = arith.mulf %250, %248 : vector<8x8xf32>
    %252 = arith.addf %246, %251 : vector<8x8xf32>
    %c0_168 = arith.constant 0 : index
    %c0_169 = arith.constant 0 : index
    %c3_170 = arith.constant 3 : index
    %c0_171 = arith.constant 0 : index
    %253 = vector.load %arg4[%c0_168, %c0_169, %c3_170, %c0_171] : memref<1x16x11x11xf32, #tpu.memory_space<vmem>>, vector<1x1x8x8xf32>
    %254 = vector.shape_cast %253 : vector<1x1x8x8xf32> to vector<8x8xf32>
    %c42 = arith.constant 42 : index
    %255 = memref.load %arg1[%c42] : memref<196xf32, #tpu.memory_space<smem>>
    %256 = vector.broadcast %255 : f32 to vector<8x8xf32>
    %257 = arith.mulf %256, %254 : vector<8x8xf32>
    %258 = arith.addf %252, %257 : vector<8x8xf32>
    %c0_172 = arith.constant 0 : index
    %c1_173 = arith.constant 1 : index
    %c3_174 = arith.constant 3 : index
    %c0_175 = arith.constant 0 : index
    %259 = vector.load %arg4[%c0_172, %c1_173, %c3_174, %c0_175] : memref<1x16x11x11xf32, #tpu.memory_space<vmem>>, vector<1x1x8x8xf32>
    %260 = vector.shape_cast %259 : vector<1x1x8x8xf32> to vector<8x8xf32>
    %c43 = arith.constant 43 : index
    %261 = memref.load %arg1[%c43] : memref<196xf32, #tpu.memory_space<smem>>
    %262 = vector.broadcast %261 : f32 to vector<8x8xf32>
    %263 = arith.mulf %262, %260 : vector<8x8xf32>
    %264 = arith.addf %258, %263 : vector<8x8xf32>
    %c0_176 = arith.constant 0 : index
    %c0_177 = arith.constant 0 : index
    %c3_178 = arith.constant 3 : index
    %c1_179 = arith.constant 1 : index
    %265 = vector.load %arg4[%c0_176, %c0_177, %c3_178, %c1_179] : memref<1x16x11x11xf32, #tpu.memory_space<vmem>>, vector<1x1x8x8xf32>
    %266 = vector.shape_cast %265 : vector<1x1x8x8xf32> to vector<8x8xf32>
    %c44 = arith.constant 44 : index
    %267 = memref.load %arg1[%c44] : memref<196xf32, #tpu.memory_space<smem>>
    %268 = vector.broadcast %267 : f32 to vector<8x8xf32>
    %269 = arith.mulf %268, %266 : vector<8x8xf32>
    %270 = arith.addf %264, %269 : vector<8x8xf32>
    %c0_180 = arith.constant 0 : index
    %c1_181 = arith.constant 1 : index
    %c3_182 = arith.constant 3 : index
    %c1_183 = arith.constant 1 : index
    %271 = vector.load %arg4[%c0_180, %c1_181, %c3_182, %c1_183] : memref<1x16x11x11xf32, #tpu.memory_space<vmem>>, vector<1x1x8x8xf32>
    %272 = vector.shape_cast %271 : vector<1x1x8x8xf32> to vector<8x8xf32>
    %c45 = arith.constant 45 : index
    %273 = memref.load %arg1[%c45] : memref<196xf32, #tpu.memory_space<smem>>
    %274 = vector.broadcast %273 : f32 to vector<8x8xf32>
    %275 = arith.mulf %274, %272 : vector<8x8xf32>
    %276 = arith.addf %270, %275 : vector<8x8xf32>
    %c0_184 = arith.constant 0 : index
    %c0_185 = arith.constant 0 : index
    %c3_186 = arith.constant 3 : index
    %c2_187 = arith.constant 2 : index
    %277 = vector.load %arg4[%c0_184, %c0_185, %c3_186, %c2_187] : memref<1x16x11x11xf32, #tpu.memory_space<vmem>>, vector<1x1x8x8xf32>
    %278 = vector.shape_cast %277 : vector<1x1x8x8xf32> to vector<8x8xf32>
    %c46 = arith.constant 46 : index
    %279 = memref.load %arg1[%c46] : memref<196xf32, #tpu.memory_space<smem>>
    %280 = vector.broadcast %279 : f32 to vector<8x8xf32>
    %281 = arith.mulf %280, %278 : vector<8x8xf32>
    %282 = arith.addf %276, %281 : vector<8x8xf32>
    %c0_188 = arith.constant 0 : index
    %c1_189 = arith.constant 1 : index
    %c3_190 = arith.constant 3 : index
    %c2_191 = arith.constant 2 : index
    %283 = vector.load %arg4[%c0_188, %c1_189, %c3_190, %c2_191] : memref<1x16x11x11xf32, #tpu.memory_space<vmem>>, vector<1x1x8x8xf32>
    %284 = vector.shape_cast %283 : vector<1x1x8x8xf32> to vector<8x8xf32>
    %c47 = arith.constant 47 : index
    %285 = memref.load %arg1[%c47] : memref<196xf32, #tpu.memory_space<smem>>
    %286 = vector.broadcast %285 : f32 to vector<8x8xf32>
    %287 = arith.mulf %286, %284 : vector<8x8xf32>
    %288 = arith.addf %282, %287 : vector<8x8xf32>
    %c0_192 = arith.constant 0 : index
    %c0_193 = arith.constant 0 : index
    %c3_194 = arith.constant 3 : index
    %c3_195 = arith.constant 3 : index
    %289 = vector.load %arg4[%c0_192, %c0_193, %c3_194, %c3_195] : memref<1x16x11x11xf32, #tpu.memory_space<vmem>>, vector<1x1x8x8xf32>
    %290 = vector.shape_cast %289 : vector<1x1x8x8xf32> to vector<8x8xf32>
    %c48 = arith.constant 48 : index
    %291 = memref.load %arg1[%c48] : memref<196xf32, #tpu.memory_space<smem>>
    %292 = vector.broadcast %291 : f32 to vector<8x8xf32>
    %293 = arith.mulf %292, %290 : vector<8x8xf32>
    %294 = arith.addf %288, %293 : vector<8x8xf32>
    %c0_196 = arith.constant 0 : index
    %c4_197 = arith.constant 4 : index
    %c0_198 = arith.constant 0 : index
    %c0_199 = arith.constant 0 : index
    %295 = vector.load %arg4[%c0_196, %c4_197, %c0_198, %c0_199] : memref<1x16x11x11xf32, #tpu.memory_space<vmem>>, vector<1x1x8x8xf32>
    %296 = vector.shape_cast %295 : vector<1x1x8x8xf32> to vector<8x8xf32>
    %c49 = arith.constant 49 : index
    %297 = memref.load %arg1[%c49] : memref<196xf32, #tpu.memory_space<smem>>
    %298 = vector.broadcast %297 : f32 to vector<8x8xf32>
    %299 = arith.mulf %298, %296 : vector<8x8xf32>
    %300 = arith.addf %294, %299 : vector<8x8xf32>
    %c0_200 = arith.constant 0 : index
    %c5_201 = arith.constant 5 : index
    %c0_202 = arith.constant 0 : index
    %c0_203 = arith.constant 0 : index
    %301 = vector.load %arg4[%c0_200, %c5_201, %c0_202, %c0_203] : memref<1x16x11x11xf32, #tpu.memory_space<vmem>>, vector<1x1x8x8xf32>
    %302 = vector.shape_cast %301 : vector<1x1x8x8xf32> to vector<8x8xf32>
    %c50 = arith.constant 50 : index
    %303 = memref.load %arg1[%c50] : memref<196xf32, #tpu.memory_space<smem>>
    %304 = vector.broadcast %303 : f32 to vector<8x8xf32>
    %305 = arith.mulf %304, %302 : vector<8x8xf32>
    %306 = arith.addf %300, %305 : vector<8x8xf32>
    %c0_204 = arith.constant 0 : index
    %c4_205 = arith.constant 4 : index
    %c0_206 = arith.constant 0 : index
    %c1_207 = arith.constant 1 : index
    %307 = vector.load %arg4[%c0_204, %c4_205, %c0_206, %c1_207] : memref<1x16x11x11xf32, #tpu.memory_space<vmem>>, vector<1x1x8x8xf32>
    %308 = vector.shape_cast %307 : vector<1x1x8x8xf32> to vector<8x8xf32>
    %c51 = arith.constant 51 : index
    %309 = memref.load %arg1[%c51] : memref<196xf32, #tpu.memory_space<smem>>
    %310 = vector.broadcast %309 : f32 to vector<8x8xf32>
    %311 = arith.mulf %310, %308 : vector<8x8xf32>
    %312 = arith.addf %306, %311 : vector<8x8xf32>
    %c0_208 = arith.constant 0 : index
    %c5_209 = arith.constant 5 : index
    %c0_210 = arith.constant 0 : index
    %c1_211 = arith.constant 1 : index
    %313 = vector.load %arg4[%c0_208, %c5_209, %c0_210, %c1_211] : memref<1x16x11x11xf32, #tpu.memory_space<vmem>>, vector<1x1x8x8xf32>
    %314 = vector.shape_cast %313 : vector<1x1x8x8xf32> to vector<8x8xf32>
    %c52 = arith.constant 52 : index
    %315 = memref.load %arg1[%c52] : memref<196xf32, #tpu.memory_space<smem>>
    %316 = vector.broadcast %315 : f32 to vector<8x8xf32>
    %317 = arith.mulf %316, %314 : vector<8x8xf32>
    %318 = arith.addf %312, %317 : vector<8x8xf32>
    %c0_212 = arith.constant 0 : index
    %c4_213 = arith.constant 4 : index
    %c0_214 = arith.constant 0 : index
    %c2_215 = arith.constant 2 : index
    %319 = vector.load %arg4[%c0_212, %c4_213, %c0_214, %c2_215] : memref<1x16x11x11xf32, #tpu.memory_space<vmem>>, vector<1x1x8x8xf32>
    %320 = vector.shape_cast %319 : vector<1x1x8x8xf32> to vector<8x8xf32>
    %c53 = arith.constant 53 : index
    %321 = memref.load %arg1[%c53] : memref<196xf32, #tpu.memory_space<smem>>
    %322 = vector.broadcast %321 : f32 to vector<8x8xf32>
    %323 = arith.mulf %322, %320 : vector<8x8xf32>
    %324 = arith.addf %318, %323 : vector<8x8xf32>
    %c0_216 = arith.constant 0 : index
    %c5_217 = arith.constant 5 : index
    %c0_218 = arith.constant 0 : index
    %c2_219 = arith.constant 2 : index
    %325 = vector.load %arg4[%c0_216, %c5_217, %c0_218, %c2_219] : memref<1x16x11x11xf32, #tpu.memory_space<vmem>>, vector<1x1x8x8xf32>
    %326 = vector.shape_cast %325 : vector<1x1x8x8xf32> to vector<8x8xf32>
    %c54 = arith.constant 54 : index
    %327 = memref.load %arg1[%c54] : memref<196xf32, #tpu.memory_space<smem>>
    %328 = vector.broadcast %327 : f32 to vector<8x8xf32>
    %329 = arith.mulf %328, %326 : vector<8x8xf32>
    %330 = arith.addf %324, %329 : vector<8x8xf32>
    %c0_220 = arith.constant 0 : index
    %c4_221 = arith.constant 4 : index
    %c0_222 = arith.constant 0 : index
    %c3_223 = arith.constant 3 : index
    %331 = vector.load %arg4[%c0_220, %c4_221, %c0_222, %c3_223] : memref<1x16x11x11xf32, #tpu.memory_space<vmem>>, vector<1x1x8x8xf32>
    %332 = vector.shape_cast %331 : vector<1x1x8x8xf32> to vector<8x8xf32>
    %c55 = arith.constant 55 : index
    %333 = memref.load %arg1[%c55] : memref<196xf32, #tpu.memory_space<smem>>
    %334 = vector.broadcast %333 : f32 to vector<8x8xf32>
    %335 = arith.mulf %334, %332 : vector<8x8xf32>
    %336 = arith.addf %330, %335 : vector<8x8xf32>
    %c0_224 = arith.constant 0 : index
    %c6_225 = arith.constant 6 : index
    %c0_226 = arith.constant 0 : index
    %c0_227 = arith.constant 0 : index
    %337 = vector.load %arg4[%c0_224, %c6_225, %c0_226, %c0_227] : memref<1x16x11x11xf32, #tpu.memory_space<vmem>>, vector<1x1x8x8xf32>
    %338 = vector.shape_cast %337 : vector<1x1x8x8xf32> to vector<8x8xf32>
    %c56 = arith.constant 56 : index
    %339 = memref.load %arg1[%c56] : memref<196xf32, #tpu.memory_space<smem>>
    %340 = vector.broadcast %339 : f32 to vector<8x8xf32>
    %341 = arith.mulf %340, %338 : vector<8x8xf32>
    %342 = arith.addf %336, %341 : vector<8x8xf32>
    %c0_228 = arith.constant 0 : index
    %c7_229 = arith.constant 7 : index
    %c0_230 = arith.constant 0 : index
    %c0_231 = arith.constant 0 : index
    %343 = vector.load %arg4[%c0_228, %c7_229, %c0_230, %c0_231] : memref<1x16x11x11xf32, #tpu.memory_space<vmem>>, vector<1x1x8x8xf32>
    %344 = vector.shape_cast %343 : vector<1x1x8x8xf32> to vector<8x8xf32>
    %c57 = arith.constant 57 : index
    %345 = memref.load %arg1[%c57] : memref<196xf32, #tpu.memory_space<smem>>
    %346 = vector.broadcast %345 : f32 to vector<8x8xf32>
    %347 = arith.mulf %346, %344 : vector<8x8xf32>
    %348 = arith.addf %342, %347 : vector<8x8xf32>
    %c0_232 = arith.constant 0 : index
    %c6_233 = arith.constant 6 : index
    %c0_234 = arith.constant 0 : index
    %c1_235 = arith.constant 1 : index
    %349 = vector.load %arg4[%c0_232, %c6_233, %c0_234, %c1_235] : memref<1x16x11x11xf32, #tpu.memory_space<vmem>>, vector<1x1x8x8xf32>
    %350 = vector.shape_cast %349 : vector<1x1x8x8xf32> to vector<8x8xf32>
    %c58 = arith.constant 58 : index
    %351 = memref.load %arg1[%c58] : memref<196xf32, #tpu.memory_space<smem>>
    %352 = vector.broadcast %351 : f32 to vector<8x8xf32>
    %353 = arith.mulf %352, %350 : vector<8x8xf32>
    %354 = arith.addf %348, %353 : vector<8x8xf32>
    %c0_236 = arith.constant 0 : index
    %c7_237 = arith.constant 7 : index
    %c0_238 = arith.constant 0 : index
    %c1_239 = arith.constant 1 : index
    %355 = vector.load %arg4[%c0_236, %c7_237, %c0_238, %c1_239] : memref<1x16x11x11xf32, #tpu.memory_space<vmem>>, vector<1x1x8x8xf32>
    %356 = vector.shape_cast %355 : vector<1x1x8x8xf32> to vector<8x8xf32>
    %c59 = arith.constant 59 : index
    %357 = memref.load %arg1[%c59] : memref<196xf32, #tpu.memory_space<smem>>
    %358 = vector.broadcast %357 : f32 to vector<8x8xf32>
    %359 = arith.mulf %358, %356 : vector<8x8xf32>
    %360 = arith.addf %354, %359 : vector<8x8xf32>
    %c0_240 = arith.constant 0 : index
    %c6_241 = arith.constant 6 : index
    %c0_242 = arith.constant 0 : index
    %c2_243 = arith.constant 2 : index
    %361 = vector.load %arg4[%c0_240, %c6_241, %c0_242, %c2_243] : memref<1x16x11x11xf32, #tpu.memory_space<vmem>>, vector<1x1x8x8xf32>
    %362 = vector.shape_cast %361 : vector<1x1x8x8xf32> to vector<8x8xf32>
    %c60 = arith.constant 60 : index
    %363 = memref.load %arg1[%c60] : memref<196xf32, #tpu.memory_space<smem>>
    %364 = vector.broadcast %363 : f32 to vector<8x8xf32>
    %365 = arith.mulf %364, %362 : vector<8x8xf32>
    %366 = arith.addf %360, %365 : vector<8x8xf32>
    %c0_244 = arith.constant 0 : index
    %c7_245 = arith.constant 7 : index
    %c0_246 = arith.constant 0 : index
    %c2_247 = arith.constant 2 : index
    %367 = vector.load %arg4[%c0_244, %c7_245, %c0_246, %c2_247] : memref<1x16x11x11xf32, #tpu.memory_space<vmem>>, vector<1x1x8x8xf32>
    %368 = vector.shape_cast %367 : vector<1x1x8x8xf32> to vector<8x8xf32>
    %c61 = arith.constant 61 : index
    %369 = memref.load %arg1[%c61] : memref<196xf32, #tpu.memory_space<smem>>
    %370 = vector.broadcast %369 : f32 to vector<8x8xf32>
    %371 = arith.mulf %370, %368 : vector<8x8xf32>
    %372 = arith.addf %366, %371 : vector<8x8xf32>
    %c0_248 = arith.constant 0 : index
    %c6_249 = arith.constant 6 : index
    %c0_250 = arith.constant 0 : index
    %c3_251 = arith.constant 3 : index
    %373 = vector.load %arg4[%c0_248, %c6_249, %c0_250, %c3_251] : memref<1x16x11x11xf32, #tpu.memory_space<vmem>>, vector<1x1x8x8xf32>
    %374 = vector.shape_cast %373 : vector<1x1x8x8xf32> to vector<8x8xf32>
    %c62 = arith.constant 62 : index
    %375 = memref.load %arg1[%c62] : memref<196xf32, #tpu.memory_space<smem>>
    %376 = vector.broadcast %375 : f32 to vector<8x8xf32>
    %377 = arith.mulf %376, %374 : vector<8x8xf32>
    %378 = arith.addf %372, %377 : vector<8x8xf32>
    %c0_252 = arith.constant 0 : index
    %c4_253 = arith.constant 4 : index
    %c1_254 = arith.constant 1 : index
    %c0_255 = arith.constant 0 : index
    %379 = vector.load %arg4[%c0_252, %c4_253, %c1_254, %c0_255] : memref<1x16x11x11xf32, #tpu.memory_space<vmem>>, vector<1x1x8x8xf32>
    %380 = vector.shape_cast %379 : vector<1x1x8x8xf32> to vector<8x8xf32>
    %c63 = arith.constant 63 : index
    %381 = memref.load %arg1[%c63] : memref<196xf32, #tpu.memory_space<smem>>
    %382 = vector.broadcast %381 : f32 to vector<8x8xf32>
    %383 = arith.mulf %382, %380 : vector<8x8xf32>
    %384 = arith.addf %378, %383 : vector<8x8xf32>
    %c0_256 = arith.constant 0 : index
    %c5_257 = arith.constant 5 : index
    %c1_258 = arith.constant 1 : index
    %c0_259 = arith.constant 0 : index
    %385 = vector.load %arg4[%c0_256, %c5_257, %c1_258, %c0_259] : memref<1x16x11x11xf32, #tpu.memory_space<vmem>>, vector<1x1x8x8xf32>
    %386 = vector.shape_cast %385 : vector<1x1x8x8xf32> to vector<8x8xf32>
    %c64 = arith.constant 64 : index
    %387 = memref.load %arg1[%c64] : memref<196xf32, #tpu.memory_space<smem>>
    %388 = vector.broadcast %387 : f32 to vector<8x8xf32>
    %389 = arith.mulf %388, %386 : vector<8x8xf32>
    %390 = arith.addf %384, %389 : vector<8x8xf32>
    %c0_260 = arith.constant 0 : index
    %c4_261 = arith.constant 4 : index
    %c1_262 = arith.constant 1 : index
    %c1_263 = arith.constant 1 : index
    %391 = vector.load %arg4[%c0_260, %c4_261, %c1_262, %c1_263] : memref<1x16x11x11xf32, #tpu.memory_space<vmem>>, vector<1x1x8x8xf32>
    %392 = vector.shape_cast %391 : vector<1x1x8x8xf32> to vector<8x8xf32>
    %c65 = arith.constant 65 : index
    %393 = memref.load %arg1[%c65] : memref<196xf32, #tpu.memory_space<smem>>
    %394 = vector.broadcast %393 : f32 to vector<8x8xf32>
    %395 = arith.mulf %394, %392 : vector<8x8xf32>
    %396 = arith.addf %390, %395 : vector<8x8xf32>
    %c0_264 = arith.constant 0 : index
    %c5_265 = arith.constant 5 : index
    %c1_266 = arith.constant 1 : index
    %c1_267 = arith.constant 1 : index
    %397 = vector.load %arg4[%c0_264, %c5_265, %c1_266, %c1_267] : memref<1x16x11x11xf32, #tpu.memory_space<vmem>>, vector<1x1x8x8xf32>
    %398 = vector.shape_cast %397 : vector<1x1x8x8xf32> to vector<8x8xf32>
    %c66 = arith.constant 66 : index
    %399 = memref.load %arg1[%c66] : memref<196xf32, #tpu.memory_space<smem>>
    %400 = vector.broadcast %399 : f32 to vector<8x8xf32>
    %401 = arith.mulf %400, %398 : vector<8x8xf32>
    %402 = arith.addf %396, %401 : vector<8x8xf32>
    %c0_268 = arith.constant 0 : index
    %c4_269 = arith.constant 4 : index
    %c1_270 = arith.constant 1 : index
    %c2_271 = arith.constant 2 : index
    %403 = vector.load %arg4[%c0_268, %c4_269, %c1_270, %c2_271] : memref<1x16x11x11xf32, #tpu.memory_space<vmem>>, vector<1x1x8x8xf32>
    %404 = vector.shape_cast %403 : vector<1x1x8x8xf32> to vector<8x8xf32>
    %c67 = arith.constant 67 : index
    %405 = memref.load %arg1[%c67] : memref<196xf32, #tpu.memory_space<smem>>
    %406 = vector.broadcast %405 : f32 to vector<8x8xf32>
    %407 = arith.mulf %406, %404 : vector<8x8xf32>
    %408 = arith.addf %402, %407 : vector<8x8xf32>
    %c0_272 = arith.constant 0 : index
    %c5_273 = arith.constant 5 : index
    %c1_274 = arith.constant 1 : index
    %c2_275 = arith.constant 2 : index
    %409 = vector.load %arg4[%c0_272, %c5_273, %c1_274, %c2_275] : memref<1x16x11x11xf32, #tpu.memory_space<vmem>>, vector<1x1x8x8xf32>
    %410 = vector.shape_cast %409 : vector<1x1x8x8xf32> to vector<8x8xf32>
    %c68 = arith.constant 68 : index
    %411 = memref.load %arg1[%c68] : memref<196xf32, #tpu.memory_space<smem>>
    %412 = vector.broadcast %411 : f32 to vector<8x8xf32>
    %413 = arith.mulf %412, %410 : vector<8x8xf32>
    %414 = arith.addf %408, %413 : vector<8x8xf32>
    %c0_276 = arith.constant 0 : index
    %c4_277 = arith.constant 4 : index
    %c1_278 = arith.constant 1 : index
    %c3_279 = arith.constant 3 : index
    %415 = vector.load %arg4[%c0_276, %c4_277, %c1_278, %c3_279] : memref<1x16x11x11xf32, #tpu.memory_space<vmem>>, vector<1x1x8x8xf32>
    %416 = vector.shape_cast %415 : vector<1x1x8x8xf32> to vector<8x8xf32>
    %c69 = arith.constant 69 : index
    %417 = memref.load %arg1[%c69] : memref<196xf32, #tpu.memory_space<smem>>
    %418 = vector.broadcast %417 : f32 to vector<8x8xf32>
    %419 = arith.mulf %418, %416 : vector<8x8xf32>
    %420 = arith.addf %414, %419 : vector<8x8xf32>
    %c0_280 = arith.constant 0 : index
    %c6_281 = arith.constant 6 : index
    %c1_282 = arith.constant 1 : index
    %c0_283 = arith.constant 0 : index
    %421 = vector.load %arg4[%c0_280, %c6_281, %c1_282, %c0_283] : memref<1x16x11x11xf32, #tpu.memory_space<vmem>>, vector<1x1x8x8xf32>
    %422 = vector.shape_cast %421 : vector<1x1x8x8xf32> to vector<8x8xf32>
    %c70 = arith.constant 70 : index
    %423 = memref.load %arg1[%c70] : memref<196xf32, #tpu.memory_space<smem>>
    %424 = vector.broadcast %423 : f32 to vector<8x8xf32>
    %425 = arith.mulf %424, %422 : vector<8x8xf32>
    %426 = arith.addf %420, %425 : vector<8x8xf32>
    %c0_284 = arith.constant 0 : index
    %c7_285 = arith.constant 7 : index
    %c1_286 = arith.constant 1 : index
    %c0_287 = arith.constant 0 : index
    %427 = vector.load %arg4[%c0_284, %c7_285, %c1_286, %c0_287] : memref<1x16x11x11xf32, #tpu.memory_space<vmem>>, vector<1x1x8x8xf32>
    %428 = vector.shape_cast %427 : vector<1x1x8x8xf32> to vector<8x8xf32>
    %c71 = arith.constant 71 : index
    %429 = memref.load %arg1[%c71] : memref<196xf32, #tpu.memory_space<smem>>
    %430 = vector.broadcast %429 : f32 to vector<8x8xf32>
    %431 = arith.mulf %430, %428 : vector<8x8xf32>
    %432 = arith.addf %426, %431 : vector<8x8xf32>
    %c0_288 = arith.constant 0 : index
    %c6_289 = arith.constant 6 : index
    %c1_290 = arith.constant 1 : index
    %c1_291 = arith.constant 1 : index
    %433 = vector.load %arg4[%c0_288, %c6_289, %c1_290, %c1_291] : memref<1x16x11x11xf32, #tpu.memory_space<vmem>>, vector<1x1x8x8xf32>
    %434 = vector.shape_cast %433 : vector<1x1x8x8xf32> to vector<8x8xf32>
    %c72 = arith.constant 72 : index
    %435 = memref.load %arg1[%c72] : memref<196xf32, #tpu.memory_space<smem>>
    %436 = vector.broadcast %435 : f32 to vector<8x8xf32>
    %437 = arith.mulf %436, %434 : vector<8x8xf32>
    %438 = arith.addf %432, %437 : vector<8x8xf32>
    %c0_292 = arith.constant 0 : index
    %c7_293 = arith.constant 7 : index
    %c1_294 = arith.constant 1 : index
    %c1_295 = arith.constant 1 : index
    %439 = vector.load %arg4[%c0_292, %c7_293, %c1_294, %c1_295] : memref<1x16x11x11xf32, #tpu.memory_space<vmem>>, vector<1x1x8x8xf32>
    %440 = vector.shape_cast %439 : vector<1x1x8x8xf32> to vector<8x8xf32>
    %c73 = arith.constant 73 : index
    %441 = memref.load %arg1[%c73] : memref<196xf32, #tpu.memory_space<smem>>
    %442 = vector.broadcast %441 : f32 to vector<8x8xf32>
    %443 = arith.mulf %442, %440 : vector<8x8xf32>
    %444 = arith.addf %438, %443 : vector<8x8xf32>
    %c0_296 = arith.constant 0 : index
    %c6_297 = arith.constant 6 : index
    %c1_298 = arith.constant 1 : index
    %c2_299 = arith.constant 2 : index
    %445 = vector.load %arg4[%c0_296, %c6_297, %c1_298, %c2_299] : memref<1x16x11x11xf32, #tpu.memory_space<vmem>>, vector<1x1x8x8xf32>
    %446 = vector.shape_cast %445 : vector<1x1x8x8xf32> to vector<8x8xf32>
    %c74 = arith.constant 74 : index
    %447 = memref.load %arg1[%c74] : memref<196xf32, #tpu.memory_space<smem>>
    %448 = vector.broadcast %447 : f32 to vector<8x8xf32>
    %449 = arith.mulf %448, %446 : vector<8x8xf32>
    %450 = arith.addf %444, %449 : vector<8x8xf32>
    %c0_300 = arith.constant 0 : index
    %c7_301 = arith.constant 7 : index
    %c1_302 = arith.constant 1 : index
    %c2_303 = arith.constant 2 : index
    %451 = vector.load %arg4[%c0_300, %c7_301, %c1_302, %c2_303] : memref<1x16x11x11xf32, #tpu.memory_space<vmem>>, vector<1x1x8x8xf32>
    %452 = vector.shape_cast %451 : vector<1x1x8x8xf32> to vector<8x8xf32>
    %c75 = arith.constant 75 : index
    %453 = memref.load %arg1[%c75] : memref<196xf32, #tpu.memory_space<smem>>
    %454 = vector.broadcast %453 : f32 to vector<8x8xf32>
    %455 = arith.mulf %454, %452 : vector<8x8xf32>
    %456 = arith.addf %450, %455 : vector<8x8xf32>
    %c0_304 = arith.constant 0 : index
    %c6_305 = arith.constant 6 : index
    %c1_306 = arith.constant 1 : index
    %c3_307 = arith.constant 3 : index
    %457 = vector.load %arg4[%c0_304, %c6_305, %c1_306, %c3_307] : memref<1x16x11x11xf32, #tpu.memory_space<vmem>>, vector<1x1x8x8xf32>
    %458 = vector.shape_cast %457 : vector<1x1x8x8xf32> to vector<8x8xf32>
    %c76 = arith.constant 76 : index
    %459 = memref.load %arg1[%c76] : memref<196xf32, #tpu.memory_space<smem>>
    %460 = vector.broadcast %459 : f32 to vector<8x8xf32>
    %461 = arith.mulf %460, %458 : vector<8x8xf32>
    %462 = arith.addf %456, %461 : vector<8x8xf32>
    %c0_308 = arith.constant 0 : index
    %c4_309 = arith.constant 4 : index
    %c2_310 = arith.constant 2 : index
    %c0_311 = arith.constant 0 : index
    %463 = vector.load %arg4[%c0_308, %c4_309, %c2_310, %c0_311] : memref<1x16x11x11xf32, #tpu.memory_space<vmem>>, vector<1x1x8x8xf32>
    %464 = vector.shape_cast %463 : vector<1x1x8x8xf32> to vector<8x8xf32>
    %c77 = arith.constant 77 : index
    %465 = memref.load %arg1[%c77] : memref<196xf32, #tpu.memory_space<smem>>
    %466 = vector.broadcast %465 : f32 to vector<8x8xf32>
    %467 = arith.mulf %466, %464 : vector<8x8xf32>
    %468 = arith.addf %462, %467 : vector<8x8xf32>
    %c0_312 = arith.constant 0 : index
    %c5_313 = arith.constant 5 : index
    %c2_314 = arith.constant 2 : index
    %c0_315 = arith.constant 0 : index
    %469 = vector.load %arg4[%c0_312, %c5_313, %c2_314, %c0_315] : memref<1x16x11x11xf32, #tpu.memory_space<vmem>>, vector<1x1x8x8xf32>
    %470 = vector.shape_cast %469 : vector<1x1x8x8xf32> to vector<8x8xf32>
    %c78 = arith.constant 78 : index
    %471 = memref.load %arg1[%c78] : memref<196xf32, #tpu.memory_space<smem>>
    %472 = vector.broadcast %471 : f32 to vector<8x8xf32>
    %473 = arith.mulf %472, %470 : vector<8x8xf32>
    %474 = arith.addf %468, %473 : vector<8x8xf32>
    %c0_316 = arith.constant 0 : index
    %c4_317 = arith.constant 4 : index
    %c2_318 = arith.constant 2 : index
    %c1_319 = arith.constant 1 : index
    %475 = vector.load %arg4[%c0_316, %c4_317, %c2_318, %c1_319] : memref<1x16x11x11xf32, #tpu.memory_space<vmem>>, vector<1x1x8x8xf32>
    %476 = vector.shape_cast %475 : vector<1x1x8x8xf32> to vector<8x8xf32>
    %c79 = arith.constant 79 : index
    %477 = memref.load %arg1[%c79] : memref<196xf32, #tpu.memory_space<smem>>
    %478 = vector.broadcast %477 : f32 to vector<8x8xf32>
    %479 = arith.mulf %478, %476 : vector<8x8xf32>
    %480 = arith.addf %474, %479 : vector<8x8xf32>
    %c0_320 = arith.constant 0 : index
    %c5_321 = arith.constant 5 : index
    %c2_322 = arith.constant 2 : index
    %c1_323 = arith.constant 1 : index
    %481 = vector.load %arg4[%c0_320, %c5_321, %c2_322, %c1_323] : memref<1x16x11x11xf32, #tpu.memory_space<vmem>>, vector<1x1x8x8xf32>
    %482 = vector.shape_cast %481 : vector<1x1x8x8xf32> to vector<8x8xf32>
    %c80 = arith.constant 80 : index
    %483 = memref.load %arg1[%c80] : memref<196xf32, #tpu.memory_space<smem>>
    %484 = vector.broadcast %483 : f32 to vector<8x8xf32>
    %485 = arith.mulf %484, %482 : vector<8x8xf32>
    %486 = arith.addf %480, %485 : vector<8x8xf32>
    %c0_324 = arith.constant 0 : index
    %c4_325 = arith.constant 4 : index
    %c2_326 = arith.constant 2 : index
    %c2_327 = arith.constant 2 : index
    %487 = vector.load %arg4[%c0_324, %c4_325, %c2_326, %c2_327] : memref<1x16x11x11xf32, #tpu.memory_space<vmem>>, vector<1x1x8x8xf32>
    %488 = vector.shape_cast %487 : vector<1x1x8x8xf32> to vector<8x8xf32>
    %c81 = arith.constant 81 : index
    %489 = memref.load %arg1[%c81] : memref<196xf32, #tpu.memory_space<smem>>
    %490 = vector.broadcast %489 : f32 to vector<8x8xf32>
    %491 = arith.mulf %490, %488 : vector<8x8xf32>
    %492 = arith.addf %486, %491 : vector<8x8xf32>
    %c0_328 = arith.constant 0 : index
    %c5_329 = arith.constant 5 : index
    %c2_330 = arith.constant 2 : index
    %c2_331 = arith.constant 2 : index
    %493 = vector.load %arg4[%c0_328, %c5_329, %c2_330, %c2_331] : memref<1x16x11x11xf32, #tpu.memory_space<vmem>>, vector<1x1x8x8xf32>
    %494 = vector.shape_cast %493 : vector<1x1x8x8xf32> to vector<8x8xf32>
    %c82 = arith.constant 82 : index
    %495 = memref.load %arg1[%c82] : memref<196xf32, #tpu.memory_space<smem>>
    %496 = vector.broadcast %495 : f32 to vector<8x8xf32>
    %497 = arith.mulf %496, %494 : vector<8x8xf32>
    %498 = arith.addf %492, %497 : vector<8x8xf32>
    %c0_332 = arith.constant 0 : index
    %c4_333 = arith.constant 4 : index
    %c2_334 = arith.constant 2 : index
    %c3_335 = arith.constant 3 : index
    %499 = vector.load %arg4[%c0_332, %c4_333, %c2_334, %c3_335] : memref<1x16x11x11xf32, #tpu.memory_space<vmem>>, vector<1x1x8x8xf32>
    %500 = vector.shape_cast %499 : vector<1x1x8x8xf32> to vector<8x8xf32>
    %c83 = arith.constant 83 : index
    %501 = memref.load %arg1[%c83] : memref<196xf32, #tpu.memory_space<smem>>
    %502 = vector.broadcast %501 : f32 to vector<8x8xf32>
    %503 = arith.mulf %502, %500 : vector<8x8xf32>
    %504 = arith.addf %498, %503 : vector<8x8xf32>
    %c0_336 = arith.constant 0 : index
    %c6_337 = arith.constant 6 : index
    %c2_338 = arith.constant 2 : index
    %c0_339 = arith.constant 0 : index
    %505 = vector.load %arg4[%c0_336, %c6_337, %c2_338, %c0_339] : memref<1x16x11x11xf32, #tpu.memory_space<vmem>>, vector<1x1x8x8xf32>
    %506 = vector.shape_cast %505 : vector<1x1x8x8xf32> to vector<8x8xf32>
    %c84 = arith.constant 84 : index
    %507 = memref.load %arg1[%c84] : memref<196xf32, #tpu.memory_space<smem>>
    %508 = vector.broadcast %507 : f32 to vector<8x8xf32>
    %509 = arith.mulf %508, %506 : vector<8x8xf32>
    %510 = arith.addf %504, %509 : vector<8x8xf32>
    %c0_340 = arith.constant 0 : index
    %c7_341 = arith.constant 7 : index
    %c2_342 = arith.constant 2 : index
    %c0_343 = arith.constant 0 : index
    %511 = vector.load %arg4[%c0_340, %c7_341, %c2_342, %c0_343] : memref<1x16x11x11xf32, #tpu.memory_space<vmem>>, vector<1x1x8x8xf32>
    %512 = vector.shape_cast %511 : vector<1x1x8x8xf32> to vector<8x8xf32>
    %c85 = arith.constant 85 : index
    %513 = memref.load %arg1[%c85] : memref<196xf32, #tpu.memory_space<smem>>
    %514 = vector.broadcast %513 : f32 to vector<8x8xf32>
    %515 = arith.mulf %514, %512 : vector<8x8xf32>
    %516 = arith.addf %510, %515 : vector<8x8xf32>
    %c0_344 = arith.constant 0 : index
    %c6_345 = arith.constant 6 : index
    %c2_346 = arith.constant 2 : index
    %c1_347 = arith.constant 1 : index
    %517 = vector.load %arg4[%c0_344, %c6_345, %c2_346, %c1_347] : memref<1x16x11x11xf32, #tpu.memory_space<vmem>>, vector<1x1x8x8xf32>
    %518 = vector.shape_cast %517 : vector<1x1x8x8xf32> to vector<8x8xf32>
    %c86 = arith.constant 86 : index
    %519 = memref.load %arg1[%c86] : memref<196xf32, #tpu.memory_space<smem>>
    %520 = vector.broadcast %519 : f32 to vector<8x8xf32>
    %521 = arith.mulf %520, %518 : vector<8x8xf32>
    %522 = arith.addf %516, %521 : vector<8x8xf32>
    %c0_348 = arith.constant 0 : index
    %c7_349 = arith.constant 7 : index
    %c2_350 = arith.constant 2 : index
    %c1_351 = arith.constant 1 : index
    %523 = vector.load %arg4[%c0_348, %c7_349, %c2_350, %c1_351] : memref<1x16x11x11xf32, #tpu.memory_space<vmem>>, vector<1x1x8x8xf32>
    %524 = vector.shape_cast %523 : vector<1x1x8x8xf32> to vector<8x8xf32>
    %c87 = arith.constant 87 : index
    %525 = memref.load %arg1[%c87] : memref<196xf32, #tpu.memory_space<smem>>
    %526 = vector.broadcast %525 : f32 to vector<8x8xf32>
    %527 = arith.mulf %526, %524 : vector<8x8xf32>
    %528 = arith.addf %522, %527 : vector<8x8xf32>
    %c0_352 = arith.constant 0 : index
    %c6_353 = arith.constant 6 : index
    %c2_354 = arith.constant 2 : index
    %c2_355 = arith.constant 2 : index
    %529 = vector.load %arg4[%c0_352, %c6_353, %c2_354, %c2_355] : memref<1x16x11x11xf32, #tpu.memory_space<vmem>>, vector<1x1x8x8xf32>
    %530 = vector.shape_cast %529 : vector<1x1x8x8xf32> to vector<8x8xf32>
    %c88 = arith.constant 88 : index
    %531 = memref.load %arg1[%c88] : memref<196xf32, #tpu.memory_space<smem>>
    %532 = vector.broadcast %531 : f32 to vector<8x8xf32>
    %533 = arith.mulf %532, %530 : vector<8x8xf32>
    %534 = arith.addf %528, %533 : vector<8x8xf32>
    %c0_356 = arith.constant 0 : index
    %c7_357 = arith.constant 7 : index
    %c2_358 = arith.constant 2 : index
    %c2_359 = arith.constant 2 : index
    %535 = vector.load %arg4[%c0_356, %c7_357, %c2_358, %c2_359] : memref<1x16x11x11xf32, #tpu.memory_space<vmem>>, vector<1x1x8x8xf32>
    %536 = vector.shape_cast %535 : vector<1x1x8x8xf32> to vector<8x8xf32>
    %c89 = arith.constant 89 : index
    %537 = memref.load %arg1[%c89] : memref<196xf32, #tpu.memory_space<smem>>
    %538 = vector.broadcast %537 : f32 to vector<8x8xf32>
    %539 = arith.mulf %538, %536 : vector<8x8xf32>
    %540 = arith.addf %534, %539 : vector<8x8xf32>
    %c0_360 = arith.constant 0 : index
    %c6_361 = arith.constant 6 : index
    %c2_362 = arith.constant 2 : index
    %c3_363 = arith.constant 3 : index
    %541 = vector.load %arg4[%c0_360, %c6_361, %c2_362, %c3_363] : memref<1x16x11x11xf32, #tpu.memory_space<vmem>>, vector<1x1x8x8xf32>
    %542 = vector.shape_cast %541 : vector<1x1x8x8xf32> to vector<8x8xf32>
    %c90 = arith.constant 90 : index
    %543 = memref.load %arg1[%c90] : memref<196xf32, #tpu.memory_space<smem>>
    %544 = vector.broadcast %543 : f32 to vector<8x8xf32>
    %545 = arith.mulf %544, %542 : vector<8x8xf32>
    %546 = arith.addf %540, %545 : vector<8x8xf32>
    %c0_364 = arith.constant 0 : index
    %c4_365 = arith.constant 4 : index
    %c3_366 = arith.constant 3 : index
    %c0_367 = arith.constant 0 : index
    %547 = vector.load %arg4[%c0_364, %c4_365, %c3_366, %c0_367] : memref<1x16x11x11xf32, #tpu.memory_space<vmem>>, vector<1x1x8x8xf32>
    %548 = vector.shape_cast %547 : vector<1x1x8x8xf32> to vector<8x8xf32>
    %c91 = arith.constant 91 : index
    %549 = memref.load %arg1[%c91] : memref<196xf32, #tpu.memory_space<smem>>
    %550 = vector.broadcast %549 : f32 to vector<8x8xf32>
    %551 = arith.mulf %550, %548 : vector<8x8xf32>
    %552 = arith.addf %546, %551 : vector<8x8xf32>
    %c0_368 = arith.constant 0 : index
    %c5_369 = arith.constant 5 : index
    %c3_370 = arith.constant 3 : index
    %c0_371 = arith.constant 0 : index
    %553 = vector.load %arg4[%c0_368, %c5_369, %c3_370, %c0_371] : memref<1x16x11x11xf32, #tpu.memory_space<vmem>>, vector<1x1x8x8xf32>
    %554 = vector.shape_cast %553 : vector<1x1x8x8xf32> to vector<8x8xf32>
    %c92 = arith.constant 92 : index
    %555 = memref.load %arg1[%c92] : memref<196xf32, #tpu.memory_space<smem>>
    %556 = vector.broadcast %555 : f32 to vector<8x8xf32>
    %557 = arith.mulf %556, %554 : vector<8x8xf32>
    %558 = arith.addf %552, %557 : vector<8x8xf32>
    %c0_372 = arith.constant 0 : index
    %c4_373 = arith.constant 4 : index
    %c3_374 = arith.constant 3 : index
    %c1_375 = arith.constant 1 : index
    %559 = vector.load %arg4[%c0_372, %c4_373, %c3_374, %c1_375] : memref<1x16x11x11xf32, #tpu.memory_space<vmem>>, vector<1x1x8x8xf32>
    %560 = vector.shape_cast %559 : vector<1x1x8x8xf32> to vector<8x8xf32>
    %c93 = arith.constant 93 : index
    %561 = memref.load %arg1[%c93] : memref<196xf32, #tpu.memory_space<smem>>
    %562 = vector.broadcast %561 : f32 to vector<8x8xf32>
    %563 = arith.mulf %562, %560 : vector<8x8xf32>
    %564 = arith.addf %558, %563 : vector<8x8xf32>
    %c0_376 = arith.constant 0 : index
    %c5_377 = arith.constant 5 : index
    %c3_378 = arith.constant 3 : index
    %c1_379 = arith.constant 1 : index
    %565 = vector.load %arg4[%c0_376, %c5_377, %c3_378, %c1_379] : memref<1x16x11x11xf32, #tpu.memory_space<vmem>>, vector<1x1x8x8xf32>
    %566 = vector.shape_cast %565 : vector<1x1x8x8xf32> to vector<8x8xf32>
    %c94 = arith.constant 94 : index
    %567 = memref.load %arg1[%c94] : memref<196xf32, #tpu.memory_space<smem>>
    %568 = vector.broadcast %567 : f32 to vector<8x8xf32>
    %569 = arith.mulf %568, %566 : vector<8x8xf32>
    %570 = arith.addf %564, %569 : vector<8x8xf32>
    %c0_380 = arith.constant 0 : index
    %c4_381 = arith.constant 4 : index
    %c3_382 = arith.constant 3 : index
    %c2_383 = arith.constant 2 : index
    %571 = vector.load %arg4[%c0_380, %c4_381, %c3_382, %c2_383] : memref<1x16x11x11xf32, #tpu.memory_space<vmem>>, vector<1x1x8x8xf32>
    %572 = vector.shape_cast %571 : vector<1x1x8x8xf32> to vector<8x8xf32>
    %c95 = arith.constant 95 : index
    %573 = memref.load %arg1[%c95] : memref<196xf32, #tpu.memory_space<smem>>
    %574 = vector.broadcast %573 : f32 to vector<8x8xf32>
    %575 = arith.mulf %574, %572 : vector<8x8xf32>
    %576 = arith.addf %570, %575 : vector<8x8xf32>
    %c0_384 = arith.constant 0 : index
    %c5_385 = arith.constant 5 : index
    %c3_386 = arith.constant 3 : index
    %c2_387 = arith.constant 2 : index
    %577 = vector.load %arg4[%c0_384, %c5_385, %c3_386, %c2_387] : memref<1x16x11x11xf32, #tpu.memory_space<vmem>>, vector<1x1x8x8xf32>
    %578 = vector.shape_cast %577 : vector<1x1x8x8xf32> to vector<8x8xf32>
    %c96 = arith.constant 96 : index
    %579 = memref.load %arg1[%c96] : memref<196xf32, #tpu.memory_space<smem>>
    %580 = vector.broadcast %579 : f32 to vector<8x8xf32>
    %581 = arith.mulf %580, %578 : vector<8x8xf32>
    %582 = arith.addf %576, %581 : vector<8x8xf32>
    %c0_388 = arith.constant 0 : index
    %c4_389 = arith.constant 4 : index
    %c3_390 = arith.constant 3 : index
    %c3_391 = arith.constant 3 : index
    %583 = vector.load %arg4[%c0_388, %c4_389, %c3_390, %c3_391] : memref<1x16x11x11xf32, #tpu.memory_space<vmem>>, vector<1x1x8x8xf32>
    %584 = vector.shape_cast %583 : vector<1x1x8x8xf32> to vector<8x8xf32>
    %c97 = arith.constant 97 : index
    %585 = memref.load %arg1[%c97] : memref<196xf32, #tpu.memory_space<smem>>
    %586 = vector.broadcast %585 : f32 to vector<8x8xf32>
    %587 = arith.mulf %586, %584 : vector<8x8xf32>
    %588 = arith.addf %582, %587 : vector<8x8xf32>
    %c0_392 = arith.constant 0 : index
    %c8_393 = arith.constant 8 : index
    %c0_394 = arith.constant 0 : index
    %c0_395 = arith.constant 0 : index
    %589 = vector.load %arg4[%c0_392, %c8_393, %c0_394, %c0_395] : memref<1x16x11x11xf32, #tpu.memory_space<vmem>>, vector<1x1x8x8xf32>
    %590 = vector.shape_cast %589 : vector<1x1x8x8xf32> to vector<8x8xf32>
    %c98 = arith.constant 98 : index
    %591 = memref.load %arg1[%c98] : memref<196xf32, #tpu.memory_space<smem>>
    %592 = vector.broadcast %591 : f32 to vector<8x8xf32>
    %593 = arith.mulf %592, %590 : vector<8x8xf32>
    %594 = arith.addf %588, %593 : vector<8x8xf32>
    %c0_396 = arith.constant 0 : index
    %c9_397 = arith.constant 9 : index
    %c0_398 = arith.constant 0 : index
    %c0_399 = arith.constant 0 : index
    %595 = vector.load %arg4[%c0_396, %c9_397, %c0_398, %c0_399] : memref<1x16x11x11xf32, #tpu.memory_space<vmem>>, vector<1x1x8x8xf32>
    %596 = vector.shape_cast %595 : vector<1x1x8x8xf32> to vector<8x8xf32>
    %c99 = arith.constant 99 : index
    %597 = memref.load %arg1[%c99] : memref<196xf32, #tpu.memory_space<smem>>
    %598 = vector.broadcast %597 : f32 to vector<8x8xf32>
    %599 = arith.mulf %598, %596 : vector<8x8xf32>
    %600 = arith.addf %594, %599 : vector<8x8xf32>
    %c0_400 = arith.constant 0 : index
    %c8_401 = arith.constant 8 : index
    %c0_402 = arith.constant 0 : index
    %c1_403 = arith.constant 1 : index
    %601 = vector.load %arg4[%c0_400, %c8_401, %c0_402, %c1_403] : memref<1x16x11x11xf32, #tpu.memory_space<vmem>>, vector<1x1x8x8xf32>
    %602 = vector.shape_cast %601 : vector<1x1x8x8xf32> to vector<8x8xf32>
    %c100 = arith.constant 100 : index
    %603 = memref.load %arg1[%c100] : memref<196xf32, #tpu.memory_space<smem>>
    %604 = vector.broadcast %603 : f32 to vector<8x8xf32>
    %605 = arith.mulf %604, %602 : vector<8x8xf32>
    %606 = arith.addf %600, %605 : vector<8x8xf32>
    %c0_404 = arith.constant 0 : index
    %c9_405 = arith.constant 9 : index
    %c0_406 = arith.constant 0 : index
    %c1_407 = arith.constant 1 : index
    %607 = vector.load %arg4[%c0_404, %c9_405, %c0_406, %c1_407] : memref<1x16x11x11xf32, #tpu.memory_space<vmem>>, vector<1x1x8x8xf32>
    %608 = vector.shape_cast %607 : vector<1x1x8x8xf32> to vector<8x8xf32>
    %c101 = arith.constant 101 : index
    %609 = memref.load %arg1[%c101] : memref<196xf32, #tpu.memory_space<smem>>
    %610 = vector.broadcast %609 : f32 to vector<8x8xf32>
    %611 = arith.mulf %610, %608 : vector<8x8xf32>
    %612 = arith.addf %606, %611 : vector<8x8xf32>
    %c0_408 = arith.constant 0 : index
    %c8_409 = arith.constant 8 : index
    %c0_410 = arith.constant 0 : index
    %c2_411 = arith.constant 2 : index
    %613 = vector.load %arg4[%c0_408, %c8_409, %c0_410, %c2_411] : memref<1x16x11x11xf32, #tpu.memory_space<vmem>>, vector<1x1x8x8xf32>
    %614 = vector.shape_cast %613 : vector<1x1x8x8xf32> to vector<8x8xf32>
    %c102 = arith.constant 102 : index
    %615 = memref.load %arg1[%c102] : memref<196xf32, #tpu.memory_space<smem>>
    %616 = vector.broadcast %615 : f32 to vector<8x8xf32>
    %617 = arith.mulf %616, %614 : vector<8x8xf32>
    %618 = arith.addf %612, %617 : vector<8x8xf32>
    %c0_412 = arith.constant 0 : index
    %c9_413 = arith.constant 9 : index
    %c0_414 = arith.constant 0 : index
    %c2_415 = arith.constant 2 : index
    %619 = vector.load %arg4[%c0_412, %c9_413, %c0_414, %c2_415] : memref<1x16x11x11xf32, #tpu.memory_space<vmem>>, vector<1x1x8x8xf32>
    %620 = vector.shape_cast %619 : vector<1x1x8x8xf32> to vector<8x8xf32>
    %c103 = arith.constant 103 : index
    %621 = memref.load %arg1[%c103] : memref<196xf32, #tpu.memory_space<smem>>
    %622 = vector.broadcast %621 : f32 to vector<8x8xf32>
    %623 = arith.mulf %622, %620 : vector<8x8xf32>
    %624 = arith.addf %618, %623 : vector<8x8xf32>
    %c0_416 = arith.constant 0 : index
    %c8_417 = arith.constant 8 : index
    %c0_418 = arith.constant 0 : index
    %c3_419 = arith.constant 3 : index
    %625 = vector.load %arg4[%c0_416, %c8_417, %c0_418, %c3_419] : memref<1x16x11x11xf32, #tpu.memory_space<vmem>>, vector<1x1x8x8xf32>
    %626 = vector.shape_cast %625 : vector<1x1x8x8xf32> to vector<8x8xf32>
    %c104 = arith.constant 104 : index
    %627 = memref.load %arg1[%c104] : memref<196xf32, #tpu.memory_space<smem>>
    %628 = vector.broadcast %627 : f32 to vector<8x8xf32>
    %629 = arith.mulf %628, %626 : vector<8x8xf32>
    %630 = arith.addf %624, %629 : vector<8x8xf32>
    %c0_420 = arith.constant 0 : index
    %c10_421 = arith.constant 10 : index
    %c0_422 = arith.constant 0 : index
    %c0_423 = arith.constant 0 : index
    %631 = vector.load %arg4[%c0_420, %c10_421, %c0_422, %c0_423] : memref<1x16x11x11xf32, #tpu.memory_space<vmem>>, vector<1x1x8x8xf32>
    %632 = vector.shape_cast %631 : vector<1x1x8x8xf32> to vector<8x8xf32>
    %c105 = arith.constant 105 : index
    %633 = memref.load %arg1[%c105] : memref<196xf32, #tpu.memory_space<smem>>
    %634 = vector.broadcast %633 : f32 to vector<8x8xf32>
    %635 = arith.mulf %634, %632 : vector<8x8xf32>
    %636 = arith.addf %630, %635 : vector<8x8xf32>
    %c0_424 = arith.constant 0 : index
    %c11_425 = arith.constant 11 : index
    %c0_426 = arith.constant 0 : index
    %c0_427 = arith.constant 0 : index
    %637 = vector.load %arg4[%c0_424, %c11_425, %c0_426, %c0_427] : memref<1x16x11x11xf32, #tpu.memory_space<vmem>>, vector<1x1x8x8xf32>
    %638 = vector.shape_cast %637 : vector<1x1x8x8xf32> to vector<8x8xf32>
    %c106 = arith.constant 106 : index
    %639 = memref.load %arg1[%c106] : memref<196xf32, #tpu.memory_space<smem>>
    %640 = vector.broadcast %639 : f32 to vector<8x8xf32>
    %641 = arith.mulf %640, %638 : vector<8x8xf32>
    %642 = arith.addf %636, %641 : vector<8x8xf32>
    %c0_428 = arith.constant 0 : index
    %c10_429 = arith.constant 10 : index
    %c0_430 = arith.constant 0 : index
    %c1_431 = arith.constant 1 : index
    %643 = vector.load %arg4[%c0_428, %c10_429, %c0_430, %c1_431] : memref<1x16x11x11xf32, #tpu.memory_space<vmem>>, vector<1x1x8x8xf32>
    %644 = vector.shape_cast %643 : vector<1x1x8x8xf32> to vector<8x8xf32>
    %c107 = arith.constant 107 : index
    %645 = memref.load %arg1[%c107] : memref<196xf32, #tpu.memory_space<smem>>
    %646 = vector.broadcast %645 : f32 to vector<8x8xf32>
    %647 = arith.mulf %646, %644 : vector<8x8xf32>
    %648 = arith.addf %642, %647 : vector<8x8xf32>
    %c0_432 = arith.constant 0 : index
    %c11_433 = arith.constant 11 : index
    %c0_434 = arith.constant 0 : index
    %c1_435 = arith.constant 1 : index
    %649 = vector.load %arg4[%c0_432, %c11_433, %c0_434, %c1_435] : memref<1x16x11x11xf32, #tpu.memory_space<vmem>>, vector<1x1x8x8xf32>
    %650 = vector.shape_cast %649 : vector<1x1x8x8xf32> to vector<8x8xf32>
    %c108 = arith.constant 108 : index
    %651 = memref.load %arg1[%c108] : memref<196xf32, #tpu.memory_space<smem>>
    %652 = vector.broadcast %651 : f32 to vector<8x8xf32>
    %653 = arith.mulf %652, %650 : vector<8x8xf32>
    %654 = arith.addf %648, %653 : vector<8x8xf32>
    %c0_436 = arith.constant 0 : index
    %c10_437 = arith.constant 10 : index
    %c0_438 = arith.constant 0 : index
    %c2_439 = arith.constant 2 : index
    %655 = vector.load %arg4[%c0_436, %c10_437, %c0_438, %c2_439] : memref<1x16x11x11xf32, #tpu.memory_space<vmem>>, vector<1x1x8x8xf32>
    %656 = vector.shape_cast %655 : vector<1x1x8x8xf32> to vector<8x8xf32>
    %c109 = arith.constant 109 : index
    %657 = memref.load %arg1[%c109] : memref<196xf32, #tpu.memory_space<smem>>
    %658 = vector.broadcast %657 : f32 to vector<8x8xf32>
    %659 = arith.mulf %658, %656 : vector<8x8xf32>
    %660 = arith.addf %654, %659 : vector<8x8xf32>
    %c0_440 = arith.constant 0 : index
    %c11_441 = arith.constant 11 : index
    %c0_442 = arith.constant 0 : index
    %c2_443 = arith.constant 2 : index
    %661 = vector.load %arg4[%c0_440, %c11_441, %c0_442, %c2_443] : memref<1x16x11x11xf32, #tpu.memory_space<vmem>>, vector<1x1x8x8xf32>
    %662 = vector.shape_cast %661 : vector<1x1x8x8xf32> to vector<8x8xf32>
    %c110 = arith.constant 110 : index
    %663 = memref.load %arg1[%c110] : memref<196xf32, #tpu.memory_space<smem>>
    %664 = vector.broadcast %663 : f32 to vector<8x8xf32>
    %665 = arith.mulf %664, %662 : vector<8x8xf32>
    %666 = arith.addf %660, %665 : vector<8x8xf32>
    %c0_444 = arith.constant 0 : index
    %c10_445 = arith.constant 10 : index
    %c0_446 = arith.constant 0 : index
    %c3_447 = arith.constant 3 : index
    %667 = vector.load %arg4[%c0_444, %c10_445, %c0_446, %c3_447] : memref<1x16x11x11xf32, #tpu.memory_space<vmem>>, vector<1x1x8x8xf32>
    %668 = vector.shape_cast %667 : vector<1x1x8x8xf32> to vector<8x8xf32>
    %c111 = arith.constant 111 : index
    %669 = memref.load %arg1[%c111] : memref<196xf32, #tpu.memory_space<smem>>
    %670 = vector.broadcast %669 : f32 to vector<8x8xf32>
    %671 = arith.mulf %670, %668 : vector<8x8xf32>
    %672 = arith.addf %666, %671 : vector<8x8xf32>
    %c0_448 = arith.constant 0 : index
    %c8_449 = arith.constant 8 : index
    %c1_450 = arith.constant 1 : index
    %c0_451 = arith.constant 0 : index
    %673 = vector.load %arg4[%c0_448, %c8_449, %c1_450, %c0_451] : memref<1x16x11x11xf32, #tpu.memory_space<vmem>>, vector<1x1x8x8xf32>
    %674 = vector.shape_cast %673 : vector<1x1x8x8xf32> to vector<8x8xf32>
    %c112 = arith.constant 112 : index
    %675 = memref.load %arg1[%c112] : memref<196xf32, #tpu.memory_space<smem>>
    %676 = vector.broadcast %675 : f32 to vector<8x8xf32>
    %677 = arith.mulf %676, %674 : vector<8x8xf32>
    %678 = arith.addf %672, %677 : vector<8x8xf32>
    %c0_452 = arith.constant 0 : index
    %c9_453 = arith.constant 9 : index
    %c1_454 = arith.constant 1 : index
    %c0_455 = arith.constant 0 : index
    %679 = vector.load %arg4[%c0_452, %c9_453, %c1_454, %c0_455] : memref<1x16x11x11xf32, #tpu.memory_space<vmem>>, vector<1x1x8x8xf32>
    %680 = vector.shape_cast %679 : vector<1x1x8x8xf32> to vector<8x8xf32>
    %c113 = arith.constant 113 : index
    %681 = memref.load %arg1[%c113] : memref<196xf32, #tpu.memory_space<smem>>
    %682 = vector.broadcast %681 : f32 to vector<8x8xf32>
    %683 = arith.mulf %682, %680 : vector<8x8xf32>
    %684 = arith.addf %678, %683 : vector<8x8xf32>
    %c0_456 = arith.constant 0 : index
    %c8_457 = arith.constant 8 : index
    %c1_458 = arith.constant 1 : index
    %c1_459 = arith.constant 1 : index
    %685 = vector.load %arg4[%c0_456, %c8_457, %c1_458, %c1_459] : memref<1x16x11x11xf32, #tpu.memory_space<vmem>>, vector<1x1x8x8xf32>
    %686 = vector.shape_cast %685 : vector<1x1x8x8xf32> to vector<8x8xf32>
    %c114 = arith.constant 114 : index
    %687 = memref.load %arg1[%c114] : memref<196xf32, #tpu.memory_space<smem>>
    %688 = vector.broadcast %687 : f32 to vector<8x8xf32>
    %689 = arith.mulf %688, %686 : vector<8x8xf32>
    %690 = arith.addf %684, %689 : vector<8x8xf32>
    %c0_460 = arith.constant 0 : index
    %c9_461 = arith.constant 9 : index
    %c1_462 = arith.constant 1 : index
    %c1_463 = arith.constant 1 : index
    %691 = vector.load %arg4[%c0_460, %c9_461, %c1_462, %c1_463] : memref<1x16x11x11xf32, #tpu.memory_space<vmem>>, vector<1x1x8x8xf32>
    %692 = vector.shape_cast %691 : vector<1x1x8x8xf32> to vector<8x8xf32>
    %c115 = arith.constant 115 : index
    %693 = memref.load %arg1[%c115] : memref<196xf32, #tpu.memory_space<smem>>
    %694 = vector.broadcast %693 : f32 to vector<8x8xf32>
    %695 = arith.mulf %694, %692 : vector<8x8xf32>
    %696 = arith.addf %690, %695 : vector<8x8xf32>
    %c0_464 = arith.constant 0 : index
    %c8_465 = arith.constant 8 : index
    %c1_466 = arith.constant 1 : index
    %c2_467 = arith.constant 2 : index
    %697 = vector.load %arg4[%c0_464, %c8_465, %c1_466, %c2_467] : memref<1x16x11x11xf32, #tpu.memory_space<vmem>>, vector<1x1x8x8xf32>
    %698 = vector.shape_cast %697 : vector<1x1x8x8xf32> to vector<8x8xf32>
    %c116 = arith.constant 116 : index
    %699 = memref.load %arg1[%c116] : memref<196xf32, #tpu.memory_space<smem>>
    %700 = vector.broadcast %699 : f32 to vector<8x8xf32>
    %701 = arith.mulf %700, %698 : vector<8x8xf32>
    %702 = arith.addf %696, %701 : vector<8x8xf32>
    %c0_468 = arith.constant 0 : index
    %c9_469 = arith.constant 9 : index
    %c1_470 = arith.constant 1 : index
    %c2_471 = arith.constant 2 : index
    %703 = vector.load %arg4[%c0_468, %c9_469, %c1_470, %c2_471] : memref<1x16x11x11xf32, #tpu.memory_space<vmem>>, vector<1x1x8x8xf32>
    %704 = vector.shape_cast %703 : vector<1x1x8x8xf32> to vector<8x8xf32>
    %c117 = arith.constant 117 : index
    %705 = memref.load %arg1[%c117] : memref<196xf32, #tpu.memory_space<smem>>
    %706 = vector.broadcast %705 : f32 to vector<8x8xf32>
    %707 = arith.mulf %706, %704 : vector<8x8xf32>
    %708 = arith.addf %702, %707 : vector<8x8xf32>
    %c0_472 = arith.constant 0 : index
    %c8_473 = arith.constant 8 : index
    %c1_474 = arith.constant 1 : index
    %c3_475 = arith.constant 3 : index
    %709 = vector.load %arg4[%c0_472, %c8_473, %c1_474, %c3_475] : memref<1x16x11x11xf32, #tpu.memory_space<vmem>>, vector<1x1x8x8xf32>
    %710 = vector.shape_cast %709 : vector<1x1x8x8xf32> to vector<8x8xf32>
    %c118 = arith.constant 118 : index
    %711 = memref.load %arg1[%c118] : memref<196xf32, #tpu.memory_space<smem>>
    %712 = vector.broadcast %711 : f32 to vector<8x8xf32>
    %713 = arith.mulf %712, %710 : vector<8x8xf32>
    %714 = arith.addf %708, %713 : vector<8x8xf32>
    %c0_476 = arith.constant 0 : index
    %c10_477 = arith.constant 10 : index
    %c1_478 = arith.constant 1 : index
    %c0_479 = arith.constant 0 : index
    %715 = vector.load %arg4[%c0_476, %c10_477, %c1_478, %c0_479] : memref<1x16x11x11xf32, #tpu.memory_space<vmem>>, vector<1x1x8x8xf32>
    %716 = vector.shape_cast %715 : vector<1x1x8x8xf32> to vector<8x8xf32>
    %c119 = arith.constant 119 : index
    %717 = memref.load %arg1[%c119] : memref<196xf32, #tpu.memory_space<smem>>
    %718 = vector.broadcast %717 : f32 to vector<8x8xf32>
    %719 = arith.mulf %718, %716 : vector<8x8xf32>
    %720 = arith.addf %714, %719 : vector<8x8xf32>
    %c0_480 = arith.constant 0 : index
    %c11_481 = arith.constant 11 : index
    %c1_482 = arith.constant 1 : index
    %c0_483 = arith.constant 0 : index
    %721 = vector.load %arg4[%c0_480, %c11_481, %c1_482, %c0_483] : memref<1x16x11x11xf32, #tpu.memory_space<vmem>>, vector<1x1x8x8xf32>
    %722 = vector.shape_cast %721 : vector<1x1x8x8xf32> to vector<8x8xf32>
    %c120 = arith.constant 120 : index
    %723 = memref.load %arg1[%c120] : memref<196xf32, #tpu.memory_space<smem>>
    %724 = vector.broadcast %723 : f32 to vector<8x8xf32>
    %725 = arith.mulf %724, %722 : vector<8x8xf32>
    %726 = arith.addf %720, %725 : vector<8x8xf32>
    %c0_484 = arith.constant 0 : index
    %c10_485 = arith.constant 10 : index
    %c1_486 = arith.constant 1 : index
    %c1_487 = arith.constant 1 : index
    %727 = vector.load %arg4[%c0_484, %c10_485, %c1_486, %c1_487] : memref<1x16x11x11xf32, #tpu.memory_space<vmem>>, vector<1x1x8x8xf32>
    %728 = vector.shape_cast %727 : vector<1x1x8x8xf32> to vector<8x8xf32>
    %c121 = arith.constant 121 : index
    %729 = memref.load %arg1[%c121] : memref<196xf32, #tpu.memory_space<smem>>
    %730 = vector.broadcast %729 : f32 to vector<8x8xf32>
    %731 = arith.mulf %730, %728 : vector<8x8xf32>
    %732 = arith.addf %726, %731 : vector<8x8xf32>
    %c0_488 = arith.constant 0 : index
    %c11_489 = arith.constant 11 : index
    %c1_490 = arith.constant 1 : index
    %c1_491 = arith.constant 1 : index
    %733 = vector.load %arg4[%c0_488, %c11_489, %c1_490, %c1_491] : memref<1x16x11x11xf32, #tpu.memory_space<vmem>>, vector<1x1x8x8xf32>
    %734 = vector.shape_cast %733 : vector<1x1x8x8xf32> to vector<8x8xf32>
    %c122 = arith.constant 122 : index
    %735 = memref.load %arg1[%c122] : memref<196xf32, #tpu.memory_space<smem>>
    %736 = vector.broadcast %735 : f32 to vector<8x8xf32>
    %737 = arith.mulf %736, %734 : vector<8x8xf32>
    %738 = arith.addf %732, %737 : vector<8x8xf32>
    %c0_492 = arith.constant 0 : index
    %c10_493 = arith.constant 10 : index
    %c1_494 = arith.constant 1 : index
    %c2_495 = arith.constant 2 : index
    %739 = vector.load %arg4[%c0_492, %c10_493, %c1_494, %c2_495] : memref<1x16x11x11xf32, #tpu.memory_space<vmem>>, vector<1x1x8x8xf32>
    %740 = vector.shape_cast %739 : vector<1x1x8x8xf32> to vector<8x8xf32>
    %c123 = arith.constant 123 : index
    %741 = memref.load %arg1[%c123] : memref<196xf32, #tpu.memory_space<smem>>
    %742 = vector.broadcast %741 : f32 to vector<8x8xf32>
    %743 = arith.mulf %742, %740 : vector<8x8xf32>
    %744 = arith.addf %738, %743 : vector<8x8xf32>
    %c0_496 = arith.constant 0 : index
    %c11_497 = arith.constant 11 : index
    %c1_498 = arith.constant 1 : index
    %c2_499 = arith.constant 2 : index
    %745 = vector.load %arg4[%c0_496, %c11_497, %c1_498, %c2_499] : memref<1x16x11x11xf32, #tpu.memory_space<vmem>>, vector<1x1x8x8xf32>
    %746 = vector.shape_cast %745 : vector<1x1x8x8xf32> to vector<8x8xf32>
    %c124 = arith.constant 124 : index
    %747 = memref.load %arg1[%c124] : memref<196xf32, #tpu.memory_space<smem>>
    %748 = vector.broadcast %747 : f32 to vector<8x8xf32>
    %749 = arith.mulf %748, %746 : vector<8x8xf32>
    %750 = arith.addf %744, %749 : vector<8x8xf32>
    %c0_500 = arith.constant 0 : index
    %c10_501 = arith.constant 10 : index
    %c1_502 = arith.constant 1 : index
    %c3_503 = arith.constant 3 : index
    %751 = vector.load %arg4[%c0_500, %c10_501, %c1_502, %c3_503] : memref<1x16x11x11xf32, #tpu.memory_space<vmem>>, vector<1x1x8x8xf32>
    %752 = vector.shape_cast %751 : vector<1x1x8x8xf32> to vector<8x8xf32>
    %c125 = arith.constant 125 : index
    %753 = memref.load %arg1[%c125] : memref<196xf32, #tpu.memory_space<smem>>
    %754 = vector.broadcast %753 : f32 to vector<8x8xf32>
    %755 = arith.mulf %754, %752 : vector<8x8xf32>
    %756 = arith.addf %750, %755 : vector<8x8xf32>
    %c0_504 = arith.constant 0 : index
    %c8_505 = arith.constant 8 : index
    %c2_506 = arith.constant 2 : index
    %c0_507 = arith.constant 0 : index
    %757 = vector.load %arg4[%c0_504, %c8_505, %c2_506, %c0_507] : memref<1x16x11x11xf32, #tpu.memory_space<vmem>>, vector<1x1x8x8xf32>
    %758 = vector.shape_cast %757 : vector<1x1x8x8xf32> to vector<8x8xf32>
    %c126 = arith.constant 126 : index
    %759 = memref.load %arg1[%c126] : memref<196xf32, #tpu.memory_space<smem>>
    %760 = vector.broadcast %759 : f32 to vector<8x8xf32>
    %761 = arith.mulf %760, %758 : vector<8x8xf32>
    %762 = arith.addf %756, %761 : vector<8x8xf32>
    %c0_508 = arith.constant 0 : index
    %c9_509 = arith.constant 9 : index
    %c2_510 = arith.constant 2 : index
    %c0_511 = arith.constant 0 : index
    %763 = vector.load %arg4[%c0_508, %c9_509, %c2_510, %c0_511] : memref<1x16x11x11xf32, #tpu.memory_space<vmem>>, vector<1x1x8x8xf32>
    %764 = vector.shape_cast %763 : vector<1x1x8x8xf32> to vector<8x8xf32>
    %c127 = arith.constant 127 : index
    %765 = memref.load %arg1[%c127] : memref<196xf32, #tpu.memory_space<smem>>
    %766 = vector.broadcast %765 : f32 to vector<8x8xf32>
    %767 = arith.mulf %766, %764 : vector<8x8xf32>
    %768 = arith.addf %762, %767 : vector<8x8xf32>
    %c0_512 = arith.constant 0 : index
    %c8_513 = arith.constant 8 : index
    %c2_514 = arith.constant 2 : index
    %c1_515 = arith.constant 1 : index
    %769 = vector.load %arg4[%c0_512, %c8_513, %c2_514, %c1_515] : memref<1x16x11x11xf32, #tpu.memory_space<vmem>>, vector<1x1x8x8xf32>
    %770 = vector.shape_cast %769 : vector<1x1x8x8xf32> to vector<8x8xf32>
    %c128 = arith.constant 128 : index
    %771 = memref.load %arg1[%c128] : memref<196xf32, #tpu.memory_space<smem>>
    %772 = vector.broadcast %771 : f32 to vector<8x8xf32>
    %773 = arith.mulf %772, %770 : vector<8x8xf32>
    %774 = arith.addf %768, %773 : vector<8x8xf32>
    %c0_516 = arith.constant 0 : index
    %c9_517 = arith.constant 9 : index
    %c2_518 = arith.constant 2 : index
    %c1_519 = arith.constant 1 : index
    %775 = vector.load %arg4[%c0_516, %c9_517, %c2_518, %c1_519] : memref<1x16x11x11xf32, #tpu.memory_space<vmem>>, vector<1x1x8x8xf32>
    %776 = vector.shape_cast %775 : vector<1x1x8x8xf32> to vector<8x8xf32>
    %c129 = arith.constant 129 : index
    %777 = memref.load %arg1[%c129] : memref<196xf32, #tpu.memory_space<smem>>
    %778 = vector.broadcast %777 : f32 to vector<8x8xf32>
    %779 = arith.mulf %778, %776 : vector<8x8xf32>
    %780 = arith.addf %774, %779 : vector<8x8xf32>
    %c0_520 = arith.constant 0 : index
    %c8_521 = arith.constant 8 : index
    %c2_522 = arith.constant 2 : index
    %c2_523 = arith.constant 2 : index
    %781 = vector.load %arg4[%c0_520, %c8_521, %c2_522, %c2_523] : memref<1x16x11x11xf32, #tpu.memory_space<vmem>>, vector<1x1x8x8xf32>
    %782 = vector.shape_cast %781 : vector<1x1x8x8xf32> to vector<8x8xf32>
    %c130 = arith.constant 130 : index
    %783 = memref.load %arg1[%c130] : memref<196xf32, #tpu.memory_space<smem>>
    %784 = vector.broadcast %783 : f32 to vector<8x8xf32>
    %785 = arith.mulf %784, %782 : vector<8x8xf32>
    %786 = arith.addf %780, %785 : vector<8x8xf32>
    %c0_524 = arith.constant 0 : index
    %c9_525 = arith.constant 9 : index
    %c2_526 = arith.constant 2 : index
    %c2_527 = arith.constant 2 : index
    %787 = vector.load %arg4[%c0_524, %c9_525, %c2_526, %c2_527] : memref<1x16x11x11xf32, #tpu.memory_space<vmem>>, vector<1x1x8x8xf32>
    %788 = vector.shape_cast %787 : vector<1x1x8x8xf32> to vector<8x8xf32>
    %c131 = arith.constant 131 : index
    %789 = memref.load %arg1[%c131] : memref<196xf32, #tpu.memory_space<smem>>
    %790 = vector.broadcast %789 : f32 to vector<8x8xf32>
    %791 = arith.mulf %790, %788 : vector<8x8xf32>
    %792 = arith.addf %786, %791 : vector<8x8xf32>
    %c0_528 = arith.constant 0 : index
    %c8_529 = arith.constant 8 : index
    %c2_530 = arith.constant 2 : index
    %c3_531 = arith.constant 3 : index
    %793 = vector.load %arg4[%c0_528, %c8_529, %c2_530, %c3_531] : memref<1x16x11x11xf32, #tpu.memory_space<vmem>>, vector<1x1x8x8xf32>
    %794 = vector.shape_cast %793 : vector<1x1x8x8xf32> to vector<8x8xf32>
    %c132 = arith.constant 132 : index
    %795 = memref.load %arg1[%c132] : memref<196xf32, #tpu.memory_space<smem>>
    %796 = vector.broadcast %795 : f32 to vector<8x8xf32>
    %797 = arith.mulf %796, %794 : vector<8x8xf32>
    %798 = arith.addf %792, %797 : vector<8x8xf32>
    %c0_532 = arith.constant 0 : index
    %c10_533 = arith.constant 10 : index
    %c2_534 = arith.constant 2 : index
    %c0_535 = arith.constant 0 : index
    %799 = vector.load %arg4[%c0_532, %c10_533, %c2_534, %c0_535] : memref<1x16x11x11xf32, #tpu.memory_space<vmem>>, vector<1x1x8x8xf32>
    %800 = vector.shape_cast %799 : vector<1x1x8x8xf32> to vector<8x8xf32>
    %c133 = arith.constant 133 : index
    %801 = memref.load %arg1[%c133] : memref<196xf32, #tpu.memory_space<smem>>
    %802 = vector.broadcast %801 : f32 to vector<8x8xf32>
    %803 = arith.mulf %802, %800 : vector<8x8xf32>
    %804 = arith.addf %798, %803 : vector<8x8xf32>
    %c0_536 = arith.constant 0 : index
    %c11_537 = arith.constant 11 : index
    %c2_538 = arith.constant 2 : index
    %c0_539 = arith.constant 0 : index
    %805 = vector.load %arg4[%c0_536, %c11_537, %c2_538, %c0_539] : memref<1x16x11x11xf32, #tpu.memory_space<vmem>>, vector<1x1x8x8xf32>
    %806 = vector.shape_cast %805 : vector<1x1x8x8xf32> to vector<8x8xf32>
    %c134 = arith.constant 134 : index
    %807 = memref.load %arg1[%c134] : memref<196xf32, #tpu.memory_space<smem>>
    %808 = vector.broadcast %807 : f32 to vector<8x8xf32>
    %809 = arith.mulf %808, %806 : vector<8x8xf32>
    %810 = arith.addf %804, %809 : vector<8x8xf32>
    %c0_540 = arith.constant 0 : index
    %c10_541 = arith.constant 10 : index
    %c2_542 = arith.constant 2 : index
    %c1_543 = arith.constant 1 : index
    %811 = vector.load %arg4[%c0_540, %c10_541, %c2_542, %c1_543] : memref<1x16x11x11xf32, #tpu.memory_space<vmem>>, vector<1x1x8x8xf32>
    %812 = vector.shape_cast %811 : vector<1x1x8x8xf32> to vector<8x8xf32>
    %c135 = arith.constant 135 : index
    %813 = memref.load %arg1[%c135] : memref<196xf32, #tpu.memory_space<smem>>
    %814 = vector.broadcast %813 : f32 to vector<8x8xf32>
    %815 = arith.mulf %814, %812 : vector<8x8xf32>
    %816 = arith.addf %810, %815 : vector<8x8xf32>
    %c0_544 = arith.constant 0 : index
    %c11_545 = arith.constant 11 : index
    %c2_546 = arith.constant 2 : index
    %c1_547 = arith.constant 1 : index
    %817 = vector.load %arg4[%c0_544, %c11_545, %c2_546, %c1_547] : memref<1x16x11x11xf32, #tpu.memory_space<vmem>>, vector<1x1x8x8xf32>
    %818 = vector.shape_cast %817 : vector<1x1x8x8xf32> to vector<8x8xf32>
    %c136 = arith.constant 136 : index
    %819 = memref.load %arg1[%c136] : memref<196xf32, #tpu.memory_space<smem>>
    %820 = vector.broadcast %819 : f32 to vector<8x8xf32>
    %821 = arith.mulf %820, %818 : vector<8x8xf32>
    %822 = arith.addf %816, %821 : vector<8x8xf32>
    %c0_548 = arith.constant 0 : index
    %c10_549 = arith.constant 10 : index
    %c2_550 = arith.constant 2 : index
    %c2_551 = arith.constant 2 : index
    %823 = vector.load %arg4[%c0_548, %c10_549, %c2_550, %c2_551] : memref<1x16x11x11xf32, #tpu.memory_space<vmem>>, vector<1x1x8x8xf32>
    %824 = vector.shape_cast %823 : vector<1x1x8x8xf32> to vector<8x8xf32>
    %c137 = arith.constant 137 : index
    %825 = memref.load %arg1[%c137] : memref<196xf32, #tpu.memory_space<smem>>
    %826 = vector.broadcast %825 : f32 to vector<8x8xf32>
    %827 = arith.mulf %826, %824 : vector<8x8xf32>
    %828 = arith.addf %822, %827 : vector<8x8xf32>
    %c0_552 = arith.constant 0 : index
    %c11_553 = arith.constant 11 : index
    %c2_554 = arith.constant 2 : index
    %c2_555 = arith.constant 2 : index
    %829 = vector.load %arg4[%c0_552, %c11_553, %c2_554, %c2_555] : memref<1x16x11x11xf32, #tpu.memory_space<vmem>>, vector<1x1x8x8xf32>
    %830 = vector.shape_cast %829 : vector<1x1x8x8xf32> to vector<8x8xf32>
    %c138 = arith.constant 138 : index
    %831 = memref.load %arg1[%c138] : memref<196xf32, #tpu.memory_space<smem>>
    %832 = vector.broadcast %831 : f32 to vector<8x8xf32>
    %833 = arith.mulf %832, %830 : vector<8x8xf32>
    %834 = arith.addf %828, %833 : vector<8x8xf32>
    %c0_556 = arith.constant 0 : index
    %c10_557 = arith.constant 10 : index
    %c2_558 = arith.constant 2 : index
    %c3_559 = arith.constant 3 : index
    %835 = vector.load %arg4[%c0_556, %c10_557, %c2_558, %c3_559] : memref<1x16x11x11xf32, #tpu.memory_space<vmem>>, vector<1x1x8x8xf32>
    %836 = vector.shape_cast %835 : vector<1x1x8x8xf32> to vector<8x8xf32>
    %c139 = arith.constant 139 : index
    %837 = memref.load %arg1[%c139] : memref<196xf32, #tpu.memory_space<smem>>
    %838 = vector.broadcast %837 : f32 to vector<8x8xf32>
    %839 = arith.mulf %838, %836 : vector<8x8xf32>
    %840 = arith.addf %834, %839 : vector<8x8xf32>
    %c0_560 = arith.constant 0 : index
    %c8_561 = arith.constant 8 : index
    %c3_562 = arith.constant 3 : index
    %c0_563 = arith.constant 0 : index
    %841 = vector.load %arg4[%c0_560, %c8_561, %c3_562, %c0_563] : memref<1x16x11x11xf32, #tpu.memory_space<vmem>>, vector<1x1x8x8xf32>
    %842 = vector.shape_cast %841 : vector<1x1x8x8xf32> to vector<8x8xf32>
    %c140 = arith.constant 140 : index
    %843 = memref.load %arg1[%c140] : memref<196xf32, #tpu.memory_space<smem>>
    %844 = vector.broadcast %843 : f32 to vector<8x8xf32>
    %845 = arith.mulf %844, %842 : vector<8x8xf32>
    %846 = arith.addf %840, %845 : vector<8x8xf32>
    %c0_564 = arith.constant 0 : index
    %c9_565 = arith.constant 9 : index
    %c3_566 = arith.constant 3 : index
    %c0_567 = arith.constant 0 : index
    %847 = vector.load %arg4[%c0_564, %c9_565, %c3_566, %c0_567] : memref<1x16x11x11xf32, #tpu.memory_space<vmem>>, vector<1x1x8x8xf32>
    %848 = vector.shape_cast %847 : vector<1x1x8x8xf32> to vector<8x8xf32>
    %c141 = arith.constant 141 : index
    %849 = memref.load %arg1[%c141] : memref<196xf32, #tpu.memory_space<smem>>
    %850 = vector.broadcast %849 : f32 to vector<8x8xf32>
    %851 = arith.mulf %850, %848 : vector<8x8xf32>
    %852 = arith.addf %846, %851 : vector<8x8xf32>
    %c0_568 = arith.constant 0 : index
    %c8_569 = arith.constant 8 : index
    %c3_570 = arith.constant 3 : index
    %c1_571 = arith.constant 1 : index
    %853 = vector.load %arg4[%c0_568, %c8_569, %c3_570, %c1_571] : memref<1x16x11x11xf32, #tpu.memory_space<vmem>>, vector<1x1x8x8xf32>
    %854 = vector.shape_cast %853 : vector<1x1x8x8xf32> to vector<8x8xf32>
    %c142 = arith.constant 142 : index
    %855 = memref.load %arg1[%c142] : memref<196xf32, #tpu.memory_space<smem>>
    %856 = vector.broadcast %855 : f32 to vector<8x8xf32>
    %857 = arith.mulf %856, %854 : vector<8x8xf32>
    %858 = arith.addf %852, %857 : vector<8x8xf32>
    %c0_572 = arith.constant 0 : index
    %c9_573 = arith.constant 9 : index
    %c3_574 = arith.constant 3 : index
    %c1_575 = arith.constant 1 : index
    %859 = vector.load %arg4[%c0_572, %c9_573, %c3_574, %c1_575] : memref<1x16x11x11xf32, #tpu.memory_space<vmem>>, vector<1x1x8x8xf32>
    %860 = vector.shape_cast %859 : vector<1x1x8x8xf32> to vector<8x8xf32>
    %c143 = arith.constant 143 : index
    %861 = memref.load %arg1[%c143] : memref<196xf32, #tpu.memory_space<smem>>
    %862 = vector.broadcast %861 : f32 to vector<8x8xf32>
    %863 = arith.mulf %862, %860 : vector<8x8xf32>
    %864 = arith.addf %858, %863 : vector<8x8xf32>
    %c0_576 = arith.constant 0 : index
    %c8_577 = arith.constant 8 : index
    %c3_578 = arith.constant 3 : index
    %c2_579 = arith.constant 2 : index
    %865 = vector.load %arg4[%c0_576, %c8_577, %c3_578, %c2_579] : memref<1x16x11x11xf32, #tpu.memory_space<vmem>>, vector<1x1x8x8xf32>
    %866 = vector.shape_cast %865 : vector<1x1x8x8xf32> to vector<8x8xf32>
    %c144 = arith.constant 144 : index
    %867 = memref.load %arg1[%c144] : memref<196xf32, #tpu.memory_space<smem>>
    %868 = vector.broadcast %867 : f32 to vector<8x8xf32>
    %869 = arith.mulf %868, %866 : vector<8x8xf32>
    %870 = arith.addf %864, %869 : vector<8x8xf32>
    %c0_580 = arith.constant 0 : index
    %c9_581 = arith.constant 9 : index
    %c3_582 = arith.constant 3 : index
    %c2_583 = arith.constant 2 : index
    %871 = vector.load %arg4[%c0_580, %c9_581, %c3_582, %c2_583] : memref<1x16x11x11xf32, #tpu.memory_space<vmem>>, vector<1x1x8x8xf32>
    %872 = vector.shape_cast %871 : vector<1x1x8x8xf32> to vector<8x8xf32>
    %c145 = arith.constant 145 : index
    %873 = memref.load %arg1[%c145] : memref<196xf32, #tpu.memory_space<smem>>
    %874 = vector.broadcast %873 : f32 to vector<8x8xf32>
    %875 = arith.mulf %874, %872 : vector<8x8xf32>
    %876 = arith.addf %870, %875 : vector<8x8xf32>
    %c0_584 = arith.constant 0 : index
    %c8_585 = arith.constant 8 : index
    %c3_586 = arith.constant 3 : index
    %c3_587 = arith.constant 3 : index
    %877 = vector.load %arg4[%c0_584, %c8_585, %c3_586, %c3_587] : memref<1x16x11x11xf32, #tpu.memory_space<vmem>>, vector<1x1x8x8xf32>
    %878 = vector.shape_cast %877 : vector<1x1x8x8xf32> to vector<8x8xf32>
    %c146 = arith.constant 146 : index
    %879 = memref.load %arg1[%c146] : memref<196xf32, #tpu.memory_space<smem>>
    %880 = vector.broadcast %879 : f32 to vector<8x8xf32>
    %881 = arith.mulf %880, %878 : vector<8x8xf32>
    %882 = arith.addf %876, %881 : vector<8x8xf32>
    %c0_588 = arith.constant 0 : index
    %c12_589 = arith.constant 12 : index
    %c0_590 = arith.constant 0 : index
    %c0_591 = arith.constant 0 : index
    %883 = vector.load %arg4[%c0_588, %c12_589, %c0_590, %c0_591] : memref<1x16x11x11xf32, #tpu.memory_space<vmem>>, vector<1x1x8x8xf32>
    %884 = vector.shape_cast %883 : vector<1x1x8x8xf32> to vector<8x8xf32>
    %c147 = arith.constant 147 : index
    %885 = memref.load %arg1[%c147] : memref<196xf32, #tpu.memory_space<smem>>
    %886 = vector.broadcast %885 : f32 to vector<8x8xf32>
    %887 = arith.mulf %886, %884 : vector<8x8xf32>
    %888 = arith.addf %882, %887 : vector<8x8xf32>
    %c0_592 = arith.constant 0 : index
    %c13_593 = arith.constant 13 : index
    %c0_594 = arith.constant 0 : index
    %c0_595 = arith.constant 0 : index
    %889 = vector.load %arg4[%c0_592, %c13_593, %c0_594, %c0_595] : memref<1x16x11x11xf32, #tpu.memory_space<vmem>>, vector<1x1x8x8xf32>
    %890 = vector.shape_cast %889 : vector<1x1x8x8xf32> to vector<8x8xf32>
    %c148 = arith.constant 148 : index
    %891 = memref.load %arg1[%c148] : memref<196xf32, #tpu.memory_space<smem>>
    %892 = vector.broadcast %891 : f32 to vector<8x8xf32>
    %893 = arith.mulf %892, %890 : vector<8x8xf32>
    %894 = arith.addf %888, %893 : vector<8x8xf32>
    %c0_596 = arith.constant 0 : index
    %c12_597 = arith.constant 12 : index
    %c0_598 = arith.constant 0 : index
    %c1_599 = arith.constant 1 : index
    %895 = vector.load %arg4[%c0_596, %c12_597, %c0_598, %c1_599] : memref<1x16x11x11xf32, #tpu.memory_space<vmem>>, vector<1x1x8x8xf32>
    %896 = vector.shape_cast %895 : vector<1x1x8x8xf32> to vector<8x8xf32>
    %c149 = arith.constant 149 : index
    %897 = memref.load %arg1[%c149] : memref<196xf32, #tpu.memory_space<smem>>
    %898 = vector.broadcast %897 : f32 to vector<8x8xf32>
    %899 = arith.mulf %898, %896 : vector<8x8xf32>
    %900 = arith.addf %894, %899 : vector<8x8xf32>
    %c0_600 = arith.constant 0 : index
    %c13_601 = arith.constant 13 : index
    %c0_602 = arith.constant 0 : index
    %c1_603 = arith.constant 1 : index
    %901 = vector.load %arg4[%c0_600, %c13_601, %c0_602, %c1_603] : memref<1x16x11x11xf32, #tpu.memory_space<vmem>>, vector<1x1x8x8xf32>
    %902 = vector.shape_cast %901 : vector<1x1x8x8xf32> to vector<8x8xf32>
    %c150 = arith.constant 150 : index
    %903 = memref.load %arg1[%c150] : memref<196xf32, #tpu.memory_space<smem>>
    %904 = vector.broadcast %903 : f32 to vector<8x8xf32>
    %905 = arith.mulf %904, %902 : vector<8x8xf32>
    %906 = arith.addf %900, %905 : vector<8x8xf32>
    %c0_604 = arith.constant 0 : index
    %c12_605 = arith.constant 12 : index
    %c0_606 = arith.constant 0 : index
    %c2_607 = arith.constant 2 : index
    %907 = vector.load %arg4[%c0_604, %c12_605, %c0_606, %c2_607] : memref<1x16x11x11xf32, #tpu.memory_space<vmem>>, vector<1x1x8x8xf32>
    %908 = vector.shape_cast %907 : vector<1x1x8x8xf32> to vector<8x8xf32>
    %c151 = arith.constant 151 : index
    %909 = memref.load %arg1[%c151] : memref<196xf32, #tpu.memory_space<smem>>
    %910 = vector.broadcast %909 : f32 to vector<8x8xf32>
    %911 = arith.mulf %910, %908 : vector<8x8xf32>
    %912 = arith.addf %906, %911 : vector<8x8xf32>
    %c0_608 = arith.constant 0 : index
    %c13_609 = arith.constant 13 : index
    %c0_610 = arith.constant 0 : index
    %c2_611 = arith.constant 2 : index
    %913 = vector.load %arg4[%c0_608, %c13_609, %c0_610, %c2_611] : memref<1x16x11x11xf32, #tpu.memory_space<vmem>>, vector<1x1x8x8xf32>
    %914 = vector.shape_cast %913 : vector<1x1x8x8xf32> to vector<8x8xf32>
    %c152 = arith.constant 152 : index
    %915 = memref.load %arg1[%c152] : memref<196xf32, #tpu.memory_space<smem>>
    %916 = vector.broadcast %915 : f32 to vector<8x8xf32>
    %917 = arith.mulf %916, %914 : vector<8x8xf32>
    %918 = arith.addf %912, %917 : vector<8x8xf32>
    %c0_612 = arith.constant 0 : index
    %c12_613 = arith.constant 12 : index
    %c0_614 = arith.constant 0 : index
    %c3_615 = arith.constant 3 : index
    %919 = vector.load %arg4[%c0_612, %c12_613, %c0_614, %c3_615] : memref<1x16x11x11xf32, #tpu.memory_space<vmem>>, vector<1x1x8x8xf32>
    %920 = vector.shape_cast %919 : vector<1x1x8x8xf32> to vector<8x8xf32>
    %c153 = arith.constant 153 : index
    %921 = memref.load %arg1[%c153] : memref<196xf32, #tpu.memory_space<smem>>
    %922 = vector.broadcast %921 : f32 to vector<8x8xf32>
    %923 = arith.mulf %922, %920 : vector<8x8xf32>
    %924 = arith.addf %918, %923 : vector<8x8xf32>
    %c0_616 = arith.constant 0 : index
    %c14_617 = arith.constant 14 : index
    %c0_618 = arith.constant 0 : index
    %c0_619 = arith.constant 0 : index
    %925 = vector.load %arg4[%c0_616, %c14_617, %c0_618, %c0_619] : memref<1x16x11x11xf32, #tpu.memory_space<vmem>>, vector<1x1x8x8xf32>
    %926 = vector.shape_cast %925 : vector<1x1x8x8xf32> to vector<8x8xf32>
    %c154 = arith.constant 154 : index
    %927 = memref.load %arg1[%c154] : memref<196xf32, #tpu.memory_space<smem>>
    %928 = vector.broadcast %927 : f32 to vector<8x8xf32>
    %929 = arith.mulf %928, %926 : vector<8x8xf32>
    %930 = arith.addf %924, %929 : vector<8x8xf32>
    %c0_620 = arith.constant 0 : index
    %c15_621 = arith.constant 15 : index
    %c0_622 = arith.constant 0 : index
    %c0_623 = arith.constant 0 : index
    %931 = vector.load %arg4[%c0_620, %c15_621, %c0_622, %c0_623] : memref<1x16x11x11xf32, #tpu.memory_space<vmem>>, vector<1x1x8x8xf32>
    %932 = vector.shape_cast %931 : vector<1x1x8x8xf32> to vector<8x8xf32>
    %c155 = arith.constant 155 : index
    %933 = memref.load %arg1[%c155] : memref<196xf32, #tpu.memory_space<smem>>
    %934 = vector.broadcast %933 : f32 to vector<8x8xf32>
    %935 = arith.mulf %934, %932 : vector<8x8xf32>
    %936 = arith.addf %930, %935 : vector<8x8xf32>
    %c0_624 = arith.constant 0 : index
    %c14_625 = arith.constant 14 : index
    %c0_626 = arith.constant 0 : index
    %c1_627 = arith.constant 1 : index
    %937 = vector.load %arg4[%c0_624, %c14_625, %c0_626, %c1_627] : memref<1x16x11x11xf32, #tpu.memory_space<vmem>>, vector<1x1x8x8xf32>
    %938 = vector.shape_cast %937 : vector<1x1x8x8xf32> to vector<8x8xf32>
    %c156 = arith.constant 156 : index
    %939 = memref.load %arg1[%c156] : memref<196xf32, #tpu.memory_space<smem>>
    %940 = vector.broadcast %939 : f32 to vector<8x8xf32>
    %941 = arith.mulf %940, %938 : vector<8x8xf32>
    %942 = arith.addf %936, %941 : vector<8x8xf32>
    %c0_628 = arith.constant 0 : index
    %c15_629 = arith.constant 15 : index
    %c0_630 = arith.constant 0 : index
    %c1_631 = arith.constant 1 : index
    %943 = vector.load %arg4[%c0_628, %c15_629, %c0_630, %c1_631] : memref<1x16x11x11xf32, #tpu.memory_space<vmem>>, vector<1x1x8x8xf32>
    %944 = vector.shape_cast %943 : vector<1x1x8x8xf32> to vector<8x8xf32>
    %c157 = arith.constant 157 : index
    %945 = memref.load %arg1[%c157] : memref<196xf32, #tpu.memory_space<smem>>
    %946 = vector.broadcast %945 : f32 to vector<8x8xf32>
    %947 = arith.mulf %946, %944 : vector<8x8xf32>
    %948 = arith.addf %942, %947 : vector<8x8xf32>
    %c0_632 = arith.constant 0 : index
    %c14_633 = arith.constant 14 : index
    %c0_634 = arith.constant 0 : index
    %c2_635 = arith.constant 2 : index
    %949 = vector.load %arg4[%c0_632, %c14_633, %c0_634, %c2_635] : memref<1x16x11x11xf32, #tpu.memory_space<vmem>>, vector<1x1x8x8xf32>
    %950 = vector.shape_cast %949 : vector<1x1x8x8xf32> to vector<8x8xf32>
    %c158 = arith.constant 158 : index
    %951 = memref.load %arg1[%c158] : memref<196xf32, #tpu.memory_space<smem>>
    %952 = vector.broadcast %951 : f32 to vector<8x8xf32>
    %953 = arith.mulf %952, %950 : vector<8x8xf32>
    %954 = arith.addf %948, %953 : vector<8x8xf32>
    %c0_636 = arith.constant 0 : index
    %c15_637 = arith.constant 15 : index
    %c0_638 = arith.constant 0 : index
    %c2_639 = arith.constant 2 : index
    %955 = vector.load %arg4[%c0_636, %c15_637, %c0_638, %c2_639] : memref<1x16x11x11xf32, #tpu.memory_space<vmem>>, vector<1x1x8x8xf32>
    %956 = vector.shape_cast %955 : vector<1x1x8x8xf32> to vector<8x8xf32>
    %c159 = arith.constant 159 : index
    %957 = memref.load %arg1[%c159] : memref<196xf32, #tpu.memory_space<smem>>
    %958 = vector.broadcast %957 : f32 to vector<8x8xf32>
    %959 = arith.mulf %958, %956 : vector<8x8xf32>
    %960 = arith.addf %954, %959 : vector<8x8xf32>
    %c0_640 = arith.constant 0 : index
    %c14_641 = arith.constant 14 : index
    %c0_642 = arith.constant 0 : index
    %c3_643 = arith.constant 3 : index
    %961 = vector.load %arg4[%c0_640, %c14_641, %c0_642, %c3_643] : memref<1x16x11x11xf32, #tpu.memory_space<vmem>>, vector<1x1x8x8xf32>
    %962 = vector.shape_cast %961 : vector<1x1x8x8xf32> to vector<8x8xf32>
    %c160 = arith.constant 160 : index
    %963 = memref.load %arg1[%c160] : memref<196xf32, #tpu.memory_space<smem>>
    %964 = vector.broadcast %963 : f32 to vector<8x8xf32>
    %965 = arith.mulf %964, %962 : vector<8x8xf32>
    %966 = arith.addf %960, %965 : vector<8x8xf32>
    %c0_644 = arith.constant 0 : index
    %c12_645 = arith.constant 12 : index
    %c1_646 = arith.constant 1 : index
    %c0_647 = arith.constant 0 : index
    %967 = vector.load %arg4[%c0_644, %c12_645, %c1_646, %c0_647] : memref<1x16x11x11xf32, #tpu.memory_space<vmem>>, vector<1x1x8x8xf32>
    %968 = vector.shape_cast %967 : vector<1x1x8x8xf32> to vector<8x8xf32>
    %c161 = arith.constant 161 : index
    %969 = memref.load %arg1[%c161] : memref<196xf32, #tpu.memory_space<smem>>
    %970 = vector.broadcast %969 : f32 to vector<8x8xf32>
    %971 = arith.mulf %970, %968 : vector<8x8xf32>
    %972 = arith.addf %966, %971 : vector<8x8xf32>
    %c0_648 = arith.constant 0 : index
    %c13_649 = arith.constant 13 : index
    %c1_650 = arith.constant 1 : index
    %c0_651 = arith.constant 0 : index
    %973 = vector.load %arg4[%c0_648, %c13_649, %c1_650, %c0_651] : memref<1x16x11x11xf32, #tpu.memory_space<vmem>>, vector<1x1x8x8xf32>
    %974 = vector.shape_cast %973 : vector<1x1x8x8xf32> to vector<8x8xf32>
    %c162 = arith.constant 162 : index
    %975 = memref.load %arg1[%c162] : memref<196xf32, #tpu.memory_space<smem>>
    %976 = vector.broadcast %975 : f32 to vector<8x8xf32>
    %977 = arith.mulf %976, %974 : vector<8x8xf32>
    %978 = arith.addf %972, %977 : vector<8x8xf32>
    %c0_652 = arith.constant 0 : index
    %c12_653 = arith.constant 12 : index
    %c1_654 = arith.constant 1 : index
    %c1_655 = arith.constant 1 : index
    %979 = vector.load %arg4[%c0_652, %c12_653, %c1_654, %c1_655] : memref<1x16x11x11xf32, #tpu.memory_space<vmem>>, vector<1x1x8x8xf32>
    %980 = vector.shape_cast %979 : vector<1x1x8x8xf32> to vector<8x8xf32>
    %c163 = arith.constant 163 : index
    %981 = memref.load %arg1[%c163] : memref<196xf32, #tpu.memory_space<smem>>
    %982 = vector.broadcast %981 : f32 to vector<8x8xf32>
    %983 = arith.mulf %982, %980 : vector<8x8xf32>
    %984 = arith.addf %978, %983 : vector<8x8xf32>
    %c0_656 = arith.constant 0 : index
    %c13_657 = arith.constant 13 : index
    %c1_658 = arith.constant 1 : index
    %c1_659 = arith.constant 1 : index
    %985 = vector.load %arg4[%c0_656, %c13_657, %c1_658, %c1_659] : memref<1x16x11x11xf32, #tpu.memory_space<vmem>>, vector<1x1x8x8xf32>
    %986 = vector.shape_cast %985 : vector<1x1x8x8xf32> to vector<8x8xf32>
    %c164 = arith.constant 164 : index
    %987 = memref.load %arg1[%c164] : memref<196xf32, #tpu.memory_space<smem>>
    %988 = vector.broadcast %987 : f32 to vector<8x8xf32>
    %989 = arith.mulf %988, %986 : vector<8x8xf32>
    %990 = arith.addf %984, %989 : vector<8x8xf32>
    %c0_660 = arith.constant 0 : index
    %c12_661 = arith.constant 12 : index
    %c1_662 = arith.constant 1 : index
    %c2_663 = arith.constant 2 : index
    %991 = vector.load %arg4[%c0_660, %c12_661, %c1_662, %c2_663] : memref<1x16x11x11xf32, #tpu.memory_space<vmem>>, vector<1x1x8x8xf32>
    %992 = vector.shape_cast %991 : vector<1x1x8x8xf32> to vector<8x8xf32>
    %c165 = arith.constant 165 : index
    %993 = memref.load %arg1[%c165] : memref<196xf32, #tpu.memory_space<smem>>
    %994 = vector.broadcast %993 : f32 to vector<8x8xf32>
    %995 = arith.mulf %994, %992 : vector<8x8xf32>
    %996 = arith.addf %990, %995 : vector<8x8xf32>
    %c0_664 = arith.constant 0 : index
    %c13_665 = arith.constant 13 : index
    %c1_666 = arith.constant 1 : index
    %c2_667 = arith.constant 2 : index
    %997 = vector.load %arg4[%c0_664, %c13_665, %c1_666, %c2_667] : memref<1x16x11x11xf32, #tpu.memory_space<vmem>>, vector<1x1x8x8xf32>
    %998 = vector.shape_cast %997 : vector<1x1x8x8xf32> to vector<8x8xf32>
    %c166 = arith.constant 166 : index
    %999 = memref.load %arg1[%c166] : memref<196xf32, #tpu.memory_space<smem>>
    %1000 = vector.broadcast %999 : f32 to vector<8x8xf32>
    %1001 = arith.mulf %1000, %998 : vector<8x8xf32>
    %1002 = arith.addf %996, %1001 : vector<8x8xf32>
    %c0_668 = arith.constant 0 : index
    %c12_669 = arith.constant 12 : index
    %c1_670 = arith.constant 1 : index
    %c3_671 = arith.constant 3 : index
    %1003 = vector.load %arg4[%c0_668, %c12_669, %c1_670, %c3_671] : memref<1x16x11x11xf32, #tpu.memory_space<vmem>>, vector<1x1x8x8xf32>
    %1004 = vector.shape_cast %1003 : vector<1x1x8x8xf32> to vector<8x8xf32>
    %c167 = arith.constant 167 : index
    %1005 = memref.load %arg1[%c167] : memref<196xf32, #tpu.memory_space<smem>>
    %1006 = vector.broadcast %1005 : f32 to vector<8x8xf32>
    %1007 = arith.mulf %1006, %1004 : vector<8x8xf32>
    %1008 = arith.addf %1002, %1007 : vector<8x8xf32>
    %c0_672 = arith.constant 0 : index
    %c14_673 = arith.constant 14 : index
    %c1_674 = arith.constant 1 : index
    %c0_675 = arith.constant 0 : index
    %1009 = vector.load %arg4[%c0_672, %c14_673, %c1_674, %c0_675] : memref<1x16x11x11xf32, #tpu.memory_space<vmem>>, vector<1x1x8x8xf32>
    %1010 = vector.shape_cast %1009 : vector<1x1x8x8xf32> to vector<8x8xf32>
    %c168 = arith.constant 168 : index
    %1011 = memref.load %arg1[%c168] : memref<196xf32, #tpu.memory_space<smem>>
    %1012 = vector.broadcast %1011 : f32 to vector<8x8xf32>
    %1013 = arith.mulf %1012, %1010 : vector<8x8xf32>
    %1014 = arith.addf %1008, %1013 : vector<8x8xf32>
    %c0_676 = arith.constant 0 : index
    %c15_677 = arith.constant 15 : index
    %c1_678 = arith.constant 1 : index
    %c0_679 = arith.constant 0 : index
    %1015 = vector.load %arg4[%c0_676, %c15_677, %c1_678, %c0_679] : memref<1x16x11x11xf32, #tpu.memory_space<vmem>>, vector<1x1x8x8xf32>
    %1016 = vector.shape_cast %1015 : vector<1x1x8x8xf32> to vector<8x8xf32>
    %c169 = arith.constant 169 : index
    %1017 = memref.load %arg1[%c169] : memref<196xf32, #tpu.memory_space<smem>>
    %1018 = vector.broadcast %1017 : f32 to vector<8x8xf32>
    %1019 = arith.mulf %1018, %1016 : vector<8x8xf32>
    %1020 = arith.addf %1014, %1019 : vector<8x8xf32>
    %c0_680 = arith.constant 0 : index
    %c14_681 = arith.constant 14 : index
    %c1_682 = arith.constant 1 : index
    %c1_683 = arith.constant 1 : index
    %1021 = vector.load %arg4[%c0_680, %c14_681, %c1_682, %c1_683] : memref<1x16x11x11xf32, #tpu.memory_space<vmem>>, vector<1x1x8x8xf32>
    %1022 = vector.shape_cast %1021 : vector<1x1x8x8xf32> to vector<8x8xf32>
    %c170 = arith.constant 170 : index
    %1023 = memref.load %arg1[%c170] : memref<196xf32, #tpu.memory_space<smem>>
    %1024 = vector.broadcast %1023 : f32 to vector<8x8xf32>
    %1025 = arith.mulf %1024, %1022 : vector<8x8xf32>
    %1026 = arith.addf %1020, %1025 : vector<8x8xf32>
    %c0_684 = arith.constant 0 : index
    %c15_685 = arith.constant 15 : index
    %c1_686 = arith.constant 1 : index
    %c1_687 = arith.constant 1 : index
    %1027 = vector.load %arg4[%c0_684, %c15_685, %c1_686, %c1_687] : memref<1x16x11x11xf32, #tpu.memory_space<vmem>>, vector<1x1x8x8xf32>
    %1028 = vector.shape_cast %1027 : vector<1x1x8x8xf32> to vector<8x8xf32>
    %c171 = arith.constant 171 : index
    %1029 = memref.load %arg1[%c171] : memref<196xf32, #tpu.memory_space<smem>>
    %1030 = vector.broadcast %1029 : f32 to vector<8x8xf32>
    %1031 = arith.mulf %1030, %1028 : vector<8x8xf32>
    %1032 = arith.addf %1026, %1031 : vector<8x8xf32>
    %c0_688 = arith.constant 0 : index
    %c14_689 = arith.constant 14 : index
    %c1_690 = arith.constant 1 : index
    %c2_691 = arith.constant 2 : index
    %1033 = vector.load %arg4[%c0_688, %c14_689, %c1_690, %c2_691] : memref<1x16x11x11xf32, #tpu.memory_space<vmem>>, vector<1x1x8x8xf32>
    %1034 = vector.shape_cast %1033 : vector<1x1x8x8xf32> to vector<8x8xf32>
    %c172 = arith.constant 172 : index
    %1035 = memref.load %arg1[%c172] : memref<196xf32, #tpu.memory_space<smem>>
    %1036 = vector.broadcast %1035 : f32 to vector<8x8xf32>
    %1037 = arith.mulf %1036, %1034 : vector<8x8xf32>
    %1038 = arith.addf %1032, %1037 : vector<8x8xf32>
    %c0_692 = arith.constant 0 : index
    %c15_693 = arith.constant 15 : index
    %c1_694 = arith.constant 1 : index
    %c2_695 = arith.constant 2 : index
    %1039 = vector.load %arg4[%c0_692, %c15_693, %c1_694, %c2_695] : memref<1x16x11x11xf32, #tpu.memory_space<vmem>>, vector<1x1x8x8xf32>
    %1040 = vector.shape_cast %1039 : vector<1x1x8x8xf32> to vector<8x8xf32>
    %c173 = arith.constant 173 : index
    %1041 = memref.load %arg1[%c173] : memref<196xf32, #tpu.memory_space<smem>>
    %1042 = vector.broadcast %1041 : f32 to vector<8x8xf32>
    %1043 = arith.mulf %1042, %1040 : vector<8x8xf32>
    %1044 = arith.addf %1038, %1043 : vector<8x8xf32>
    %c0_696 = arith.constant 0 : index
    %c14_697 = arith.constant 14 : index
    %c1_698 = arith.constant 1 : index
    %c3_699 = arith.constant 3 : index
    %1045 = vector.load %arg4[%c0_696, %c14_697, %c1_698, %c3_699] : memref<1x16x11x11xf32, #tpu.memory_space<vmem>>, vector<1x1x8x8xf32>
    %1046 = vector.shape_cast %1045 : vector<1x1x8x8xf32> to vector<8x8xf32>
    %c174 = arith.constant 174 : index
    %1047 = memref.load %arg1[%c174] : memref<196xf32, #tpu.memory_space<smem>>
    %1048 = vector.broadcast %1047 : f32 to vector<8x8xf32>
    %1049 = arith.mulf %1048, %1046 : vector<8x8xf32>
    %1050 = arith.addf %1044, %1049 : vector<8x8xf32>
    %c0_700 = arith.constant 0 : index
    %c12_701 = arith.constant 12 : index
    %c2_702 = arith.constant 2 : index
    %c0_703 = arith.constant 0 : index
    %1051 = vector.load %arg4[%c0_700, %c12_701, %c2_702, %c0_703] : memref<1x16x11x11xf32, #tpu.memory_space<vmem>>, vector<1x1x8x8xf32>
    %1052 = vector.shape_cast %1051 : vector<1x1x8x8xf32> to vector<8x8xf32>
    %c175 = arith.constant 175 : index
    %1053 = memref.load %arg1[%c175] : memref<196xf32, #tpu.memory_space<smem>>
    %1054 = vector.broadcast %1053 : f32 to vector<8x8xf32>
    %1055 = arith.mulf %1054, %1052 : vector<8x8xf32>
    %1056 = arith.addf %1050, %1055 : vector<8x8xf32>
    %c0_704 = arith.constant 0 : index
    %c13_705 = arith.constant 13 : index
    %c2_706 = arith.constant 2 : index
    %c0_707 = arith.constant 0 : index
    %1057 = vector.load %arg4[%c0_704, %c13_705, %c2_706, %c0_707] : memref<1x16x11x11xf32, #tpu.memory_space<vmem>>, vector<1x1x8x8xf32>
    %1058 = vector.shape_cast %1057 : vector<1x1x8x8xf32> to vector<8x8xf32>
    %c176 = arith.constant 176 : index
    %1059 = memref.load %arg1[%c176] : memref<196xf32, #tpu.memory_space<smem>>
    %1060 = vector.broadcast %1059 : f32 to vector<8x8xf32>
    %1061 = arith.mulf %1060, %1058 : vector<8x8xf32>
    %1062 = arith.addf %1056, %1061 : vector<8x8xf32>
    %c0_708 = arith.constant 0 : index
    %c12_709 = arith.constant 12 : index
    %c2_710 = arith.constant 2 : index
    %c1_711 = arith.constant 1 : index
    %1063 = vector.load %arg4[%c0_708, %c12_709, %c2_710, %c1_711] : memref<1x16x11x11xf32, #tpu.memory_space<vmem>>, vector<1x1x8x8xf32>
    %1064 = vector.shape_cast %1063 : vector<1x1x8x8xf32> to vector<8x8xf32>
    %c177 = arith.constant 177 : index
    %1065 = memref.load %arg1[%c177] : memref<196xf32, #tpu.memory_space<smem>>
    %1066 = vector.broadcast %1065 : f32 to vector<8x8xf32>
    %1067 = arith.mulf %1066, %1064 : vector<8x8xf32>
    %1068 = arith.addf %1062, %1067 : vector<8x8xf32>
    %c0_712 = arith.constant 0 : index
    %c13_713 = arith.constant 13 : index
    %c2_714 = arith.constant 2 : index
    %c1_715 = arith.constant 1 : index
    %1069 = vector.load %arg4[%c0_712, %c13_713, %c2_714, %c1_715] : memref<1x16x11x11xf32, #tpu.memory_space<vmem>>, vector<1x1x8x8xf32>
    %1070 = vector.shape_cast %1069 : vector<1x1x8x8xf32> to vector<8x8xf32>
    %c178 = arith.constant 178 : index
    %1071 = memref.load %arg1[%c178] : memref<196xf32, #tpu.memory_space<smem>>
    %1072 = vector.broadcast %1071 : f32 to vector<8x8xf32>
    %1073 = arith.mulf %1072, %1070 : vector<8x8xf32>
    %1074 = arith.addf %1068, %1073 : vector<8x8xf32>
    %c0_716 = arith.constant 0 : index
    %c12_717 = arith.constant 12 : index
    %c2_718 = arith.constant 2 : index
    %c2_719 = arith.constant 2 : index
    %1075 = vector.load %arg4[%c0_716, %c12_717, %c2_718, %c2_719] : memref<1x16x11x11xf32, #tpu.memory_space<vmem>>, vector<1x1x8x8xf32>
    %1076 = vector.shape_cast %1075 : vector<1x1x8x8xf32> to vector<8x8xf32>
    %c179 = arith.constant 179 : index
    %1077 = memref.load %arg1[%c179] : memref<196xf32, #tpu.memory_space<smem>>
    %1078 = vector.broadcast %1077 : f32 to vector<8x8xf32>
    %1079 = arith.mulf %1078, %1076 : vector<8x8xf32>
    %1080 = arith.addf %1074, %1079 : vector<8x8xf32>
    %c0_720 = arith.constant 0 : index
    %c13_721 = arith.constant 13 : index
    %c2_722 = arith.constant 2 : index
    %c2_723 = arith.constant 2 : index
    %1081 = vector.load %arg4[%c0_720, %c13_721, %c2_722, %c2_723] : memref<1x16x11x11xf32, #tpu.memory_space<vmem>>, vector<1x1x8x8xf32>
    %1082 = vector.shape_cast %1081 : vector<1x1x8x8xf32> to vector<8x8xf32>
    %c180 = arith.constant 180 : index
    %1083 = memref.load %arg1[%c180] : memref<196xf32, #tpu.memory_space<smem>>
    %1084 = vector.broadcast %1083 : f32 to vector<8x8xf32>
    %1085 = arith.mulf %1084, %1082 : vector<8x8xf32>
    %1086 = arith.addf %1080, %1085 : vector<8x8xf32>
    %c0_724 = arith.constant 0 : index
    %c12_725 = arith.constant 12 : index
    %c2_726 = arith.constant 2 : index
    %c3_727 = arith.constant 3 : index
    %1087 = vector.load %arg4[%c0_724, %c12_725, %c2_726, %c3_727] : memref<1x16x11x11xf32, #tpu.memory_space<vmem>>, vector<1x1x8x8xf32>
    %1088 = vector.shape_cast %1087 : vector<1x1x8x8xf32> to vector<8x8xf32>
    %c181 = arith.constant 181 : index
    %1089 = memref.load %arg1[%c181] : memref<196xf32, #tpu.memory_space<smem>>
    %1090 = vector.broadcast %1089 : f32 to vector<8x8xf32>
    %1091 = arith.mulf %1090, %1088 : vector<8x8xf32>
    %1092 = arith.addf %1086, %1091 : vector<8x8xf32>
    %c0_728 = arith.constant 0 : index
    %c14_729 = arith.constant 14 : index
    %c2_730 = arith.constant 2 : index
    %c0_731 = arith.constant 0 : index
    %1093 = vector.load %arg4[%c0_728, %c14_729, %c2_730, %c0_731] : memref<1x16x11x11xf32, #tpu.memory_space<vmem>>, vector<1x1x8x8xf32>
    %1094 = vector.shape_cast %1093 : vector<1x1x8x8xf32> to vector<8x8xf32>
    %c182 = arith.constant 182 : index
    %1095 = memref.load %arg1[%c182] : memref<196xf32, #tpu.memory_space<smem>>
    %1096 = vector.broadcast %1095 : f32 to vector<8x8xf32>
    %1097 = arith.mulf %1096, %1094 : vector<8x8xf32>
    %1098 = arith.addf %1092, %1097 : vector<8x8xf32>
    %c0_732 = arith.constant 0 : index
    %c15_733 = arith.constant 15 : index
    %c2_734 = arith.constant 2 : index
    %c0_735 = arith.constant 0 : index
    %1099 = vector.load %arg4[%c0_732, %c15_733, %c2_734, %c0_735] : memref<1x16x11x11xf32, #tpu.memory_space<vmem>>, vector<1x1x8x8xf32>
    %1100 = vector.shape_cast %1099 : vector<1x1x8x8xf32> to vector<8x8xf32>
    %c183 = arith.constant 183 : index
    %1101 = memref.load %arg1[%c183] : memref<196xf32, #tpu.memory_space<smem>>
    %1102 = vector.broadcast %1101 : f32 to vector<8x8xf32>
    %1103 = arith.mulf %1102, %1100 : vector<8x8xf32>
    %1104 = arith.addf %1098, %1103 : vector<8x8xf32>
    %c0_736 = arith.constant 0 : index
    %c14_737 = arith.constant 14 : index
    %c2_738 = arith.constant 2 : index
    %c1_739 = arith.constant 1 : index
    %1105 = vector.load %arg4[%c0_736, %c14_737, %c2_738, %c1_739] : memref<1x16x11x11xf32, #tpu.memory_space<vmem>>, vector<1x1x8x8xf32>
    %1106 = vector.shape_cast %1105 : vector<1x1x8x8xf32> to vector<8x8xf32>
    %c184 = arith.constant 184 : index
    %1107 = memref.load %arg1[%c184] : memref<196xf32, #tpu.memory_space<smem>>
    %1108 = vector.broadcast %1107 : f32 to vector<8x8xf32>
    %1109 = arith.mulf %1108, %1106 : vector<8x8xf32>
    %1110 = arith.addf %1104, %1109 : vector<8x8xf32>
    %c0_740 = arith.constant 0 : index
    %c15_741 = arith.constant 15 : index
    %c2_742 = arith.constant 2 : index
    %c1_743 = arith.constant 1 : index
    %1111 = vector.load %arg4[%c0_740, %c15_741, %c2_742, %c1_743] : memref<1x16x11x11xf32, #tpu.memory_space<vmem>>, vector<1x1x8x8xf32>
    %1112 = vector.shape_cast %1111 : vector<1x1x8x8xf32> to vector<8x8xf32>
    %c185 = arith.constant 185 : index
    %1113 = memref.load %arg1[%c185] : memref<196xf32, #tpu.memory_space<smem>>
    %1114 = vector.broadcast %1113 : f32 to vector<8x8xf32>
    %1115 = arith.mulf %1114, %1112 : vector<8x8xf32>
    %1116 = arith.addf %1110, %1115 : vector<8x8xf32>
    %c0_744 = arith.constant 0 : index
    %c14_745 = arith.constant 14 : index
    %c2_746 = arith.constant 2 : index
    %c2_747 = arith.constant 2 : index
    %1117 = vector.load %arg4[%c0_744, %c14_745, %c2_746, %c2_747] : memref<1x16x11x11xf32, #tpu.memory_space<vmem>>, vector<1x1x8x8xf32>
    %1118 = vector.shape_cast %1117 : vector<1x1x8x8xf32> to vector<8x8xf32>
    %c186 = arith.constant 186 : index
    %1119 = memref.load %arg1[%c186] : memref<196xf32, #tpu.memory_space<smem>>
    %1120 = vector.broadcast %1119 : f32 to vector<8x8xf32>
    %1121 = arith.mulf %1120, %1118 : vector<8x8xf32>
    %1122 = arith.addf %1116, %1121 : vector<8x8xf32>
    %c0_748 = arith.constant 0 : index
    %c15_749 = arith.constant 15 : index
    %c2_750 = arith.constant 2 : index
    %c2_751 = arith.constant 2 : index
    %1123 = vector.load %arg4[%c0_748, %c15_749, %c2_750, %c2_751] : memref<1x16x11x11xf32, #tpu.memory_space<vmem>>, vector<1x1x8x8xf32>
    %1124 = vector.shape_cast %1123 : vector<1x1x8x8xf32> to vector<8x8xf32>
    %c187 = arith.constant 187 : index
    %1125 = memref.load %arg1[%c187] : memref<196xf32, #tpu.memory_space<smem>>
    %1126 = vector.broadcast %1125 : f32 to vector<8x8xf32>
    %1127 = arith.mulf %1126, %1124 : vector<8x8xf32>
    %1128 = arith.addf %1122, %1127 : vector<8x8xf32>
    %c0_752 = arith.constant 0 : index
    %c14_753 = arith.constant 14 : index
    %c2_754 = arith.constant 2 : index
    %c3_755 = arith.constant 3 : index
    %1129 = vector.load %arg4[%c0_752, %c14_753, %c2_754, %c3_755] : memref<1x16x11x11xf32, #tpu.memory_space<vmem>>, vector<1x1x8x8xf32>
    %1130 = vector.shape_cast %1129 : vector<1x1x8x8xf32> to vector<8x8xf32>
    %c188 = arith.constant 188 : index
    %1131 = memref.load %arg1[%c188] : memref<196xf32, #tpu.memory_space<smem>>
    %1132 = vector.broadcast %1131 : f32 to vector<8x8xf32>
    %1133 = arith.mulf %1132, %1130 : vector<8x8xf32>
    %1134 = arith.addf %1128, %1133 : vector<8x8xf32>
    %c0_756 = arith.constant 0 : index
    %c12_757 = arith.constant 12 : index
    %c3_758 = arith.constant 3 : index
    %c0_759 = arith.constant 0 : index
    %1135 = vector.load %arg4[%c0_756, %c12_757, %c3_758, %c0_759] : memref<1x16x11x11xf32, #tpu.memory_space<vmem>>, vector<1x1x8x8xf32>
    %1136 = vector.shape_cast %1135 : vector<1x1x8x8xf32> to vector<8x8xf32>
    %c189 = arith.constant 189 : index
    %1137 = memref.load %arg1[%c189] : memref<196xf32, #tpu.memory_space<smem>>
    %1138 = vector.broadcast %1137 : f32 to vector<8x8xf32>
    %1139 = arith.mulf %1138, %1136 : vector<8x8xf32>
    %1140 = arith.addf %1134, %1139 : vector<8x8xf32>
    %c0_760 = arith.constant 0 : index
    %c13_761 = arith.constant 13 : index
    %c3_762 = arith.constant 3 : index
    %c0_763 = arith.constant 0 : index
    %1141 = vector.load %arg4[%c0_760, %c13_761, %c3_762, %c0_763] : memref<1x16x11x11xf32, #tpu.memory_space<vmem>>, vector<1x1x8x8xf32>
    %1142 = vector.shape_cast %1141 : vector<1x1x8x8xf32> to vector<8x8xf32>
    %c190 = arith.constant 190 : index
    %1143 = memref.load %arg1[%c190] : memref<196xf32, #tpu.memory_space<smem>>
    %1144 = vector.broadcast %1143 : f32 to vector<8x8xf32>
    %1145 = arith.mulf %1144, %1142 : vector<8x8xf32>
    %1146 = arith.addf %1140, %1145 : vector<8x8xf32>
    %c0_764 = arith.constant 0 : index
    %c12_765 = arith.constant 12 : index
    %c3_766 = arith.constant 3 : index
    %c1_767 = arith.constant 1 : index
    %1147 = vector.load %arg4[%c0_764, %c12_765, %c3_766, %c1_767] : memref<1x16x11x11xf32, #tpu.memory_space<vmem>>, vector<1x1x8x8xf32>
    %1148 = vector.shape_cast %1147 : vector<1x1x8x8xf32> to vector<8x8xf32>
    %c191 = arith.constant 191 : index
    %1149 = memref.load %arg1[%c191] : memref<196xf32, #tpu.memory_space<smem>>
    %1150 = vector.broadcast %1149 : f32 to vector<8x8xf32>
    %1151 = arith.mulf %1150, %1148 : vector<8x8xf32>
    %1152 = arith.addf %1146, %1151 : vector<8x8xf32>
    %c0_768 = arith.constant 0 : index
    %c13_769 = arith.constant 13 : index
    %c3_770 = arith.constant 3 : index
    %c1_771 = arith.constant 1 : index
    %1153 = vector.load %arg4[%c0_768, %c13_769, %c3_770, %c1_771] : memref<1x16x11x11xf32, #tpu.memory_space<vmem>>, vector<1x1x8x8xf32>
    %1154 = vector.shape_cast %1153 : vector<1x1x8x8xf32> to vector<8x8xf32>
    %c192 = arith.constant 192 : index
    %1155 = memref.load %arg1[%c192] : memref<196xf32, #tpu.memory_space<smem>>
    %1156 = vector.broadcast %1155 : f32 to vector<8x8xf32>
    %1157 = arith.mulf %1156, %1154 : vector<8x8xf32>
    %1158 = arith.addf %1152, %1157 : vector<8x8xf32>
    %c0_772 = arith.constant 0 : index
    %c12_773 = arith.constant 12 : index
    %c3_774 = arith.constant 3 : index
    %c2_775 = arith.constant 2 : index
    %1159 = vector.load %arg4[%c0_772, %c12_773, %c3_774, %c2_775] : memref<1x16x11x11xf32, #tpu.memory_space<vmem>>, vector<1x1x8x8xf32>
    %1160 = vector.shape_cast %1159 : vector<1x1x8x8xf32> to vector<8x8xf32>
    %c193 = arith.constant 193 : index
    %1161 = memref.load %arg1[%c193] : memref<196xf32, #tpu.memory_space<smem>>
    %1162 = vector.broadcast %1161 : f32 to vector<8x8xf32>
    %1163 = arith.mulf %1162, %1160 : vector<8x8xf32>
    %1164 = arith.addf %1158, %1163 : vector<8x8xf32>
    %c0_776 = arith.constant 0 : index
    %c13_777 = arith.constant 13 : index
    %c3_778 = arith.constant 3 : index
    %c2_779 = arith.constant 2 : index
    %1165 = vector.load %arg4[%c0_776, %c13_777, %c3_778, %c2_779] : memref<1x16x11x11xf32, #tpu.memory_space<vmem>>, vector<1x1x8x8xf32>
    %1166 = vector.shape_cast %1165 : vector<1x1x8x8xf32> to vector<8x8xf32>
    %c194 = arith.constant 194 : index
    %1167 = memref.load %arg1[%c194] : memref<196xf32, #tpu.memory_space<smem>>
    %1168 = vector.broadcast %1167 : f32 to vector<8x8xf32>
    %1169 = arith.mulf %1168, %1166 : vector<8x8xf32>
    %1170 = arith.addf %1164, %1169 : vector<8x8xf32>
    %c0_780 = arith.constant 0 : index
    %c12_781 = arith.constant 12 : index
    %c3_782 = arith.constant 3 : index
    %c3_783 = arith.constant 3 : index
    %1171 = vector.load %arg4[%c0_780, %c12_781, %c3_782, %c3_783] : memref<1x16x11x11xf32, #tpu.memory_space<vmem>>, vector<1x1x8x8xf32>
    %1172 = vector.shape_cast %1171 : vector<1x1x8x8xf32> to vector<8x8xf32>
    %c195 = arith.constant 195 : index
    %1173 = memref.load %arg1[%c195] : memref<196xf32, #tpu.memory_space<smem>>
    %1174 = vector.broadcast %1173 : f32 to vector<8x8xf32>
    %1175 = arith.mulf %1174, %1172 : vector<8x8xf32>
    %1176 = arith.addf %1170, %1175 : vector<8x8xf32>
    %c0_784 = arith.constant 0 : index
    %1177 = memref.load %arg2[%c0_784] : memref<1xf32, #tpu.memory_space<smem>>
    %1178 = vector.broadcast %1177 : f32 to vector<8x8xf32>
    %1179 = arith.mulf %1176, %1178 : vector<8x8xf32>
    %c0_785 = arith.constant 0 : index
    %1180 = memref.load %arg3[%c0_785] : memref<1xf32, #tpu.memory_space<smem>>
    %1181 = vector.broadcast %1180 : f32 to vector<8x8xf32>
    %1182 = arith.addf %1179, %1181 : vector<8x8xf32>
    %cst_786 = arith.constant 0.000000e+00 : f32
    %1183 = vector.broadcast %cst_786 : f32 to vector<8x8xf32>
    %1184 = arith.maximumf %1182, %1183 : vector<8x8xf32>
    %c0_787 = arith.constant 0 : index
    %c0_788 = arith.constant 0 : index
    %c0_789 = arith.constant 0 : index
    %c0_790 = arith.constant 0 : index
    %1185 = vector.load %arg5[%c0_787, %c0_788, %c0_789, %c0_790] : memref<1x1x8x8xf32, #tpu.memory_space<vmem>>, vector<1x1x8x8xf32>
    %1186 = vector.shape_cast %1185 : vector<1x1x8x8xf32> to vector<8x8xf32>
    %1187 = vector.shape_cast %1184 : vector<8x8xf32> to vector<1x1x8x8xf32>
    tpu.vector_store %arg5[%c0_787, %c0_788, %c0_789, %c0_790], %1187 {strides = array<i32>} : memref<1x1x8x8xf32, #tpu.memory_space<vmem>>, vector<1x1x8x8xf32>,
    return
  }
  func.func @transform_0(%arg0: i32) -> i32 {
    %c0_i32 = arith.constant 0 : i32
    %c0_i32_0 = arith.constant 0 : i32
    return %c0_i32 : i32
  }
  func.func @transform_1(%arg0: i32) -> i32 {
    %c0_i32 = arith.constant 0 : i32
    %c0_i32_0 = arith.constant 0 : i32
    return %c0_i32 : i32
  }
  func.func @transform_2(%arg0: i32) -> i32 {
    %c0_i32 = arith.constant 0 : i32
    %c0_i32_0 = arith.constant 0 : i32
    return %c0_i32 : i32
  }
  func.func @transform_3(%arg0: i32) -> (i32, i32, i32, i32) {
    %c0_i32 = arith.constant 0 : i32
    %c0_i32_0 = arith.constant 0 : i32
    %c0_i32_1 = arith.constant 0 : i32
    %c0_i32_2 = arith.constant 0 : i32
    return %arg0, %c0_i32, %c0_i32_0, %c0_i32_1 : i32, i32, i32, i32
  }
  func.func @transform_4(%arg0: i32) -> (i32, i32, i32, i32) {
    %c0_i32 = arith.constant 0 : i32
    %c0_i32_0 = arith.constant 0 : i32
    %c0_i32_1 = arith.constant 0 : i32
    %c0_i32_2 = arith.constant 0 : i32
    return %arg0, %c0_i32, %c0_i32_0, %c0_i32_1 : i32, i32, i32, i32
  }
}

module attributes {stable_mosaic.version = 11 : i64} {
  func.func @kernel(%arg0: i32, %arg1: memref<25xf32, #tpu.memory_space<smem>>, %arg2: memref<1xf32, #tpu.memory_space<smem>>, %arg3: memref<1xf32, #tpu.memory_space<smem>>, %arg4: memref<1x4x6x6xf32, #tpu.memory_space<vmem>>, %arg5: memref<1x1x4x4xf32, #tpu.memory_space<vmem>>) attributes {dimension_semantics = [#tpu.dimension_semantics<parallel>], iteration_bounds = array<i64: 2>, scalar_prefetch = 0 : i64, scratch_operands = 0 : i64, tpu.core_type = #tpu.core_type<tc>, window_params = [{transform_indices = @transform_0, window_bounds = array<i64: 25>}, {transform_indices = @transform_1, window_bounds = array<i64: 1>}, {transform_indices = @transform_2, window_bounds = array<i64: 1>}, {transform_indices = @transform_3, window_bounds = array<i64: 1, 4, 6, 6>}, {transform_indices = @transform_4, window_bounds = array<i64: 1, 1, 4, 4>}]} {
    %cst = arith.constant 0.000000e+00 : f32
    %0 = vector.broadcast %cst : f32 to vector<4x4xf32>
    %c0 = arith.constant 0 : index
    %c0_0 = arith.constant 0 : index
    %c0_1 = arith.constant 0 : index
    %c0_2 = arith.constant 0 : index
    %1 = vector.load %arg4[%c0, %c0_0, %c0_1, %c0_2] : memref<1x4x6x6xf32, #tpu.memory_space<vmem>>, vector<1x1x4x4xf32>
    %2 = vector.shape_cast %1 : vector<1x1x4x4xf32> to vector<4x4xf32>
    %c0_3 = arith.constant 0 : index
    %3 = memref.load %arg1[%c0_3] : memref<25xf32, #tpu.memory_space<smem>>
    %4 = vector.broadcast %3 : f32 to vector<4x4xf32>
    %5 = arith.mulf %4, %2 : vector<4x4xf32>
    %6 = arith.addf %0, %5 : vector<4x4xf32>
    %c0_4 = arith.constant 0 : index
    %c1 = arith.constant 1 : index
    %c0_5 = arith.constant 0 : index
    %c0_6 = arith.constant 0 : index
    %7 = vector.load %arg4[%c0_4, %c1, %c0_5, %c0_6] : memref<1x4x6x6xf32, #tpu.memory_space<vmem>>, vector<1x1x4x4xf32>
    %8 = vector.shape_cast %7 : vector<1x1x4x4xf32> to vector<4x4xf32>
    %c1_7 = arith.constant 1 : index
    %9 = memref.load %arg1[%c1_7] : memref<25xf32, #tpu.memory_space<smem>>
    %10 = vector.broadcast %9 : f32 to vector<4x4xf32>
    %11 = arith.mulf %10, %8 : vector<4x4xf32>
    %12 = arith.addf %6, %11 : vector<4x4xf32>
    %c0_8 = arith.constant 0 : index
    %c0_9 = arith.constant 0 : index
    %c0_10 = arith.constant 0 : index
    %c1_11 = arith.constant 1 : index
    %13 = vector.load %arg4[%c0_8, %c0_9, %c0_10, %c1_11] : memref<1x4x6x6xf32, #tpu.memory_space<vmem>>, vector<1x1x4x4xf32>
    %14 = vector.shape_cast %13 : vector<1x1x4x4xf32> to vector<4x4xf32>
    %c2 = arith.constant 2 : index
    %15 = memref.load %arg1[%c2] : memref<25xf32, #tpu.memory_space<smem>>
    %16 = vector.broadcast %15 : f32 to vector<4x4xf32>
    %17 = arith.mulf %16, %14 : vector<4x4xf32>
    %18 = arith.addf %12, %17 : vector<4x4xf32>
    %c0_12 = arith.constant 0 : index
    %c1_13 = arith.constant 1 : index
    %c0_14 = arith.constant 0 : index
    %c1_15 = arith.constant 1 : index
    %19 = vector.load %arg4[%c0_12, %c1_13, %c0_14, %c1_15] : memref<1x4x6x6xf32, #tpu.memory_space<vmem>>, vector<1x1x4x4xf32>
    %20 = vector.shape_cast %19 : vector<1x1x4x4xf32> to vector<4x4xf32>
    %c3 = arith.constant 3 : index
    %21 = memref.load %arg1[%c3] : memref<25xf32, #tpu.memory_space<smem>>
    %22 = vector.broadcast %21 : f32 to vector<4x4xf32>
    %23 = arith.mulf %22, %20 : vector<4x4xf32>
    %24 = arith.addf %18, %23 : vector<4x4xf32>
    %c0_16 = arith.constant 0 : index
    %c0_17 = arith.constant 0 : index
    %c0_18 = arith.constant 0 : index
    %c2_19 = arith.constant 2 : index
    %25 = vector.load %arg4[%c0_16, %c0_17, %c0_18, %c2_19] : memref<1x4x6x6xf32, #tpu.memory_space<vmem>>, vector<1x1x4x4xf32>
    %26 = vector.shape_cast %25 : vector<1x1x4x4xf32> to vector<4x4xf32>
    %c4 = arith.constant 4 : index
    %27 = memref.load %arg1[%c4] : memref<25xf32, #tpu.memory_space<smem>>
    %28 = vector.broadcast %27 : f32 to vector<4x4xf32>
    %29 = arith.mulf %28, %26 : vector<4x4xf32>
    %30 = arith.addf %24, %29 : vector<4x4xf32>
    %c0_20 = arith.constant 0 : index
    %c2_21 = arith.constant 2 : index
    %c0_22 = arith.constant 0 : index
    %c0_23 = arith.constant 0 : index
    %31 = vector.load %arg4[%c0_20, %c2_21, %c0_22, %c0_23] : memref<1x4x6x6xf32, #tpu.memory_space<vmem>>, vector<1x1x4x4xf32>
    %32 = vector.shape_cast %31 : vector<1x1x4x4xf32> to vector<4x4xf32>
    %c5 = arith.constant 5 : index
    %33 = memref.load %arg1[%c5] : memref<25xf32, #tpu.memory_space<smem>>
    %34 = vector.broadcast %33 : f32 to vector<4x4xf32>
    %35 = arith.mulf %34, %32 : vector<4x4xf32>
    %36 = arith.addf %30, %35 : vector<4x4xf32>
    %c0_24 = arith.constant 0 : index
    %c3_25 = arith.constant 3 : index
    %c0_26 = arith.constant 0 : index
    %c0_27 = arith.constant 0 : index
    %37 = vector.load %arg4[%c0_24, %c3_25, %c0_26, %c0_27] : memref<1x4x6x6xf32, #tpu.memory_space<vmem>>, vector<1x1x4x4xf32>
    %38 = vector.shape_cast %37 : vector<1x1x4x4xf32> to vector<4x4xf32>
    %c6 = arith.constant 6 : index
    %39 = memref.load %arg1[%c6] : memref<25xf32, #tpu.memory_space<smem>>
    %40 = vector.broadcast %39 : f32 to vector<4x4xf32>
    %41 = arith.mulf %40, %38 : vector<4x4xf32>
    %42 = arith.addf %36, %41 : vector<4x4xf32>
    %c0_28 = arith.constant 0 : index
    %c2_29 = arith.constant 2 : index
    %c0_30 = arith.constant 0 : index
    %c1_31 = arith.constant 1 : index
    %43 = vector.load %arg4[%c0_28, %c2_29, %c0_30, %c1_31] : memref<1x4x6x6xf32, #tpu.memory_space<vmem>>, vector<1x1x4x4xf32>
    %44 = vector.shape_cast %43 : vector<1x1x4x4xf32> to vector<4x4xf32>
    %c7 = arith.constant 7 : index
    %45 = memref.load %arg1[%c7] : memref<25xf32, #tpu.memory_space<smem>>
    %46 = vector.broadcast %45 : f32 to vector<4x4xf32>
    %47 = arith.mulf %46, %44 : vector<4x4xf32>
    %48 = arith.addf %42, %47 : vector<4x4xf32>
    %c0_32 = arith.constant 0 : index
    %c3_33 = arith.constant 3 : index
    %c0_34 = arith.constant 0 : index
    %c1_35 = arith.constant 1 : index
    %49 = vector.load %arg4[%c0_32, %c3_33, %c0_34, %c1_35] : memref<1x4x6x6xf32, #tpu.memory_space<vmem>>, vector<1x1x4x4xf32>
    %50 = vector.shape_cast %49 : vector<1x1x4x4xf32> to vector<4x4xf32>
    %c8 = arith.constant 8 : index
    %51 = memref.load %arg1[%c8] : memref<25xf32, #tpu.memory_space<smem>>
    %52 = vector.broadcast %51 : f32 to vector<4x4xf32>
    %53 = arith.mulf %52, %50 : vector<4x4xf32>
    %54 = arith.addf %48, %53 : vector<4x4xf32>
    %c0_36 = arith.constant 0 : index
    %c2_37 = arith.constant 2 : index
    %c0_38 = arith.constant 0 : index
    %c2_39 = arith.constant 2 : index
    %55 = vector.load %arg4[%c0_36, %c2_37, %c0_38, %c2_39] : memref<1x4x6x6xf32, #tpu.memory_space<vmem>>, vector<1x1x4x4xf32>
    %56 = vector.shape_cast %55 : vector<1x1x4x4xf32> to vector<4x4xf32>
    %c9 = arith.constant 9 : index
    %57 = memref.load %arg1[%c9] : memref<25xf32, #tpu.memory_space<smem>>
    %58 = vector.broadcast %57 : f32 to vector<4x4xf32>
    %59 = arith.mulf %58, %56 : vector<4x4xf32>
    %60 = arith.addf %54, %59 : vector<4x4xf32>
    %c0_40 = arith.constant 0 : index
    %c0_41 = arith.constant 0 : index
    %c1_42 = arith.constant 1 : index
    %c0_43 = arith.constant 0 : index
    %61 = vector.load %arg4[%c0_40, %c0_41, %c1_42, %c0_43] : memref<1x4x6x6xf32, #tpu.memory_space<vmem>>, vector<1x1x4x4xf32>
    %62 = vector.shape_cast %61 : vector<1x1x4x4xf32> to vector<4x4xf32>
    %c10 = arith.constant 10 : index
    %63 = memref.load %arg1[%c10] : memref<25xf32, #tpu.memory_space<smem>>
    %64 = vector.broadcast %63 : f32 to vector<4x4xf32>
    %65 = arith.mulf %64, %62 : vector<4x4xf32>
    %66 = arith.addf %60, %65 : vector<4x4xf32>
    %c0_44 = arith.constant 0 : index
    %c1_45 = arith.constant 1 : index
    %c1_46 = arith.constant 1 : index
    %c0_47 = arith.constant 0 : index
    %67 = vector.load %arg4[%c0_44, %c1_45, %c1_46, %c0_47] : memref<1x4x6x6xf32, #tpu.memory_space<vmem>>, vector<1x1x4x4xf32>
    %68 = vector.shape_cast %67 : vector<1x1x4x4xf32> to vector<4x4xf32>
    %c11 = arith.constant 11 : index
    %69 = memref.load %arg1[%c11] : memref<25xf32, #tpu.memory_space<smem>>
    %70 = vector.broadcast %69 : f32 to vector<4x4xf32>
    %71 = arith.mulf %70, %68 : vector<4x4xf32>
    %72 = arith.addf %66, %71 : vector<4x4xf32>
    %c0_48 = arith.constant 0 : index
    %c0_49 = arith.constant 0 : index
    %c1_50 = arith.constant 1 : index
    %c1_51 = arith.constant 1 : index
    %73 = vector.load %arg4[%c0_48, %c0_49, %c1_50, %c1_51] : memref<1x4x6x6xf32, #tpu.memory_space<vmem>>, vector<1x1x4x4xf32>
    %74 = vector.shape_cast %73 : vector<1x1x4x4xf32> to vector<4x4xf32>
    %c12 = arith.constant 12 : index
    %75 = memref.load %arg1[%c12] : memref<25xf32, #tpu.memory_space<smem>>
    %76 = vector.broadcast %75 : f32 to vector<4x4xf32>
    %77 = arith.mulf %76, %74 : vector<4x4xf32>
    %78 = arith.addf %72, %77 : vector<4x4xf32>
    %c0_52 = arith.constant 0 : index
    %c1_53 = arith.constant 1 : index
    %c1_54 = arith.constant 1 : index
    %c1_55 = arith.constant 1 : index
    %79 = vector.load %arg4[%c0_52, %c1_53, %c1_54, %c1_55] : memref<1x4x6x6xf32, #tpu.memory_space<vmem>>, vector<1x1x4x4xf32>
    %80 = vector.shape_cast %79 : vector<1x1x4x4xf32> to vector<4x4xf32>
    %c13 = arith.constant 13 : index
    %81 = memref.load %arg1[%c13] : memref<25xf32, #tpu.memory_space<smem>>
    %82 = vector.broadcast %81 : f32 to vector<4x4xf32>
    %83 = arith.mulf %82, %80 : vector<4x4xf32>
    %84 = arith.addf %78, %83 : vector<4x4xf32>
    %c0_56 = arith.constant 0 : index
    %c0_57 = arith.constant 0 : index
    %c1_58 = arith.constant 1 : index
    %c2_59 = arith.constant 2 : index
    %85 = vector.load %arg4[%c0_56, %c0_57, %c1_58, %c2_59] : memref<1x4x6x6xf32, #tpu.memory_space<vmem>>, vector<1x1x4x4xf32>
    %86 = vector.shape_cast %85 : vector<1x1x4x4xf32> to vector<4x4xf32>
    %c14 = arith.constant 14 : index
    %87 = memref.load %arg1[%c14] : memref<25xf32, #tpu.memory_space<smem>>
    %88 = vector.broadcast %87 : f32 to vector<4x4xf32>
    %89 = arith.mulf %88, %86 : vector<4x4xf32>
    %90 = arith.addf %84, %89 : vector<4x4xf32>
    %c0_60 = arith.constant 0 : index
    %c2_61 = arith.constant 2 : index
    %c1_62 = arith.constant 1 : index
    %c0_63 = arith.constant 0 : index
    %91 = vector.load %arg4[%c0_60, %c2_61, %c1_62, %c0_63] : memref<1x4x6x6xf32, #tpu.memory_space<vmem>>, vector<1x1x4x4xf32>
    %92 = vector.shape_cast %91 : vector<1x1x4x4xf32> to vector<4x4xf32>
    %c15 = arith.constant 15 : index
    %93 = memref.load %arg1[%c15] : memref<25xf32, #tpu.memory_space<smem>>
    %94 = vector.broadcast %93 : f32 to vector<4x4xf32>
    %95 = arith.mulf %94, %92 : vector<4x4xf32>
    %96 = arith.addf %90, %95 : vector<4x4xf32>
    %c0_64 = arith.constant 0 : index
    %c3_65 = arith.constant 3 : index
    %c1_66 = arith.constant 1 : index
    %c0_67 = arith.constant 0 : index
    %97 = vector.load %arg4[%c0_64, %c3_65, %c1_66, %c0_67] : memref<1x4x6x6xf32, #tpu.memory_space<vmem>>, vector<1x1x4x4xf32>
    %98 = vector.shape_cast %97 : vector<1x1x4x4xf32> to vector<4x4xf32>
    %c16 = arith.constant 16 : index
    %99 = memref.load %arg1[%c16] : memref<25xf32, #tpu.memory_space<smem>>
    %100 = vector.broadcast %99 : f32 to vector<4x4xf32>
    %101 = arith.mulf %100, %98 : vector<4x4xf32>
    %102 = arith.addf %96, %101 : vector<4x4xf32>
    %c0_68 = arith.constant 0 : index
    %c2_69 = arith.constant 2 : index
    %c1_70 = arith.constant 1 : index
    %c1_71 = arith.constant 1 : index
    %103 = vector.load %arg4[%c0_68, %c2_69, %c1_70, %c1_71] : memref<1x4x6x6xf32, #tpu.memory_space<vmem>>, vector<1x1x4x4xf32>
    %104 = vector.shape_cast %103 : vector<1x1x4x4xf32> to vector<4x4xf32>
    %c17 = arith.constant 17 : index
    %105 = memref.load %arg1[%c17] : memref<25xf32, #tpu.memory_space<smem>>
    %106 = vector.broadcast %105 : f32 to vector<4x4xf32>
    %107 = arith.mulf %106, %104 : vector<4x4xf32>
    %108 = arith.addf %102, %107 : vector<4x4xf32>
    %c0_72 = arith.constant 0 : index
    %c3_73 = arith.constant 3 : index
    %c1_74 = arith.constant 1 : index
    %c1_75 = arith.constant 1 : index
    %109 = vector.load %arg4[%c0_72, %c3_73, %c1_74, %c1_75] : memref<1x4x6x6xf32, #tpu.memory_space<vmem>>, vector<1x1x4x4xf32>
    %110 = vector.shape_cast %109 : vector<1x1x4x4xf32> to vector<4x4xf32>
    %c18 = arith.constant 18 : index
    %111 = memref.load %arg1[%c18] : memref<25xf32, #tpu.memory_space<smem>>
    %112 = vector.broadcast %111 : f32 to vector<4x4xf32>
    %113 = arith.mulf %112, %110 : vector<4x4xf32>
    %114 = arith.addf %108, %113 : vector<4x4xf32>
    %c0_76 = arith.constant 0 : index
    %c2_77 = arith.constant 2 : index
    %c1_78 = arith.constant 1 : index
    %c2_79 = arith.constant 2 : index
    %115 = vector.load %arg4[%c0_76, %c2_77, %c1_78, %c2_79] : memref<1x4x6x6xf32, #tpu.memory_space<vmem>>, vector<1x1x4x4xf32>
    %116 = vector.shape_cast %115 : vector<1x1x4x4xf32> to vector<4x4xf32>
    %c19 = arith.constant 19 : index
    %117 = memref.load %arg1[%c19] : memref<25xf32, #tpu.memory_space<smem>>
    %118 = vector.broadcast %117 : f32 to vector<4x4xf32>
    %119 = arith.mulf %118, %116 : vector<4x4xf32>
    %120 = arith.addf %114, %119 : vector<4x4xf32>
    %c0_80 = arith.constant 0 : index
    %c0_81 = arith.constant 0 : index
    %c2_82 = arith.constant 2 : index
    %c0_83 = arith.constant 0 : index
    %121 = vector.load %arg4[%c0_80, %c0_81, %c2_82, %c0_83] : memref<1x4x6x6xf32, #tpu.memory_space<vmem>>, vector<1x1x4x4xf32>
    %122 = vector.shape_cast %121 : vector<1x1x4x4xf32> to vector<4x4xf32>
    %c20 = arith.constant 20 : index
    %123 = memref.load %arg1[%c20] : memref<25xf32, #tpu.memory_space<smem>>
    %124 = vector.broadcast %123 : f32 to vector<4x4xf32>
    %125 = arith.mulf %124, %122 : vector<4x4xf32>
    %126 = arith.addf %120, %125 : vector<4x4xf32>
    %c0_84 = arith.constant 0 : index
    %c1_85 = arith.constant 1 : index
    %c2_86 = arith.constant 2 : index
    %c0_87 = arith.constant 0 : index
    %127 = vector.load %arg4[%c0_84, %c1_85, %c2_86, %c0_87] : memref<1x4x6x6xf32, #tpu.memory_space<vmem>>, vector<1x1x4x4xf32>
    %128 = vector.shape_cast %127 : vector<1x1x4x4xf32> to vector<4x4xf32>
    %c21 = arith.constant 21 : index
    %129 = memref.load %arg1[%c21] : memref<25xf32, #tpu.memory_space<smem>>
    %130 = vector.broadcast %129 : f32 to vector<4x4xf32>
    %131 = arith.mulf %130, %128 : vector<4x4xf32>
    %132 = arith.addf %126, %131 : vector<4x4xf32>
    %c0_88 = arith.constant 0 : index
    %c0_89 = arith.constant 0 : index
    %c2_90 = arith.constant 2 : index
    %c1_91 = arith.constant 1 : index
    %133 = vector.load %arg4[%c0_88, %c0_89, %c2_90, %c1_91] : memref<1x4x6x6xf32, #tpu.memory_space<vmem>>, vector<1x1x4x4xf32>
    %134 = vector.shape_cast %133 : vector<1x1x4x4xf32> to vector<4x4xf32>
    %c22 = arith.constant 22 : index
    %135 = memref.load %arg1[%c22] : memref<25xf32, #tpu.memory_space<smem>>
    %136 = vector.broadcast %135 : f32 to vector<4x4xf32>
    %137 = arith.mulf %136, %134 : vector<4x4xf32>
    %138 = arith.addf %132, %137 : vector<4x4xf32>
    %c0_92 = arith.constant 0 : index
    %c1_93 = arith.constant 1 : index
    %c2_94 = arith.constant 2 : index
    %c1_95 = arith.constant 1 : index
    %139 = vector.load %arg4[%c0_92, %c1_93, %c2_94, %c1_95] : memref<1x4x6x6xf32, #tpu.memory_space<vmem>>, vector<1x1x4x4xf32>
    %140 = vector.shape_cast %139 : vector<1x1x4x4xf32> to vector<4x4xf32>
    %c23 = arith.constant 23 : index
    %141 = memref.load %arg1[%c23] : memref<25xf32, #tpu.memory_space<smem>>
    %142 = vector.broadcast %141 : f32 to vector<4x4xf32>
    %143 = arith.mulf %142, %140 : vector<4x4xf32>
    %144 = arith.addf %138, %143 : vector<4x4xf32>
    %c0_96 = arith.constant 0 : index
    %c0_97 = arith.constant 0 : index
    %c2_98 = arith.constant 2 : index
    %c2_99 = arith.constant 2 : index
    %145 = vector.load %arg4[%c0_96, %c0_97, %c2_98, %c2_99] : memref<1x4x6x6xf32, #tpu.memory_space<vmem>>, vector<1x1x4x4xf32>
    %146 = vector.shape_cast %145 : vector<1x1x4x4xf32> to vector<4x4xf32>
    %c24 = arith.constant 24 : index
    %147 = memref.load %arg1[%c24] : memref<25xf32, #tpu.memory_space<smem>>
    %148 = vector.broadcast %147 : f32 to vector<4x4xf32>
    %149 = arith.mulf %148, %146 : vector<4x4xf32>
    %150 = arith.addf %144, %149 : vector<4x4xf32>
    %c0_100 = arith.constant 0 : index
    %151 = memref.load %arg2[%c0_100] : memref<1xf32, #tpu.memory_space<smem>>
    %152 = vector.broadcast %151 : f32 to vector<4x4xf32>
    %153 = arith.mulf %150, %152 : vector<4x4xf32>
    %c0_101 = arith.constant 0 : index
    %154 = memref.load %arg3[%c0_101] : memref<1xf32, #tpu.memory_space<smem>>
    %155 = vector.broadcast %154 : f32 to vector<4x4xf32>
    %156 = arith.addf %153, %155 : vector<4x4xf32>
    %cst_102 = arith.constant 0.000000e+00 : f32
    %157 = vector.broadcast %cst_102 : f32 to vector<4x4xf32>
    %158 = arith.maximumf %156, %157 : vector<4x4xf32>
    %c0_103 = arith.constant 0 : index
    %c0_104 = arith.constant 0 : index
    %c0_105 = arith.constant 0 : index
    %c0_106 = arith.constant 0 : index
    %159 = vector.load %arg5[%c0_103, %c0_104, %c0_105, %c0_106] : memref<1x1x4x4xf32, #tpu.memory_space<vmem>>, vector<1x1x4x4xf32>
    %160 = vector.shape_cast %159 : vector<1x1x4x4xf32> to vector<4x4xf32>
    %161 = vector.shape_cast %158 : vector<4x4xf32> to vector<1x1x4x4xf32>
    tpu.vector_store %arg5[%c0_103, %c0_104, %c0_105, %c0_106], %161 {strides = array<i32>} : memref<1x1x4x4xf32, #tpu.memory_space<vmem>>, vector<1x1x4x4xf32>,
    return
  }
  func.func @transform_0(%arg0: i32) -> i32 {
    %c0_i32 = arith.constant 0 : i32
    %c0_i32_0 = arith.constant 0 : i32
    return %c0_i32 : i32
  }
  func.func @transform_1(%arg0: i32) -> i32 {
    %c0_i32 = arith.constant 0 : i32
    %c0_i32_0 = arith.constant 0 : i32
    return %c0_i32 : i32
  }
  func.func @transform_2(%arg0: i32) -> i32 {
    %c0_i32 = arith.constant 0 : i32
    %c0_i32_0 = arith.constant 0 : i32
    return %c0_i32 : i32
  }
  func.func @transform_3(%arg0: i32) -> (i32, i32, i32, i32) {
    %c0_i32 = arith.constant 0 : i32
    %c0_i32_0 = arith.constant 0 : i32
    %c0_i32_1 = arith.constant 0 : i32
    %c0_i32_2 = arith.constant 0 : i32
    return %arg0, %c0_i32, %c0_i32_0, %c0_i32_1 : i32, i32, i32, i32
  }
  func.func @transform_4(%arg0: i32) -> (i32, i32, i32, i32) {
    %c0_i32 = arith.constant 0 : i32
    %c0_i32_0 = arith.constant 0 : i32
    %c0_i32_1 = arith.constant 0 : i32
    %c0_i32_2 = arith.constant 0 : i32
    return %arg0, %c0_i32, %c0_i32_0, %c0_i32_1 : i32, i32, i32, i32
  }
}

module attributes {stable_mosaic.version = 11 : i64} {
  func.func @kernel(%arg0: i32, %arg1: memref<9xf32, #tpu.memory_space<smem>>, %arg2: memref<1xf32, #tpu.memory_space<smem>>, %arg3: memref<1xf32, #tpu.memory_space<smem>>, %arg4: memref<1x4x3x3xf32, #tpu.memory_space<vmem>>, %arg5: memref<1x1x2x2xf32, #tpu.memory_space<vmem>>) attributes {dimension_semantics = [#tpu.dimension_semantics<parallel>], iteration_bounds = array<i64: 2>, scalar_prefetch = 0 : i64, scratch_operands = 0 : i64, tpu.core_type = #tpu.core_type<tc>, window_params = [{transform_indices = @transform_0, window_bounds = array<i64: 9>}, {transform_indices = @transform_1, window_bounds = array<i64: 1>}, {transform_indices = @transform_2, window_bounds = array<i64: 1>}, {transform_indices = @transform_3, window_bounds = array<i64: 1, 4, 3, 3>}, {transform_indices = @transform_4, window_bounds = array<i64: 1, 1, 2, 2>}]} {
    %cst = arith.constant 0.000000e+00 : f32
    %0 = vector.broadcast %cst : f32 to vector<2x2xf32>
    %c0 = arith.constant 0 : index
    %c0_0 = arith.constant 0 : index
    %c0_1 = arith.constant 0 : index
    %c0_2 = arith.constant 0 : index
    %1 = vector.load %arg4[%c0, %c0_0, %c0_1, %c0_2] : memref<1x4x3x3xf32, #tpu.memory_space<vmem>>, vector<1x1x2x2xf32>
    %2 = vector.shape_cast %1 : vector<1x1x2x2xf32> to vector<2x2xf32>
    %c0_3 = arith.constant 0 : index
    %3 = memref.load %arg1[%c0_3] : memref<9xf32, #tpu.memory_space<smem>>
    %4 = vector.broadcast %3 : f32 to vector<2x2xf32>
    %5 = arith.mulf %4, %2 : vector<2x2xf32>
    %6 = arith.addf %0, %5 : vector<2x2xf32>
    %c0_4 = arith.constant 0 : index
    %c1 = arith.constant 1 : index
    %c0_5 = arith.constant 0 : index
    %c0_6 = arith.constant 0 : index
    %7 = vector.load %arg4[%c0_4, %c1, %c0_5, %c0_6] : memref<1x4x3x3xf32, #tpu.memory_space<vmem>>, vector<1x1x2x2xf32>
    %8 = vector.shape_cast %7 : vector<1x1x2x2xf32> to vector<2x2xf32>
    %c1_7 = arith.constant 1 : index
    %9 = memref.load %arg1[%c1_7] : memref<9xf32, #tpu.memory_space<smem>>
    %10 = vector.broadcast %9 : f32 to vector<2x2xf32>
    %11 = arith.mulf %10, %8 : vector<2x2xf32>
    %12 = arith.addf %6, %11 : vector<2x2xf32>
    %c0_8 = arith.constant 0 : index
    %c0_9 = arith.constant 0 : index
    %c0_10 = arith.constant 0 : index
    %c1_11 = arith.constant 1 : index
    %13 = vector.load %arg4[%c0_8, %c0_9, %c0_10, %c1_11] : memref<1x4x3x3xf32, #tpu.memory_space<vmem>>, vector<1x1x2x2xf32>
    %14 = vector.shape_cast %13 : vector<1x1x2x2xf32> to vector<2x2xf32>
    %c2 = arith.constant 2 : index
    %15 = memref.load %arg1[%c2] : memref<9xf32, #tpu.memory_space<smem>>
    %16 = vector.broadcast %15 : f32 to vector<2x2xf32>
    %17 = arith.mulf %16, %14 : vector<2x2xf32>
    %18 = arith.addf %12, %17 : vector<2x2xf32>
    %c0_12 = arith.constant 0 : index
    %c2_13 = arith.constant 2 : index
    %c0_14 = arith.constant 0 : index
    %c0_15 = arith.constant 0 : index
    %19 = vector.load %arg4[%c0_12, %c2_13, %c0_14, %c0_15] : memref<1x4x3x3xf32, #tpu.memory_space<vmem>>, vector<1x1x2x2xf32>
    %20 = vector.shape_cast %19 : vector<1x1x2x2xf32> to vector<2x2xf32>
    %c3 = arith.constant 3 : index
    %21 = memref.load %arg1[%c3] : memref<9xf32, #tpu.memory_space<smem>>
    %22 = vector.broadcast %21 : f32 to vector<2x2xf32>
    %23 = arith.mulf %22, %20 : vector<2x2xf32>
    %24 = arith.addf %18, %23 : vector<2x2xf32>
    %c0_16 = arith.constant 0 : index
    %c3_17 = arith.constant 3 : index
    %c0_18 = arith.constant 0 : index
    %c0_19 = arith.constant 0 : index
    %25 = vector.load %arg4[%c0_16, %c3_17, %c0_18, %c0_19] : memref<1x4x3x3xf32, #tpu.memory_space<vmem>>, vector<1x1x2x2xf32>
    %26 = vector.shape_cast %25 : vector<1x1x2x2xf32> to vector<2x2xf32>
    %c4 = arith.constant 4 : index
    %27 = memref.load %arg1[%c4] : memref<9xf32, #tpu.memory_space<smem>>
    %28 = vector.broadcast %27 : f32 to vector<2x2xf32>
    %29 = arith.mulf %28, %26 : vector<2x2xf32>
    %30 = arith.addf %24, %29 : vector<2x2xf32>
    %c0_20 = arith.constant 0 : index
    %c2_21 = arith.constant 2 : index
    %c0_22 = arith.constant 0 : index
    %c1_23 = arith.constant 1 : index
    %31 = vector.load %arg4[%c0_20, %c2_21, %c0_22, %c1_23] : memref<1x4x3x3xf32, #tpu.memory_space<vmem>>, vector<1x1x2x2xf32>
    %32 = vector.shape_cast %31 : vector<1x1x2x2xf32> to vector<2x2xf32>
    %c5 = arith.constant 5 : index
    %33 = memref.load %arg1[%c5] : memref<9xf32, #tpu.memory_space<smem>>
    %34 = vector.broadcast %33 : f32 to vector<2x2xf32>
    %35 = arith.mulf %34, %32 : vector<2x2xf32>
    %36 = arith.addf %30, %35 : vector<2x2xf32>
    %c0_24 = arith.constant 0 : index
    %c0_25 = arith.constant 0 : index
    %c1_26 = arith.constant 1 : index
    %c0_27 = arith.constant 0 : index
    %37 = vector.load %arg4[%c0_24, %c0_25, %c1_26, %c0_27] : memref<1x4x3x3xf32, #tpu.memory_space<vmem>>, vector<1x1x2x2xf32>
    %38 = vector.shape_cast %37 : vector<1x1x2x2xf32> to vector<2x2xf32>
    %c6 = arith.constant 6 : index
    %39 = memref.load %arg1[%c6] : memref<9xf32, #tpu.memory_space<smem>>
    %40 = vector.broadcast %39 : f32 to vector<2x2xf32>
    %41 = arith.mulf %40, %38 : vector<2x2xf32>
    %42 = arith.addf %36, %41 : vector<2x2xf32>
    %c0_28 = arith.constant 0 : index
    %c1_29 = arith.constant 1 : index
    %c1_30 = arith.constant 1 : index
    %c0_31 = arith.constant 0 : index
    %43 = vector.load %arg4[%c0_28, %c1_29, %c1_30, %c0_31] : memref<1x4x3x3xf32, #tpu.memory_space<vmem>>, vector<1x1x2x2xf32>
    %44 = vector.shape_cast %43 : vector<1x1x2x2xf32> to vector<2x2xf32>
    %c7 = arith.constant 7 : index
    %45 = memref.load %arg1[%c7] : memref<9xf32, #tpu.memory_space<smem>>
    %46 = vector.broadcast %45 : f32 to vector<2x2xf32>
    %47 = arith.mulf %46, %44 : vector<2x2xf32>
    %48 = arith.addf %42, %47 : vector<2x2xf32>
    %c0_32 = arith.constant 0 : index
    %c0_33 = arith.constant 0 : index
    %c1_34 = arith.constant 1 : index
    %c1_35 = arith.constant 1 : index
    %49 = vector.load %arg4[%c0_32, %c0_33, %c1_34, %c1_35] : memref<1x4x3x3xf32, #tpu.memory_space<vmem>>, vector<1x1x2x2xf32>
    %50 = vector.shape_cast %49 : vector<1x1x2x2xf32> to vector<2x2xf32>
    %c8 = arith.constant 8 : index
    %51 = memref.load %arg1[%c8] : memref<9xf32, #tpu.memory_space<smem>>
    %52 = vector.broadcast %51 : f32 to vector<2x2xf32>
    %53 = arith.mulf %52, %50 : vector<2x2xf32>
    %54 = arith.addf %48, %53 : vector<2x2xf32>
    %c0_36 = arith.constant 0 : index
    %55 = memref.load %arg2[%c0_36] : memref<1xf32, #tpu.memory_space<smem>>
    %56 = vector.broadcast %55 : f32 to vector<2x2xf32>
    %57 = arith.mulf %54, %56 : vector<2x2xf32>
    %c0_37 = arith.constant 0 : index
    %58 = memref.load %arg3[%c0_37] : memref<1xf32, #tpu.memory_space<smem>>
    %59 = vector.broadcast %58 : f32 to vector<2x2xf32>
    %60 = arith.addf %57, %59 : vector<2x2xf32>
    %cst_38 = arith.constant 0.000000e+00 : f32
    %61 = vector.broadcast %cst_38 : f32 to vector<2x2xf32>
    %62 = arith.maximumf %60, %61 : vector<2x2xf32>
    %c0_39 = arith.constant 0 : index
    %c0_40 = arith.constant 0 : index
    %c0_41 = arith.constant 0 : index
    %c0_42 = arith.constant 0 : index
    %63 = vector.load %arg5[%c0_39, %c0_40, %c0_41, %c0_42] : memref<1x1x2x2xf32, #tpu.memory_space<vmem>>, vector<1x1x2x2xf32>
    %64 = vector.shape_cast %63 : vector<1x1x2x2xf32> to vector<2x2xf32>
    %65 = vector.shape_cast %62 : vector<2x2xf32> to vector<1x1x2x2xf32>
    tpu.vector_store %arg5[%c0_39, %c0_40, %c0_41, %c0_42], %65 {strides = array<i32>} : memref<1x1x2x2xf32, #tpu.memory_space<vmem>>, vector<1x1x2x2xf32>,
    return
  }
  func.func @transform_0(%arg0: i32) -> i32 {
    %c0_i32 = arith.constant 0 : i32
    %c0_i32_0 = arith.constant 0 : i32
    return %c0_i32 : i32
  }
  func.func @transform_1(%arg0: i32) -> i32 {
    %c0_i32 = arith.constant 0 : i32
    %c0_i32_0 = arith.constant 0 : i32
    return %c0_i32 : i32
  }
  func.func @transform_2(%arg0: i32) -> i32 {
    %c0_i32 = arith.constant 0 : i32
    %c0_i32_0 = arith.constant 0 : i32
    return %c0_i32 : i32
  }
  func.func @transform_3(%arg0: i32) -> (i32, i32, i32, i32) {
    %c0_i32 = arith.constant 0 : i32
    %c0_i32_0 = arith.constant 0 : i32
    %c0_i32_1 = arith.constant 0 : i32
    %c0_i32_2 = arith.constant 0 : i32
    return %arg0, %c0_i32, %c0_i32_0, %c0_i32_1 : i32, i32, i32, i32
  }
  func.func @transform_4(%arg0: i32) -> (i32, i32, i32, i32) {
    %c0_i32 = arith.constant 0 : i32
    %c0_i32_0 = arith.constant 0 : i32
    %c0_i32_1 = arith.constant 0 : i32
    %c0_i32_2 = arith.constant 0 : i32
    return %arg0, %c0_i32, %c0_i32_0, %c0_i32_1 : i32, i32, i32, i32
  }
}

module attributes {stable_mosaic.version = 11 : i64} {
  func.func @kernel(%arg0: i32, %arg1: memref<9xf32, #tpu.memory_space<smem>>, %arg2: memref<1xf32, #tpu.memory_space<smem>>, %arg3: memref<1xf32, #tpu.memory_space<smem>>, %arg4: memref<1x1x4x4xf32, #tpu.memory_space<vmem>>, %arg5: memref<1x1x2x2xf32, #tpu.memory_space<vmem>>) attributes {dimension_semantics = [#tpu.dimension_semantics<parallel>], iteration_bounds = array<i64: 2>, scalar_prefetch = 0 : i64, scratch_operands = 0 : i64, tpu.core_type = #tpu.core_type<tc>, window_params = [{transform_indices = @transform_0, window_bounds = array<i64: 9>}, {transform_indices = @transform_1, window_bounds = array<i64: 1>}, {transform_indices = @transform_2, window_bounds = array<i64: 1>}, {transform_indices = @transform_3, window_bounds = array<i64: 1, 1, 4, 4>}, {transform_indices = @transform_4, window_bounds = array<i64: 1, 1, 2, 2>}]} {
    %cst = arith.constant 0.000000e+00 : f32
    %0 = vector.broadcast %cst : f32 to vector<2x2xf32>
    %c0 = arith.constant 0 : index
    %c0_0 = arith.constant 0 : index
    %c0_1 = arith.constant 0 : index
    %c0_2 = arith.constant 0 : index
    %1 = vector.load %arg4[%c0, %c0_0, %c0_1, %c0_2] : memref<1x1x4x4xf32, #tpu.memory_space<vmem>>, vector<1x1x2x2xf32>
    %2 = vector.shape_cast %1 : vector<1x1x2x2xf32> to vector<2x2xf32>
    %c0_3 = arith.constant 0 : index
    %3 = memref.load %arg1[%c0_3] : memref<9xf32, #tpu.memory_space<smem>>
    %4 = vector.broadcast %3 : f32 to vector<2x2xf32>
    %5 = arith.mulf %4, %2 : vector<2x2xf32>
    %6 = arith.addf %0, %5 : vector<2x2xf32>
    %c0_4 = arith.constant 0 : index
    %c0_5 = arith.constant 0 : index
    %c0_6 = arith.constant 0 : index
    %c1 = arith.constant 1 : index
    %7 = vector.load %arg4[%c0_4, %c0_5, %c0_6, %c1] : memref<1x1x4x4xf32, #tpu.memory_space<vmem>>, vector<1x1x2x2xf32>
    %8 = vector.shape_cast %7 : vector<1x1x2x2xf32> to vector<2x2xf32>
    %c1_7 = arith.constant 1 : index
    %9 = memref.load %arg1[%c1_7] : memref<9xf32, #tpu.memory_space<smem>>
    %10 = vector.broadcast %9 : f32 to vector<2x2xf32>
    %11 = arith.mulf %10, %8 : vector<2x2xf32>
    %12 = arith.addf %6, %11 : vector<2x2xf32>
    %c0_8 = arith.constant 0 : index
    %c0_9 = arith.constant 0 : index
    %c0_10 = arith.constant 0 : index
    %c2 = arith.constant 2 : index
    %13 = vector.load %arg4[%c0_8, %c0_9, %c0_10, %c2] : memref<1x1x4x4xf32, #tpu.memory_space<vmem>>, vector<1x1x2x2xf32>
    %14 = vector.shape_cast %13 : vector<1x1x2x2xf32> to vector<2x2xf32>
    %c2_11 = arith.constant 2 : index
    %15 = memref.load %arg1[%c2_11] : memref<9xf32, #tpu.memory_space<smem>>
    %16 = vector.broadcast %15 : f32 to vector<2x2xf32>
    %17 = arith.mulf %16, %14 : vector<2x2xf32>
    %18 = arith.addf %12, %17 : vector<2x2xf32>
    %c0_12 = arith.constant 0 : index
    %c0_13 = arith.constant 0 : index
    %c1_14 = arith.constant 1 : index
    %c0_15 = arith.constant 0 : index
    %19 = vector.load %arg4[%c0_12, %c0_13, %c1_14, %c0_15] : memref<1x1x4x4xf32, #tpu.memory_space<vmem>>, vector<1x1x2x2xf32>
    %20 = vector.shape_cast %19 : vector<1x1x2x2xf32> to vector<2x2xf32>
    %c3 = arith.constant 3 : index
    %21 = memref.load %arg1[%c3] : memref<9xf32, #tpu.memory_space<smem>>
    %22 = vector.broadcast %21 : f32 to vector<2x2xf32>
    %23 = arith.mulf %22, %20 : vector<2x2xf32>
    %24 = arith.addf %18, %23 : vector<2x2xf32>
    %c0_16 = arith.constant 0 : index
    %c0_17 = arith.constant 0 : index
    %c1_18 = arith.constant 1 : index
    %c1_19 = arith.constant 1 : index
    %25 = vector.load %arg4[%c0_16, %c0_17, %c1_18, %c1_19] : memref<1x1x4x4xf32, #tpu.memory_space<vmem>>, vector<1x1x2x2xf32>
    %26 = vector.shape_cast %25 : vector<1x1x2x2xf32> to vector<2x2xf32>
    %c4 = arith.constant 4 : index
    %27 = memref.load %arg1[%c4] : memref<9xf32, #tpu.memory_space<smem>>
    %28 = vector.broadcast %27 : f32 to vector<2x2xf32>
    %29 = arith.mulf %28, %26 : vector<2x2xf32>
    %30 = arith.addf %24, %29 : vector<2x2xf32>
    %c0_20 = arith.constant 0 : index
    %c0_21 = arith.constant 0 : index
    %c1_22 = arith.constant 1 : index
    %c2_23 = arith.constant 2 : index
    %31 = vector.load %arg4[%c0_20, %c0_21, %c1_22, %c2_23] : memref<1x1x4x4xf32, #tpu.memory_space<vmem>>, vector<1x1x2x2xf32>
    %32 = vector.shape_cast %31 : vector<1x1x2x2xf32> to vector<2x2xf32>
    %c5 = arith.constant 5 : index
    %33 = memref.load %arg1[%c5] : memref<9xf32, #tpu.memory_space<smem>>
    %34 = vector.broadcast %33 : f32 to vector<2x2xf32>
    %35 = arith.mulf %34, %32 : vector<2x2xf32>
    %36 = arith.addf %30, %35 : vector<2x2xf32>
    %c0_24 = arith.constant 0 : index
    %c0_25 = arith.constant 0 : index
    %c2_26 = arith.constant 2 : index
    %c0_27 = arith.constant 0 : index
    %37 = vector.load %arg4[%c0_24, %c0_25, %c2_26, %c0_27] : memref<1x1x4x4xf32, #tpu.memory_space<vmem>>, vector<1x1x2x2xf32>
    %38 = vector.shape_cast %37 : vector<1x1x2x2xf32> to vector<2x2xf32>
    %c6 = arith.constant 6 : index
    %39 = memref.load %arg1[%c6] : memref<9xf32, #tpu.memory_space<smem>>
    %40 = vector.broadcast %39 : f32 to vector<2x2xf32>
    %41 = arith.mulf %40, %38 : vector<2x2xf32>
    %42 = arith.addf %36, %41 : vector<2x2xf32>
    %c0_28 = arith.constant 0 : index
    %c0_29 = arith.constant 0 : index
    %c2_30 = arith.constant 2 : index
    %c1_31 = arith.constant 1 : index
    %43 = vector.load %arg4[%c0_28, %c0_29, %c2_30, %c1_31] : memref<1x1x4x4xf32, #tpu.memory_space<vmem>>, vector<1x1x2x2xf32>
    %44 = vector.shape_cast %43 : vector<1x1x2x2xf32> to vector<2x2xf32>
    %c7 = arith.constant 7 : index
    %45 = memref.load %arg1[%c7] : memref<9xf32, #tpu.memory_space<smem>>
    %46 = vector.broadcast %45 : f32 to vector<2x2xf32>
    %47 = arith.mulf %46, %44 : vector<2x2xf32>
    %48 = arith.addf %42, %47 : vector<2x2xf32>
    %c0_32 = arith.constant 0 : index
    %c0_33 = arith.constant 0 : index
    %c2_34 = arith.constant 2 : index
    %c2_35 = arith.constant 2 : index
    %49 = vector.load %arg4[%c0_32, %c0_33, %c2_34, %c2_35] : memref<1x1x4x4xf32, #tpu.memory_space<vmem>>, vector<1x1x2x2xf32>
    %50 = vector.shape_cast %49 : vector<1x1x2x2xf32> to vector<2x2xf32>
    %c8 = arith.constant 8 : index
    %51 = memref.load %arg1[%c8] : memref<9xf32, #tpu.memory_space<smem>>
    %52 = vector.broadcast %51 : f32 to vector<2x2xf32>
    %53 = arith.mulf %52, %50 : vector<2x2xf32>
    %54 = arith.addf %48, %53 : vector<2x2xf32>
    %c0_36 = arith.constant 0 : index
    %55 = memref.load %arg2[%c0_36] : memref<1xf32, #tpu.memory_space<smem>>
    %56 = vector.broadcast %55 : f32 to vector<2x2xf32>
    %57 = arith.mulf %54, %56 : vector<2x2xf32>
    %c0_37 = arith.constant 0 : index
    %58 = memref.load %arg3[%c0_37] : memref<1xf32, #tpu.memory_space<smem>>
    %59 = vector.broadcast %58 : f32 to vector<2x2xf32>
    %60 = arith.addf %57, %59 : vector<2x2xf32>
    %cst_38 = arith.constant 0.000000e+00 : f32
    %61 = vector.broadcast %cst_38 : f32 to vector<2x2xf32>
    %62 = arith.maximumf %60, %61 : vector<2x2xf32>
    %c0_39 = arith.constant 0 : index
    %c0_40 = arith.constant 0 : index
    %c0_41 = arith.constant 0 : index
    %c0_42 = arith.constant 0 : index
    %63 = vector.load %arg5[%c0_39, %c0_40, %c0_41, %c0_42] : memref<1x1x2x2xf32, #tpu.memory_space<vmem>>, vector<1x1x2x2xf32>
    %64 = vector.shape_cast %63 : vector<1x1x2x2xf32> to vector<2x2xf32>
    %65 = vector.shape_cast %62 : vector<2x2xf32> to vector<1x1x2x2xf32>
    tpu.vector_store %arg5[%c0_39, %c0_40, %c0_41, %c0_42], %65 {strides = array<i32>} : memref<1x1x2x2xf32, #tpu.memory_space<vmem>>, vector<1x1x2x2xf32>,
    return
  }
  func.func @transform_0(%arg0: i32) -> i32 {
    %c0_i32 = arith.constant 0 : i32
    %c0_i32_0 = arith.constant 0 : i32
    return %c0_i32 : i32
  }
  func.func @transform_1(%arg0: i32) -> i32 {
    %c0_i32 = arith.constant 0 : i32
    %c0_i32_0 = arith.constant 0 : i32
    return %c0_i32 : i32
  }
  func.func @transform_2(%arg0: i32) -> i32 {
    %c0_i32 = arith.constant 0 : i32
    %c0_i32_0 = arith.constant 0 : i32
    return %c0_i32 : i32
  }
  func.func @transform_3(%arg0: i32) -> (i32, i32, i32, i32) {
    %c0_i32 = arith.constant 0 : i32
    %c0_i32_0 = arith.constant 0 : i32
    %c0_i32_1 = arith.constant 0 : i32
    %c0_i32_2 = arith.constant 0 : i32
    return %arg0, %c0_i32, %c0_i32_0, %c0_i32_1 : i32, i32, i32, i32
  }
  func.func @transform_4(%arg0: i32) -> (i32, i32, i32, i32) {
    %c0_i32 = arith.constant 0 : i32
    %c0_i32_0 = arith.constant 0 : i32
    %c0_i32_1 = arith.constant 0 : i32
    %c0_i32_2 = arith.constant 0 : i32
    return %arg0, %c0_i32, %c0_i32_0, %c0_i32_1 : i32, i32, i32, i32
  }
}

module attributes {stable_mosaic.version = 11 : i64} {
  func.func @kernel(%arg0: i32, %arg1: memref<25xf32, #tpu.memory_space<smem>>, %arg2: memref<1xf32, #tpu.memory_space<smem>>, %arg3: memref<1xf32, #tpu.memory_space<smem>>, %arg4: memref<1x1x8x8xf32, #tpu.memory_space<vmem>>, %arg5: memref<1x1x4x4xf32, #tpu.memory_space<vmem>>) attributes {dimension_semantics = [#tpu.dimension_semantics<parallel>], iteration_bounds = array<i64: 2>, scalar_prefetch = 0 : i64, scratch_operands = 0 : i64, tpu.core_type = #tpu.core_type<tc>, window_params = [{transform_indices = @transform_0, window_bounds = array<i64: 25>}, {transform_indices = @transform_1, window_bounds = array<i64: 1>}, {transform_indices = @transform_2, window_bounds = array<i64: 1>}, {transform_indices = @transform_3, window_bounds = array<i64: 1, 1, 8, 8>}, {transform_indices = @transform_4, window_bounds = array<i64: 1, 1, 4, 4>}]} {
    %cst = arith.constant 0.000000e+00 : f32
    %0 = vector.broadcast %cst : f32 to vector<4x4xf32>
    %c0 = arith.constant 0 : index
    %c0_0 = arith.constant 0 : index
    %c0_1 = arith.constant 0 : index
    %c0_2 = arith.constant 0 : index
    %1 = vector.load %arg4[%c0, %c0_0, %c0_1, %c0_2] : memref<1x1x8x8xf32, #tpu.memory_space<vmem>>, vector<1x1x4x4xf32>
    %2 = vector.shape_cast %1 : vector<1x1x4x4xf32> to vector<4x4xf32>
    %c0_3 = arith.constant 0 : index
    %3 = memref.load %arg1[%c0_3] : memref<25xf32, #tpu.memory_space<smem>>
    %4 = vector.broadcast %3 : f32 to vector<4x4xf32>
    %5 = arith.mulf %4, %2 : vector<4x4xf32>
    %6 = arith.addf %0, %5 : vector<4x4xf32>
    %c0_4 = arith.constant 0 : index
    %c0_5 = arith.constant 0 : index
    %c0_6 = arith.constant 0 : index
    %c1 = arith.constant 1 : index
    %7 = vector.load %arg4[%c0_4, %c0_5, %c0_6, %c1] : memref<1x1x8x8xf32, #tpu.memory_space<vmem>>, vector<1x1x4x4xf32>
    %8 = vector.shape_cast %7 : vector<1x1x4x4xf32> to vector<4x4xf32>
    %c1_7 = arith.constant 1 : index
    %9 = memref.load %arg1[%c1_7] : memref<25xf32, #tpu.memory_space<smem>>
    %10 = vector.broadcast %9 : f32 to vector<4x4xf32>
    %11 = arith.mulf %10, %8 : vector<4x4xf32>
    %12 = arith.addf %6, %11 : vector<4x4xf32>
    %c0_8 = arith.constant 0 : index
    %c0_9 = arith.constant 0 : index
    %c0_10 = arith.constant 0 : index
    %c2 = arith.constant 2 : index
    %13 = vector.load %arg4[%c0_8, %c0_9, %c0_10, %c2] : memref<1x1x8x8xf32, #tpu.memory_space<vmem>>, vector<1x1x4x4xf32>
    %14 = vector.shape_cast %13 : vector<1x1x4x4xf32> to vector<4x4xf32>
    %c2_11 = arith.constant 2 : index
    %15 = memref.load %arg1[%c2_11] : memref<25xf32, #tpu.memory_space<smem>>
    %16 = vector.broadcast %15 : f32 to vector<4x4xf32>
    %17 = arith.mulf %16, %14 : vector<4x4xf32>
    %18 = arith.addf %12, %17 : vector<4x4xf32>
    %c0_12 = arith.constant 0 : index
    %c0_13 = arith.constant 0 : index
    %c0_14 = arith.constant 0 : index
    %c3 = arith.constant 3 : index
    %19 = vector.load %arg4[%c0_12, %c0_13, %c0_14, %c3] : memref<1x1x8x8xf32, #tpu.memory_space<vmem>>, vector<1x1x4x4xf32>
    %20 = vector.shape_cast %19 : vector<1x1x4x4xf32> to vector<4x4xf32>
    %c3_15 = arith.constant 3 : index
    %21 = memref.load %arg1[%c3_15] : memref<25xf32, #tpu.memory_space<smem>>
    %22 = vector.broadcast %21 : f32 to vector<4x4xf32>
    %23 = arith.mulf %22, %20 : vector<4x4xf32>
    %24 = arith.addf %18, %23 : vector<4x4xf32>
    %c0_16 = arith.constant 0 : index
    %c0_17 = arith.constant 0 : index
    %c0_18 = arith.constant 0 : index
    %c4 = arith.constant 4 : index
    %25 = vector.load %arg4[%c0_16, %c0_17, %c0_18, %c4] : memref<1x1x8x8xf32, #tpu.memory_space<vmem>>, vector<1x1x4x4xf32>
    %26 = vector.shape_cast %25 : vector<1x1x4x4xf32> to vector<4x4xf32>
    %c4_19 = arith.constant 4 : index
    %27 = memref.load %arg1[%c4_19] : memref<25xf32, #tpu.memory_space<smem>>
    %28 = vector.broadcast %27 : f32 to vector<4x4xf32>
    %29 = arith.mulf %28, %26 : vector<4x4xf32>
    %30 = arith.addf %24, %29 : vector<4x4xf32>
    %c0_20 = arith.constant 0 : index
    %c0_21 = arith.constant 0 : index
    %c1_22 = arith.constant 1 : index
    %c0_23 = arith.constant 0 : index
    %31 = vector.load %arg4[%c0_20, %c0_21, %c1_22, %c0_23] : memref<1x1x8x8xf32, #tpu.memory_space<vmem>>, vector<1x1x4x4xf32>
    %32 = vector.shape_cast %31 : vector<1x1x4x4xf32> to vector<4x4xf32>
    %c5 = arith.constant 5 : index
    %33 = memref.load %arg1[%c5] : memref<25xf32, #tpu.memory_space<smem>>
    %34 = vector.broadcast %33 : f32 to vector<4x4xf32>
    %35 = arith.mulf %34, %32 : vector<4x4xf32>
    %36 = arith.addf %30, %35 : vector<4x4xf32>
    %c0_24 = arith.constant 0 : index
    %c0_25 = arith.constant 0 : index
    %c1_26 = arith.constant 1 : index
    %c1_27 = arith.constant 1 : index
    %37 = vector.load %arg4[%c0_24, %c0_25, %c1_26, %c1_27] : memref<1x1x8x8xf32, #tpu.memory_space<vmem>>, vector<1x1x4x4xf32>
    %38 = vector.shape_cast %37 : vector<1x1x4x4xf32> to vector<4x4xf32>
    %c6 = arith.constant 6 : index
    %39 = memref.load %arg1[%c6] : memref<25xf32, #tpu.memory_space<smem>>
    %40 = vector.broadcast %39 : f32 to vector<4x4xf32>
    %41 = arith.mulf %40, %38 : vector<4x4xf32>
    %42 = arith.addf %36, %41 : vector<4x4xf32>
    %c0_28 = arith.constant 0 : index
    %c0_29 = arith.constant 0 : index
    %c1_30 = arith.constant 1 : index
    %c2_31 = arith.constant 2 : index
    %43 = vector.load %arg4[%c0_28, %c0_29, %c1_30, %c2_31] : memref<1x1x8x8xf32, #tpu.memory_space<vmem>>, vector<1x1x4x4xf32>
    %44 = vector.shape_cast %43 : vector<1x1x4x4xf32> to vector<4x4xf32>
    %c7 = arith.constant 7 : index
    %45 = memref.load %arg1[%c7] : memref<25xf32, #tpu.memory_space<smem>>
    %46 = vector.broadcast %45 : f32 to vector<4x4xf32>
    %47 = arith.mulf %46, %44 : vector<4x4xf32>
    %48 = arith.addf %42, %47 : vector<4x4xf32>
    %c0_32 = arith.constant 0 : index
    %c0_33 = arith.constant 0 : index
    %c1_34 = arith.constant 1 : index
    %c3_35 = arith.constant 3 : index
    %49 = vector.load %arg4[%c0_32, %c0_33, %c1_34, %c3_35] : memref<1x1x8x8xf32, #tpu.memory_space<vmem>>, vector<1x1x4x4xf32>
    %50 = vector.shape_cast %49 : vector<1x1x4x4xf32> to vector<4x4xf32>
    %c8 = arith.constant 8 : index
    %51 = memref.load %arg1[%c8] : memref<25xf32, #tpu.memory_space<smem>>
    %52 = vector.broadcast %51 : f32 to vector<4x4xf32>
    %53 = arith.mulf %52, %50 : vector<4x4xf32>
    %54 = arith.addf %48, %53 : vector<4x4xf32>
    %c0_36 = arith.constant 0 : index
    %c0_37 = arith.constant 0 : index
    %c1_38 = arith.constant 1 : index
    %c4_39 = arith.constant 4 : index
    %55 = vector.load %arg4[%c0_36, %c0_37, %c1_38, %c4_39] : memref<1x1x8x8xf32, #tpu.memory_space<vmem>>, vector<1x1x4x4xf32>
    %56 = vector.shape_cast %55 : vector<1x1x4x4xf32> to vector<4x4xf32>
    %c9 = arith.constant 9 : index
    %57 = memref.load %arg1[%c9] : memref<25xf32, #tpu.memory_space<smem>>
    %58 = vector.broadcast %57 : f32 to vector<4x4xf32>
    %59 = arith.mulf %58, %56 : vector<4x4xf32>
    %60 = arith.addf %54, %59 : vector<4x4xf32>
    %c0_40 = arith.constant 0 : index
    %c0_41 = arith.constant 0 : index
    %c2_42 = arith.constant 2 : index
    %c0_43 = arith.constant 0 : index
    %61 = vector.load %arg4[%c0_40, %c0_41, %c2_42, %c0_43] : memref<1x1x8x8xf32, #tpu.memory_space<vmem>>, vector<1x1x4x4xf32>
    %62 = vector.shape_cast %61 : vector<1x1x4x4xf32> to vector<4x4xf32>
    %c10 = arith.constant 10 : index
    %63 = memref.load %arg1[%c10] : memref<25xf32, #tpu.memory_space<smem>>
    %64 = vector.broadcast %63 : f32 to vector<4x4xf32>
    %65 = arith.mulf %64, %62 : vector<4x4xf32>
    %66 = arith.addf %60, %65 : vector<4x4xf32>
    %c0_44 = arith.constant 0 : index
    %c0_45 = arith.constant 0 : index
    %c2_46 = arith.constant 2 : index
    %c1_47 = arith.constant 1 : index
    %67 = vector.load %arg4[%c0_44, %c0_45, %c2_46, %c1_47] : memref<1x1x8x8xf32, #tpu.memory_space<vmem>>, vector<1x1x4x4xf32>
    %68 = vector.shape_cast %67 : vector<1x1x4x4xf32> to vector<4x4xf32>
    %c11 = arith.constant 11 : index
    %69 = memref.load %arg1[%c11] : memref<25xf32, #tpu.memory_space<smem>>
    %70 = vector.broadcast %69 : f32 to vector<4x4xf32>
    %71 = arith.mulf %70, %68 : vector<4x4xf32>
    %72 = arith.addf %66, %71 : vector<4x4xf32>
    %c0_48 = arith.constant 0 : index
    %c0_49 = arith.constant 0 : index
    %c2_50 = arith.constant 2 : index
    %c2_51 = arith.constant 2 : index
    %73 = vector.load %arg4[%c0_48, %c0_49, %c2_50, %c2_51] : memref<1x1x8x8xf32, #tpu.memory_space<vmem>>, vector<1x1x4x4xf32>
    %74 = vector.shape_cast %73 : vector<1x1x4x4xf32> to vector<4x4xf32>
    %c12 = arith.constant 12 : index
    %75 = memref.load %arg1[%c12] : memref<25xf32, #tpu.memory_space<smem>>
    %76 = vector.broadcast %75 : f32 to vector<4x4xf32>
    %77 = arith.mulf %76, %74 : vector<4x4xf32>
    %78 = arith.addf %72, %77 : vector<4x4xf32>
    %c0_52 = arith.constant 0 : index
    %c0_53 = arith.constant 0 : index
    %c2_54 = arith.constant 2 : index
    %c3_55 = arith.constant 3 : index
    %79 = vector.load %arg4[%c0_52, %c0_53, %c2_54, %c3_55] : memref<1x1x8x8xf32, #tpu.memory_space<vmem>>, vector<1x1x4x4xf32>
    %80 = vector.shape_cast %79 : vector<1x1x4x4xf32> to vector<4x4xf32>
    %c13 = arith.constant 13 : index
    %81 = memref.load %arg1[%c13] : memref<25xf32, #tpu.memory_space<smem>>
    %82 = vector.broadcast %81 : f32 to vector<4x4xf32>
    %83 = arith.mulf %82, %80 : vector<4x4xf32>
    %84 = arith.addf %78, %83 : vector<4x4xf32>
    %c0_56 = arith.constant 0 : index
    %c0_57 = arith.constant 0 : index
    %c2_58 = arith.constant 2 : index
    %c4_59 = arith.constant 4 : index
    %85 = vector.load %arg4[%c0_56, %c0_57, %c2_58, %c4_59] : memref<1x1x8x8xf32, #tpu.memory_space<vmem>>, vector<1x1x4x4xf32>
    %86 = vector.shape_cast %85 : vector<1x1x4x4xf32> to vector<4x4xf32>
    %c14 = arith.constant 14 : index
    %87 = memref.load %arg1[%c14] : memref<25xf32, #tpu.memory_space<smem>>
    %88 = vector.broadcast %87 : f32 to vector<4x4xf32>
    %89 = arith.mulf %88, %86 : vector<4x4xf32>
    %90 = arith.addf %84, %89 : vector<4x4xf32>
    %c0_60 = arith.constant 0 : index
    %c0_61 = arith.constant 0 : index
    %c3_62 = arith.constant 3 : index
    %c0_63 = arith.constant 0 : index
    %91 = vector.load %arg4[%c0_60, %c0_61, %c3_62, %c0_63] : memref<1x1x8x8xf32, #tpu.memory_space<vmem>>, vector<1x1x4x4xf32>
    %92 = vector.shape_cast %91 : vector<1x1x4x4xf32> to vector<4x4xf32>
    %c15 = arith.constant 15 : index
    %93 = memref.load %arg1[%c15] : memref<25xf32, #tpu.memory_space<smem>>
    %94 = vector.broadcast %93 : f32 to vector<4x4xf32>
    %95 = arith.mulf %94, %92 : vector<4x4xf32>
    %96 = arith.addf %90, %95 : vector<4x4xf32>
    %c0_64 = arith.constant 0 : index
    %c0_65 = arith.constant 0 : index
    %c3_66 = arith.constant 3 : index
    %c1_67 = arith.constant 1 : index
    %97 = vector.load %arg4[%c0_64, %c0_65, %c3_66, %c1_67] : memref<1x1x8x8xf32, #tpu.memory_space<vmem>>, vector<1x1x4x4xf32>
    %98 = vector.shape_cast %97 : vector<1x1x4x4xf32> to vector<4x4xf32>
    %c16 = arith.constant 16 : index
    %99 = memref.load %arg1[%c16] : memref<25xf32, #tpu.memory_space<smem>>
    %100 = vector.broadcast %99 : f32 to vector<4x4xf32>
    %101 = arith.mulf %100, %98 : vector<4x4xf32>
    %102 = arith.addf %96, %101 : vector<4x4xf32>
    %c0_68 = arith.constant 0 : index
    %c0_69 = arith.constant 0 : index
    %c3_70 = arith.constant 3 : index
    %c2_71 = arith.constant 2 : index
    %103 = vector.load %arg4[%c0_68, %c0_69, %c3_70, %c2_71] : memref<1x1x8x8xf32, #tpu.memory_space<vmem>>, vector<1x1x4x4xf32>
    %104 = vector.shape_cast %103 : vector<1x1x4x4xf32> to vector<4x4xf32>
    %c17 = arith.constant 17 : index
    %105 = memref.load %arg1[%c17] : memref<25xf32, #tpu.memory_space<smem>>
    %106 = vector.broadcast %105 : f32 to vector<4x4xf32>
    %107 = arith.mulf %106, %104 : vector<4x4xf32>
    %108 = arith.addf %102, %107 : vector<4x4xf32>
    %c0_72 = arith.constant 0 : index
    %c0_73 = arith.constant 0 : index
    %c3_74 = arith.constant 3 : index
    %c3_75 = arith.constant 3 : index
    %109 = vector.load %arg4[%c0_72, %c0_73, %c3_74, %c3_75] : memref<1x1x8x8xf32, #tpu.memory_space<vmem>>, vector<1x1x4x4xf32>
    %110 = vector.shape_cast %109 : vector<1x1x4x4xf32> to vector<4x4xf32>
    %c18 = arith.constant 18 : index
    %111 = memref.load %arg1[%c18] : memref<25xf32, #tpu.memory_space<smem>>
    %112 = vector.broadcast %111 : f32 to vector<4x4xf32>
    %113 = arith.mulf %112, %110 : vector<4x4xf32>
    %114 = arith.addf %108, %113 : vector<4x4xf32>
    %c0_76 = arith.constant 0 : index
    %c0_77 = arith.constant 0 : index
    %c3_78 = arith.constant 3 : index
    %c4_79 = arith.constant 4 : index
    %115 = vector.load %arg4[%c0_76, %c0_77, %c3_78, %c4_79] : memref<1x1x8x8xf32, #tpu.memory_space<vmem>>, vector<1x1x4x4xf32>
    %116 = vector.shape_cast %115 : vector<1x1x4x4xf32> to vector<4x4xf32>
    %c19 = arith.constant 19 : index
    %117 = memref.load %arg1[%c19] : memref<25xf32, #tpu.memory_space<smem>>
    %118 = vector.broadcast %117 : f32 to vector<4x4xf32>
    %119 = arith.mulf %118, %116 : vector<4x4xf32>
    %120 = arith.addf %114, %119 : vector<4x4xf32>
    %c0_80 = arith.constant 0 : index
    %c0_81 = arith.constant 0 : index
    %c4_82 = arith.constant 4 : index
    %c0_83 = arith.constant 0 : index
    %121 = vector.load %arg4[%c0_80, %c0_81, %c4_82, %c0_83] : memref<1x1x8x8xf32, #tpu.memory_space<vmem>>, vector<1x1x4x4xf32>
    %122 = vector.shape_cast %121 : vector<1x1x4x4xf32> to vector<4x4xf32>
    %c20 = arith.constant 20 : index
    %123 = memref.load %arg1[%c20] : memref<25xf32, #tpu.memory_space<smem>>
    %124 = vector.broadcast %123 : f32 to vector<4x4xf32>
    %125 = arith.mulf %124, %122 : vector<4x4xf32>
    %126 = arith.addf %120, %125 : vector<4x4xf32>
    %c0_84 = arith.constant 0 : index
    %c0_85 = arith.constant 0 : index
    %c4_86 = arith.constant 4 : index
    %c1_87 = arith.constant 1 : index
    %127 = vector.load %arg4[%c0_84, %c0_85, %c4_86, %c1_87] : memref<1x1x8x8xf32, #tpu.memory_space<vmem>>, vector<1x1x4x4xf32>
    %128 = vector.shape_cast %127 : vector<1x1x4x4xf32> to vector<4x4xf32>
    %c21 = arith.constant 21 : index
    %129 = memref.load %arg1[%c21] : memref<25xf32, #tpu.memory_space<smem>>
    %130 = vector.broadcast %129 : f32 to vector<4x4xf32>
    %131 = arith.mulf %130, %128 : vector<4x4xf32>
    %132 = arith.addf %126, %131 : vector<4x4xf32>
    %c0_88 = arith.constant 0 : index
    %c0_89 = arith.constant 0 : index
    %c4_90 = arith.constant 4 : index
    %c2_91 = arith.constant 2 : index
    %133 = vector.load %arg4[%c0_88, %c0_89, %c4_90, %c2_91] : memref<1x1x8x8xf32, #tpu.memory_space<vmem>>, vector<1x1x4x4xf32>
    %134 = vector.shape_cast %133 : vector<1x1x4x4xf32> to vector<4x4xf32>
    %c22 = arith.constant 22 : index
    %135 = memref.load %arg1[%c22] : memref<25xf32, #tpu.memory_space<smem>>
    %136 = vector.broadcast %135 : f32 to vector<4x4xf32>
    %137 = arith.mulf %136, %134 : vector<4x4xf32>
    %138 = arith.addf %132, %137 : vector<4x4xf32>
    %c0_92 = arith.constant 0 : index
    %c0_93 = arith.constant 0 : index
    %c4_94 = arith.constant 4 : index
    %c3_95 = arith.constant 3 : index
    %139 = vector.load %arg4[%c0_92, %c0_93, %c4_94, %c3_95] : memref<1x1x8x8xf32, #tpu.memory_space<vmem>>, vector<1x1x4x4xf32>
    %140 = vector.shape_cast %139 : vector<1x1x4x4xf32> to vector<4x4xf32>
    %c23 = arith.constant 23 : index
    %141 = memref.load %arg1[%c23] : memref<25xf32, #tpu.memory_space<smem>>
    %142 = vector.broadcast %141 : f32 to vector<4x4xf32>
    %143 = arith.mulf %142, %140 : vector<4x4xf32>
    %144 = arith.addf %138, %143 : vector<4x4xf32>
    %c0_96 = arith.constant 0 : index
    %c0_97 = arith.constant 0 : index
    %c4_98 = arith.constant 4 : index
    %c4_99 = arith.constant 4 : index
    %145 = vector.load %arg4[%c0_96, %c0_97, %c4_98, %c4_99] : memref<1x1x8x8xf32, #tpu.memory_space<vmem>>, vector<1x1x4x4xf32>
    %146 = vector.shape_cast %145 : vector<1x1x4x4xf32> to vector<4x4xf32>
    %c24 = arith.constant 24 : index
    %147 = memref.load %arg1[%c24] : memref<25xf32, #tpu.memory_space<smem>>
    %148 = vector.broadcast %147 : f32 to vector<4x4xf32>
    %149 = arith.mulf %148, %146 : vector<4x4xf32>
    %150 = arith.addf %144, %149 : vector<4x4xf32>
    %c0_100 = arith.constant 0 : index
    %151 = memref.load %arg2[%c0_100] : memref<1xf32, #tpu.memory_space<smem>>
    %152 = vector.broadcast %151 : f32 to vector<4x4xf32>
    %153 = arith.mulf %150, %152 : vector<4x4xf32>
    %c0_101 = arith.constant 0 : index
    %154 = memref.load %arg3[%c0_101] : memref<1xf32, #tpu.memory_space<smem>>
    %155 = vector.broadcast %154 : f32 to vector<4x4xf32>
    %156 = arith.addf %153, %155 : vector<4x4xf32>
    %cst_102 = arith.constant 0.000000e+00 : f32
    %157 = vector.broadcast %cst_102 : f32 to vector<4x4xf32>
    %158 = arith.maximumf %156, %157 : vector<4x4xf32>
    %c0_103 = arith.constant 0 : index
    %c0_104 = arith.constant 0 : index
    %c0_105 = arith.constant 0 : index
    %c0_106 = arith.constant 0 : index
    %159 = vector.load %arg5[%c0_103, %c0_104, %c0_105, %c0_106] : memref<1x1x4x4xf32, #tpu.memory_space<vmem>>, vector<1x1x4x4xf32>
    %160 = vector.shape_cast %159 : vector<1x1x4x4xf32> to vector<4x4xf32>
    %161 = vector.shape_cast %158 : vector<4x4xf32> to vector<1x1x4x4xf32>
    tpu.vector_store %arg5[%c0_103, %c0_104, %c0_105, %c0_106], %161 {strides = array<i32>} : memref<1x1x4x4xf32, #tpu.memory_space<vmem>>, vector<1x1x4x4xf32>,
    return
  }
  func.func @transform_0(%arg0: i32) -> i32 {
    %c0_i32 = arith.constant 0 : i32
    %c0_i32_0 = arith.constant 0 : i32
    return %c0_i32 : i32
  }
  func.func @transform_1(%arg0: i32) -> i32 {
    %c0_i32 = arith.constant 0 : i32
    %c0_i32_0 = arith.constant 0 : i32
    return %c0_i32 : i32
  }
  func.func @transform_2(%arg0: i32) -> i32 {
    %c0_i32 = arith.constant 0 : i32
    %c0_i32_0 = arith.constant 0 : i32
    return %c0_i32 : i32
  }
  func.func @transform_3(%arg0: i32) -> (i32, i32, i32, i32) {
    %c0_i32 = arith.constant 0 : i32
    %c0_i32_0 = arith.constant 0 : i32
    %c0_i32_1 = arith.constant 0 : i32
    %c0_i32_2 = arith.constant 0 : i32
    return %arg0, %c0_i32, %c0_i32_0, %c0_i32_1 : i32, i32, i32, i32
  }
  func.func @transform_4(%arg0: i32) -> (i32, i32, i32, i32) {
    %c0_i32 = arith.constant 0 : i32
    %c0_i32_0 = arith.constant 0 : i32
    %c0_i32_1 = arith.constant 0 : i32
    %c0_i32_2 = arith.constant 0 : i32
    return %arg0, %c0_i32, %c0_i32_0, %c0_i32_1 : i32, i32, i32, i32
  }
}

module attributes {stable_mosaic.version = 11 : i64} {
  func.func @kernel(%arg0: i32, %arg1: memref<49xf32, #tpu.memory_space<smem>>, %arg2: memref<1xf32, #tpu.memory_space<smem>>, %arg3: memref<1xf32, #tpu.memory_space<smem>>, %arg4: memref<1x1x14x14xf32, #tpu.memory_space<vmem>>, %arg5: memref<1x1x8x8xf32, #tpu.memory_space<vmem>>) attributes {dimension_semantics = [#tpu.dimension_semantics<parallel>], iteration_bounds = array<i64: 2>, scalar_prefetch = 0 : i64, scratch_operands = 0 : i64, tpu.core_type = #tpu.core_type<tc>, window_params = [{transform_indices = @transform_0, window_bounds = array<i64: 49>}, {transform_indices = @transform_1, window_bounds = array<i64: 1>}, {transform_indices = @transform_2, window_bounds = array<i64: 1>}, {transform_indices = @transform_3, window_bounds = array<i64: 1, 1, 14, 14>}, {transform_indices = @transform_4, window_bounds = array<i64: 1, 1, 8, 8>}]} {
    %cst = arith.constant 0.000000e+00 : f32
    %0 = vector.broadcast %cst : f32 to vector<8x8xf32>
    %c0 = arith.constant 0 : index
    %c0_0 = arith.constant 0 : index
    %c0_1 = arith.constant 0 : index
    %c0_2 = arith.constant 0 : index
    %1 = vector.load %arg4[%c0, %c0_0, %c0_1, %c0_2] : memref<1x1x14x14xf32, #tpu.memory_space<vmem>>, vector<1x1x8x8xf32>
    %2 = vector.shape_cast %1 : vector<1x1x8x8xf32> to vector<8x8xf32>
    %c0_3 = arith.constant 0 : index
    %3 = memref.load %arg1[%c0_3] : memref<49xf32, #tpu.memory_space<smem>>
    %4 = vector.broadcast %3 : f32 to vector<8x8xf32>
    %5 = arith.mulf %4, %2 : vector<8x8xf32>
    %6 = arith.addf %0, %5 : vector<8x8xf32>
    %c0_4 = arith.constant 0 : index
    %c0_5 = arith.constant 0 : index
    %c0_6 = arith.constant 0 : index
    %c1 = arith.constant 1 : index
    %7 = vector.load %arg4[%c0_4, %c0_5, %c0_6, %c1] : memref<1x1x14x14xf32, #tpu.memory_space<vmem>>, vector<1x1x8x8xf32>
    %8 = vector.shape_cast %7 : vector<1x1x8x8xf32> to vector<8x8xf32>
    %c1_7 = arith.constant 1 : index
    %9 = memref.load %arg1[%c1_7] : memref<49xf32, #tpu.memory_space<smem>>
    %10 = vector.broadcast %9 : f32 to vector<8x8xf32>
    %11 = arith.mulf %10, %8 : vector<8x8xf32>
    %12 = arith.addf %6, %11 : vector<8x8xf32>
    %c0_8 = arith.constant 0 : index
    %c0_9 = arith.constant 0 : index
    %c0_10 = arith.constant 0 : index
    %c2 = arith.constant 2 : index
    %13 = vector.load %arg4[%c0_8, %c0_9, %c0_10, %c2] : memref<1x1x14x14xf32, #tpu.memory_space<vmem>>, vector<1x1x8x8xf32>
    %14 = vector.shape_cast %13 : vector<1x1x8x8xf32> to vector<8x8xf32>
    %c2_11 = arith.constant 2 : index
    %15 = memref.load %arg1[%c2_11] : memref<49xf32, #tpu.memory_space<smem>>
    %16 = vector.broadcast %15 : f32 to vector<8x8xf32>
    %17 = arith.mulf %16, %14 : vector<8x8xf32>
    %18 = arith.addf %12, %17 : vector<8x8xf32>
    %c0_12 = arith.constant 0 : index
    %c0_13 = arith.constant 0 : index
    %c0_14 = arith.constant 0 : index
    %c3 = arith.constant 3 : index
    %19 = vector.load %arg4[%c0_12, %c0_13, %c0_14, %c3] : memref<1x1x14x14xf32, #tpu.memory_space<vmem>>, vector<1x1x8x8xf32>
    %20 = vector.shape_cast %19 : vector<1x1x8x8xf32> to vector<8x8xf32>
    %c3_15 = arith.constant 3 : index
    %21 = memref.load %arg1[%c3_15] : memref<49xf32, #tpu.memory_space<smem>>
    %22 = vector.broadcast %21 : f32 to vector<8x8xf32>
    %23 = arith.mulf %22, %20 : vector<8x8xf32>
    %24 = arith.addf %18, %23 : vector<8x8xf32>
    %c0_16 = arith.constant 0 : index
    %c0_17 = arith.constant 0 : index
    %c0_18 = arith.constant 0 : index
    %c4 = arith.constant 4 : index
    %25 = vector.load %arg4[%c0_16, %c0_17, %c0_18, %c4] : memref<1x1x14x14xf32, #tpu.memory_space<vmem>>, vector<1x1x8x8xf32>
    %26 = vector.shape_cast %25 : vector<1x1x8x8xf32> to vector<8x8xf32>
    %c4_19 = arith.constant 4 : index
    %27 = memref.load %arg1[%c4_19] : memref<49xf32, #tpu.memory_space<smem>>
    %28 = vector.broadcast %27 : f32 to vector<8x8xf32>
    %29 = arith.mulf %28, %26 : vector<8x8xf32>
    %30 = arith.addf %24, %29 : vector<8x8xf32>
    %c0_20 = arith.constant 0 : index
    %c0_21 = arith.constant 0 : index
    %c0_22 = arith.constant 0 : index
    %c5 = arith.constant 5 : index
    %31 = vector.load %arg4[%c0_20, %c0_21, %c0_22, %c5] : memref<1x1x14x14xf32, #tpu.memory_space<vmem>>, vector<1x1x8x8xf32>
    %32 = vector.shape_cast %31 : vector<1x1x8x8xf32> to vector<8x8xf32>
    %c5_23 = arith.constant 5 : index
    %33 = memref.load %arg1[%c5_23] : memref<49xf32, #tpu.memory_space<smem>>
    %34 = vector.broadcast %33 : f32 to vector<8x8xf32>
    %35 = arith.mulf %34, %32 : vector<8x8xf32>
    %36 = arith.addf %30, %35 : vector<8x8xf32>
    %c0_24 = arith.constant 0 : index
    %c0_25 = arith.constant 0 : index
    %c0_26 = arith.constant 0 : index
    %c6 = arith.constant 6 : index
    %37 = vector.load %arg4[%c0_24, %c0_25, %c0_26, %c6] : memref<1x1x14x14xf32, #tpu.memory_space<vmem>>, vector<1x1x8x8xf32>
    %38 = vector.shape_cast %37 : vector<1x1x8x8xf32> to vector<8x8xf32>
    %c6_27 = arith.constant 6 : index
    %39 = memref.load %arg1[%c6_27] : memref<49xf32, #tpu.memory_space<smem>>
    %40 = vector.broadcast %39 : f32 to vector<8x8xf32>
    %41 = arith.mulf %40, %38 : vector<8x8xf32>
    %42 = arith.addf %36, %41 : vector<8x8xf32>
    %c0_28 = arith.constant 0 : index
    %c0_29 = arith.constant 0 : index
    %c1_30 = arith.constant 1 : index
    %c0_31 = arith.constant 0 : index
    %43 = vector.load %arg4[%c0_28, %c0_29, %c1_30, %c0_31] : memref<1x1x14x14xf32, #tpu.memory_space<vmem>>, vector<1x1x8x8xf32>
    %44 = vector.shape_cast %43 : vector<1x1x8x8xf32> to vector<8x8xf32>
    %c7 = arith.constant 7 : index
    %45 = memref.load %arg1[%c7] : memref<49xf32, #tpu.memory_space<smem>>
    %46 = vector.broadcast %45 : f32 to vector<8x8xf32>
    %47 = arith.mulf %46, %44 : vector<8x8xf32>
    %48 = arith.addf %42, %47 : vector<8x8xf32>
    %c0_32 = arith.constant 0 : index
    %c0_33 = arith.constant 0 : index
    %c1_34 = arith.constant 1 : index
    %c1_35 = arith.constant 1 : index
    %49 = vector.load %arg4[%c0_32, %c0_33, %c1_34, %c1_35] : memref<1x1x14x14xf32, #tpu.memory_space<vmem>>, vector<1x1x8x8xf32>
    %50 = vector.shape_cast %49 : vector<1x1x8x8xf32> to vector<8x8xf32>
    %c8 = arith.constant 8 : index
    %51 = memref.load %arg1[%c8] : memref<49xf32, #tpu.memory_space<smem>>
    %52 = vector.broadcast %51 : f32 to vector<8x8xf32>
    %53 = arith.mulf %52, %50 : vector<8x8xf32>
    %54 = arith.addf %48, %53 : vector<8x8xf32>
    %c0_36 = arith.constant 0 : index
    %c0_37 = arith.constant 0 : index
    %c1_38 = arith.constant 1 : index
    %c2_39 = arith.constant 2 : index
    %55 = vector.load %arg4[%c0_36, %c0_37, %c1_38, %c2_39] : memref<1x1x14x14xf32, #tpu.memory_space<vmem>>, vector<1x1x8x8xf32>
    %56 = vector.shape_cast %55 : vector<1x1x8x8xf32> to vector<8x8xf32>
    %c9 = arith.constant 9 : index
    %57 = memref.load %arg1[%c9] : memref<49xf32, #tpu.memory_space<smem>>
    %58 = vector.broadcast %57 : f32 to vector<8x8xf32>
    %59 = arith.mulf %58, %56 : vector<8x8xf32>
    %60 = arith.addf %54, %59 : vector<8x8xf32>
    %c0_40 = arith.constant 0 : index
    %c0_41 = arith.constant 0 : index
    %c1_42 = arith.constant 1 : index
    %c3_43 = arith.constant 3 : index
    %61 = vector.load %arg4[%c0_40, %c0_41, %c1_42, %c3_43] : memref<1x1x14x14xf32, #tpu.memory_space<vmem>>, vector<1x1x8x8xf32>
    %62 = vector.shape_cast %61 : vector<1x1x8x8xf32> to vector<8x8xf32>
    %c10 = arith.constant 10 : index
    %63 = memref.load %arg1[%c10] : memref<49xf32, #tpu.memory_space<smem>>
    %64 = vector.broadcast %63 : f32 to vector<8x8xf32>
    %65 = arith.mulf %64, %62 : vector<8x8xf32>
    %66 = arith.addf %60, %65 : vector<8x8xf32>
    %c0_44 = arith.constant 0 : index
    %c0_45 = arith.constant 0 : index
    %c1_46 = arith.constant 1 : index
    %c4_47 = arith.constant 4 : index
    %67 = vector.load %arg4[%c0_44, %c0_45, %c1_46, %c4_47] : memref<1x1x14x14xf32, #tpu.memory_space<vmem>>, vector<1x1x8x8xf32>
    %68 = vector.shape_cast %67 : vector<1x1x8x8xf32> to vector<8x8xf32>
    %c11 = arith.constant 11 : index
    %69 = memref.load %arg1[%c11] : memref<49xf32, #tpu.memory_space<smem>>
    %70 = vector.broadcast %69 : f32 to vector<8x8xf32>
    %71 = arith.mulf %70, %68 : vector<8x8xf32>
    %72 = arith.addf %66, %71 : vector<8x8xf32>
    %c0_48 = arith.constant 0 : index
    %c0_49 = arith.constant 0 : index
    %c1_50 = arith.constant 1 : index
    %c5_51 = arith.constant 5 : index
    %73 = vector.load %arg4[%c0_48, %c0_49, %c1_50, %c5_51] : memref<1x1x14x14xf32, #tpu.memory_space<vmem>>, vector<1x1x8x8xf32>
    %74 = vector.shape_cast %73 : vector<1x1x8x8xf32> to vector<8x8xf32>
    %c12 = arith.constant 12 : index
    %75 = memref.load %arg1[%c12] : memref<49xf32, #tpu.memory_space<smem>>
    %76 = vector.broadcast %75 : f32 to vector<8x8xf32>
    %77 = arith.mulf %76, %74 : vector<8x8xf32>
    %78 = arith.addf %72, %77 : vector<8x8xf32>
    %c0_52 = arith.constant 0 : index
    %c0_53 = arith.constant 0 : index
    %c1_54 = arith.constant 1 : index
    %c6_55 = arith.constant 6 : index
    %79 = vector.load %arg4[%c0_52, %c0_53, %c1_54, %c6_55] : memref<1x1x14x14xf32, #tpu.memory_space<vmem>>, vector<1x1x8x8xf32>
    %80 = vector.shape_cast %79 : vector<1x1x8x8xf32> to vector<8x8xf32>
    %c13 = arith.constant 13 : index
    %81 = memref.load %arg1[%c13] : memref<49xf32, #tpu.memory_space<smem>>
    %82 = vector.broadcast %81 : f32 to vector<8x8xf32>
    %83 = arith.mulf %82, %80 : vector<8x8xf32>
    %84 = arith.addf %78, %83 : vector<8x8xf32>
    %c0_56 = arith.constant 0 : index
    %c0_57 = arith.constant 0 : index
    %c2_58 = arith.constant 2 : index
    %c0_59 = arith.constant 0 : index
    %85 = vector.load %arg4[%c0_56, %c0_57, %c2_58, %c0_59] : memref<1x1x14x14xf32, #tpu.memory_space<vmem>>, vector<1x1x8x8xf32>
    %86 = vector.shape_cast %85 : vector<1x1x8x8xf32> to vector<8x8xf32>
    %c14 = arith.constant 14 : index
    %87 = memref.load %arg1[%c14] : memref<49xf32, #tpu.memory_space<smem>>
    %88 = vector.broadcast %87 : f32 to vector<8x8xf32>
    %89 = arith.mulf %88, %86 : vector<8x8xf32>
    %90 = arith.addf %84, %89 : vector<8x8xf32>
    %c0_60 = arith.constant 0 : index
    %c0_61 = arith.constant 0 : index
    %c2_62 = arith.constant 2 : index
    %c1_63 = arith.constant 1 : index
    %91 = vector.load %arg4[%c0_60, %c0_61, %c2_62, %c1_63] : memref<1x1x14x14xf32, #tpu.memory_space<vmem>>, vector<1x1x8x8xf32>
    %92 = vector.shape_cast %91 : vector<1x1x8x8xf32> to vector<8x8xf32>
    %c15 = arith.constant 15 : index
    %93 = memref.load %arg1[%c15] : memref<49xf32, #tpu.memory_space<smem>>
    %94 = vector.broadcast %93 : f32 to vector<8x8xf32>
    %95 = arith.mulf %94, %92 : vector<8x8xf32>
    %96 = arith.addf %90, %95 : vector<8x8xf32>
    %c0_64 = arith.constant 0 : index
    %c0_65 = arith.constant 0 : index
    %c2_66 = arith.constant 2 : index
    %c2_67 = arith.constant 2 : index
    %97 = vector.load %arg4[%c0_64, %c0_65, %c2_66, %c2_67] : memref<1x1x14x14xf32, #tpu.memory_space<vmem>>, vector<1x1x8x8xf32>
    %98 = vector.shape_cast %97 : vector<1x1x8x8xf32> to vector<8x8xf32>
    %c16 = arith.constant 16 : index
    %99 = memref.load %arg1[%c16] : memref<49xf32, #tpu.memory_space<smem>>
    %100 = vector.broadcast %99 : f32 to vector<8x8xf32>
    %101 = arith.mulf %100, %98 : vector<8x8xf32>
    %102 = arith.addf %96, %101 : vector<8x8xf32>
    %c0_68 = arith.constant 0 : index
    %c0_69 = arith.constant 0 : index
    %c2_70 = arith.constant 2 : index
    %c3_71 = arith.constant 3 : index
    %103 = vector.load %arg4[%c0_68, %c0_69, %c2_70, %c3_71] : memref<1x1x14x14xf32, #tpu.memory_space<vmem>>, vector<1x1x8x8xf32>
    %104 = vector.shape_cast %103 : vector<1x1x8x8xf32> to vector<8x8xf32>
    %c17 = arith.constant 17 : index
    %105 = memref.load %arg1[%c17] : memref<49xf32, #tpu.memory_space<smem>>
    %106 = vector.broadcast %105 : f32 to vector<8x8xf32>
    %107 = arith.mulf %106, %104 : vector<8x8xf32>
    %108 = arith.addf %102, %107 : vector<8x8xf32>
    %c0_72 = arith.constant 0 : index
    %c0_73 = arith.constant 0 : index
    %c2_74 = arith.constant 2 : index
    %c4_75 = arith.constant 4 : index
    %109 = vector.load %arg4[%c0_72, %c0_73, %c2_74, %c4_75] : memref<1x1x14x14xf32, #tpu.memory_space<vmem>>, vector<1x1x8x8xf32>
    %110 = vector.shape_cast %109 : vector<1x1x8x8xf32> to vector<8x8xf32>
    %c18 = arith.constant 18 : index
    %111 = memref.load %arg1[%c18] : memref<49xf32, #tpu.memory_space<smem>>
    %112 = vector.broadcast %111 : f32 to vector<8x8xf32>
    %113 = arith.mulf %112, %110 : vector<8x8xf32>
    %114 = arith.addf %108, %113 : vector<8x8xf32>
    %c0_76 = arith.constant 0 : index
    %c0_77 = arith.constant 0 : index
    %c2_78 = arith.constant 2 : index
    %c5_79 = arith.constant 5 : index
    %115 = vector.load %arg4[%c0_76, %c0_77, %c2_78, %c5_79] : memref<1x1x14x14xf32, #tpu.memory_space<vmem>>, vector<1x1x8x8xf32>
    %116 = vector.shape_cast %115 : vector<1x1x8x8xf32> to vector<8x8xf32>
    %c19 = arith.constant 19 : index
    %117 = memref.load %arg1[%c19] : memref<49xf32, #tpu.memory_space<smem>>
    %118 = vector.broadcast %117 : f32 to vector<8x8xf32>
    %119 = arith.mulf %118, %116 : vector<8x8xf32>
    %120 = arith.addf %114, %119 : vector<8x8xf32>
    %c0_80 = arith.constant 0 : index
    %c0_81 = arith.constant 0 : index
    %c2_82 = arith.constant 2 : index
    %c6_83 = arith.constant 6 : index
    %121 = vector.load %arg4[%c0_80, %c0_81, %c2_82, %c6_83] : memref<1x1x14x14xf32, #tpu.memory_space<vmem>>, vector<1x1x8x8xf32>
    %122 = vector.shape_cast %121 : vector<1x1x8x8xf32> to vector<8x8xf32>
    %c20 = arith.constant 20 : index
    %123 = memref.load %arg1[%c20] : memref<49xf32, #tpu.memory_space<smem>>
    %124 = vector.broadcast %123 : f32 to vector<8x8xf32>
    %125 = arith.mulf %124, %122 : vector<8x8xf32>
    %126 = arith.addf %120, %125 : vector<8x8xf32>
    %c0_84 = arith.constant 0 : index
    %c0_85 = arith.constant 0 : index
    %c3_86 = arith.constant 3 : index
    %c0_87 = arith.constant 0 : index
    %127 = vector.load %arg4[%c0_84, %c0_85, %c3_86, %c0_87] : memref<1x1x14x14xf32, #tpu.memory_space<vmem>>, vector<1x1x8x8xf32>
    %128 = vector.shape_cast %127 : vector<1x1x8x8xf32> to vector<8x8xf32>
    %c21 = arith.constant 21 : index
    %129 = memref.load %arg1[%c21] : memref<49xf32, #tpu.memory_space<smem>>
    %130 = vector.broadcast %129 : f32 to vector<8x8xf32>
    %131 = arith.mulf %130, %128 : vector<8x8xf32>
    %132 = arith.addf %126, %131 : vector<8x8xf32>
    %c0_88 = arith.constant 0 : index
    %c0_89 = arith.constant 0 : index
    %c3_90 = arith.constant 3 : index
    %c1_91 = arith.constant 1 : index
    %133 = vector.load %arg4[%c0_88, %c0_89, %c3_90, %c1_91] : memref<1x1x14x14xf32, #tpu.memory_space<vmem>>, vector<1x1x8x8xf32>
    %134 = vector.shape_cast %133 : vector<1x1x8x8xf32> to vector<8x8xf32>
    %c22 = arith.constant 22 : index
    %135 = memref.load %arg1[%c22] : memref<49xf32, #tpu.memory_space<smem>>
    %136 = vector.broadcast %135 : f32 to vector<8x8xf32>
    %137 = arith.mulf %136, %134 : vector<8x8xf32>
    %138 = arith.addf %132, %137 : vector<8x8xf32>
    %c0_92 = arith.constant 0 : index
    %c0_93 = arith.constant 0 : index
    %c3_94 = arith.constant 3 : index
    %c2_95 = arith.constant 2 : index
    %139 = vector.load %arg4[%c0_92, %c0_93, %c3_94, %c2_95] : memref<1x1x14x14xf32, #tpu.memory_space<vmem>>, vector<1x1x8x8xf32>
    %140 = vector.shape_cast %139 : vector<1x1x8x8xf32> to vector<8x8xf32>
    %c23 = arith.constant 23 : index
    %141 = memref.load %arg1[%c23] : memref<49xf32, #tpu.memory_space<smem>>
    %142 = vector.broadcast %141 : f32 to vector<8x8xf32>
    %143 = arith.mulf %142, %140 : vector<8x8xf32>
    %144 = arith.addf %138, %143 : vector<8x8xf32>
    %c0_96 = arith.constant 0 : index
    %c0_97 = arith.constant 0 : index
    %c3_98 = arith.constant 3 : index
    %c3_99 = arith.constant 3 : index
    %145 = vector.load %arg4[%c0_96, %c0_97, %c3_98, %c3_99] : memref<1x1x14x14xf32, #tpu.memory_space<vmem>>, vector<1x1x8x8xf32>
    %146 = vector.shape_cast %145 : vector<1x1x8x8xf32> to vector<8x8xf32>
    %c24 = arith.constant 24 : index
    %147 = memref.load %arg1[%c24] : memref<49xf32, #tpu.memory_space<smem>>
    %148 = vector.broadcast %147 : f32 to vector<8x8xf32>
    %149 = arith.mulf %148, %146 : vector<8x8xf32>
    %150 = arith.addf %144, %149 : vector<8x8xf32>
    %c0_100 = arith.constant 0 : index
    %c0_101 = arith.constant 0 : index
    %c3_102 = arith.constant 3 : index
    %c4_103 = arith.constant 4 : index
    %151 = vector.load %arg4[%c0_100, %c0_101, %c3_102, %c4_103] : memref<1x1x14x14xf32, #tpu.memory_space<vmem>>, vector<1x1x8x8xf32>
    %152 = vector.shape_cast %151 : vector<1x1x8x8xf32> to vector<8x8xf32>
    %c25 = arith.constant 25 : index
    %153 = memref.load %arg1[%c25] : memref<49xf32, #tpu.memory_space<smem>>
    %154 = vector.broadcast %153 : f32 to vector<8x8xf32>
    %155 = arith.mulf %154, %152 : vector<8x8xf32>
    %156 = arith.addf %150, %155 : vector<8x8xf32>
    %c0_104 = arith.constant 0 : index
    %c0_105 = arith.constant 0 : index
    %c3_106 = arith.constant 3 : index
    %c5_107 = arith.constant 5 : index
    %157 = vector.load %arg4[%c0_104, %c0_105, %c3_106, %c5_107] : memref<1x1x14x14xf32, #tpu.memory_space<vmem>>, vector<1x1x8x8xf32>
    %158 = vector.shape_cast %157 : vector<1x1x8x8xf32> to vector<8x8xf32>
    %c26 = arith.constant 26 : index
    %159 = memref.load %arg1[%c26] : memref<49xf32, #tpu.memory_space<smem>>
    %160 = vector.broadcast %159 : f32 to vector<8x8xf32>
    %161 = arith.mulf %160, %158 : vector<8x8xf32>
    %162 = arith.addf %156, %161 : vector<8x8xf32>
    %c0_108 = arith.constant 0 : index
    %c0_109 = arith.constant 0 : index
    %c3_110 = arith.constant 3 : index
    %c6_111 = arith.constant 6 : index
    %163 = vector.load %arg4[%c0_108, %c0_109, %c3_110, %c6_111] : memref<1x1x14x14xf32, #tpu.memory_space<vmem>>, vector<1x1x8x8xf32>
    %164 = vector.shape_cast %163 : vector<1x1x8x8xf32> to vector<8x8xf32>
    %c27 = arith.constant 27 : index
    %165 = memref.load %arg1[%c27] : memref<49xf32, #tpu.memory_space<smem>>
    %166 = vector.broadcast %165 : f32 to vector<8x8xf32>
    %167 = arith.mulf %166, %164 : vector<8x8xf32>
    %168 = arith.addf %162, %167 : vector<8x8xf32>
    %c0_112 = arith.constant 0 : index
    %c0_113 = arith.constant 0 : index
    %c4_114 = arith.constant 4 : index
    %c0_115 = arith.constant 0 : index
    %169 = vector.load %arg4[%c0_112, %c0_113, %c4_114, %c0_115] : memref<1x1x14x14xf32, #tpu.memory_space<vmem>>, vector<1x1x8x8xf32>
    %170 = vector.shape_cast %169 : vector<1x1x8x8xf32> to vector<8x8xf32>
    %c28 = arith.constant 28 : index
    %171 = memref.load %arg1[%c28] : memref<49xf32, #tpu.memory_space<smem>>
    %172 = vector.broadcast %171 : f32 to vector<8x8xf32>
    %173 = arith.mulf %172, %170 : vector<8x8xf32>
    %174 = arith.addf %168, %173 : vector<8x8xf32>
    %c0_116 = arith.constant 0 : index
    %c0_117 = arith.constant 0 : index
    %c4_118 = arith.constant 4 : index
    %c1_119 = arith.constant 1 : index
    %175 = vector.load %arg4[%c0_116, %c0_117, %c4_118, %c1_119] : memref<1x1x14x14xf32, #tpu.memory_space<vmem>>, vector<1x1x8x8xf32>
    %176 = vector.shape_cast %175 : vector<1x1x8x8xf32> to vector<8x8xf32>
    %c29 = arith.constant 29 : index
    %177 = memref.load %arg1[%c29] : memref<49xf32, #tpu.memory_space<smem>>
    %178 = vector.broadcast %177 : f32 to vector<8x8xf32>
    %179 = arith.mulf %178, %176 : vector<8x8xf32>
    %180 = arith.addf %174, %179 : vector<8x8xf32>
    %c0_120 = arith.constant 0 : index
    %c0_121 = arith.constant 0 : index
    %c4_122 = arith.constant 4 : index
    %c2_123 = arith.constant 2 : index
    %181 = vector.load %arg4[%c0_120, %c0_121, %c4_122, %c2_123] : memref<1x1x14x14xf32, #tpu.memory_space<vmem>>, vector<1x1x8x8xf32>
    %182 = vector.shape_cast %181 : vector<1x1x8x8xf32> to vector<8x8xf32>
    %c30 = arith.constant 30 : index
    %183 = memref.load %arg1[%c30] : memref<49xf32, #tpu.memory_space<smem>>
    %184 = vector.broadcast %183 : f32 to vector<8x8xf32>
    %185 = arith.mulf %184, %182 : vector<8x8xf32>
    %186 = arith.addf %180, %185 : vector<8x8xf32>
    %c0_124 = arith.constant 0 : index
    %c0_125 = arith.constant 0 : index
    %c4_126 = arith.constant 4 : index
    %c3_127 = arith.constant 3 : index
    %187 = vector.load %arg4[%c0_124, %c0_125, %c4_126, %c3_127] : memref<1x1x14x14xf32, #tpu.memory_space<vmem>>, vector<1x1x8x8xf32>
    %188 = vector.shape_cast %187 : vector<1x1x8x8xf32> to vector<8x8xf32>
    %c31 = arith.constant 31 : index
    %189 = memref.load %arg1[%c31] : memref<49xf32, #tpu.memory_space<smem>>
    %190 = vector.broadcast %189 : f32 to vector<8x8xf32>
    %191 = arith.mulf %190, %188 : vector<8x8xf32>
    %192 = arith.addf %186, %191 : vector<8x8xf32>
    %c0_128 = arith.constant 0 : index
    %c0_129 = arith.constant 0 : index
    %c4_130 = arith.constant 4 : index
    %c4_131 = arith.constant 4 : index
    %193 = vector.load %arg4[%c0_128, %c0_129, %c4_130, %c4_131] : memref<1x1x14x14xf32, #tpu.memory_space<vmem>>, vector<1x1x8x8xf32>
    %194 = vector.shape_cast %193 : vector<1x1x8x8xf32> to vector<8x8xf32>
    %c32 = arith.constant 32 : index
    %195 = memref.load %arg1[%c32] : memref<49xf32, #tpu.memory_space<smem>>
    %196 = vector.broadcast %195 : f32 to vector<8x8xf32>
    %197 = arith.mulf %196, %194 : vector<8x8xf32>
    %198 = arith.addf %192, %197 : vector<8x8xf32>
    %c0_132 = arith.constant 0 : index
    %c0_133 = arith.constant 0 : index
    %c4_134 = arith.constant 4 : index
    %c5_135 = arith.constant 5 : index
    %199 = vector.load %arg4[%c0_132, %c0_133, %c4_134, %c5_135] : memref<1x1x14x14xf32, #tpu.memory_space<vmem>>, vector<1x1x8x8xf32>
    %200 = vector.shape_cast %199 : vector<1x1x8x8xf32> to vector<8x8xf32>
    %c33 = arith.constant 33 : index
    %201 = memref.load %arg1[%c33] : memref<49xf32, #tpu.memory_space<smem>>
    %202 = vector.broadcast %201 : f32 to vector<8x8xf32>
    %203 = arith.mulf %202, %200 : vector<8x8xf32>
    %204 = arith.addf %198, %203 : vector<8x8xf32>
    %c0_136 = arith.constant 0 : index
    %c0_137 = arith.constant 0 : index
    %c4_138 = arith.constant 4 : index
    %c6_139 = arith.constant 6 : index
    %205 = vector.load %arg4[%c0_136, %c0_137, %c4_138, %c6_139] : memref<1x1x14x14xf32, #tpu.memory_space<vmem>>, vector<1x1x8x8xf32>
    %206 = vector.shape_cast %205 : vector<1x1x8x8xf32> to vector<8x8xf32>
    %c34 = arith.constant 34 : index
    %207 = memref.load %arg1[%c34] : memref<49xf32, #tpu.memory_space<smem>>
    %208 = vector.broadcast %207 : f32 to vector<8x8xf32>
    %209 = arith.mulf %208, %206 : vector<8x8xf32>
    %210 = arith.addf %204, %209 : vector<8x8xf32>
    %c0_140 = arith.constant 0 : index
    %c0_141 = arith.constant 0 : index
    %c5_142 = arith.constant 5 : index
    %c0_143 = arith.constant 0 : index
    %211 = vector.load %arg4[%c0_140, %c0_141, %c5_142, %c0_143] : memref<1x1x14x14xf32, #tpu.memory_space<vmem>>, vector<1x1x8x8xf32>
    %212 = vector.shape_cast %211 : vector<1x1x8x8xf32> to vector<8x8xf32>
    %c35 = arith.constant 35 : index
    %213 = memref.load %arg1[%c35] : memref<49xf32, #tpu.memory_space<smem>>
    %214 = vector.broadcast %213 : f32 to vector<8x8xf32>
    %215 = arith.mulf %214, %212 : vector<8x8xf32>
    %216 = arith.addf %210, %215 : vector<8x8xf32>
    %c0_144 = arith.constant 0 : index
    %c0_145 = arith.constant 0 : index
    %c5_146 = arith.constant 5 : index
    %c1_147 = arith.constant 1 : index
    %217 = vector.load %arg4[%c0_144, %c0_145, %c5_146, %c1_147] : memref<1x1x14x14xf32, #tpu.memory_space<vmem>>, vector<1x1x8x8xf32>
    %218 = vector.shape_cast %217 : vector<1x1x8x8xf32> to vector<8x8xf32>
    %c36 = arith.constant 36 : index
    %219 = memref.load %arg1[%c36] : memref<49xf32, #tpu.memory_space<smem>>
    %220 = vector.broadcast %219 : f32 to vector<8x8xf32>
    %221 = arith.mulf %220, %218 : vector<8x8xf32>
    %222 = arith.addf %216, %221 : vector<8x8xf32>
    %c0_148 = arith.constant 0 : index
    %c0_149 = arith.constant 0 : index
    %c5_150 = arith.constant 5 : index
    %c2_151 = arith.constant 2 : index
    %223 = vector.load %arg4[%c0_148, %c0_149, %c5_150, %c2_151] : memref<1x1x14x14xf32, #tpu.memory_space<vmem>>, vector<1x1x8x8xf32>
    %224 = vector.shape_cast %223 : vector<1x1x8x8xf32> to vector<8x8xf32>
    %c37 = arith.constant 37 : index
    %225 = memref.load %arg1[%c37] : memref<49xf32, #tpu.memory_space<smem>>
    %226 = vector.broadcast %225 : f32 to vector<8x8xf32>
    %227 = arith.mulf %226, %224 : vector<8x8xf32>
    %228 = arith.addf %222, %227 : vector<8x8xf32>
    %c0_152 = arith.constant 0 : index
    %c0_153 = arith.constant 0 : index
    %c5_154 = arith.constant 5 : index
    %c3_155 = arith.constant 3 : index
    %229 = vector.load %arg4[%c0_152, %c0_153, %c5_154, %c3_155] : memref<1x1x14x14xf32, #tpu.memory_space<vmem>>, vector<1x1x8x8xf32>
    %230 = vector.shape_cast %229 : vector<1x1x8x8xf32> to vector<8x8xf32>
    %c38 = arith.constant 38 : index
    %231 = memref.load %arg1[%c38] : memref<49xf32, #tpu.memory_space<smem>>
    %232 = vector.broadcast %231 : f32 to vector<8x8xf32>
    %233 = arith.mulf %232, %230 : vector<8x8xf32>
    %234 = arith.addf %228, %233 : vector<8x8xf32>
    %c0_156 = arith.constant 0 : index
    %c0_157 = arith.constant 0 : index
    %c5_158 = arith.constant 5 : index
    %c4_159 = arith.constant 4 : index
    %235 = vector.load %arg4[%c0_156, %c0_157, %c5_158, %c4_159] : memref<1x1x14x14xf32, #tpu.memory_space<vmem>>, vector<1x1x8x8xf32>
    %236 = vector.shape_cast %235 : vector<1x1x8x8xf32> to vector<8x8xf32>
    %c39 = arith.constant 39 : index
    %237 = memref.load %arg1[%c39] : memref<49xf32, #tpu.memory_space<smem>>
    %238 = vector.broadcast %237 : f32 to vector<8x8xf32>
    %239 = arith.mulf %238, %236 : vector<8x8xf32>
    %240 = arith.addf %234, %239 : vector<8x8xf32>
    %c0_160 = arith.constant 0 : index
    %c0_161 = arith.constant 0 : index
    %c5_162 = arith.constant 5 : index
    %c5_163 = arith.constant 5 : index
    %241 = vector.load %arg4[%c0_160, %c0_161, %c5_162, %c5_163] : memref<1x1x14x14xf32, #tpu.memory_space<vmem>>, vector<1x1x8x8xf32>
    %242 = vector.shape_cast %241 : vector<1x1x8x8xf32> to vector<8x8xf32>
    %c40 = arith.constant 40 : index
    %243 = memref.load %arg1[%c40] : memref<49xf32, #tpu.memory_space<smem>>
    %244 = vector.broadcast %243 : f32 to vector<8x8xf32>
    %245 = arith.mulf %244, %242 : vector<8x8xf32>
    %246 = arith.addf %240, %245 : vector<8x8xf32>
    %c0_164 = arith.constant 0 : index
    %c0_165 = arith.constant 0 : index
    %c5_166 = arith.constant 5 : index
    %c6_167 = arith.constant 6 : index
    %247 = vector.load %arg4[%c0_164, %c0_165, %c5_166, %c6_167] : memref<1x1x14x14xf32, #tpu.memory_space<vmem>>, vector<1x1x8x8xf32>
    %248 = vector.shape_cast %247 : vector<1x1x8x8xf32> to vector<8x8xf32>
    %c41 = arith.constant 41 : index
    %249 = memref.load %arg1[%c41] : memref<49xf32, #tpu.memory_space<smem>>
    %250 = vector.broadcast %249 : f32 to vector<8x8xf32>
    %251 = arith.mulf %250, %248 : vector<8x8xf32>
    %252 = arith.addf %246, %251 : vector<8x8xf32>
    %c0_168 = arith.constant 0 : index
    %c0_169 = arith.constant 0 : index
    %c6_170 = arith.constant 6 : index
    %c0_171 = arith.constant 0 : index
    %253 = vector.load %arg4[%c0_168, %c0_169, %c6_170, %c0_171] : memref<1x1x14x14xf32, #tpu.memory_space<vmem>>, vector<1x1x8x8xf32>
    %254 = vector.shape_cast %253 : vector<1x1x8x8xf32> to vector<8x8xf32>
    %c42 = arith.constant 42 : index
    %255 = memref.load %arg1[%c42] : memref<49xf32, #tpu.memory_space<smem>>
    %256 = vector.broadcast %255 : f32 to vector<8x8xf32>
    %257 = arith.mulf %256, %254 : vector<8x8xf32>
    %258 = arith.addf %252, %257 : vector<8x8xf32>
    %c0_172 = arith.constant 0 : index
    %c0_173 = arith.constant 0 : index
    %c6_174 = arith.constant 6 : index
    %c1_175 = arith.constant 1 : index
    %259 = vector.load %arg4[%c0_172, %c0_173, %c6_174, %c1_175] : memref<1x1x14x14xf32, #tpu.memory_space<vmem>>, vector<1x1x8x8xf32>
    %260 = vector.shape_cast %259 : vector<1x1x8x8xf32> to vector<8x8xf32>
    %c43 = arith.constant 43 : index
    %261 = memref.load %arg1[%c43] : memref<49xf32, #tpu.memory_space<smem>>
    %262 = vector.broadcast %261 : f32 to vector<8x8xf32>
    %263 = arith.mulf %262, %260 : vector<8x8xf32>
    %264 = arith.addf %258, %263 : vector<8x8xf32>
    %c0_176 = arith.constant 0 : index
    %c0_177 = arith.constant 0 : index
    %c6_178 = arith.constant 6 : index
    %c2_179 = arith.constant 2 : index
    %265 = vector.load %arg4[%c0_176, %c0_177, %c6_178, %c2_179] : memref<1x1x14x14xf32, #tpu.memory_space<vmem>>, vector<1x1x8x8xf32>
    %266 = vector.shape_cast %265 : vector<1x1x8x8xf32> to vector<8x8xf32>
    %c44 = arith.constant 44 : index
    %267 = memref.load %arg1[%c44] : memref<49xf32, #tpu.memory_space<smem>>
    %268 = vector.broadcast %267 : f32 to vector<8x8xf32>
    %269 = arith.mulf %268, %266 : vector<8x8xf32>
    %270 = arith.addf %264, %269 : vector<8x8xf32>
    %c0_180 = arith.constant 0 : index
    %c0_181 = arith.constant 0 : index
    %c6_182 = arith.constant 6 : index
    %c3_183 = arith.constant 3 : index
    %271 = vector.load %arg4[%c0_180, %c0_181, %c6_182, %c3_183] : memref<1x1x14x14xf32, #tpu.memory_space<vmem>>, vector<1x1x8x8xf32>
    %272 = vector.shape_cast %271 : vector<1x1x8x8xf32> to vector<8x8xf32>
    %c45 = arith.constant 45 : index
    %273 = memref.load %arg1[%c45] : memref<49xf32, #tpu.memory_space<smem>>
    %274 = vector.broadcast %273 : f32 to vector<8x8xf32>
    %275 = arith.mulf %274, %272 : vector<8x8xf32>
    %276 = arith.addf %270, %275 : vector<8x8xf32>
    %c0_184 = arith.constant 0 : index
    %c0_185 = arith.constant 0 : index
    %c6_186 = arith.constant 6 : index
    %c4_187 = arith.constant 4 : index
    %277 = vector.load %arg4[%c0_184, %c0_185, %c6_186, %c4_187] : memref<1x1x14x14xf32, #tpu.memory_space<vmem>>, vector<1x1x8x8xf32>
    %278 = vector.shape_cast %277 : vector<1x1x8x8xf32> to vector<8x8xf32>
    %c46 = arith.constant 46 : index
    %279 = memref.load %arg1[%c46] : memref<49xf32, #tpu.memory_space<smem>>
    %280 = vector.broadcast %279 : f32 to vector<8x8xf32>
    %281 = arith.mulf %280, %278 : vector<8x8xf32>
    %282 = arith.addf %276, %281 : vector<8x8xf32>
    %c0_188 = arith.constant 0 : index
    %c0_189 = arith.constant 0 : index
    %c6_190 = arith.constant 6 : index
    %c5_191 = arith.constant 5 : index
    %283 = vector.load %arg4[%c0_188, %c0_189, %c6_190, %c5_191] : memref<1x1x14x14xf32, #tpu.memory_space<vmem>>, vector<1x1x8x8xf32>
    %284 = vector.shape_cast %283 : vector<1x1x8x8xf32> to vector<8x8xf32>
    %c47 = arith.constant 47 : index
    %285 = memref.load %arg1[%c47] : memref<49xf32, #tpu.memory_space<smem>>
    %286 = vector.broadcast %285 : f32 to vector<8x8xf32>
    %287 = arith.mulf %286, %284 : vector<8x8xf32>
    %288 = arith.addf %282, %287 : vector<8x8xf32>
    %c0_192 = arith.constant 0 : index
    %c0_193 = arith.constant 0 : index
    %c6_194 = arith.constant 6 : index
    %c6_195 = arith.constant 6 : index
    %289 = vector.load %arg4[%c0_192, %c0_193, %c6_194, %c6_195] : memref<1x1x14x14xf32, #tpu.memory_space<vmem>>, vector<1x1x8x8xf32>
    %290 = vector.shape_cast %289 : vector<1x1x8x8xf32> to vector<8x8xf32>
    %c48 = arith.constant 48 : index
    %291 = memref.load %arg1[%c48] : memref<49xf32, #tpu.memory_space<smem>>
    %292 = vector.broadcast %291 : f32 to vector<8x8xf32>
    %293 = arith.mulf %292, %290 : vector<8x8xf32>
    %294 = arith.addf %288, %293 : vector<8x8xf32>
    %c0_196 = arith.constant 0 : index
    %295 = memref.load %arg2[%c0_196] : memref<1xf32, #tpu.memory_space<smem>>
    %296 = vector.broadcast %295 : f32 to vector<8x8xf32>
    %297 = arith.mulf %294, %296 : vector<8x8xf32>
    %c0_197 = arith.constant 0 : index
    %298 = memref.load %arg3[%c0_197] : memref<1xf32, #tpu.memory_space<smem>>
    %299 = vector.broadcast %298 : f32 to vector<8x8xf32>
    %300 = arith.addf %297, %299 : vector<8x8xf32>
    %cst_198 = arith.constant 0.000000e+00 : f32
    %301 = vector.broadcast %cst_198 : f32 to vector<8x8xf32>
    %302 = arith.maximumf %300, %301 : vector<8x8xf32>
    %c0_199 = arith.constant 0 : index
    %c0_200 = arith.constant 0 : index
    %c0_201 = arith.constant 0 : index
    %c0_202 = arith.constant 0 : index
    %303 = vector.load %arg5[%c0_199, %c0_200, %c0_201, %c0_202] : memref<1x1x8x8xf32, #tpu.memory_space<vmem>>, vector<1x1x8x8xf32>
    %304 = vector.shape_cast %303 : vector<1x1x8x8xf32> to vector<8x8xf32>
    %305 = vector.shape_cast %302 : vector<8x8xf32> to vector<1x1x8x8xf32>
    tpu.vector_store %arg5[%c0_199, %c0_200, %c0_201, %c0_202], %305 {strides = array<i32>} : memref<1x1x8x8xf32, #tpu.memory_space<vmem>>, vector<1x1x8x8xf32>,
    return
  }
  func.func @transform_0(%arg0: i32) -> i32 {
    %c0_i32 = arith.constant 0 : i32
    %c0_i32_0 = arith.constant 0 : i32
    return %c0_i32 : i32
  }
  func.func @transform_1(%arg0: i32) -> i32 {
    %c0_i32 = arith.constant 0 : i32
    %c0_i32_0 = arith.constant 0 : i32
    return %c0_i32 : i32
  }
  func.func @transform_2(%arg0: i32) -> i32 {
    %c0_i32 = arith.constant 0 : i32
    %c0_i32_0 = arith.constant 0 : i32
    return %c0_i32 : i32
  }
  func.func @transform_3(%arg0: i32) -> (i32, i32, i32, i32) {
    %c0_i32 = arith.constant 0 : i32
    %c0_i32_0 = arith.constant 0 : i32
    %c0_i32_1 = arith.constant 0 : i32
    %c0_i32_2 = arith.constant 0 : i32
    return %arg0, %c0_i32, %c0_i32_0, %c0_i32_1 : i32, i32, i32, i32
  }
  func.func @transform_4(%arg0: i32) -> (i32, i32, i32, i32) {
    %c0_i32 = arith.constant 0 : i32
    %c0_i32_0 = arith.constant 0 : i32
    %c0_i32_1 = arith.constant 0 : i32
    %c0_i32_2 = arith.constant 0 : i32
    return %arg0, %c0_i32, %c0_i32_0, %c0_i32_1 : i32, i32, i32, i32
  }
}

module attributes {stable_mosaic.version = 11 : i64} {
  func.func @_branch1_kernel(%arg0: i32, %arg1: memref<2x4x256xf32, #tpu.memory_space<vmem>>, %arg2: memref<4x8xf32, #tpu.memory_space<vmem>>, %arg3: memref<1x8xf32, #tpu.memory_space<vmem>>, %arg4: memref<1x8xf32, #tpu.memory_space<vmem>>, %arg5: memref<2x8xf32, #tpu.memory_space<vmem>>, %arg6: memref<2x4xf32, #tpu.memory_space<vmem>>) attributes {dimension_semantics = [#tpu.dimension_semantics<arbitrary>], iteration_bounds = array<i64: 1>, scalar_prefetch = 0 : i64, scratch_operands = 1 : i64, tpu.core_type = #tpu.core_type<tc>, window_params = [{transform_indices = @transform_0, window_bounds = array<i64: 2, 4, 256>}, {pipeline_mode = #tpu.pipeline_mode<synchronous>, transform_indices = @transform_1, window_bounds = array<i64: 4, 8>}, {pipeline_mode = #tpu.pipeline_mode<synchronous>, transform_indices = @transform_2, window_bounds = array<i64: 1, 8>}, {pipeline_mode = #tpu.pipeline_mode<synchronous>, transform_indices = @transform_3, window_bounds = array<i64: 1, 8>}, {pipeline_mode = #tpu.pipeline_mode<synchronous>, transform_indices = @transform_4, window_bounds = array<i64: 2, 8>}]} {
    %c0_i32 = arith.constant 0 : i32
    %0 = arith.cmpi eq, %arg0, %c0_i32 : i32
    %1 = arith.extui %0 : i1 to i32
    %c0_i32_0 = arith.constant 0 : i32
    %2 = arith.cmpi ne, %1, %c0_i32_0 : i32
    scf.if %2 {
      %cst_9 = arith.constant 0.000000e+00 : f32
      %11 = vector.broadcast %cst_9 : f32 to vector<2x4xf32>
      %c0_10 = arith.constant 0 : index
      %c0_11 = arith.constant 0 : index
      %12 = vector.load %arg6[%c0_10, %c0_11] : memref<2x4xf32, #tpu.memory_space<vmem>>, vector<2x4xf32>
      tpu.vector_store %arg6[%c0_10, %c0_11], %11 {strides = array<i32>} : memref<2x4xf32, #tpu.memory_space<vmem>>, vector<2x4xf32>,
    } else {
    }
    %c0 = arith.constant 0 : index
    %c0_1 = arith.constant 0 : index
    %3 = vector.load %arg6[%c0, %c0_1] : memref<2x4xf32, #tpu.memory_space<vmem>>, vector<2x4xf32>
    %c0_2 = arith.constant 0 : index
    %c0_3 = arith.constant 0 : index
    %c0_4 = arith.constant 0 : index
    %4 = vector.load %arg1[%c0_2, %c0_3, %c0_4] : memref<2x4x256xf32, #tpu.memory_space<vmem>>, vector<2x4x256xf32>
    %cst = arith.constant dense<0.000000e+00> : vector<2x4xf32>
    %5 = vector.multi_reduction <add>, %4, %cst [2] : vector<2x4x256xf32> to vector<2x4xf32>
    %6 = arith.addf %3, %5 : vector<2x4xf32>
    %c0_5 = arith.constant 0 : index
    %c0_6 = arith.constant 0 : index
    %7 = vector.load %arg6[%c0_5, %c0_6] : memref<2x4xf32, #tpu.memory_space<vmem>>, vector<2x4xf32>
    tpu.vector_store %arg6[%c0_5, %c0_6], %6 {strides = array<i32>} : memref<2x4xf32, #tpu.memory_space<vmem>>, vector<2x4xf32>,
    %c0_i32_7 = arith.constant 0 : i32
    %8 = arith.cmpi eq, %arg0, %c0_i32_7 : i32
    %9 = arith.extui %8 : i1 to i32
    %c0_i32_8 = arith.constant 0 : i32
    %10 = arith.cmpi ne, %9, %c0_i32_8 : i32
    scf.if %10 {
      %c0_9 = arith.constant 0 : index
      %c0_10 = arith.constant 0 : index
      %11 = vector.load %arg6[%c0_9, %c0_10] : memref<2x4xf32, #tpu.memory_space<vmem>>, vector<2x4xf32>
      %cst_11 = arith.constant 3.906250e-03 : f32
      %12 = vector.broadcast %cst_11 : f32 to vector<2x4xf32>
      %13 = arith.mulf %11, %12 : vector<2x4xf32>
      %c0_12 = arith.constant 0 : index
      %c0_13 = arith.constant 0 : index
      %14 = vector.load %arg2[%c0_12, %c0_13] : memref<4x8xf32, #tpu.memory_space<vmem>>, vector<4x8xf32>
      %cst_14 = arith.constant dense<0.000000e+00> : vector<2x8xf32>
      %15 = tpu.matmul %13, %14, %cst_14 {dimension_numbers = #tpu.dot_dimension_numbers<[1], [0], [0], [1], [0, 0, 1, 1], [], []>} : vector<2x4xf32>, vector<4x8xf32>, vector<2x8xf32> -> vector<2x8xf32>
      %c0_15 = arith.constant 0 : index
      %c0_16 = arith.constant 0 : index
      %16 = vector.load %arg3[%c0_15, %c0_16] : memref<1x8xf32, #tpu.memory_space<vmem>>, vector<1x8xf32>
      %17 = vector.broadcast %16 : vector<1x8xf32> to vector<2x8xf32>
      %18 = arith.mulf %15, %17 : vector<2x8xf32>
      %c0_17 = arith.constant 0 : index
      %c0_18 = arith.constant 0 : index
      %19 = vector.load %arg4[%c0_17, %c0_18] : memref<1x8xf32, #tpu.memory_space<vmem>>, vector<1x8xf32>
      %20 = vector.broadcast %19 : vector<1x8xf32> to vector<2x8xf32>
      %21 = arith.addf %18, %20 : vector<2x8xf32>
      %cst_19 = arith.constant 0.000000e+00 : f32
      %22 = vector.broadcast %cst_19 : f32 to vector<2x8xf32>
      %23 = arith.maximumf %21, %22 : vector<2x8xf32>
      %c0_20 = arith.constant 0 : index
      %c0_21 = arith.constant 0 : index
      %24 = vector.load %arg5[%c0_20, %c0_21] : memref<2x8xf32, #tpu.memory_space<vmem>>, vector<2x8xf32>
      tpu.vector_store %arg5[%c0_20, %c0_21], %23 {strides = array<i32>} : memref<2x8xf32, #tpu.memory_space<vmem>>, vector<2x8xf32>,
    } else {
    }
    return
  }
  func.func @transform_0(%arg0: i32) -> (i32, i32, i32) {
    %c0_i32 = arith.constant 0 : i32
    %c0_i32_0 = arith.constant 0 : i32
    %c0_i32_1 = arith.constant 0 : i32
    return %c0_i32, %c0_i32_0, %arg0 : i32, i32, i32
  }
  func.func @transform_1(%arg0: i32) -> (i32, i32) {
    %c0_i32 = arith.constant 0 : i32
    %c0_i32_0 = arith.constant 0 : i32
    %c0_i32_1 = arith.constant 0 : i32
    return %c0_i32, %c0_i32_0 : i32, i32
  }
  func.func @transform_2(%arg0: i32) -> (i32, i32) {
    %c0_i32 = arith.constant 0 : i32
    %c0_i32_0 = arith.constant 0 : i32
    %c0_i32_1 = arith.constant 0 : i32
    return %c0_i32, %c0_i32_0 : i32, i32
  }
  func.func @transform_3(%arg0: i32) -> (i32, i32) {
    %c0_i32 = arith.constant 0 : i32
    %c0_i32_0 = arith.constant 0 : i32
    %c0_i32_1 = arith.constant 0 : i32
    return %c0_i32, %c0_i32_0 : i32, i32
  }
  func.func @transform_4(%arg0: i32) -> (i32, i32) {
    %c0_i32 = arith.constant 0 : i32
    %c0_i32_0 = arith.constant 0 : i32
    %c0_i32_1 = arith.constant 0 : i32
    return %c0_i32, %c0_i32_0 : i32, i32
  }
}

module attributes {stable_mosaic.version = 11 : i64} {
  func.func @_mid_fused_kernel(%arg0: i32, %arg1: i32, %arg2: memref<1x4x256xbf16, #tpu.memory_space<vmem>>, %arg3: memref<8x4xbf16, #tpu.memory_space<vmem>>, %arg4: memref<8x1xf32, #tpu.memory_space<vmem>>, %arg5: memref<8x1xf32, #tpu.memory_space<vmem>>, %arg6: memref<1x1x256xf32, #tpu.memory_space<vmem>>, %arg7: memref<1x8x1xf32, #tpu.memory_space<vmem>>, %arg8: memref<1x8x256xf32, #tpu.memory_space<vmem>>) attributes {dimension_semantics = [#tpu.dimension_semantics<parallel>, #tpu.dimension_semantics<parallel>], iteration_bounds = array<i64: 2, 1>, scalar_prefetch = 0 : i64, scratch_operands = 0 : i64, tpu.core_type = #tpu.core_type<tc>, window_params = [{transform_indices = @transform_0, window_bounds = array<i64: 1, 4, 256>}, {pipeline_mode = #tpu.pipeline_mode<synchronous>, transform_indices = @transform_1, window_bounds = array<i64: 8, 4>}, {pipeline_mode = #tpu.pipeline_mode<synchronous>, transform_indices = @transform_2, window_bounds = array<i64: 8, 1>}, {pipeline_mode = #tpu.pipeline_mode<synchronous>, transform_indices = @transform_3, window_bounds = array<i64: 8, 1>}, {transform_indices = @transform_4, window_bounds = array<i64: 1, 1, 256>}, {transform_indices = @transform_5, window_bounds = array<i64: 1, 8, 1>}, {transform_indices = @transform_6, window_bounds = array<i64: 1, 8, 256>}]} {
    %c0 = arith.constant 0 : index
    %c0_0 = arith.constant 0 : index
    %0 = vector.load %arg3[%c0, %c0_0] : memref<8x4xbf16, #tpu.memory_space<vmem>>, vector<8x4xbf16>
    %c0_1 = arith.constant 0 : index
    %c0_2 = arith.constant 0 : index
    %c0_3 = arith.constant 0 : index
    %1 = vector.load %arg2[%c0_1, %c0_2, %c0_3] : memref<1x4x256xbf16, #tpu.memory_space<vmem>>, vector<1x4x256xbf16>
    %2 = vector.shape_cast %1 : vector<1x4x256xbf16> to vector<4x256xbf16>
    %cst = arith.constant dense<0.000000e+00> : vector<8x256xf32>
    %3 = tpu.matmul %0, %2, %cst {dimension_numbers = #tpu.dot_dimension_numbers<[1], [0], [0], [1], [0, 0, 1, 1], [], []>} : vector<8x4xbf16>, vector<4x256xbf16>, vector<8x256xf32> -> vector<8x256xf32>
    %c0_4 = arith.constant 0 : index
    %c0_5 = arith.constant 0 : index
    %4 = vector.load %arg4[%c0_4, %c0_5] : memref<8x1xf32, #tpu.memory_space<vmem>>, vector<8x1xf32>
    %5 = vector.broadcast %4 : vector<8x1xf32> to vector<8x256xf32>
    %6 = arith.mulf %3, %5 : vector<8x256xf32>
    %c0_6 = arith.constant 0 : index
    %c0_7 = arith.constant 0 : index
    %7 = vector.load %arg5[%c0_6, %c0_7] : memref<8x1xf32, #tpu.memory_space<vmem>>, vector<8x1xf32>
    %8 = vector.broadcast %7 : vector<8x1xf32> to vector<8x256xf32>
    %9 = arith.addf %6, %8 : vector<8x256xf32>
    %cst_8 = arith.constant 0.000000e+00 : f32
    %10 = vector.broadcast %cst_8 : f32 to vector<8x256xf32>
    %11 = arith.maximumf %9, %10 : vector<8x256xf32>
    %c0_9 = arith.constant 0 : index
    %c0_10 = arith.constant 0 : index
    %c0_11 = arith.constant 0 : index
    %12 = vector.load %arg6[%c0_9, %c0_10, %c0_11] : memref<1x1x256xf32, #tpu.memory_space<vmem>>, vector<1x1x256xf32>
    %13 = vector.shape_cast %12 : vector<1x1x256xf32> to vector<1x256xf32>
    %14 = vector.broadcast %13 : vector<1x256xf32> to vector<8x256xf32>
    %15 = arith.mulf %14, %11 : vector<8x256xf32>
    %c0_12 = arith.constant 0 : index
    %c0_13 = arith.constant 0 : index
    %c0_14 = arith.constant 0 : index
    %16 = vector.load %arg7[%c0_12, %c0_13, %c0_14] : memref<1x8x1xf32, #tpu.memory_space<vmem>>, vector<1x8x1xf32>
    %17 = vector.shape_cast %16 : vector<1x8x1xf32> to vector<8x1xf32>
    %18 = vector.broadcast %17 : vector<8x1xf32> to vector<8x256xf32>
    %19 = arith.addf %15, %18 : vector<8x256xf32>
    %c0_15 = arith.constant 0 : index
    %c0_16 = arith.constant 0 : index
    %c0_17 = arith.constant 0 : index
    %20 = vector.load %arg8[%c0_15, %c0_16, %c0_17] : memref<1x8x256xf32, #tpu.memory_space<vmem>>, vector<1x8x256xf32>
    %21 = vector.shape_cast %20 : vector<1x8x256xf32> to vector<8x256xf32>
    %22 = vector.shape_cast %19 : vector<8x256xf32> to vector<1x8x256xf32>
    tpu.vector_store %arg8[%c0_15, %c0_16, %c0_17], %22 {strides = array<i32>} : memref<1x8x256xf32, #tpu.memory_space<vmem>>, vector<1x8x256xf32>,
    return
  }
  func.func @transform_0(%arg0: i32, %arg1: i32) -> (i32, i32, i32) {
    %c0_i32 = arith.constant 0 : i32
    %c0_i32_0 = arith.constant 0 : i32
    return %arg0, %c0_i32, %arg1 : i32, i32, i32
  }
  func.func @transform_1(%arg0: i32, %arg1: i32) -> (i32, i32) {
    %c0_i32 = arith.constant 0 : i32
    %c0_i32_0 = arith.constant 0 : i32
    %c0_i32_1 = arith.constant 0 : i32
    return %c0_i32, %c0_i32_0 : i32, i32
  }
  func.func @transform_2(%arg0: i32, %arg1: i32) -> (i32, i32) {
    %c0_i32 = arith.constant 0 : i32
    %c0_i32_0 = arith.constant 0 : i32
    %c0_i32_1 = arith.constant 0 : i32
    return %c0_i32, %c0_i32_0 : i32, i32
  }
  func.func @transform_3(%arg0: i32, %arg1: i32) -> (i32, i32) {
    %c0_i32 = arith.constant 0 : i32
    %c0_i32_0 = arith.constant 0 : i32
    %c0_i32_1 = arith.constant 0 : i32
    return %c0_i32, %c0_i32_0 : i32, i32
  }
  func.func @transform_4(%arg0: i32, %arg1: i32) -> (i32, i32, i32) {
    %c0_i32 = arith.constant 0 : i32
    %c0_i32_0 = arith.constant 0 : i32
    return %arg0, %c0_i32, %arg1 : i32, i32, i32
  }
  func.func @transform_5(%arg0: i32, %arg1: i32) -> (i32, i32, i32) {
    %c0_i32 = arith.constant 0 : i32
    %c0_i32_0 = arith.constant 0 : i32
    %c0_i32_1 = arith.constant 0 : i32
    return %arg0, %c0_i32, %c0_i32_0 : i32, i32, i32
  }
  func.func @transform_6(%arg0: i32, %arg1: i32) -> (i32, i32, i32) {
    %c0_i32 = arith.constant 0 : i32
    %c0_i32_0 = arith.constant 0 : i32
    return %arg0, %c0_i32, %arg1 : i32, i32, i32
  }
}

</mosaic_0001>

<bundles_post_ra>
// kernel: apn_forward.9
= control target key start
LH: loop header
LB: loop body
LE: loop exit
PB: predicated region body
PF: predicated region fallthrough
CT: control target
= control target key end

     0   :  { %s688_s0 = inlined_call_operand.vmem [shape: f32[25], index: 0, kind: input, shape index: {}]   ;;  %s689_s1 = inlined_call_operand.<no memory space> [shape: f32[1], index: 1, kind: input, shape index: {}]   ;;  %s690_s2 = inlined_call_operand.<no memory space> [shape: f32[1], index: 2, kind: input, shape index: {}]   ;;  %s691_s3 = inlined_call_operand.vmem [shape: f32[2,4,6,6], index: 3, kind: input, shape index: {}]   ;;  %s692_s4 = inlined_call_operand.vmem [shape: f32[2,1,4,4], index: 4, kind: output, shape index: {}]  }
   0x1   :  { %9 = sst [smem:[#allocation2]] %s689_s1 }
   0x2   :  { %10 = sst [smem:[#allocation3]] %s690_s2 }
   0x3   :  { %11 = vsyncpa [#allocation5], 0  ;;  %s585_s19 = smov 0  }
   0x4 LB: > { %s459_s20 = sadd.s32 4294967295, %s549_s19   ;;  %p461_p0 = scmp.ge.s32.totalorder %s549_s19, 1  ;;  %s549_s19 = sphi %s585_s19, %s17_s19  }
   0x5   : > { %p137_p1 = scmp.lt.s32.totalorder %s549_s19, 3  ;;  %s150_s22 = sshll.u32 %s688_s0, 4  ;;  %s151_s22 = int_to_ptr.vmem [resolvable:$true] %s150_s22 }
   0x6   : > { %p511_p3 = scmp.eq.s32.totalorder %s459_s20, 0  ;;  %s524_s23 = scalar_lea.vmem %s151_s22, 16 }
   0x7   : > { %p596_p2 = pnand %p461_p0, %p137_p1  ;;  %p525_p6 = scmp.ne.s32.totalorder %s151_s22, %s524_s23 }
   0x8   : > { %p532_p10 = scmp.lt.s32.totalorder %s151_s22, %s151_s22  ;;  %p533_p11 = scmp.lt.s32.totalorder %s524_s23, %s524_s23 }
   0x9   : > { %p507_p4 = pneg %p596_p2 }
   0xa   : > { %p534_p12 = por %p533_p11, %p532_p10 }
   0xb   : > { %p508_p5 = pnand %p511_p3, %p507_p4 }
   0xd   : > { %p526_p7 = pneg %p508_p5 }
   0xf   : > { %p527_p8 = pnand %p526_p7, %p525_p6 }
  0x11   : > { %p528_p9 = pneg %p527_p8 }
  0x13   : > { %p535_p13 = pnand %p534_p12, %p528_p9 }
  0x15   : > { %538 = shalt.err (!%p535_p13)
}
  0x16   : > { %s551_s24 = smov [#allocation4]   ;;  %177 = sbr.rel (%p596_p2) target bundleno = 211 (0xd3), region = 36 }
  0x17   : > { %510 = dma.vmem_to_smem (!%p508_p5), %s151_s22, 16, %s551_s24, [#allocation5]  }
  0x1d   : > { %544 = dma.done.wait (%p511_p3), [#allocation5], 16  }
  0x1e   : > { %546 = vsyncadd (%p511_p3), [#allocation5], 4294967280 }
  0x1f   : > { %183 = sfence }
  0x20   : > { %p203_p0 = scmp.lt.s32.totalorder %s459_s20, 1  ;;  %s471_s25 = sld [smem:[#allocation4 + $0x2]]  ;;  %vm392_vm0 = vcmask 27648  }
  0x21   : > { %s472_s26 = sld [smem:[#allocation4 + $0x3]]  ;;  %s473_s27 = sld [smem:[#allocation4 + $0x4]] }
  0x22   : > { %s695_s20 = smov (!%p203_p0, %s459_s20), 1  ;;  %s478_s29 = sld [smem:[#allocation4 + $0x7]] }
  0x23   : > { %s502_s28 = sshll.u32 %s695_s20, 5  ;;  %s479_s7 = sld [smem:[#allocation4 + $0x8]] }
  0x24   : > { %s613_s6 = scalar_lea.vmem %s691_s3, %s502_s28  ;;  %s480_s8 = sld [smem:[#allocation4 + $0x9]] }
  0x25   : > { %v212_v0 = vld [vmem:[%s613_s6] sm:$0xf]  ;;  %v469_v2 = vld [vmem:[%s613_s6 + $0x8] sm:$0xf]  ;;  %s484_s9 = sld [smem:[#allocation4 + $0xc]]  ;;  %s552_s10 = smov 127  }
  0x26   : > { %v224_v1 = vstv %s471_s25  ;;  %v619_v7 = vld [vmem:[%s613_s6 + $0x10] sm:$0xf]  ;;  %s621_s11 = sld [smem:[#allocation4 + $0xd]]  ;;  %v624_v10 = vld [vmem:[%s613_s6 + $0x18] sm:$0xf]  ;;  %s626_s12 = sld [smem:[#allocation4 + $0xe]] }
  0x27   : > { %v225_v3 = vmul.f32 %v224_v1, %v212_v0  ;;  %v232_v4 = vstv %s472_s26  ;;  %v240_v6 = vstv %s473_s27  ;;  %s553_s13 = smov 126   ;;  %s630_s14 = sld [smem:[#allocation4 + $0x11]]  ;;  %v635_v15 = vld [vmem:[%s613_s6 + $0x1] sm:$0xf]  ;;  %v642_v19 = vld [vmem:[%s613_s6 + $0x9] sm:$0xf] }
  0x28   : > { %v233_v5 = vmul.f32 %v469_v2, %v232_v4  ;;  %v241_v8 = vmul.f32 %v240_v6, %v212_v0  ;;  %v260_v9 = vstv %s478_s29  ;;  %s213_s15 = sld [smem:[#allocation4]]  ;;  %s470_s16 = sld [smem:[#allocation4 + $0x1]]  ;;  %v651_v28 = vld [vmem:[%s613_s6 + $0x11] sm:$0xf]  ;;  %v655_v30 = vld [vmem:[%s613_s6 + $0x19] sm:$0xf] }
  0x29   : > { %227 = vrot.lane.b32.xlu0 %v225_v3, %s552_s10  ;;  %v268_v11 = vstv %s479_s7  ;;  %v261_v12 = vmul.f32 %v619_v7, %v260_v9  ;;  %s492_s17 = sld [smem:[#allocation4 + $0x12]]  ;;  %s493_s18 = sld [smem:[#allocation4 + $0x13]]  ;;  %v662_v36 = vld [vmem:[%s613_s6 + $0x2] sm:$0xf]  ;;  %v495_v40 = vld [vmem:[%s613_s6 + $0xa] sm:$0xf] }
  0x2a   : > { %243 = vrot.lane.b32.xlu1 %v241_v8, %s553_s13  ;;  %v269_v13 = vmul.f32 %v624_v10, %v268_v11  ;;  %v276_v14 = vstv %s480_s8  ;;  %s497_s21 = sld [smem:[#allocation4 + $0x16]]  ;;  %s498_s1 = sld [smem:[#allocation4 + $0x17]] }
  0x2b   : > { %v294_v16 = vstv %s484_s9  ;;  %v277_v17 = vmul.f32 %v619_v7, %v276_v14  ;;  %s499_s22 = sld [smem:[#allocation4 + $0x18]]  ;;  %s475_s2 = sld [smem:[#allocation4 + $0x5]] }
  0x2c   : > { %v295_v18 = vmul.f32 %v294_v16, %v635_v15  ;;  %v302_v20 = vstv %s621_s11  ;;  %v310_v21 = vstv %s626_s12  ;;  %s477_s23 = sld [smem:[#allocation4 + $0x6]]  ;;  %s481_s24 = sld [smem:[#allocation4 + $0xa]] }
  0x2d   : > { %235 = vrot.lane.b32.xlu0 %v233_v5, %s552_s10  ;;  %v303_v24 = vmul.f32 %v642_v19, %v302_v20  ;;  %v311_v27 = vmul.f32 %v310_v21, %v635_v15  ;;  %v328_v29 = vstv %s630_s14  ;;  %s483_s25 = sld [smem:[#allocation4 + $0xb]]  ;;  %s488_s26 = sld [smem:[#allocation4 + $0xf]] }
  0x2e   : > { %263 = vrot.lane.b32.xlu1 %v261_v12, %s552_s10  ;;  %v214_v22 = vstv %s213_s15  ;;  %v220_v23 = vstv %s470_s16  ;;  %v329_v33 = vmul.f32 %v651_v28, %v328_v29  ;;  %s490_s27 = sld [smem:[#allocation4 + $0x10]]  ;;  %s494_s28 = sld [smem:[#allocation4 + $0x14]] }
  0x2f   : > { %v221_v25 = vmul.f32 %v469_v2, %v220_v23  ;;  %v215_v26 = vmul.f32 %v214_v22, %v212_v0  ;;  %v336_v31 = vstv %s492_s17  ;;  %v344_v35 = vstv %s493_s18  ;;  %s496_s29 = sld [smem:[#allocation4 + $0x15]]  ;;  %s385_s30 = sld [smem:[#allocation2]] }
  0x30   : > { %v337_v34 = vmul.f32 %v655_v30, %v336_v31  ;;  %v362_v37 = vstv %s497_s21  ;;  %v345_v38 = vmul.f32 %v651_v28, %v344_v35  ;;  %v370_v41 = vstv %s498_s1  ;;  %s388_s5 = sld [smem:[#allocation3]]  ;;  %s468_s6 = sshll.u32 %s695_s20, 2 }
  0x31   : > { %271 = vrot.lane.b32.xlu0 %v269_v13, %s552_s10  ;;  %v222_v32 = vadd.f32 %v221_v25, %v215_v26  ;;  %v363_v39 = vmul.f32 %v362_v37, %v662_v36  ;;  %v378_v42 = vstv %s499_s22  ;;  %v371_v43 = vmul.f32 %v495_v40, %v370_v41  ;;  %s211_s9 = scalar_lea.vmem %s692_s4, %s468_s6 }
  0x32   : > { %279 = vrot.lane.b32.xlu1 %v277_v17, %s553_s13  ;;  %v379_v44 = vmul.f32 %v378_v42, %v662_v36  ;;  %v250_v46 = vstv %s475_s2  ;;  %v256_v50 = vstv %s477_s23  ;;  %v285_v59 = vstv %s481_s24 }
  0x33   : > { %v251_v52 = vmul.f32 %v619_v7, %v250_v46  ;;  %v257_v54 = vmul.f32 %v624_v10, %v256_v50  ;;  %v290_v62 = vstv %s483_s25  ;;  %v286_v0 = vmul.f32 %v285_v59, %v635_v15 }
  0x34   : > { %v291_v2 = vmul.f32 %v642_v19, %v290_v62  ;;  %v319_v7 = vstv %s488_s26  ;;  %v324_v10 = vstv %s490_s27  ;;  %v353_v19 = vstv %s494_s28 }
  0x35   : > { %297 = vrot.lane.b32.xlu0 %v295_v18, %s552_s10  ;;  %v320_v12 = vmul.f32 %v651_v28, %v319_v7  ;;  %v325_v14 = vmul.f32 %v655_v30, %v324_v10  ;;  %v358_v22 = vstv %s496_s29 }
  0x36   : > { %305 = vrot.lane.b32.xlu1 %v303_v24, %s552_s10  ;;  %v354_v24 = vmul.f32 %v353_v19, %v662_v36  ;;  %v359_v26 = vmul.f32 %v495_v40, %v358_v22  ;;  %v389_v37 = vstv %s388_s5 }
  0x39   : > { %313 = vrot.lane.b32.xlu0 %v311_v27, %s553_s13 }
  0x3a   : > { %331 = vrot.lane.b32.xlu1 %v329_v33, %s552_s10 }
  0x3d   : > { %339 = vrot.lane.b32.xlu0 %v337_v34, %s552_s10  ;;  %v386_v34 = vstv %s385_s30 }
  0x3e   : > { %347 = vrot.lane.b32.xlu1 %v345_v38, %s553_s13 }
  0x41   : > { %365 = vrot.lane.b32.xlu0 %v363_v39, %s552_s10 }
  0x42   : > { %373 = vrot.lane.b32.xlu1 %v371_v43, %s552_s10 }
  0x45   : > { %381 = vrot.lane.b32.xlu0 %v379_v44, %s553_s13 }
  0x9b   : > { %v228_v45 = vpop.permute.xlu0 %227 }
  0x9c   : > { %v230_v47 = vadd.f32 %v228_v45, %v222_v32  ;;  %v244_v49 = vpop.permute.xlu1 %243 }
  0x9f   : > { %v236_v48 = vpop.permute.xlu0 %235 }
  0xa0   : > { %v238_v51 = vadd.f32 %v236_v48, %v230_v47  ;;  %v264_v55 = vpop.permute.xlu1 %263 }
  0xa2   : > { %v246_v53 = vadd.f32 %v244_v49, %v238_v51 }
  0xa3   : > { %v272_v58 = vpop.permute.xlu0 %271 }
  0xa4   : > { %v252_v56 = vadd.f32 %v251_v52, %v246_v53  ;;  %v280_v61 = vpop.permute.xlu1 %279 }
  0xa6   : > { %v258_v57 = vadd.f32 %v257_v54, %v252_v56 }
  0xa7   : > { %v298_v3 = vpop.permute.xlu0 %297 }
  0xa8   : > { %v266_v60 = vadd.f32 %v264_v55, %v258_v57  ;;  %v306_v6 = vpop.permute.xlu1 %305 }
  0xaa   : > { %v274_v63 = vadd.f32 %v272_v58, %v266_v60 }
  0xab   : > { %v314_v9 = vpop.permute.xlu0 %313 }
  0xac   : > { %v282_v1 = vadd.f32 %v280_v61, %v274_v63  ;;  %v332_v15 = vpop.permute.xlu1 %331 }
  0xae   : > { %v287_v4 = vadd.f32 %v286_v0, %v282_v1 }
  0xaf   : > { %v340_v18 = vpop.permute.xlu0 %339 }
  0xb0   : > { %v292_v5 = vadd.f32 %v291_v2, %v287_v4  ;;  %v348_v21 = vpop.permute.xlu1 %347 }
  0xb2   : > { %v300_v8 = vadd.f32 %v298_v3, %v292_v5 }
  0xb3   : > { %v366_v27 = vpop.permute.xlu0 %365 }
  0xb4   : > { %v308_v11 = vadd.f32 %v306_v6, %v300_v8  ;;  %v374_v30 = vpop.permute.xlu1 %373 }
  0xb6   : > { %v316_v13 = vadd.f32 %v314_v9, %v308_v11 }
  0xb7   : > { %v382_v32 = vpop.permute.xlu0 %381 }
  0xb8   : > { %v321_v16 = vadd.f32 %v320_v12, %v316_v13 }
  0xba   : > { %v326_v17 = vadd.f32 %v325_v14, %v321_v16 }
  0xbc   : > { %v334_v20 = vadd.f32 %v332_v15, %v326_v17 }
  0xbe   : > { %v342_v23 = vadd.f32 %v340_v18, %v334_v20 }
  0xc0   : > { %v350_v25 = vadd.f32 %v348_v21, %v342_v23 }
  0xc2   : > { %v355_v28 = vadd.f32 %v354_v24, %v350_v25 }
  0xc4   : > { %v360_v29 = vadd.f32 %v359_v26, %v355_v28 }
  0xc6   : > { %v368_v31 = vadd.f32 %v366_v27, %v360_v29 }
  0xc8   : > { %v376_v33 = vadd.f32 %v374_v30, %v368_v31 }
  0xca   : > { %v384_v35 = vadd.f32 %v382_v32, %v376_v33 }
  0xcc   : > { %v387_v38 = vmul.f32 %v386_v34, %v384_v35 }
  0xce   : > { %v390_v39 = vadd.f32 %v389_v37, %v387_v38 }
  0xd0   : > { %v391_v36 = vmax.f32 %v390_v39, 0.0 }
  0xd2   : > { %393 = vst.msk [vmem:[%s211_s9] sm:$0xf] %vm392_vm0, %v391_v36 }
  0xd3 PF: > { %s17_s19 = sadd.s32 1, %s549_s19  }
  0xd4   : > { %p14_p1 = scmp.ge.s32.totalorder %s17_s19, 4  }
  0xd6   :  { %16 = sbr.rel (!%p14_p1) target bundleno = 4 (0x4), region = 74 }
  0xdd   :  { %413 = vsyncpa [#allocation5], 1 }
  0xde   :  { %415 = vsyncpa [#allocation5 + $0x1], 1 }

// kernel: apn_forward.10
= control target key start
LH: loop header
LB: loop body
LE: loop exit
PB: predicated region body
PF: predicated region fallthrough
CT: control target
= control target key end

     0   :  { %s491_s0 = inlined_call_operand.vmem [shape: f32[9], index: 0, kind: input, shape index: {}]   ;;  %s492_s1 = inlined_call_operand.<no memory space> [shape: f32[1], index: 1, kind: input, shape index: {}]   ;;  %s493_s2 = inlined_call_operand.<no memory space> [shape: f32[1], index: 2, kind: input, shape index: {}]   ;;  %s494_s3 = inlined_call_operand.vmem [shape: f32[2,4,3,3], index: 3, kind: input, shape index: {}]   ;;  %s495_s4 = inlined_call_operand.vmem [shape: f32[2,1,2,2], index: 4, kind: output, shape index: {}]  }
   0x1   :  { %9 = sst [smem:[#allocation2]] %s492_s1 }
   0x2   :  { %10 = sst [smem:[#allocation3]] %s493_s2 }
   0x3   :  { %11 = vsyncpa [#allocation5], 0  ;;  %s448_s19 = smov 0  }
   0x4 LB: > { %s343_s20 = sadd.s32 4294967295, %s413_s19   ;;  %p345_p0 = scmp.ge.s32.totalorder %s413_s19, 1  ;;  %s413_s19 = sphi %s448_s19, %s17_s19  }
   0x5   : > { %p137_p1 = scmp.lt.s32.totalorder %s413_s19, 3  ;;  %s150_s22 = sshll.u32 %s491_s0, 4  ;;  %s151_s22 = int_to_ptr.vmem [resolvable:$true] %s150_s22 }
   0x6   : > { %p376_p3 = scmp.eq.s32.totalorder %s343_s20, 0  ;;  %s388_s23 = scalar_lea.vmem %s151_s22, 16 }
   0x7   : > { %p459_p2 = pnand %p345_p0, %p137_p1  ;;  %p389_p6 = scmp.ne.s32.totalorder %s151_s22, %s388_s23 }
   0x8   : > { %p396_p10 = scmp.lt.s32.totalorder %s151_s22, %s151_s22  ;;  %p397_p11 = scmp.lt.s32.totalorder %s388_s23, %s388_s23 }
   0x9   : > { %p372_p4 = pneg %p459_p2 }
   0xa   : > { %p398_p12 = por %p397_p11, %p396_p10 }
   0xb   : > { %p373_p5 = pnand %p376_p3, %p372_p4 }
   0xd   : > { %p390_p7 = pneg %p373_p5 }
   0xf   : > { %p391_p8 = pnand %p390_p7, %p389_p6 }
  0x11   : > { %p392_p9 = pneg %p391_p8 }
  0x13   : > { %p399_p13 = pnand %p398_p12, %p392_p9 }
  0x15   : > { %402 = shalt.err (!%p399_p13)
}
  0x16   : > { %s415_s24 = smov [#allocation4]   ;;  %177 = sbr.rel (%p459_p2) target bundleno = 178 (0xb2), region = 36 }
  0x17   : > { %375 = dma.vmem_to_smem (!%p373_p5), %s151_s22, 16, %s415_s24, [#allocation5]  }
  0x1d   : > { %408 = dma.done.wait (%p376_p3), [#allocation5], 16  }
  0x1e   : > { %410 = vsyncadd (%p376_p3), [#allocation5], 4294967280 }
  0x1f   : > { %183 = sfence }
  0x20   : > { %p203_p0 = scmp.lt.s32.totalorder %s343_s20, 1  ;;  %s213_s25 = sld [smem:[#allocation4]]  ;;  %vm276_vm0 = vcmask 9216  }
  0x21   : > { %s355_s26 = sld [smem:[#allocation4 + $0x2]]  ;;  %s360_s27 = sld [smem:[#allocation4 + $0x5]] }
  0x22   : > { %s498_s20 = smov (!%p203_p0, %s343_s20), 1  ;;  %s364_s29 = sld [smem:[#allocation4 + $0x8]] }
  0x23   : > { %s367_s28 = sshll.u32 %s498_s20, 4  ;;  %s354_s7 = sld [smem:[#allocation4 + $0x1]] }
  0x24   : > { %s476_s6 = scalar_lea.vmem %s494_s3, %s367_s28  ;;  %s416_s8 = smov 127  }
  0x25   : > { %v212_v0 = vld [vmem:[%s476_s6] sm:$0x3]  ;;  %v356_v3 = vld [vmem:[%s476_s6 + $0x8] sm:$0x3]  ;;  %v353_v7 = vld [vmem:[%s476_s6 + $0x4] sm:$0x3] }
  0x26   : > { %v214_v1 = vstv %s213_s25  ;;  %v251_v5 = vld [vmem:[%s476_s6 + $0x1] sm:$0x3]  ;;  %s357_s9 = sld [smem:[#allocation4 + $0x3]]  ;;  %s359_s10 = sld [smem:[#allocation4 + $0x4]]  ;;  %v358_v16 = vld [vmem:[%s476_s6 + $0xc] sm:$0x3] }
  0x27   : > { %v224_v2 = vstv %s355_s26  ;;  %v244_v6 = vstv %s360_s27  ;;  %v215_v8 = vmul.f32 %v214_v1, %v212_v0  ;;  %s361_s11 = sld [smem:[#allocation4 + $0x6]]  ;;  %s363_s12 = sld [smem:[#allocation4 + $0x7]]  ;;  %v362_v25 = vld [vmem:[%s476_s6 + $0x5] sm:$0x3] }
  0x28   : > { %v225_v4 = vmul.f32 %v224_v2, %v212_v0  ;;  %v245_v9 = vmul.f32 %v356_v3, %v244_v6  ;;  %v262_v10 = vstv %s364_s29  ;;  %s269_s13 = sld [smem:[#allocation2]]  ;;  %s352_s15 = sshll.u32 %s498_s20, 1 }
  0x29   : > { %v263_v11 = vmul.f32 %v262_v10, %v251_v5  ;;  %v220_v12 = vstv %s354_s7  ;;  %s272_s14 = sld [smem:[#allocation3]]  ;;  %s211_s18 = scalar_lea.vmem %s495_s4, %s352_s15 }
  0x2a   : > { %227 = vrot.lane.b32.xlu0 %v225_v4, %s416_s8  ;;  %v221_v13 = vmul.f32 %v353_v7, %v220_v12 }
  0x2b   : > { %265 = vrot.lane.b32.xlu1 %v263_v11, %s416_s8 }
  0x2c   : > { %v222_v14 = vadd.f32 %v221_v13, %v215_v8  ;;  %v234_v15 = vstv %s357_s9  ;;  %v240_v17 = vstv %s359_s10 }
  0x2d   : > { %v235_v18 = vmul.f32 %v356_v3, %v234_v15  ;;  %v241_v21 = vmul.f32 %v358_v16, %v240_v17  ;;  %v253_v22 = vstv %s361_s11  ;;  %v258_v26 = vstv %s363_s12 }
  0x2e   : > { %247 = vrot.lane.b32.xlu0 %v245_v9, %s416_s8  ;;  %v254_v27 = vmul.f32 %v253_v22, %v251_v5  ;;  %v259_v30 = vmul.f32 %v362_v25, %v258_v26  ;;  %v270_v34 = vstv %s269_s13 }
  0x2f   : > { %v273_v36 = vstv %s272_s14 }
  0x9c   : > { %v228_v19 = vpop.permute.xlu0 %227 }
  0x9d   : > { %v230_v20 = vadd.f32 %v228_v19, %v222_v14  ;;  %v266_v32 = vpop.permute.xlu1 %265 }
  0x9f   : > { %v236_v23 = vadd.f32 %v235_v18, %v230_v20 }
  0xa0   : > { %v248_v24 = vpop.permute.xlu0 %247 }
  0xa1   : > { %v242_v28 = vadd.f32 %v241_v21, %v236_v23 }
  0xa3   : > { %v250_v29 = vadd.f32 %v248_v24, %v242_v28 }
  0xa5   : > { %v255_v31 = vadd.f32 %v254_v27, %v250_v29 }
  0xa7   : > { %v260_v33 = vadd.f32 %v259_v30, %v255_v31 }
  0xa9   : > { %v268_v35 = vadd.f32 %v266_v32, %v260_v33 }
  0xab   : > { %v271_v37 = vmul.f32 %v270_v34, %v268_v35 }
  0xad   : > { %v274_v38 = vadd.f32 %v273_v36, %v271_v37 }
  0xaf   : > { %v275_v39 = vmax.f32 %v274_v38, 0.0 }
  0xb1   : > { %277 = vst.msk [vmem:[%s211_s18] sm:$0x3] %vm276_vm0, %v275_v39 }
  0xb2 PF: > { %s17_s19 = sadd.s32 1, %s413_s19  }
  0xb3   : > { %p14_p1 = scmp.ge.s32.totalorder %s17_s19, 4  }
  0xb5   :  { %16 = sbr.rel (!%p14_p1) target bundleno = 4 (0x4), region = 74 }
  0xbc   :  { %297 = vsyncpa [#allocation5], 1 }
  0xbd   :  { %299 = vsyncpa [#allocation5 + $0x1], 1 }

// kernel: apn_forward.11
= control target key start
LH: loop header
LB: loop body
LE: loop exit
PB: predicated region body
PF: predicated region fallthrough
CT: control target
= control target key end

     0   :  { %s482_s0 = inlined_call_operand.vmem [shape: f32[9], index: 0, kind: input, shape index: {}]   ;;  %s483_s1 = inlined_call_operand.<no memory space> [shape: f32[1], index: 1, kind: input, shape index: {}]   ;;  %s484_s2 = inlined_call_operand.<no memory space> [shape: f32[1], index: 2, kind: input, shape index: {}]   ;;  %s485_s3 = inlined_call_operand.vmem [shape: f32[2,1,4,4], index: 3, kind: input, shape index: {}]   ;;  %s486_s4 = inlined_call_operand.vmem [shape: f32[2,1,2,2], index: 4, kind: output, shape index: {}]  }
   0x1   :  { %9 = sst [smem:[#allocation2]] %s483_s1 }
   0x2   :  { %10 = sst [smem:[#allocation3]] %s484_s2 }
   0x3   :  { %11 = vsyncpa [#allocation5], 0  ;;  %s447_s19 = smov 0  }
   0x4 LB: > { %s346_s20 = sadd.s32 4294967295, %s411_s19   ;;  %p348_p0 = scmp.ge.s32.totalorder %s411_s19, 1  ;;  %s411_s19 = sphi %s447_s19, %s17_s19  }
   0x5   : > { %p137_p1 = scmp.lt.s32.totalorder %s411_s19, 3  ;;  %s150_s22 = sshll.u32 %s482_s0, 4  ;;  %s151_s22 = int_to_ptr.vmem [resolvable:$true] %s150_s22 }
   0x6   : > { %p373_p3 = scmp.eq.s32.totalorder %s346_s20, 0  ;;  %s386_s23 = scalar_lea.vmem %s151_s22, 16 }
   0x7   : > { %p458_p2 = pnand %p348_p0, %p137_p1  ;;  %p387_p6 = scmp.ne.s32.totalorder %s151_s22, %s386_s23 }
   0x8   : > { %p394_p10 = scmp.lt.s32.totalorder %s151_s22, %s151_s22  ;;  %p395_p11 = scmp.lt.s32.totalorder %s386_s23, %s386_s23 }
   0x9   : > { %p369_p4 = pneg %p458_p2 }
   0xa   : > { %p396_p12 = por %p395_p11, %p394_p10 }
   0xb   : > { %p370_p5 = pnand %p373_p3, %p369_p4 }
   0xd   : > { %p388_p7 = pneg %p370_p5 }
   0xf   : > { %p389_p8 = pnand %p388_p7, %p387_p6 }
  0x11   : > { %p390_p9 = pneg %p389_p8 }
  0x13   : > { %p397_p13 = pnand %p396_p12, %p390_p9 }
  0x15   : > { %400 = shalt.err (!%p397_p13)
}
  0x16   : > { %s413_s24 = smov [#allocation4]   ;;  %176 = sbr.rel (%p458_p2) target bundleno = 181 (0xb5), region = 36 }
  0x17   : > { %372 = dma.vmem_to_smem (!%p370_p5), %s151_s22, 16, %s413_s24, [#allocation5]  }
  0x1d   : > { %406 = dma.done.wait (%p373_p3), [#allocation5], 16  }
  0x1e   : > { %408 = vsyncadd (%p373_p3), [#allocation5], 4294967280 }
  0x1f   : > { %182 = sfence }
  0x20   : > { %p201_p0 = scmp.lt.s32.totalorder %s346_s20, 1  ;;  %s355_s25 = sld [smem:[#allocation4 + $0x1]]  ;;  %vm279_vm0 = vcmask 9216  }
  0x21   : > { %s356_s26 = sld [smem:[#allocation4 + $0x2]]  ;;  %s358_s27 = sld [smem:[#allocation4 + $0x4]] }
  0x22   : > { %s489_s20 = smov (!%p201_p0, %s346_s20), 1  ;;  %s359_s6 = sld [smem:[#allocation4 + $0x5]] }
  0x23   : > { %s353_s28 = sshll.u32 %s489_s20, 2  ;;  %s361_s7 = sld [smem:[#allocation4 + $0x7]] }
  0x24   : > { %s204_s5 = scalar_lea.vmem %s485_s3, %s353_s28  ;;  %s362_s8 = sld [smem:[#allocation4 + $0x8]] }
  0x25   : > { %v209_v0 = vld [vmem:[%s204_s5] sm:$0x3]  ;;  %s414_s9 = smov 127   ;;  %v251_v8 = vld [vmem:[%s204_s5 + $0x2] sm:$0x3]  ;;  %s415_s10 = smov 126  }
  0x26   : > { %v215_v1 = vstv %s355_s25  ;;  %v230_v4 = vld [vmem:[%s204_s5 + $0x1] sm:$0x3]  ;;  %s210_s11 = sld [smem:[#allocation4]]  ;;  %s357_s12 = sld [smem:[#allocation4 + $0x3]] }
  0x27   : > { %v216_v2 = vmul.f32 %v215_v1, %v209_v0  ;;  %v223_v3 = vstv %s356_s26  ;;  %v236_v6 = vstv %s358_s27  ;;  %s360_s13 = sld [smem:[#allocation4 + $0x6]]  ;;  %s272_s14 = sld [smem:[#allocation2]] }
  0x28   : > { %v224_v5 = vmul.f32 %v223_v3, %v209_v0  ;;  %v237_v7 = vmul.f32 %v236_v6, %v230_v4  ;;  %v244_v9 = vstv %s359_s6  ;;  %s275_s15 = sld [smem:[#allocation3]]  ;;  %s354_s16 = sshll.u32 %s489_s20, 1 }
  0x29   : > { %218 = vrot.lane.b32.xlu0 %v216_v2, %s414_s9  ;;  %v245_v10 = vmul.f32 %v244_v9, %v230_v4  ;;  %v257_v11 = vstv %s361_s7  ;;  %s208_s21 = scalar_lea.vmem %s486_s4, %s354_s16 }
  0x2a   : > { %239 = vrot.lane.b32.xlu1 %v237_v7, %s414_s9  ;;  %v265_v12 = vstv %s362_s8  ;;  %v258_v13 = vmul.f32 %v257_v11, %v251_v8 }
  0x2b   : > { %v266_v14 = vmul.f32 %v265_v12, %v251_v8 }
  0x2c   : > { %v211_v15 = vstv %s210_s11  ;;  %v232_v18 = vstv %s357_s12 }
  0x2d   : > { %226 = vrot.lane.b32.xlu0 %v224_v5, %s415_s10  ;;  %v212_v16 = vmul.f32 %v211_v15, %v209_v0  ;;  %v233_v21 = vmul.f32 %v232_v18, %v230_v4  ;;  %v253_v24 = vstv %s360_s13  ;;  %v273_v34 = vstv %s272_s14 }
  0x2e   : > { %247 = vrot.lane.b32.xlu1 %v245_v10, %s415_s10  ;;  %v254_v28 = vmul.f32 %v253_v24, %v251_v8  ;;  %v276_v36 = vstv %s275_s15 }
  0x31   : > { %260 = vrot.lane.b32.xlu0 %v258_v13, %s414_s9 }
  0x32   : > { %268 = vrot.lane.b32.xlu1 %v266_v14, %s415_s10 }
  0x9b   : > { %v219_v17 = vpop.permute.xlu0 %218 }
  0x9c   : > { %v221_v19 = vadd.f32 %v219_v17, %v212_v16  ;;  %v240_v20 = vpop.permute.xlu1 %239 }
  0x9f   : > { %v227_v22 = vpop.permute.xlu0 %226 }
  0xa0   : > { %v229_v23 = vadd.f32 %v227_v22, %v221_v19  ;;  %v248_v26 = vpop.permute.xlu1 %247 }
  0xa2   : > { %v234_v25 = vadd.f32 %v233_v21, %v229_v23 }
  0xa3   : > { %v261_v30 = vpop.permute.xlu0 %260 }
  0xa4   : > { %v242_v27 = vadd.f32 %v240_v20, %v234_v25  ;;  %v269_v32 = vpop.permute.xlu1 %268 }
  0xa6   : > { %v250_v29 = vadd.f32 %v248_v26, %v242_v27 }
  0xa8   : > { %v255_v31 = vadd.f32 %v254_v28, %v250_v29 }
  0xaa   : > { %v263_v33 = vadd.f32 %v261_v30, %v255_v31 }
  0xac   : > { %v271_v35 = vadd.f32 %v269_v32, %v263_v33 }
  0xae   : > { %v274_v37 = vmul.f32 %v273_v34, %v271_v35 }
  0xb0   : > { %v277_v38 = vadd.f32 %v276_v36, %v274_v37 }
  0xb2   : > { %v278_v39 = vmax.f32 %v277_v38, 0.0 }
  0xb4   : > { %280 = vst.msk [vmem:[%s208_s21] sm:$0x3] %vm279_vm0, %v278_v39 }
  0xb5 PF: > { %s17_s19 = sadd.s32 1, %s411_s19  }
  0xb6   : > { %p14_p1 = scmp.ge.s32.totalorder %s17_s19, 4  }
  0xb8   :  { %16 = sbr.rel (!%p14_p1) target bundleno = 4 (0x4), region = 71 }
  0xbf   :  { %300 = vsyncpa [#allocation5], 1 }
  0xc0   :  { %302 = vsyncpa [#allocation5 + $0x1], 1 }

// kernel: apn_forward.8
= control target key start
LH: loop header
LB: loop body
LE: loop exit
PB: predicated region body
PF: predicated region fallthrough
CT: control target
= control target key end

     0   :  { %s2850_s0 = inlined_call_operand.vmem [shape: f32[196], index: 0, kind: input, shape index: {}]   ;;  %s2851_s1 = inlined_call_operand.<no memory space> [shape: f32[1], index: 1, kind: input, shape index: {}]   ;;  %s2852_s2 = inlined_call_operand.<no memory space> [shape: f32[1], index: 2, kind: input, shape index: {}]   ;;  %s2853_s3 = inlined_call_operand.vmem [shape: f32[2,16,11,11], index: 3, kind: input, shape index: {}]   ;;  %s2854_s4 = inlined_call_operand.vmem [shape: f32[2,1,8,8], index: 4, kind: output, shape index: {}]  }
   0x1   :  { %9 = sst [smem:[#allocation2]] %s2851_s1 }
   0x2   :  { %10 = sst [smem:[#allocation3]] %s2852_s2 }
   0x3   :  { %11 = vsyncpa [#allocation5], 0  ;;  %s2056_s19 = smov 0  }
   0x4 LB: > { %s1701_s20 = sadd.s32 4294967295, %s2019_s19   ;;  %p1703_p0 = scmp.ge.s32.totalorder %s2019_s19, 1  ;;  %s2019_s19 = sphi %s2056_s19, %s17_s19  }
   0x5   : > { %p137_p1 = scmp.lt.s32.totalorder %s2019_s19, 3  ;;  %s150_s22 = sshll.u32 %s2850_s0, 4  ;;  %s151_s22 = int_to_ptr.vmem [resolvable:$true] %s150_s22 }
   0x6   : > { %p1969_p3 = scmp.eq.s32.totalorder %s1701_s20, 0  ;;  %s1994_s23 = scalar_lea.vmem %s151_s22, 32 }
   0x7   : > { %p2067_p2 = pnand %p1703_p0, %p137_p1  ;;  %p1995_p6 = scmp.ne.s32.totalorder %s151_s22, %s1994_s23 }
   0x8   : > { %p2002_p10 = scmp.lt.s32.totalorder %s151_s22, %s151_s22  ;;  %p2003_p11 = scmp.lt.s32.totalorder %s1994_s23, %s1994_s23 }
   0x9   : > { %p1965_p4 = pneg %p2067_p2 }
   0xa   : > { %p2004_p12 = por %p2003_p11, %p2002_p10 }
   0xb   : > { %p1966_p5 = pnand %p1969_p3, %p1965_p4 }
   0xd   : > { %p1996_p7 = pneg %p1966_p5 }
   0xf   : > { %p1997_p8 = pnand %p1996_p7, %p1995_p6 }
  0x11   : > { %p1998_p9 = pneg %p1997_p8 }
  0x13   : > { %p2005_p13 = pnand %p2004_p12, %p1998_p9 }
  0x15   : > { %2008 = shalt.err (!%p2005_p13)
}
  0x16   : > { %s2021_s24 = smov [#allocation4]   ;;  %177 = sbr.rel (%p2067_p2) target bundleno = 553 (0x229), region = 36 }
  0x17   : > { %1968 = dma.vmem_to_smem (!%p1966_p5), %s151_s22, 32, %s2021_s24, [#allocation5]  }
  0x1d   : > { %2014 = dma.done.wait (%p1969_p3), [#allocation5], 32  }
  0x1e   : > { %2016 = vsyncadd (%p1969_p3), [#allocation5], 4294967264 }
  0x1f   : > { %183 = sfence }
  0x20   : > { %p203_p0 = scmp.lt.s32.totalorder %s1701_s20, 1  ;;  %s1713_s25 = sld [smem:[#allocation4 + $0x2]]  ;;  %vm1634_vm0 = vcmask 64512  }
  0x21   : > { %s1715_s26 = sld [smem:[#allocation4 + $0x4]]  ;;  %s1714_s27 = sld [smem:[#allocation4 + $0x3]] }
  0x22   : > { %s2857_s20 = smov (!%p203_p0, %s1701_s20), 1  ;;  %s1716_s29 = sld [smem:[#allocation4 + $0x5]] }
  0x23   : > { %s1960_s28 = sshll.u32 %s2857_s20, 8  ;;  %s1717_s7 = sld [smem:[#allocation4 + $0x6]] }
  0x24   : > { %s2084_s6 = scalar_lea.vmem %s2853_s3, %s1960_s28  ;;  %s1722_s8 = sld [smem:[#allocation4 + $0x9]] }
  0x25   : > { %v2087_v0 = vld [vmem:[%s2084_s6] sm:$0xff]  ;;  %v2091_v4 = vld [vmem:[%s2084_s6 + $0x10] sm:$0xff]  ;;  %s1723_s9 = sld [smem:[#allocation4 + $0xa]]  ;;  %s1724_s10 = sld [smem:[#allocation4 + $0xb]] }
  0x26   : > { %v224_v1 = vstv %s1713_s25  ;;  %s2022_s11 = smov 127   ;;  %s2023_s12 = smov 126   ;;  %v2099_v11 = vld [vmem:[%s2084_s6 + $0x20] sm:$0xff]  ;;  %v2106_v15 = vld [vmem:[%s2084_s6 + $0x30] sm:$0xff] }
  0x27   : > { %v225_v2 = vmul.f32 %v224_v1, %v2087_v0  ;;  %v240_v3 = vstv %s1715_s26  ;;  %v232_v6 = vstv %s1714_s27  ;;  %s1725_s13 = sld [smem:[#allocation4 + $0xc]]  ;;  %s1726_s14 = sld [smem:[#allocation4 + $0xd]]  ;;  %v2117_v24 = vld [vmem:[%s2084_s6 + $0x1] sm:$0xff]  ;;  %v2120_v26 = vld [vmem:[%s2084_s6 + $0x11] sm:$0xff] }
  0x28   : > { %v241_v5 = vmul.f32 %v240_v3, %v2087_v0  ;;  %v233_v7 = vmul.f32 %v2091_v4, %v232_v6  ;;  %v248_v8 = vstv %s1716_s29  ;;  %s1730_s15 = sld [smem:[#allocation4 + $0x10]]  ;;  %s1731_s16 = sld [smem:[#allocation4 + $0x11]]  ;;  %v2131_v36 = vld [vmem:[%s2084_s6 + $0x21] sm:$0xff]  ;;  %v2140_v43 = vld [vmem:[%s2084_s6 + $0x31] sm:$0xff] }
  0x29   : > { %227 = vrot.lane.b32.xlu0 %v225_v2, %s2022_s11  ;;  %v249_v9 = vmul.f32 %v2091_v4, %v248_v8  ;;  %v256_v10 = vstv %s1717_s7  ;;  %s2024_s17 = smov 125   ;;  %s1732_s18 = sld [smem:[#allocation4 + $0x12]]  ;;  %v2153_v53 = vld [vmem:[%s2084_s6 + $0x2] sm:$0xff]  ;;  %v2156_v55 = vld [vmem:[%s2084_s6 + $0x12] sm:$0xff] }
  0x2a   : > { %243 = vrot.lane.b32.xlu1 %v241_v5, %s2023_s12  ;;  %v276_v12 = vstv %s1722_s8  ;;  %v257_v13 = vmul.f32 %v256_v10, %v2087_v0  ;;  %s1733_s21 = sld [smem:[#allocation4 + $0x13]]  ;;  %s1734_s1 = sld [smem:[#allocation4 + $0x14]] }
  0x2b   : > { %v277_v14 = vmul.f32 %v2099_v11, %v276_v12  ;;  %v284_v16 = vstv %s1723_s9  ;;  %v292_v17 = vstv %s1724_s10  ;;  %s1739_s22 = sld [smem:[#allocation4 + $0x17]]  ;;  %s213_s2 = sld [smem:[#allocation4]] }
  0x2c   : > { %v285_v18 = vmul.f32 %v2106_v15, %v284_v16  ;;  %v293_v19 = vmul.f32 %v2099_v11, %v292_v17  ;;  %s1712_s23 = sld [smem:[#allocation4 + $0x1]]  ;;  %s1740_s24 = sld [smem:[#allocation4 + $0x18]]  ;;  %v2188_v17 = vld [vmem:[%s2084_s6 + $0x13] sm:$0xff] }
  0x2d   : > { %235 = vrot.lane.b32.xlu0 %v233_v7, %s2022_s11  ;;  %v300_v20 = vstv %s1725_s13  ;;  %v308_v21 = vstv %s1726_s14  ;;  %s1741_s25 = sld [smem:[#allocation4 + $0x19]]  ;;  %s1742_s26 = sld [smem:[#allocation4 + $0x1a]] }
  0x2e   : > { %251 = vrot.lane.b32.xlu1 %v249_v9, %s2023_s12  ;;  %v301_v22 = vmul.f32 %v2106_v15, %v300_v20  ;;  %v309_v23 = vmul.f32 %v2099_v11, %v308_v21  ;;  %v326_v25 = vstv %s1730_s15  ;;  %v334_v27 = vstv %s1731_s16  ;;  %s1743_s27 = sld [smem:[#allocation4 + $0x1b]]  ;;  %s1747_s28 = sld [smem:[#allocation4 + $0x1e]] }
  0x2f   : > { %v327_v28 = vmul.f32 %v326_v25, %v2117_v24  ;;  %v335_v29 = vmul.f32 %v2120_v26, %v334_v27  ;;  %v342_v30 = vstv %s1732_s18  ;;  %s1748_s29 = sld [smem:[#allocation4 + $0x1f]]  ;;  %s1749_s30 = sld [smem:[#allocation4 + $0x20]] }
  0x30   : > { %v350_v31 = vstv %s1733_s21  ;;  %v343_v32 = vmul.f32 %v342_v30, %v2117_v24  ;;  %v358_v34 = vstv %s1734_s1  ;;  %s1750_s5 = sld [smem:[#allocation4 + $0x21]]  ;;  %s1751_s7 = sld [smem:[#allocation4 + $0x22]] }
  0x31   : > { %259 = vrot.lane.b32.xlu0 %v257_v13, %s2024_s17  ;;  %v351_v33 = vmul.f32 %v2120_v26, %v350_v31  ;;  %v214_v35 = vstv %s213_s2  ;;  %v376_v37 = vstv %s1739_s22  ;;  %v359_v41 = vmul.f32 %v358_v34, %v2117_v24  ;;  %s1756_s8 = sld [smem:[#allocation4 + $0x25]]  ;;  %s1757_s9 = sld [smem:[#allocation4 + $0x26]] }
  0x32   : > { %279 = vrot.lane.b32.xlu1 %v277_v14, %s2022_s11  ;;  %v220_v38 = vstv %s1712_s23  ;;  %v215_v39 = vmul.f32 %v214_v35, %v2087_v0  ;;  %v377_v42 = vmul.f32 %v2131_v36, %v376_v37  ;;  %v384_v44 = vstv %s1740_s24  ;;  %s1758_s10 = sld [smem:[#allocation4 + $0x27]]  ;;  %s1759_s13 = sld [smem:[#allocation4 + $0x28]]  ;;  %v2167_v0 = vld [vmem:[%s2084_s6 + $0x22] sm:$0xff] }
  0x33   : > { %v221_v40 = vmul.f32 %v2091_v4, %v220_v38  ;;  %v392_v46 = vstv %s1741_s25  ;;  %v385_v47 = vmul.f32 %v2140_v43, %v384_v44  ;;  %v400_v49 = vstv %s1742_s26  ;;  %s1760_s14 = sld [smem:[#allocation4 + $0x29]]  ;;  %v2174_v4 = vld [vmem:[%s2084_s6 + $0x32] sm:$0xff]  ;;  %s1764_s15 = sld [smem:[#allocation4 + $0x2c]]  ;;  %v2185_v14 = vld [vmem:[%s2084_s6 + $0x3] sm:$0xff] }
  0x34   : > { %v393_v48 = vmul.f32 %v2131_v36, %v392_v46  ;;  %v408_v50 = vstv %s1743_s27  ;;  %v401_v51 = vmul.f32 %v2140_v43, %v400_v49  ;;  %v426_v54 = vstv %s1747_s28  ;;  %s1765_s16 = sld [smem:[#allocation4 + $0x2d]]  ;;  %s1766_s18 = sld [smem:[#allocation4 + $0x2e]]  ;;  %v2220_v46 = vld [vmem:[%s2084_s6 + $0x70] sm:$0xff] }
  0x35   : > { %287 = vrot.lane.b32.xlu0 %v285_v18, %s2022_s11  ;;  %v2142_v45 = vadd.f32 %v221_v40, %v215_v39  ;;  %v409_v52 = vmul.f32 %v2131_v36, %v408_v50  ;;  %v434_v56 = vstv %s1748_s29  ;;  %v427_v57 = vmul.f32 %v426_v54, %v2153_v53  ;;  %s1767_s21 = sld [smem:[#allocation4 + $0x2f]]  ;;  %s1768_s1 = sld [smem:[#allocation4 + $0x30]] }
  0x36   : > { %295 = vrot.lane.b32.xlu1 %v293_v19, %s2023_s12  ;;  %v435_v58 = vmul.f32 %v2156_v55, %v434_v56  ;;  %v442_v59 = vstv %s1749_s30  ;;  %v450_v60 = vstv %s1750_s5  ;;  %v458_v63 = vstv %s1751_s7  ;;  %s1773_s22 = sld [smem:[#allocation4 + $0x33]]  ;;  %s1774_s2 = sld [smem:[#allocation4 + $0x34]] }
  0x37   : > { %v443_v61 = vmul.f32 %v442_v59, %v2153_v53  ;;  %v451_v62 = vmul.f32 %v2156_v55, %v450_v60  ;;  %v476_v1 = vstv %s1756_s8  ;;  %v459_v2 = vmul.f32 %v458_v63, %v2153_v53  ;;  %s1775_s23 = sld [smem:[#allocation4 + $0x35]]  ;;  %s1776_s24 = sld [smem:[#allocation4 + $0x36]] }
  0x38   : > { %v477_v3 = vmul.f32 %v2167_v0, %v476_v1  ;;  %v484_v5 = vstv %s1757_s9  ;;  %v492_v6 = vstv %s1758_s10  ;;  %v500_v9 = vstv %s1759_s13  ;;  %s1777_s25 = sld [smem:[#allocation4 + $0x37]]  ;;  %s1782_s26 = sld [smem:[#allocation4 + $0x3a]] }
  0x39   : > { %303 = vrot.lane.b32.xlu0 %v301_v22, %s2023_s12  ;;  %v485_v7 = vmul.f32 %v2174_v4, %v484_v5  ;;  %v493_v8 = vmul.f32 %v2167_v0, %v492_v6  ;;  %v508_v10 = vstv %s1760_s14  ;;  %v501_v12 = vmul.f32 %v2174_v4, %v500_v9  ;;  %s1783_s27 = sld [smem:[#allocation4 + $0x3b]]  ;;  %s1784_s28 = sld [smem:[#allocation4 + $0x3c]] }
  0x3a   : > { %311 = vrot.lane.b32.xlu1 %v309_v23, %s2024_s17  ;;  %v509_v13 = vmul.f32 %v2167_v0, %v508_v10  ;;  %v526_v16 = vstv %s1764_s15  ;;  %v534_v18 = vstv %s1765_s16  ;;  %v542_v21 = vstv %s1766_s18  ;;  %s1785_s29 = sld [smem:[#allocation4 + $0x3d]]  ;;  %s1786_s30 = sld [smem:[#allocation4 + $0x3e]] }
  0x3b   : > { %v527_v19 = vmul.f32 %v526_v16, %v2185_v14  ;;  %v535_v20 = vmul.f32 %v2188_v17, %v534_v18  ;;  %v550_v22 = vstv %s1767_s21  ;;  %v543_v23 = vmul.f32 %v542_v21, %v2185_v14  ;;  %s1791_s5 = sld [smem:[#allocation4 + $0x41]]  ;;  %s1792_s7 = sld [smem:[#allocation4 + $0x42]]  ;;  %v1798_v10 = vld [vmem:[%s2084_s6 + $0x71] sm:$0xff] }
  0x3c   : > { %v551_v25 = vmul.f32 %v2188_v17, %v550_v22  ;;  %v558_v27 = vstv %s1768_s1  ;;  %s1793_s8 = sld [smem:[#allocation4 + $0x43]]  ;;  %s1794_s9 = sld [smem:[#allocation4 + $0x44]] }
  0x3d   : > { %329 = vrot.lane.b32.xlu0 %v327_v28, %s2022_s11  ;;  %v2199_v28 = vld [vmem:[%s2084_s6 + $0x40] sm:$0xff]  ;;  %v559_v30 = vmul.f32 %v558_v27, %v2185_v14  ;;  %v594_v34 = vstv %s1775_s23  ;;  %v602_v38 = vstv %s1776_s24  ;;  %s1795_s10 = sld [smem:[#allocation4 + $0x45]]  ;;  %s1800_s13 = sld [smem:[#allocation4 + $0x48]] }
  0x3e   : > { %337 = vrot.lane.b32.xlu1 %v335_v29, %s2022_s11  ;;  %v578_v29 = vstv %s1773_s22  ;;  %v595_v37 = vmul.f32 %v2199_v28, %v594_v34  ;;  %v610_v39 = vstv %s1777_s25  ;;  %v630_v44 = vstv %s1782_s26  ;;  %s1801_s14 = sld [smem:[#allocation4 + $0x49]]  ;;  %s1802_s15 = sld [smem:[#allocation4 + $0x4a]] }
  0x3f   : > { %v579_v31 = vmul.f32 %v2199_v28, %v578_v29  ;;  %v646_v50 = vstv %s1784_s28  ;;  %s1803_s16 = sld [smem:[#allocation4 + $0x4b]]  ;;  %s1804_s18 = sld [smem:[#allocation4 + $0x4c]] }
  0x40   : > { %v662_v56 = vstv %s1786_s30  ;;  %s1809_s21 = sld [smem:[#allocation4 + $0x4f]]  ;;  %s1810_s1 = sld [smem:[#allocation4 + $0x50]] }
  0x41   : > { %345 = vrot.lane.b32.xlu0 %v343_v32, %s2023_s12  ;;  %v2206_v32 = vld [vmem:[%s2084_s6 + $0x50] sm:$0xff]  ;;  %s1811_s22 = sld [smem:[#allocation4 + $0x51]]  ;;  %s1813_s23 = sld [smem:[#allocation4 + $0x53]] }
  0x42   : > { %353 = vrot.lane.b32.xlu1 %v351_v33, %s2023_s12  ;;  %v586_v33 = vstv %s1774_s2  ;;  %v603_v40 = vmul.f32 %v2206_v32, %v602_v38  ;;  %v696_v63 = vstv %s1793_s8  ;;  %s1812_s2 = sld [smem:[#allocation4 + $0x52]]  ;;  %s1818_s24 = sld [smem:[#allocation4 + $0x56]] }
  0x43   : > { %v587_v35 = vmul.f32 %v2206_v32, %v586_v33  ;;  %v712_v5 = vstv %s1795_s10  ;;  %v730_v9 = vstv %s1800_s13  ;;  %s1819_s25 = sld [smem:[#allocation4 + $0x57]]  ;;  %s2260_s26 = sld [smem:[#allocation4 + $0x58]] }
  0x44   : > { %v746_v18 = vstv %s1802_s15  ;;  %s2264_s28 = sld [smem:[#allocation4 + $0x7]]  ;;  %s2271_s30 = sld [smem:[#allocation4 + $0x8]] }
  0x45   : > { %361 = vrot.lane.b32.xlu0 %v359_v41, %s2024_s17  ;;  %v611_v41 = vmul.f32 %v2199_v28, %v610_v39  ;;  %v762_v22 = vstv %s1804_s18  ;;  %s2283_s8 = sld [smem:[#allocation4 + $0x5f]]  ;;  %s2294_s10 = sld [smem:[#allocation4 + $0x61]] }
  0x46   : > { %379 = vrot.lane.b32.xlu1 %v377_v42, %s2022_s11  ;;  %v2217_v42 = vld [vmem:[%s2084_s6 + $0x60] sm:$0xff]  ;;  %s2302_s13 = sld [smem:[#allocation4 + $0x64]]  ;;  %s2307_s15 = sld [smem:[#allocation4 + $0x65]] }
  0x47   : > { %v663_v59 = vmul.f32 %v2217_v42, %v662_v56  ;;  %v796_v33 = vstv %s1811_s22  ;;  %v812_v38 = vstv %s1813_s23  ;;  %s2314_s18 = sld [smem:[#allocation4 + $0x66]]  ;;  %s2328_s22 = sld [smem:[#allocation4 + $0x6b]] }
  0x48   : > { %s2338_s23 = sld [smem:[#allocation4 + $0x6d]] }
  0x49   : > { %387 = vrot.lane.b32.xlu0 %v385_v47, %s2022_s11  ;;  %v638_v47 = vstv %s1783_s27  ;;  %s2262_s27 = sld [smem:[#allocation4 + $0x59]]  ;;  %v846_v56 = vstv %s2260_s26  ;;  %s2348_s26 = sld [smem:[#allocation4 + $0x16]] }
  0x4a   : > { %395 = vrot.lane.b32.xlu1 %v393_v48, %s2023_s12  ;;  %v631_v48 = vmul.f32 %v2217_v42, %v630_v44  ;;  %v639_v49 = vmul.f32 %v2220_v46, %v638_v47  ;;  %v830_v44 = vstv %s1818_s24  ;;  %s2341_s24 = sld [smem:[#allocation4 + $0x15]] }
  0x4d   : > { %403 = vrot.lane.b32.xlu0 %v401_v51, %s2023_s12  ;;  %v654_v51 = vstv %s1785_s29  ;;  %s2269_s29 = sld [smem:[#allocation4 + $0x5a]] }
  0x4e   : > { %411 = vrot.lane.b32.xlu1 %v409_v52, %s2024_s17  ;;  %v647_v52 = vmul.f32 %v2217_v42, %v646_v50  ;;  %v655_v54 = vmul.f32 %v2220_v46, %v654_v51 }
  0x51   : > { %429 = vrot.lane.b32.xlu0 %v427_v57, %s2022_s11  ;;  %v2231_v57 = vld [vmem:[%s2084_s6 + $0x41] sm:$0xff] }
  0x52   : > { %437 = vrot.lane.b32.xlu1 %v435_v58, %s2022_s11  ;;  %v680_v58 = vstv %s1791_s5  ;;  %s2274_s5 = sld [smem:[#allocation4 + $0x5d]] }
  0x53   : > { %v681_v60 = vmul.f32 %v2231_v57, %v680_v58 }
  0x55   : > { %445 = vrot.lane.b32.xlu0 %v443_v61, %s2023_s12  ;;  %v2238_v61 = vld [vmem:[%s2084_s6 + $0x51] sm:$0xff] }
  0x56   : > { %453 = vrot.lane.b32.xlu1 %v451_v62, %s2023_s12  ;;  %v688_v62 = vstv %s1792_s7  ;;  %s2280_s7 = sld [smem:[#allocation4 + $0x5e]] }
  0x57   : > { %v689_v1 = vmul.f32 %v2238_v61, %v688_v62 }
  0x59   : > { %461 = vrot.lane.b32.xlu0 %v459_v2, %s2024_s17  ;;  %v697_v2 = vmul.f32 %v2231_v57, %v696_v63  ;;  %v266_v63 = vstv %s2264_s28  ;;  %s2360_s28 = sld [smem:[#allocation4 + $0x72]] }
  0x5a   : > { %479 = vrot.lane.b32.xlu1 %v477_v3, %s2022_s11  ;;  %v704_v3 = vstv %s1794_s9  ;;  %s2289_s9 = sld [smem:[#allocation4 + $0x60]] }
  0x5b   : > { %v705_v6 = vmul.f32 %v2238_v61, %v704_v3  ;;  %v862_v3 = vstv %s2269_s29  ;;  %s2363_s29 = sld [smem:[#allocation4 + $0x73]] }
  0x5d   : > { %487 = vrot.lane.b32.xlu0 %v485_v7, %s2022_s11  ;;  %v713_v7 = vmul.f32 %v2231_v57, %v712_v5  ;;  %v272_v5 = vstv %s2271_s30  ;;  %s2370_s30 = sld [smem:[#allocation4 + $0x74]] }
  0x5e   : > { %495 = vrot.lane.b32.xlu1 %v493_v8, %s2023_s12  ;;  %v1796_v8 = vld [vmem:[%s2084_s6 + $0x61] sm:$0xff] }
  0x5f   : > { %v763_v27 = vmul.f32 %v1796_v8, %v762_v22  ;;  %v896_v22 = vstv %s2283_s8  ;;  %s2387_s8 = sld [smem:[#allocation4 + $0x1c]] }
  0x61   : > { %503 = vrot.lane.b32.xlu0 %v501_v12, %s2023_s12  ;;  %v738_v12 = vstv %s1801_s14  ;;  %s2304_s14 = sld [smem:[#allocation4 + $0xe]] }
  0x62   : > { %511 = vrot.lane.b32.xlu1 %v509_v13, %s2024_s17  ;;  %v731_v13 = vmul.f32 %v1796_v8, %v730_v9  ;;  %v739_v16 = vmul.f32 %v1798_v10, %v738_v12 }
  0x65   : > { %529 = vrot.lane.b32.xlu0 %v527_v19, %s2022_s11  ;;  %v754_v19 = vstv %s1803_s16  ;;  %s2309_s16 = sld [smem:[#allocation4 + $0xf]] }
  0x66   : > { %537 = vrot.lane.b32.xlu1 %v535_v20, %s2022_s11  ;;  %v747_v20 = vmul.f32 %v1796_v8, %v746_v18  ;;  %v755_v21 = vmul.f32 %v1798_v10, %v754_v19  ;;  %v880_v8 = vstv %s2274_s5  ;;  %v267_v10 = vmul.f32 %v2099_v11, %v266_v63  ;;  %s2374_s5 = sld [smem:[#allocation4 + $0x75]] }
  0x69   : > { %545 = vrot.lane.b32.xlu0 %v543_v23, %s2023_s12  ;;  %v1805_v23 = vld [vmem:[%s2084_s6 + $0x42] sm:$0xff] }
  0x6a   : > { %553 = vrot.lane.b32.xlu1 %v551_v25, %s2023_s12  ;;  %v780_v25 = vstv %s1809_s21  ;;  %s2317_s21 = sld [smem:[#allocation4 + $0x67]] }
  0x6b   : > { %v781_v29 = vmul.f32 %v1805_v23, %v780_v25 }
  0x6d   : > { %561 = vrot.lane.b32.xlu0 %v559_v30, %s2024_s17  ;;  %v1807_v30 = vld [vmem:[%s2084_s6 + $0x52] sm:$0xff] }
  0x6e   : > { %581 = vrot.lane.b32.xlu1 %v579_v31, %s2022_s11  ;;  %v788_v31 = vstv %s1810_s1  ;;  %s2323_s1 = sld [smem:[#allocation4 + $0x68]] }
  0x6f   : > { %v789_v34 = vmul.f32 %v1807_v30, %v788_v31  ;;  %v912_v31 = vstv %s2294_s10  ;;  %s2395_s10 = sld [smem:[#allocation4 + $0x1d]] }
  0x71   : > { %589 = vrot.lane.b32.xlu0 %v587_v35, %s2022_s11  ;;  %v797_v35 = vmul.f32 %v1805_v23, %v796_v33 }
  0x72   : > { %597 = vrot.lane.b32.xlu1 %v595_v37, %s2023_s12  ;;  %v804_v37 = vstv %s1812_s2  ;;  %s2335_s2 = sld [smem:[#allocation4 + $0x6c]] }
  0x73   : > { %v805_v39 = vmul.f32 %v1807_v30, %v804_v37 }
  0x75   : > { %605 = vrot.lane.b32.xlu0 %v603_v40, %s2023_s12  ;;  %v813_v40 = vmul.f32 %v1805_v23, %v812_v38  ;;  %v1832_v38 = vld [vmem:[%s2084_s6 + $0x80] sm:$0xff] }
  0x76   : > { %613 = vrot.lane.b32.xlu1 %v611_v41, %s2024_s17  ;;  %v1814_v41 = vld [vmem:[%s2084_s6 + $0x62] sm:$0xff] }
  0x77   : > { %v831_v51 = vmul.f32 %v1814_v41, %v830_v44  ;;  %v1834_v44 = vld [vmem:[%s2084_s6 + $0x90] sm:$0xff] }
  0x79   : > { %633 = vrot.lane.b32.xlu0 %v631_v48, %s2022_s11  ;;  %v1816_v48 = vld [vmem:[%s2084_s6 + $0x72] sm:$0xff] }
  0x7a   : > { %641 = vrot.lane.b32.xlu1 %v639_v49, %s2022_s11  ;;  %v838_v49 = vstv %s1819_s25  ;;  %s2346_s25 = sld [smem:[#allocation4 + $0x6e]] }
  0x7d   : > { %649 = vrot.lane.b32.xlu0 %v647_v52, %s2023_s12 }
  0x7e   : > { %657 = vrot.lane.b32.xlu1 %v655_v54, %s2023_s12  ;;  %v839_v54 = vmul.f32 %v1816_v48, %v838_v49  ;;  %v322_v49 = vstv %s2309_s16  ;;  %s2419_s16 = sld [smem:[#allocation4 + $0x7d]] }
  0x81   : > { %665 = vrot.lane.b32.xlu0 %v663_v59, %s2024_s17  ;;  %v854_v59 = vstv %s2262_s27  ;;  %s2352_s27 = sld [smem:[#allocation4 + $0x6f]] }
  0x82   : > { %683 = vrot.lane.b32.xlu1 %v681_v60, %s2022_s11 }
  0x85   : > { %691 = vrot.lane.b32.xlu0 %v689_v1, %s2022_s11 }
  0x86   : > { %699 = vrot.lane.b32.xlu1 %v697_v2, %s2023_s12  ;;  %v855_v2 = vmul.f32 %v1816_v48, %v854_v59 }
  0x89   : > { %707 = vrot.lane.b32.xlu0 %v705_v6, %s2023_s12 }
  0x8a   : > { %715 = vrot.lane.b32.xlu1 %v713_v7, %s2024_s17  ;;  %v1823_v7 = vld [vmem:[%s2084_s6 + $0x43] sm:$0xff] }
  0x8b   : > { %v881_v19 = vmul.f32 %v1823_v7, %v880_v8  ;;  %v913_v37 = vmul.f32 %v1823_v7, %v912_v31 }
  0x8d   : > { %733 = vrot.lane.b32.xlu0 %v731_v13, %s2022_s11  ;;  %v863_v13 = vmul.f32 %v1814_v41, %v862_v3 }
  0x8e   : > { %741 = vrot.lane.b32.xlu1 %v739_v16, %s2022_s11  ;;  %v273_v16 = vmul.f32 %v2106_v15, %v272_v5  ;;  %v984_v5 = vstv %s2328_s22  ;;  %s2444_s22 = sld [smem:[#allocation4 + $0x82]] }
  0x91   : > { %749 = vrot.lane.b32.xlu0 %v747_v20, %s2023_s12  ;;  %v1825_v20 = vld [vmem:[%s2084_s6 + $0x53] sm:$0xff] }
  0x92   : > { %757 = vrot.lane.b32.xlu1 %v755_v21, %s2023_s12  ;;  %v888_v21 = vstv %s2280_s7  ;;  %s2385_s7 = sld [smem:[#allocation4 + $0x76]] }
  0x93   : > { %v889_v15 = vmul.f32 %v1825_v20, %v888_v21 }
  0x95   : > { %765 = vrot.lane.b32.xlu0 %v763_v27, %s2024_s17  ;;  %v897_v27 = vmul.f32 %v1823_v7, %v896_v22 }
  0x96   : > { %783 = vrot.lane.b32.xlu1 %v781_v29, %s2022_s11  ;;  %v904_v29 = vstv %s2289_s9  ;;  %s2393_s9 = sld [smem:[#allocation4 + $0x79]] }
  0x99   : > { %791 = vrot.lane.b32.xlu0 %v789_v34, %s2022_s11  ;;  %v905_v34 = vmul.f32 %v1825_v20, %v904_v29  ;;  %v367_v20 = vstv %s2341_s24  ;;  %s2459_s24 = sld [smem:[#allocation4 + $0x84]] }
  0x9a   : > { %799 = vrot.lane.b32.xlu1 %v797_v35, %s2023_s12 }
  0x9b   : > { %v228_v47 = vpop.permute.xlu0 %227 }
  0x9c   : > { %v244_v50 = vpop.permute.xlu1 %243  ;;  %v230_v52 = vadd.f32 %v228_v47, %v2142_v45  ;;  %v847_v45 = vmul.f32 %v1814_v41, %v846_v56  ;;  %v317_v41 = vstv %s2304_s14  ;;  %v940_v47 = vstv %s2307_s15  ;;  %s2405_s14 = sld [smem:[#allocation4 + $0x7b]]  ;;  %s2412_s15 = sld [smem:[#allocation4 + $0x7c]] }
  0x9d   : > { %807 = vrot.lane.b32.xlu0 %v805_v39, %s2023_s12  ;;  %v932_v39 = vstv %s2302_s13  ;;  %v941_v56 = vmul.f32 %v1834_v44, %v940_v47  ;;  %s2402_s13 = sld [smem:[#allocation4 + $0x7a]] }
  0x9e   : > { %815 = vrot.lane.b32.xlu1 %v813_v40, %s2024_s17 }
  0x9f   : > { %v236_v58 = vpop.permute.xlu0 %235 }
  0xa0   : > { %v238_v60 = vadd.f32 %v236_v58, %v230_v52  ;;  %v252_v62 = vpop.permute.xlu1 %251  ;;  %v948_v58 = vstv %s2314_s18  ;;  %s2431_s18 = sld [smem:[#allocation4 + $0x80]] }
  0xa1   : > { %833 = vrot.lane.b32.xlu0 %v831_v51, %s2022_s11  ;;  %v933_v51 = vmul.f32 %v1832_v38, %v932_v39  ;;  %v1034_v39 = vstv %s2360_s28  ;;  %s2486_s28 = sld [smem:[#allocation4 + $0x8a]] }
  0xa2   : > { %v246_v1 = vadd.f32 %v244_v50, %v238_v60  ;;  %841 = vrot.lane.b32.xlu1 %v839_v54, %s2022_s11  ;;  %v318_v54 = vmul.f32 %v317_v41, %v2117_v24  ;;  %v956_v60 = vstv %s2317_s21  ;;  %v949_v24 = vmul.f32 %v1832_v38, %v948_v58  ;;  %s2434_s21 = sld [smem:[#allocation4 + $0x81]] }
  0xa3   : > { %v260_v6 = vpop.permute.xlu0 %259 }
  0xa4   : > { %v254_v9 = vadd.f32 %v252_v62, %v246_v1  ;;  %v280_v12 = vpop.permute.xlu1 %279  ;;  %v323_v62 = vmul.f32 %v2120_v26, %v322_v49  ;;  %v957_v1 = vmul.f32 %v1834_v44, %v956_v60  ;;  %v1841_v26 = vld [vmem:[%s2084_s6 + $0xa0] sm:$0xff]  ;;  %v1050_v49 = vstv %s2370_s30  ;;  %s2494_s30 = sld [smem:[#allocation4 + $0x8b]] }
  0xa5   : > { %849 = vrot.lane.b32.xlu0 %v847_v45, %s2023_s12 }
  0xa6   : > { %v262_v18 = vadd.f32 %v260_v6, %v254_v9  ;;  %857 = vrot.lane.b32.xlu1 %v855_v2, %s2023_s12  ;;  %v964_v2 = vstv %s2323_s1  ;;  %s2437_s1 = sld [smem:[#allocation4 + $0x23]] }
  0xa7   : > { %v288_v23 = vpop.permute.xlu0 %287  ;;  %v965_v8 = vmul.f32 %v1832_v38, %v964_v2  ;;  %v2382_v38 = vld [vmem:[%s2084_s6 + $0x81] sm:$0xff] }
  0xa8   : > { %v268_v11 = vadd.f32 %v267_v10, %v262_v18  ;;  %v296_v30 = vpop.permute.xlu1 %295  ;;  %v985_v10 = vmul.f32 %v1841_v26, %v984_v5  ;;  %v1035_v44 = vmul.f32 %v2382_v38, %v1034_v39 }
  0xa9   : > { %865 = vrot.lane.b32.xlu0 %v863_v13, %s2024_s17  ;;  %v992_v13 = vstv %s2335_s2  ;;  %s2446_s2 = sld [smem:[#allocation4 + $0x24]] }
  0xaa   : > { %v274_v25 = vadd.f32 %v273_v16, %v268_v11  ;;  %883 = vrot.lane.b32.xlu1 %v881_v19, %s2022_s11  ;;  %v1000_v16 = vstv %s2338_s23  ;;  %s2449_s23 = sld [smem:[#allocation4 + $0x83]] }
  0xab   : > { %v304_v40 = vpop.permute.xlu0 %303  ;;  %v1001_v11 = vmul.f32 %v1841_v26, %v1000_v16 }
  0xac   : > { %v282_v33 = vadd.f32 %v280_v12, %v274_v25  ;;  %v312_v50 = vpop.permute.xlu1 %311  ;;  %v2357_v12 = vld [vmem:[%s2084_s6 + $0xb0] sm:$0xff] }
  0xad   : > { %891 = vrot.lane.b32.xlu0 %v889_v15, %s2022_s11  ;;  %v993_v21 = vmul.f32 %v2357_v12, %v992_v13  ;;  %v372_v15 = vstv %s2348_s26  ;;  %s2473_s26 = sld [smem:[#allocation4 + $0x88]] }
  0xae   : > { %v290_v35 = vadd.f32 %v288_v23, %v282_v33  ;;  %899 = vrot.lane.b32.xlu1 %v897_v27, %s2023_s12  ;;  %v1008_v23 = vstv %s2346_s25  ;;  %v1016_v27 = vstv %s2352_s27  ;;  %s2465_s25 = sld [smem:[#allocation4 + $0x87]]  ;;  %s2477_s27 = sld [smem:[#allocation4 + $0x89]] }
  0xaf   : > { %v330_v59 = vpop.permute.xlu0 %329  ;;  %v1009_v33 = vmul.f32 %v2357_v12, %v1008_v23 }
  0xb0   : > { %v298_v48 = vadd.f32 %v296_v30, %v290_v35  ;;  %v338_v3 = vpop.permute.xlu1 %337  ;;  %v368_v30 = vmul.f32 %v2131_v36, %v367_v20  ;;  %v2390_v36 = vld [vmem:[%s2084_s6 + $0x91] sm:$0xff]  ;;  %v1108_v20 = vstv %s2412_s15  ;;  %s2541_s15 = sld [smem:[#allocation4 + $0x31]] }
  0xb1   : > { %907 = vrot.lane.b32.xlu0 %v905_v34, %s2023_s12  ;;  %v373_v34 = vmul.f32 %v2140_v43, %v372_v15 }
  0xb2   : > { %v306_v52 = vadd.f32 %v304_v40, %v298_v48  ;;  %915 = vrot.lane.b32.xlu1 %v913_v37, %s2024_s17  ;;  %v1017_v37 = vmul.f32 %v1841_v26, %v1016_v27  ;;  %v1042_v40 = vstv %s2363_s29  ;;  %v2456_v27 = vld [vmem:[%s2084_s6 + $0x82] sm:$0xff]  ;;  %s2488_s29 = sld [smem:[#allocation4 + $0x2a]] }
  0xb3   : > { %v346_v7 = vpop.permute.xlu0 %345  ;;  %v1043_v48 = vmul.f32 %v2390_v36, %v1042_v40 }
  0xb4   : > { %v314_v63 = vadd.f32 %v312_v50, %v306_v52  ;;  %v354_v19 = vpop.permute.xlu1 %353 }
  0xb5   : > { %935 = vrot.lane.b32.xlu0 %v933_v51, %s2022_s11  ;;  %v1058_v51 = vstv %s2374_s5  ;;  %s2496_s5 = sld [smem:[#allocation4 + $0x2b]] }
  0xb6   : > { %v319_v45 = vadd.f32 %v318_v54, %v314_v63  ;;  %943 = vrot.lane.b32.xlu1 %v941_v56, %s2022_s11  ;;  %v1051_v54 = vmul.f32 %v2382_v38, %v1050_v49  ;;  %v1059_v58 = vmul.f32 %v2390_v36, %v1058_v51  ;;  %v2416_v63 = vld [vmem:[%s2084_s6 + $0xa1] sm:$0xff] }
  0xb7   : > { %v362_v25 = vpop.permute.xlu0 %361 }
  0xb8   : > { %v324_v6 = vadd.f32 %v323_v62, %v319_v45  ;;  %v380_v31 = vpop.permute.xlu1 %379  ;;  %v417_v62 = vstv %s2387_s8  ;;  %s2509_s8 = sld [smem:[#allocation4 + $0x8f]] }
  0xb9   : > { %951 = vrot.lane.b32.xlu0 %v949_v24, %s2023_s12  ;;  %v1084_v24 = vstv %s2393_s9  ;;  %v418_v5 = vmul.f32 %v417_v62, %v2153_v53  ;;  %s2516_s9 = sld [smem:[#allocation4 + $0x90]] }
  0xba   : > { %v332_v9 = vadd.f32 %v330_v59, %v324_v6  ;;  %959 = vrot.lane.b32.xlu1 %v957_v1, %s2023_s12  ;;  %v1066_v59 = vstv %s2385_s7  ;;  %v422_v1 = vstv %s2395_s10  ;;  %v1085_v6 = vmul.f32 %v2416_v63, %v1084_v24  ;;  %s2506_s7 = sld [smem:[#allocation4 + $0x8e]]  ;;  %s2520_s10 = sld [smem:[#allocation4 + $0x91]] }
  0xbb   : > { %v388_v43 = vpop.permute.xlu0 %387  ;;  %v423_v13 = vmul.f32 %v2156_v55, %v422_v1  ;;  %v2503_v1 = vld [vmem:[%s2084_s6 + $0xb2] sm:$0xff] }
  0xbc   : > { %v340_v18 = vadd.f32 %v338_v3, %v332_v9  ;;  %v396_v50 = vpop.permute.xlu1 %395  ;;  %v1067_v3 = vmul.f32 %v2382_v38, %v1066_v59  ;;  %v1184_v59 = vstv %s2465_s25  ;;  %s2592_s25 = sld [smem:[#allocation4 + $0x38]] }
  0xbd   : > { %967 = vrot.lane.b32.xlu0 %v965_v8, %s2024_s17  ;;  %v1092_v8 = vstv %s2402_s13  ;;  %s2532_s13 = sld [smem:[#allocation4 + $0x92]] }
  0xbe   : > { %v348_v22 = vadd.f32 %v346_v7, %v340_v18  ;;  %987 = vrot.lane.b32.xlu1 %v985_v10, %s2022_s11  ;;  %v2428_v7 = vld [vmem:[%s2084_s6 + $0xb1] sm:$0xff]  ;;  %v1100_v10 = vstv %s2405_s14  ;;  %s2538_s14 = sld [smem:[#allocation4 + $0x95]] }
  0xbf   : > { %v404_v60 = vpop.permute.xlu0 %403  ;;  %v1093_v53 = vmul.f32 %v2428_v7, %v1092_v8  ;;  %v1109_v23 = vmul.f32 %v2428_v7, %v1108_v20 }
  0xc0   : > { %v356_v29 = vadd.f32 %v354_v19, %v348_v22  ;;  %v412_v2 = vpop.permute.xlu1 %411  ;;  %v1101_v19 = vmul.f32 %v2416_v63, %v1100_v10  ;;  %v1208_v10 = vstv %s2486_s28  ;;  %s2607_s28 = sld [smem:[#allocation4 + $0xa0]] }
  0xc1   : > { %995 = vrot.lane.b32.xlu0 %v993_v21, %s2022_s11  ;;  %v1116_v21 = vstv %s2419_s16  ;;  %s2548_s16 = sld [smem:[#allocation4 + $0x96]] }
  0xc2   : > { %v364_v35 = vadd.f32 %v362_v25, %v356_v29  ;;  %1003 = vrot.lane.b32.xlu1 %v1001_v11, %s2023_s12  ;;  %v1117_v25 = vmul.f32 %v2416_v63, %v1116_v21  ;;  %v1134_v29 = vstv %s2431_s18  ;;  %s2550_s18 = sld [smem:[#allocation4 + $0x32]] }
  0xc3   : > { %v430_v9 = vpop.permute.xlu0 %429 }
  0xc4   : > { %v369_v41 = vadd.f32 %v368_v30, %v364_v35  ;;  %v438_v55 = vpop.permute.xlu1 %437  ;;  %v2462_v30 = vld [vmem:[%s2084_s6 + $0x92] sm:$0xff]  ;;  %v467_v35 = vstv %s2437_s1  ;;  %s2560_s1 = sld [smem:[#allocation4 + $0x98]] }
  0xc5   : > { %1011 = vrot.lane.b32.xlu0 %v1009_v33, %s2023_s12  ;;  %v468_v49 = vmul.f32 %v2167_v0, %v467_v35  ;;  %v2491_v0 = vld [vmem:[%s2084_s6 + $0xa2] sm:$0xff] }
  0xc6   : > { %v374_v47 = vadd.f32 %v373_v34, %v369_v41  ;;  %1019 = vrot.lane.b32.xlu1 %v1017_v37, %s2024_s17  ;;  %v1135_v37 = vmul.f32 %v2456_v27, %v1134_v29  ;;  %v1150_v41 = vstv %s2444_s22  ;;  %v2535_v29 = vld [vmem:[%s2084_s6 + $0x93] sm:$0xff]  ;;  %s2566_s22 = sld [smem:[#allocation4 + $0x99]] }
  0xc7   : > { %v446_v11 = vpop.permute.xlu0 %445  ;;  %v1151_v51 = vmul.f32 %v2456_v27, %v1150_v41 }
  0xc8   : > { %v382_v52 = vadd.f32 %v380_v31, %v374_v47  ;;  %v1142_v31 = vstv %s2434_s21  ;;  %v454_v34 = vpop.permute.xlu1 %453  ;;  %v1158_v47 = vstv %s2449_s23  ;;  %s2553_s21 = sld [smem:[#allocation4 + $0x97]]  ;;  %s2581_s23 = sld [smem:[#allocation4 + $0x9d]] }
  0xc9   : > { %1037 = vrot.lane.b32.xlu0 %v1035_v44, %s2022_s11  ;;  %v1143_v40 = vmul.f32 %v2462_v30, %v1142_v31  ;;  %v1242_v31 = vstv %s2509_s8  ;;  %s2639_s8 = sld [smem:[#allocation4 + $0xa7]] }
  0xca   : > { %v390_v56 = vadd.f32 %v388_v43, %v382_v52  ;;  %1045 = vrot.lane.b32.xlu1 %v1043_v48, %s2022_s11  ;;  %v472_v43 = vstv %s2446_s2  ;;  %s2577_s2 = sld [smem:[#allocation4 + $0x9c]] }
  0xcb   : > { %v462_v44 = vpop.permute.xlu0 %461  ;;  %v473_v52 = vmul.f32 %v2174_v4, %v472_v43 }
  0xcc   : > { %v398_v45 = vadd.f32 %v396_v50, %v390_v56  ;;  %v480_v50 = vpop.permute.xlu1 %479  ;;  %v1159_v56 = vmul.f32 %v2462_v30, %v1158_v47 }
  0xcd   : > { %1053 = vrot.lane.b32.xlu0 %v1051_v54, %s2023_s12 }
  0xce   : > { %v406_v26 = vadd.f32 %v404_v60, %v398_v45  ;;  %1061 = vrot.lane.b32.xlu1 %v1059_v58, %s2023_s12  ;;  %v1166_v58 = vstv %s2459_s24  ;;  %v1185_v45 = vmul.f32 %v2491_v0, %v1184_v59  ;;  %s2590_s24 = sld [smem:[#allocation4 + $0x9e]] }
  0xcf   : > { %v488_v4 = vpop.permute.xlu0 %487  ;;  %v1167_v62 = vmul.f32 %v2456_v27, %v1166_v58 }
  0xd0   : > { %v414_v16 = vadd.f32 %v412_v2, %v406_v26  ;;  %v1192_v2 = vstv %s2473_s26  ;;  %v1200_v26 = vstv %s2477_s27  ;;  %s2595_s26 = sld [smem:[#allocation4 + $0x9f]]  ;;  %s2597_s27 = sld [smem:[#allocation4 + $0x39]] }
  0xd1   : > { %1069 = vrot.lane.b32.xlu0 %v1067_v3, %s2024_s17  ;;  %v496_v3 = vpop.permute.xlu1 %495 }
  0xd2   : > { %v419_v18 = vadd.f32 %v418_v5, %v414_v16  ;;  %1087 = vrot.lane.b32.xlu1 %v1085_v6, %s2022_s11  ;;  %v1193_v6 = vmul.f32 %v2503_v1, %v1192_v2  ;;  %v517_v16 = vstv %s2488_s29  ;;  %v1302_v2 = vstv %s2553_s21  ;;  %s2613_s29 = sld [smem:[#allocation4 + $0xa3]]  ;;  %s2685_s21 = sld [smem:[#allocation4 + $0xb1]] }
  0xd4   : > { %v424_v22 = vadd.f32 %v423_v13, %v419_v18  ;;  %v504_v13 = vpop.permute.xlu0 %503 }
  0xd5   : > { %1095 = vrot.lane.b32.xlu0 %v1093_v53, %s2022_s11  ;;  %v1216_v53 = vstv %s2494_s30  ;;  %v512_v20 = vpop.permute.xlu1 %511  ;;  %s2620_s30 = sld [smem:[#allocation4 + $0xa4]] }
  0xd6   : > { %v432_v15 = vadd.f32 %v430_v9, %v424_v22  ;;  %1103 = vrot.lane.b32.xlu1 %v1101_v19, %s2023_s12  ;;  %v1201_v9 = vmul.f32 %v2491_v0, %v1200_v26  ;;  %v522_v19 = vstv %s2496_s5  ;;  %v518_v22 = vmul.f32 %v517_v16, %v2185_v14  ;;  %s2624_s5 = sld [smem:[#allocation4 + $0xa5]] }
  0xd8   : > { %v440_v33 = vadd.f32 %v438_v55, %v432_v15  ;;  %v1209_v55 = vmul.f32 %v2503_v1, %v1208_v10  ;;  %v1234_v15 = vstv %s2506_s7  ;;  %s2633_s7 = sld [smem:[#allocation4 + $0xa6]] }
  0xd9   : > { %1111 = vrot.lane.b32.xlu0 %v1109_v23, %s2023_s12  ;;  %v2529_v23 = vld [vmem:[%s2084_s6 + $0x83] sm:$0xff] }
  0xda   : > { %v448_v39 = vadd.f32 %v446_v11, %v440_v33  ;;  %1119 = vrot.lane.b32.xlu1 %v1117_v25, %s2024_s17  ;;  %v1217_v11 = vmul.f32 %v2491_v0, %v1216_v53  ;;  %v530_v25 = vpop.permute.xlu0 %529  ;;  %v523_v33 = vmul.f32 %v2188_v17, %v522_v19  ;;  %v1258_v17 = vstv %s2520_s10  ;;  %s2652_s10 = sld [smem:[#allocation4 + $0xaa]] }
  0xdc   : > { %v456_v48 = vadd.f32 %v454_v34, %v448_v39  ;;  %v1235_v34 = vmul.f32 %v2529_v23, %v1234_v15  ;;  %v1250_v39 = vstv %s2516_s9  ;;  %s2642_s9 = sld [smem:[#allocation4 + $0x3f]] }
  0xdd   : > { %1137 = vrot.lane.b32.xlu0 %v1135_v37, %s2022_s11  ;;  %v1243_v37 = vmul.f32 %v2535_v29, %v1242_v31 }
  0xde   : > { %v464_v54 = vadd.f32 %v462_v44, %v456_v48  ;;  %1145 = vrot.lane.b32.xlu1 %v1143_v40, %s2022_s11  ;;  %v538_v40 = vpop.permute.xlu1 %537  ;;  %v546_v43 = vpop.permute.xlu0 %545  ;;  %v1251_v44 = vmul.f32 %v2529_v23, %v1250_v39  ;;  %v1259_v48 = vmul.f32 %v2535_v29, %v1258_v17 }
  0xe0   : > { %v469_v60 = vadd.f32 %v468_v49, %v464_v54  ;;  %v1266_v49 = vstv %s2532_s13  ;;  %s2654_s13 = sld [smem:[#allocation4 + $0x40]] }
  0xe1   : > { %1153 = vrot.lane.b32.xlu0 %v1151_v51, %s2023_s12  ;;  %v1286_v51 = vstv %s2538_s14  ;;  %v1267_v58 = vmul.f32 %v2529_v23, %v1266_v49  ;;  %s2657_s14 = sld [smem:[#allocation4 + $0xab]] }
  0xe2   : > { %v474_v24 = vadd.f32 %v473_v52, %v469_v60  ;;  %1161 = vrot.lane.b32.xlu1 %v1159_v56, %s2023_s12  ;;  %v554_v54 = vpop.permute.xlu1 %553  ;;  %v568_v56 = vstv %s2541_s15  ;;  %s2664_s15 = sld [smem:[#allocation4 + $0xac]] }
  0xe3   : > { %v569_v26 = vmul.f32 %v2199_v28, %v568_v56  ;;  %v1318_v28 = vstv %s2566_s22  ;;  %s2696_s22 = sld [smem:[#allocation4 + $0x46]] }
  0xe4   : > { %v482_v5 = vadd.f32 %v480_v50, %v474_v24  ;;  %v2563_v50 = vld [vmem:[%s2084_s6 + $0xc0] sm:$0xff]  ;;  %v574_v24 = vstv %s2550_s18  ;;  %s2678_s18 = sld [smem:[#allocation4 + $0xae]] }
  0xe5   : > { %1169 = vrot.lane.b32.xlu0 %v1167_v62, %s2024_s17  ;;  %v1287_v60 = vmul.f32 %v2563_v50, %v1286_v51  ;;  %v1294_v62 = vstv %s2548_s16  ;;  %v1303_v10 = vmul.f32 %v2563_v50, %v1302_v2  ;;  %v1319_v19 = vmul.f32 %v2563_v50, %v1318_v28  ;;  %v2636_v51 = vld [vmem:[%s2084_s6 + $0xc1] sm:$0xff]  ;;  %s2667_s16 = sld [smem:[#allocation4 + $0xad]] }
  0xe6   : > { %v490_v8 = vadd.f32 %v488_v4, %v482_v5  ;;  %1187 = vrot.lane.b32.xlu1 %v1185_v45, %s2022_s11  ;;  %v2574_v4 = vld [vmem:[%s2084_s6 + $0xd0] sm:$0xff]  ;;  %v562_v45 = vpop.permute.xlu0 %561  ;;  %v582_v5 = vpop.permute.xlu1 %581 }
  0xe8   : > { %v498_v18 = vadd.f32 %v496_v3, %v490_v8  ;;  %v575_v8 = vmul.f32 %v2206_v32, %v574_v24  ;;  %v1404_v24 = vstv %s2624_s5  ;;  %s2753_s5 = sld [smem:[#allocation4 + $0xbc]] }
  0xe9   : > { %1195 = vrot.lane.b32.xlu0 %v1193_v6, %s2022_s11  ;;  %v1295_v6 = vmul.f32 %v2574_v4, %v1294_v62  ;;  %v1396_v62 = vstv %s2620_s30  ;;  %s2743_s30 = sld [smem:[#allocation4 + $0x4d]] }
  0xea   : > { %v506_v21 = vadd.f32 %v504_v13, %v498_v18  ;;  %1203 = vrot.lane.b32.xlu1 %v1201_v9, %s2023_s12  ;;  %v1310_v13 = vstv %s2560_s1  ;;  %v590_v53 = vpop.permute.xlu0 %589  ;;  %s2694_s1 = sld [smem:[#allocation4 + $0xb2]] }
  0xeb   : > { %v1311_v32 = vmul.f32 %v2574_v4, %v1310_v13  ;;  %v671_v13 = vstv %s2642_s9  ;;  %s2768_s9 = sld [smem:[#allocation4 + $0xc0]] }
  0xec   : > { %v514_v14 = vadd.f32 %v512_v20, %v506_v21  ;;  %v2604_v20 = vld [vmem:[%s2084_s6 + $0xe0] sm:$0xff]  ;;  %v598_v21 = vpop.permute.xlu1 %597 }
  0xed   : > { %1211 = vrot.lane.b32.xlu0 %v1209_v55, %s2023_s12  ;;  %v1338_v55 = vstv %s2577_s2  ;;  %s2699_s2 = sld [smem:[#allocation4 + $0xb3]] }
  0xee   : > { %v519_v35 = vadd.f32 %v518_v22, %v514_v14  ;;  %1219 = vrot.lane.b32.xlu1 %v1217_v11, %s2024_s17  ;;  %v2610_v22 = vld [vmem:[%s2084_s6 + $0xf0] sm:$0xff]  ;;  %v1346_v11 = vstv %s2581_s23  ;;  %v1354_v14 = vstv %s2590_s24  ;;  %s2701_s23 = sld [smem:[#allocation4 + $0x47]]  ;;  %s2708_s24 = sld [smem:[#allocation4 + $0xb4]] }
  0xf0   : > { %v524_v41 = vadd.f32 %v523_v33, %v519_v35  ;;  %v1347_v33 = vmul.f32 %v2610_v22, %v1346_v11  ;;  %v620_v35 = vstv %s2592_s25  ;;  %v614_v17 = vpop.permute.xlu1 %613  ;;  %v1446_v11 = vstv %s2657_s14  ;;  %s2714_s25 = sld [smem:[#allocation4 + $0xb5]]  ;;  %s2786_s14 = sld [smem:[#allocation4 + $0xc3]] }
  0xf1   : > { %1237 = vrot.lane.b32.xlu0 %v1235_v34, %s2022_s11  ;;  %v606_v34 = vpop.permute.xlu0 %605 }
  0xf2   : > { %v532_v47 = vadd.f32 %v530_v25, %v524_v41  ;;  %1245 = vrot.lane.b32.xlu1 %v1243_v37, %s2022_s11  ;;  %v1339_v25 = vmul.f32 %v2604_v20, %v1338_v55  ;;  %v1362_v37 = vstv %s2595_s26  ;;  %v1355_v41 = vmul.f32 %v2604_v20, %v1354_v14  ;;  %s2724_s26 = sld [smem:[#allocation4 + $0xb8]] }
  0xf4   : > { %v540_v52 = vadd.f32 %v538_v40, %v532_v47  ;;  %v626_v40 = vstv %s2597_s27  ;;  %v1363_v47 = vmul.f32 %v2610_v22, %v1362_v37  ;;  %v1454_v37 = vstv %s2664_s15  ;;  %s2728_s27 = sld [smem:[#allocation4 + $0xb9]]  ;;  %s1815_s15 = sld [smem:[#allocation4 + $0x54]] }
  0xf5   : > { %1253 = vrot.lane.b32.xlu0 %v1251_v44, %s2023_s12  ;;  %v621_v44 = vmul.f32 %v2217_v42, %v620_v35  ;;  %v634_v49 = vpop.permute.xlu0 %633 }
  0xf6   : > { %v548_v59 = vadd.f32 %v546_v43, %v540_v52  ;;  %1261 = vrot.lane.b32.xlu1 %v1259_v48, %s2023_s12  ;;  %v1370_v48 = vstv %s2607_s28  ;;  %v1388_v52 = vstv %s2613_s29  ;;  %s2737_s28 = sld [smem:[#allocation4 + $0xba]]  ;;  %s2740_s29 = sld [smem:[#allocation4 + $0xbb]] }
  0xf7   : > { %v1371_v42 = vmul.f32 %v2604_v20, %v1370_v48  ;;  %v1488_v48 = vstv %s2685_s21  ;;  %s1842_s21 = sld [smem:[#allocation4 + $0x69]] }
  0xf8   : > { %v556_v3 = vadd.f32 %v554_v54, %v548_v59  ;;  %v627_v54 = vmul.f32 %v2220_v46, %v626_v40  ;;  %v1389_v59 = vmul.f32 %v2636_v51, %v1388_v52  ;;  %v642_v46 = vpop.permute.xlu1 %641 }
  0xf9   : > { %1269 = vrot.lane.b32.xlu0 %v1267_v58, %s2024_s17  ;;  %v650_v2 = vpop.permute.xlu0 %649 }
  0xfa   : > { %v564_v9 = vadd.f32 %v562_v45, %v556_v3  ;;  %1289 = vrot.lane.b32.xlu1 %v1287_v60, %s2022_s11  ;;  %v2649_v60 = vld [vmem:[%s2084_s6 + $0xd1] sm:$0xff] }
  0xfb   : > { %v1397_v3 = vmul.f32 %v2649_v60, %v1396_v62  ;;  %v721_v62 = vstv %s2696_s22  ;;  %s1851_s22 = sld [smem:[#allocation4 + $0x70]] }
  0xfc   : > { %v570_v16 = vadd.f32 %v569_v26, %v564_v9 }
  0xfd   : > { %1297 = vrot.lane.b32.xlu0 %v1295_v6, %s2022_s11  ;;  %v1412_v6 = vstv %s2633_s7  ;;  %v666_v55 = vpop.permute.xlu0 %665  ;;  %s2755_s7 = sld [smem:[#allocation4 + $0x4e]] }
  0xfe   : > { %v576_v18 = vadd.f32 %v575_v8, %v570_v16  ;;  %1305 = vrot.lane.b32.xlu1 %v1303_v10, %s2023_s12  ;;  %v1420_v8 = vstv %s2639_s8  ;;  %v658_v10 = vpop.permute.xlu1 %657  ;;  %v1413_v28 = vmul.f32 %v2649_v60, %v1412_v6  ;;  %s2761_s8 = sld [smem:[#allocation4 + $0xbf]] }
 0x100   : > { %v584_v15 = vadd.f32 %v582_v5, %v576_v18  ;;  %v1405_v5 = vmul.f32 %v2636_v51, %v1404_v24  ;;  %v1438_v18 = vstv %s2652_s10  ;;  %s2771_s10 = sld [smem:[#allocation4 + $0xc1]] }
 0x101   : > { %1313 = vrot.lane.b32.xlu0 %v1311_v32, %s2023_s12  ;;  %v2675_v32 = vld [vmem:[%s2084_s6 + $0xe1] sm:$0xff]  ;;  %v692_v40 = vpop.permute.xlu0 %691 }
 0x102   : > { %v592_v31 = vadd.f32 %v590_v53, %v584_v15  ;;  %1321 = vrot.lane.b32.xlu1 %v1319_v19, %s2024_s17  ;;  %v1421_v53 = vmul.f32 %v2636_v51, %v1420_v8  ;;  %v676_v19 = vstv %s2654_s13  ;;  %s2779_s13 = sld [smem:[#allocation4 + $0xc2]] }
 0x103   : > { %v677_v14 = vmul.f32 %v2238_v61, %v676_v19  ;;  %v1455_v61 = vmul.f32 %v2675_v32, %v1454_v37 }
 0x104   : > { %v600_v39 = vadd.f32 %v598_v21, %v592_v31  ;;  %v2682_v21 = vld [vmem:[%s2084_s6 + $0xf1] sm:$0xff]  ;;  %v684_v31 = vpop.permute.xlu1 %683 }
 0x105   : > { %1341 = vrot.lane.b32.xlu0 %v1339_v25, %s2022_s11  ;;  %v672_v25 = vmul.f32 %v2231_v57, %v671_v13  ;;  %v1447_v35 = vmul.f32 %v2682_v21, %v1446_v11  ;;  %v1462_v57 = vstv %s2667_s16  ;;  %v1520_v13 = vstv %s2714_s25  ;;  %v2750_v11 = vld [vmem:[%s2084_s6 + $0xe2] sm:$0xff]  ;;  %s1817_s16 = sld [smem:[#allocation4 + $0x55]]  ;;  %s1871_s25 = sld [smem:[#allocation4 + $0x7f]] }
 0x106   : > { %v608_v43 = vadd.f32 %v606_v34, %v600_v39  ;;  %1349 = vrot.lane.b32.xlu1 %v1347_v33, %s2022_s11  ;;  %v1439_v33 = vmul.f32 %v2675_v32, %v1438_v18 }
 0x108   : > { %v616_v56 = vadd.f32 %v614_v17, %v608_v43  ;;  %v1470_v43 = vstv %s2678_s18  ;;  %s1826_s18 = sld [smem:[#allocation4 + $0x5c]] }
 0x109   : > { %1357 = vrot.lane.b32.xlu0 %v1355_v41, %s2023_s12  ;;  %v1463_v41 = vmul.f32 %v2682_v21, %v1462_v57  ;;  %v1471_v52 = vmul.f32 %v2675_v32, %v1470_v43 }
 0x10a   : > { %v622_v58 = vadd.f32 %v621_v44, %v616_v56  ;;  %1365 = vrot.lane.b32.xlu1 %v1363_v47, %s2023_s12  ;;  %v700_v44 = vpop.permute.xlu1 %699  ;;  %v2711_v47 = vld [vmem:[%s2084_s6 + $0xc2] sm:$0xff] }
 0x10b   : > { %v1489_v56 = vmul.f32 %v2711_v47, %v1488_v48 }
 0x10c   : > { %v628_v45 = vadd.f32 %v627_v54, %v622_v58  ;;  %v1496_v58 = vstv %s2694_s1  ;;  %s1844_s1 = sld [smem:[#allocation4 + $0x6a]] }
 0x10d   : > { %1373 = vrot.lane.b32.xlu0 %v1371_v42, %s2024_s17  ;;  %v2721_v42 = vld [vmem:[%s2084_s6 + $0xd2] sm:$0xff] }
 0x10e   : > { %v636_v26 = vadd.f32 %v634_v49, %v628_v45  ;;  %1391 = vrot.lane.b32.xlu1 %v1389_v59, %s2022_s11  ;;  %v708_v59 = vpop.permute.xlu0 %707  ;;  %v726_v45 = vstv %s2701_s23  ;;  %s1862_s23 = sld [smem:[#allocation4 + $0x78]] }
 0x110   : > { %v644_v9 = vadd.f32 %v642_v46, %v636_v26  ;;  %v1504_v46 = vstv %s2699_s2  ;;  %s1853_s2 = sld [smem:[#allocation4 + $0x71]] }
 0x111   : > { %1399 = vrot.lane.b32.xlu0 %v1397_v3, %s2022_s11  ;;  %v1497_v3 = vmul.f32 %v2721_v42, %v1496_v58  ;;  %v1505_v8 = vmul.f32 %v2711_v47, %v1504_v46  ;;  %v1588_v58 = vstv %s2761_s8  ;;  %s1907_s8 = sld [smem:[#allocation4 + $0x9b]] }
 0x112   : > { %v652_v16 = vadd.f32 %v650_v2, %v644_v9  ;;  %1407 = vrot.lane.b32.xlu1 %v1405_v5, %s2023_s12  ;;  %v716_v2 = vpop.permute.xlu1 %715  ;;  %v1983_v5 = vld [vmem:[%s2084_s6 + $0x61] sm:$0xff]  ;;  %v1512_v9 = vstv %s2708_s24  ;;  %s1869_s24 = sld [smem:[#allocation4 + $0x7e]] }
 0x113   : > { %v722_v6 = vmul.f32 %v1983_v5, %v721_v62  ;;  %v1513_v18 = vmul.f32 %v2721_v42, %v1512_v9  ;;  %v1985_v62 = vld [vmem:[%s2084_s6 + $0x42] sm:$0xff]  ;;  %v1604_v9 = vstv %s2771_s10  ;;  %s1916_s10 = sld [smem:[#allocation4 + $0xa2]] }
 0x114   : > { %v660_v15 = vadd.f32 %v658_v10, %v652_v16  ;;  %v734_v10 = vpop.permute.xlu0 %733 }
 0x115   : > { %1415 = vrot.lane.b32.xlu0 %v1413_v28, %s2023_s12  ;;  %v1984_v28 = vld [vmem:[%s2084_s6 + $0x71] sm:$0xff] }
 0x116   : > { %v668_v34 = vadd.f32 %v666_v55, %v660_v15  ;;  %1423 = vrot.lane.b32.xlu1 %v1421_v53, %s2024_s17  ;;  %v727_v16 = vmul.f32 %v1984_v28, %v726_v45  ;;  %v1521_v55 = vmul.f32 %v2711_v47, %v1520_v13  ;;  %v1538_v15 = vstv %s2724_s26  ;;  %s1878_s26 = sld [smem:[#allocation4 + $0x85]] }
 0x118   : > { %v673_v39 = vadd.f32 %v672_v25, %v668_v34  ;;  %v742_v25 = vpop.permute.xlu1 %741  ;;  %v750_v34 = vpop.permute.xlu0 %749 }
 0x119   : > { %1441 = vrot.lane.b32.xlu0 %v1439_v33, %s2022_s11  ;;  %v1546_v33 = vstv %s2728_s27  ;;  %s1880_s27 = sld [smem:[#allocation4 + $0x86]] }
 0x11a   : > { %v678_v17 = vadd.f32 %v677_v14, %v673_v39  ;;  %1449 = vrot.lane.b32.xlu1 %v1447_v35, %s2022_s11  ;;  %v1539_v35 = vmul.f32 %v2750_v11, %v1538_v15  ;;  %v1554_v39 = vstv %s2737_s28  ;;  %s1887_s28 = sld [smem:[#allocation4 + $0x8c]] }
 0x11b   : > { %v1555_v43 = vmul.f32 %v2750_v11, %v1554_v39 }
 0x11c   : > { %v686_v49 = vadd.f32 %v684_v31, %v678_v17  ;;  %v2758_v31 = vld [vmem:[%s2084_s6 + $0xf2] sm:$0xff]  ;;  %v758_v17 = vpop.permute.xlu1 %757 }
 0x11d   : > { %1457 = vrot.lane.b32.xlu0 %v1455_v61, %s2023_s12  ;;  %v1547_v57 = vmul.f32 %v2758_v31, %v1546_v33 }
 0x11e   : > { %v694_v54 = vadd.f32 %v692_v40, %v686_v49  ;;  %1465 = vrot.lane.b32.xlu1 %v1463_v41, %s2023_s12  ;;  %v1562_v40 = vstv %s2740_s29  ;;  %v771_v41 = vstv %s2743_s30  ;;  %v1570_v49 = vstv %s2753_s5  ;;  %s1889_s29 = sld [smem:[#allocation4 + $0x8d]]  ;;  %s1896_s30 = sld [smem:[#allocation4 + $0x93]] }
 0x11f   : > { %v1563_v48 = vmul.f32 %v2758_v31, %v1562_v40  ;;  %v772_v46 = vmul.f32 %v1985_v62, %v771_v41  ;;  %v1571_v45 = vmul.f32 %v2750_v11, %v1570_v49  ;;  %s1898_s5 = sld [smem:[#allocation4 + $0x94]] }
 0x120   : > { %v702_v24 = vadd.f32 %v700_v44, %v694_v54  ;;  %v766_v54 = vpop.permute.xlu0 %765 }
 0x121   : > { %1473 = vrot.lane.b32.xlu0 %v1471_v52, %s2024_s17  ;;  %v776_v52 = vstv %s2755_s7  ;;  %s1905_s7 = sld [smem:[#allocation4 + $0x9a]] }
 0x122   : > { %v710_v26 = vadd.f32 %v708_v59, %v702_v24  ;;  %1491 = vrot.lane.b32.xlu1 %v1489_v56, %s2022_s11  ;;  %v2783_v56 = vld [vmem:[%s2084_s6 + $0xc3] sm:$0xff]  ;;  %v784_v24 = vpop.permute.xlu1 %783 }
 0x123   : > { %v1589_v5 = vmul.f32 %v2783_v56, %v1588_v58 }
 0x124   : > { %v718_v53 = vadd.f32 %v716_v2, %v710_v26  ;;  %v1986_v2 = vld [vmem:[%s2084_s6 + $0x52] sm:$0xff]  ;;  %v792_v13 = vpop.permute.xlu0 %791 }
 0x125   : > { %1499 = vrot.lane.b32.xlu0 %v1497_v3, %s2022_s11  ;;  %v777_v3 = vmul.f32 %v1986_v2, %v776_v52  ;;  %v876_v2 = vstv %s1826_s18  ;;  %s1943_s18 = sld [smem:[#allocation4 + $0xb7]] }
 0x126   : > { %v723_v19 = vadd.f32 %v722_v6, %v718_v53  ;;  %1507 = vrot.lane.b32.xlu1 %v1505_v8, %s2023_s12  ;;  %v2795_v6 = vld [vmem:[%s2084_s6 + $0xd3] sm:$0xff]  ;;  %v1596_v8 = vstv %s2768_s9  ;;  %v1605_v53 = vmul.f32 %v2783_v56, %v1604_v9  ;;  %s1914_s9 = sld [smem:[#allocation4 + $0xa1]] }
 0x127   : > { %v1597_v28 = vmul.f32 %v2795_v6, %v1596_v8 }
 0x128   : > { %v728_v14 = vadd.f32 %v727_v16, %v723_v19  ;;  %v800_v19 = vpop.permute.xlu1 %799 }
 0x129   : > { %1515 = vrot.lane.b32.xlu0 %v1513_v18, %s2023_s12  ;;  %v1612_v18 = vstv %s2779_s13  ;;  %s1923_s13 = sld [smem:[#allocation4 + $0xa8]] }
 0x12a   : > { %v736_v37 = vadd.f32 %v734_v10, %v728_v14  ;;  %1523 = vrot.lane.b32.xlu1 %v1521_v55, %s2024_s17  ;;  %v1620_v55 = vstv %s2786_s14  ;;  %s1925_s14 = sld [smem:[#allocation4 + $0xa9]] }
 0x12b   : > { %v1621_v14 = vmul.f32 %v2783_v56, %v1620_v55 }
 0x12c   : > { %v744_v61 = vadd.f32 %v742_v25, %v736_v37  ;;  %v1613_v25 = vmul.f32 %v2795_v6, %v1612_v18  ;;  %v816_v39 = vpop.permute.xlu1 %815 }
 0x12d   : > { %1541 = vrot.lane.b32.xlu0 %v1539_v35, %s2022_s11  ;;  %v821_v35 = vstv %s1815_s15  ;;  %s1932_s15 = sld [smem:[#allocation4 + $0xaf]] }
 0x12e   : > { %v752_v44 = vadd.f32 %v750_v34, %v744_v61  ;;  %1549 = vrot.lane.b32.xlu1 %v1547_v57, %s2022_s11  ;;  %v808_v34 = vpop.permute.xlu0 %807  ;;  %v826_v57 = vstv %s1817_s16  ;;  %v1987_v61 = vld [vmem:[%s2084_s6 + $0x62] sm:$0xff]  ;;  %s1934_s16 = sld [smem:[#allocation4 + $0xb0]] }
 0x130   : > { %v760_v59 = vadd.f32 %v758_v17, %v752_v44  ;;  %v822_v17 = vmul.f32 %v1987_v61, %v821_v35  ;;  %v842_v52 = vpop.permute.xlu1 %841  ;;  %v1992_v61 = vld [vmem:[%s2084_s6 + $0x90] sm:$0xff] }
 0x131   : > { %1557 = vrot.lane.b32.xlu0 %v1555_v43, %s2023_s12  ;;  %v1988_v43 = vld [vmem:[%s2084_s6 + $0x72] sm:$0xff] }
 0x132   : > { %v768_v26 = vadd.f32 %v766_v54, %v760_v59  ;;  %1565 = vrot.lane.b32.xlu1 %v1563_v48, %s2023_s12  ;;  %v834_v41 = vpop.permute.xlu0 %833  ;;  %v827_v44 = vmul.f32 %v1988_v43, %v826_v57  ;;  %v1991_v57 = vld [vmem:[%s2084_s6 + $0x80] sm:$0xff] }
 0x134   : > { %v773_v10 = vadd.f32 %v772_v46, %v768_v26  ;;  %v858_v46 = vpop.permute.xlu1 %857 }
 0x135   : > { %1573 = vrot.lane.b32.xlu0 %v1571_v45, %s2024_s17 }
 0x136   : > { %v778_v16 = vadd.f32 %v777_v3, %v773_v10  ;;  %1591 = vrot.lane.b32.xlu1 %v1589_v5, %s2022_s11  ;;  %v850_v58 = vpop.permute.xlu0 %849  ;;  %v1989_v5 = vld [vmem:[%s2084_s6 + $0x43] sm:$0xff]  ;;  %v1990_v10 = vld [vmem:[%s2084_s6 + $0x53] sm:$0xff] }
 0x138   : > { %v786_v15 = vadd.f32 %v784_v24, %v778_v16  ;;  %v884_v9 = vpop.permute.xlu1 %883 }
 0x139   : > { %1599 = vrot.lane.b32.xlu0 %v1597_v28, %s2022_s11  ;;  %s1824_s11 = sld [smem:[#allocation4 + $0x5b]] }
 0x13a   : > { %v794_v33 = vadd.f32 %v792_v13, %v786_v15  ;;  %1607 = vrot.lane.b32.xlu1 %v1605_v53, %s2023_s12  ;;  %v866_v3 = vpop.permute.xlu0 %865  ;;  %v877_v13 = vmul.f32 %v1990_v10, %v876_v2  ;;  %v1993_v2 = vld [vmem:[%s2084_s6 + $0xa0] sm:$0xff]  ;;  %s1860_s6 = sld [smem:[#allocation4 + $0x77]] }
 0x13c   : > { %v802_v37 = vadd.f32 %v800_v19, %v794_v33  ;;  %v900_v19 = vpop.permute.xlu1 %899 }
 0x13d   : > { %1615 = vrot.lane.b32.xlu0 %v1613_v25, %s2023_s12  ;;  %s1833_s12 = sld [smem:[#allocation4 + $0x62]] }
 0x13e   : > { %v810_v40 = vadd.f32 %v808_v34, %v802_v37  ;;  %1623 = vrot.lane.b32.xlu1 %v1621_v14, %s2024_s17  ;;  %v892_v53 = vpop.permute.xlu0 %891  ;;  %s1835_s17 = sld [smem:[#allocation4 + $0x63]] }
 0x13f   : > { %v871_v24 = vstv %s1824_s11  ;;  %s1941_s11 = sld [smem:[#allocation4 + $0xb6]] }
 0x140   : > { %v818_v48 = vadd.f32 %v816_v39, %v810_v40  ;;  %v872_v8 = vmul.f32 %v1989_v5, %v871_v24  ;;  %v916_v35 = vpop.permute.xlu1 %915 }
 0x142   : > { %v823_v49 = vadd.f32 %v822_v17, %v818_v48  ;;  %v908_v25 = vpop.permute.xlu0 %907 }
 0x143   : > { %v922_v33 = vstv %s1833_s12  ;;  %s1950_s12 = sld [smem:[#allocation4 + $0xbd]] }
 0x144   : > { %v828_v54 = vadd.f32 %v827_v44, %v823_v49  ;;  %v928_v34 = vstv %s1835_s17  ;;  %v923_v39 = vmul.f32 %v1991_v57, %v922_v33  ;;  %v944_v44 = vpop.permute.xlu1 %943  ;;  %s1952_s17 = sld [smem:[#allocation4 + $0xbe]] }
 0x145   : > { %v929_v17 = vmul.f32 %v1992_v61, %v928_v34 }
 0x146   : > { %v836_v59 = vadd.f32 %v834_v41, %v828_v54  ;;  %v936_v40 = vpop.permute.xlu0 %935 }
 0x148   : > { %v844_v62 = vadd.f32 %v842_v52, %v836_v59  ;;  %v974_v59 = vstv %s1842_s21  ;;  %s1627_s21 = sld [smem:[#allocation2]] }
 0x14a   : > { %v852_v45 = vadd.f32 %v850_v58, %v844_v62  ;;  %v952_v49 = vpop.permute.xlu0 %951  ;;  %v960_v58 = vpop.permute.xlu1 %959 }
 0x14c   : > { %v860_v26 = vadd.f32 %v858_v46, %v852_v45  ;;  %v980_v46 = vstv %s1844_s1  ;;  %s1630_s1 = sld [smem:[#allocation3]] }
 0x14d   : > { %v981_v5 = vmul.f32 %v2357_v12, %v980_v46 }
 0x14e   : > { %v868_v28 = vadd.f32 %v866_v3, %v860_v26  ;;  %v968_v24 = vpop.permute.xlu0 %967  ;;  %v975_v3 = vmul.f32 %v1993_v2, %v974_v59  ;;  %v988_v26 = vpop.permute.xlu1 %987 }
 0x150   : > { %v873_v16 = vadd.f32 %v872_v8, %v868_v28 }
 0x152   : > { %v878_v18 = vadd.f32 %v877_v13, %v873_v16  ;;  %v996_v10 = vpop.permute.xlu0 %995  ;;  %v1004_v28 = vpop.permute.xlu1 %1003 }
 0x154   : > { %v886_v55 = vadd.f32 %v884_v9, %v878_v18 }
 0x156   : > { %v894_v15 = vadd.f32 %v892_v53, %v886_v55  ;;  %v1012_v18 = vpop.permute.xlu0 %1011 }
 0x158   : > { %v902_v14 = vadd.f32 %v900_v19, %v894_v15  ;;  %v1025_v19 = vstv %s1851_s22  ;;  %v1030_v15 = vstv %s1853_s2  ;;  %s1710_s22 = sshll.u32 %s2857_s20, 3 }
 0x159   : > { %v1031_v12 = vmul.f32 %v2390_v36, %v1030_v15 }
 0x15a   : > { %v910_v37 = vadd.f32 %v908_v25, %v902_v14  ;;  %v1020_v25 = vpop.permute.xlu1 %1019  ;;  %v1026_v14 = vmul.f32 %v2382_v38, %v1025_v19  ;;  %v1038_v34 = vpop.permute.xlu0 %1037 }
 0x15c   : > { %v918_v41 = vadd.f32 %v916_v35, %v910_v37 }
 0x15e   : > { %v924_v43 = vadd.f32 %v923_v39, %v918_v41  ;;  %v1046_v57 = vpop.permute.xlu1 %1045 }
 0x160   : > { %v930_v48 = vadd.f32 %v929_v17, %v924_v43  ;;  %v1075_v43 = vstv %s1860_s6 }
 0x161   : > { %v1076_v38 = vmul.f32 %v2416_v63, %v1075_v43 }
 0x162   : > { %v938_v52 = vadd.f32 %v936_v40, %v930_v48  ;;  %v1054_v40 = vpop.permute.xlu0 %1053  ;;  %v1062_v41 = vpop.permute.xlu1 %1061  ;;  %v1080_v48 = vstv %s1862_s23  ;;  %s211_s23 = scalar_lea.vmem %s2854_s4, %s1710_s22 }
 0x163   : > { %v1081_v36 = vmul.f32 %v2428_v7, %v1080_v48  ;;  %v1225_v48 = vstv %s1887_s28 }
 0x164   : > { %v946_v54 = vadd.f32 %v944_v44, %v938_v52 }
 0x166   : > { %v954_v62 = vadd.f32 %v952_v49, %v946_v54  ;;  %v1070_v49 = vpop.permute.xlu0 %1069  ;;  %v1088_v54 = vpop.permute.xlu1 %1087 }
 0x168   : > { %v962_v45 = vadd.f32 %v960_v58, %v954_v62 }
 0x16a   : > { %v970_v8 = vadd.f32 %v968_v24, %v962_v45  ;;  %v1096_v62 = vpop.permute.xlu0 %1095  ;;  %v1104_v24 = vpop.permute.xlu1 %1103 }
 0x16c   : > { %v976_v9 = vadd.f32 %v975_v3, %v970_v8  ;;  %v1130_v8 = vstv %s1871_s25 }
 0x16d   : > { %v1131_v7 = vmul.f32 %v2462_v30, %v1130_v8  ;;  %v1282_v8 = vstv %s1898_s5 }
 0x16e   : > { %v982_v13 = vadd.f32 %v981_v5, %v976_v9  ;;  %v1112_v3 = vpop.permute.xlu0 %1111  ;;  %v1120_v9 = vpop.permute.xlu1 %1119 }
 0x170   : > { %v990_v16 = vadd.f32 %v988_v26, %v982_v13  ;;  %v1125_v26 = vstv %s1869_s24 }
 0x171   : > { %v1126_v63 = vmul.f32 %v2456_v27, %v1125_v26  ;;  %v1276_v26 = vstv %s1896_s30 }
 0x172   : > { %v998_v53 = vadd.f32 %v996_v10, %v990_v16  ;;  %v1138_v13 = vpop.permute.xlu0 %1137 }
 0x174   : > { %v1006_v55 = vadd.f32 %v1004_v28, %v998_v53  ;;  %v1146_v53 = vpop.permute.xlu1 %1145 }
 0x176   : > { %v1014_v33 = vadd.f32 %v1012_v18, %v1006_v55  ;;  %v1154_v19 = vpop.permute.xlu0 %1153 }
 0x178   : > { %v1022_v35 = vadd.f32 %v1020_v25, %v1014_v33  ;;  %v1162_v25 = vpop.permute.xlu1 %1161  ;;  %v1175_v33 = vstv %s1878_s26 }
 0x179   : > { %v1176_v27 = vmul.f32 %v2491_v0, %v1175_v33  ;;  %v1226_v0 = vmul.f32 %v2529_v23, %v1225_v48  ;;  %v1277_v23 = vmul.f32 %v2563_v50, %v1276_v26 }
 0x17a   : > { %v1027_v37 = vadd.f32 %v1026_v14, %v1022_v35 }
 0x17c   : > { %v1032_v39 = vadd.f32 %v1031_v12, %v1027_v37  ;;  %v1170_v12 = vpop.permute.xlu0 %1169  ;;  %v1188_v37 = vpop.permute.xlu1 %1187 }
 0x17e   : > { %v1040_v61 = vadd.f32 %v1038_v34, %v1032_v39  ;;  %v1180_v34 = vstv %s1880_s27 }
 0x17f   : > { %v1181_v30 = vmul.f32 %v2503_v1, %v1180_v34 }
 0x180   : > { %v1048_v17 = vadd.f32 %v1046_v57, %v1040_v61 }
 0x182   : > { %v1056_v44 = vadd.f32 %v1054_v40, %v1048_v17  ;;  %v1196_v40 = vpop.permute.xlu0 %1195  ;;  %v1204_v17 = vpop.permute.xlu1 %1203 }
 0x184   : > { %v1064_v52 = vadd.f32 %v1062_v41, %v1056_v44 }
 0x186   : > { %v1072_v58 = vadd.f32 %v1070_v49, %v1064_v52  ;;  %v1212_v44 = vpop.permute.xlu0 %1211  ;;  %v1230_v52 = vstv %s1889_s29 }
 0x187   : > { %v1231_v1 = vmul.f32 %v2535_v29, %v1230_v52  ;;  %v1283_v29 = vmul.f32 %v2574_v4, %v1282_v8 }
 0x188   : > { %v1077_v59 = vadd.f32 %v1076_v38, %v1072_v58  ;;  %v1220_v38 = vpop.permute.xlu1 %1219 }
 0x18a   : > { %v1082_v46 = vadd.f32 %v1081_v36, %v1077_v59  ;;  %v1238_v36 = vpop.permute.xlu0 %1237 }
 0x18c   : > { %v1090_v45 = vadd.f32 %v1088_v54, %v1082_v46 }
 0x18e   : > { %v1098_v2 = vadd.f32 %v1096_v62, %v1090_v45  ;;  %v1246_v62 = vpop.permute.xlu1 %1245 }
 0x190   : > { %v1106_v5 = vadd.f32 %v1104_v24, %v1098_v2  ;;  %v1254_v24 = vpop.permute.xlu0 %1253 }
 0x192   : > { %v1114_v10 = vadd.f32 %v1112_v3, %v1106_v5  ;;  %v1262_v3 = vpop.permute.xlu1 %1261 }
 0x194   : > { %v1122_v28 = vadd.f32 %v1120_v9, %v1114_v10  ;;  %v1270_v9 = vpop.permute.xlu0 %1269 }
 0x196   : > { %v1127_v16 = vadd.f32 %v1126_v63, %v1122_v28  ;;  %v1290_v63 = vpop.permute.xlu1 %1289 }
 0x198   : > { %v1132_v18 = vadd.f32 %v1131_v7, %v1127_v16  ;;  %v1298_v28 = vpop.permute.xlu0 %1297 }
 0x19a   : > { %v1140_v55 = vadd.f32 %v1138_v13, %v1132_v18 }
 0x19c   : > { %v1148_v15 = vadd.f32 %v1146_v53, %v1140_v55  ;;  %v1306_v53 = vpop.permute.xlu1 %1305  ;;  %v1314_v55 = vpop.permute.xlu0 %1313 }
 0x19e   : > { %v1156_v14 = vadd.f32 %v1154_v19, %v1148_v15  ;;  %v1328_v15 = vstv %s1905_s7 }
 0x19f   : > { %v1329_v50 = vmul.f32 %v2604_v20, %v1328_v15 }
 0x1a0   : > { %v1164_v35 = vadd.f32 %v1162_v25, %v1156_v14  ;;  %v1322_v33 = vpop.permute.xlu1 %1321  ;;  %v1334_v14 = vstv %s1907_s8 }
 0x1a1   : > { %v1335_v4 = vmul.f32 %v2610_v22, %v1334_v14 }
 0x1a2   : > { %v1172_v57 = vadd.f32 %v1170_v12, %v1164_v35  ;;  %v1342_v12 = vpop.permute.xlu0 %1341 }
 0x1a4   : > { %v1177_v39 = vadd.f32 %v1176_v27, %v1172_v57 }
 0x1a6   : > { %v1182_v61 = vadd.f32 %v1181_v30, %v1177_v39  ;;  %v1358_v57 = vpop.permute.xlu0 %1357 }
 0x1a8   : > { %v1190_v41 = vadd.f32 %v1188_v37, %v1182_v61  ;;  %v1350_v37 = vpop.permute.xlu1 %1349 }
 0x1aa   : > { %v1198_v43 = vadd.f32 %v1196_v40, %v1190_v41 }
 0x1ac   : > { %v1206_v49 = vadd.f32 %v1204_v17, %v1198_v43  ;;  %v1366_v61 = vpop.permute.xlu1 %1365  ;;  %v1379_v17 = vstv %s1914_s9  ;;  %v1374_v43 = vpop.permute.xlu0 %1373 }
 0x1ad   : > { %v1380_v20 = vmul.f32 %v2636_v51, %v1379_v17 }
 0x1ae   : > { %v1214_v54 = vadd.f32 %v1212_v44, %v1206_v49  ;;  %v1384_v44 = vstv %s1916_s10 }
 0x1af   : > { %v1385_v22 = vmul.f32 %v2649_v60, %v1384_v44 }
 0x1b0   : > { %v1222_v58 = vadd.f32 %v1220_v38, %v1214_v54  ;;  %v1392_v49 = vpop.permute.xlu1 %1391  ;;  %v1400_v54 = vpop.permute.xlu0 %1399 }
 0x1b2   : > { %v1227_v59 = vadd.f32 %v1226_v0, %v1222_v58 }
 0x1b4   : > { %v1232_v46 = vadd.f32 %v1231_v1, %v1227_v59  ;;  %v1416_v59 = vpop.permute.xlu0 %1415 }
 0x1b6   : > { %v1240_v45 = vadd.f32 %v1238_v36, %v1232_v46  ;;  %v1408_v36 = vpop.permute.xlu1 %1407 }
 0x1b8   : > { %v1248_v2 = vadd.f32 %v1246_v62, %v1240_v45  ;;  %v1429_v62 = vstv %s1923_s13  ;;  %v1434_v45 = vstv %s1925_s14 }
 0x1b9   : > { %v1430_v51 = vmul.f32 %v2675_v32, %v1429_v62  ;;  %v1435_v60 = vmul.f32 %v2682_v21, %v1434_v45 }
 0x1ba   : > { %v1256_v5 = vadd.f32 %v1254_v24, %v1248_v2  ;;  %v1424_v24 = vpop.permute.xlu1 %1423 }
 0x1bc   : > { %v1264_v10 = vadd.f32 %v1262_v3, %v1256_v5  ;;  %v1442_v3 = vpop.permute.xlu0 %1441 }
 0x1be   : > { %v1272_v13 = vadd.f32 %v1270_v9, %v1264_v10  ;;  %v1450_v8 = vpop.permute.xlu1 %1449 }
 0x1c0   : > { %v1278_v7 = vadd.f32 %v1277_v23, %v1272_v13  ;;  %v1458_v10 = vpop.permute.xlu0 %1457  ;;  %v1479_v13 = vstv %s1932_s15 }
 0x1c1   : > { %v1480_v32 = vmul.f32 %v2711_v47, %v1479_v13 }
 0x1c2   : > { %v1284_v16 = vadd.f32 %v1283_v29, %v1278_v7  ;;  %v1466_v29 = vpop.permute.xlu1 %1465 }
 0x1c4   : > { %v1292_v18 = vadd.f32 %v1290_v63, %v1284_v16  ;;  %v1484_v16 = vstv %s1934_s16 }
 0x1c5   : > { %v1485_v21 = vmul.f32 %v2721_v42, %v1484_v16 }
 0x1c6   : > { %v1300_v19 = vadd.f32 %v1298_v28, %v1292_v18  ;;  %v1474_v28 = vpop.permute.xlu0 %1473  ;;  %v1492_v18 = vpop.permute.xlu1 %1491 }
 0x1c8   : > { %v1308_v25 = vadd.f32 %v1306_v53, %v1300_v19 }
 0x1ca   : > { %v1316_v34 = vadd.f32 %v1314_v55, %v1308_v25  ;;  %v1500_v15 = vpop.permute.xlu0 %1499 }
 0x1cc   : > { %v1324_v35 = vadd.f32 %v1322_v33, %v1316_v34  ;;  %v1508_v33 = vpop.permute.xlu1 %1507 }
 0x1ce   : > { %v1330_v27 = vadd.f32 %v1329_v50, %v1324_v35  ;;  %v1516_v50 = vpop.permute.xlu0 %1515 }
 0x1d0   : > { %v1336_v30 = vadd.f32 %v1335_v4, %v1330_v27  ;;  %v1524_v4 = vpop.permute.xlu1 %1523  ;;  %v1534_v27 = vstv %s1943_s18 }
 0x1d1   : > { %v1535_v42 = vmul.f32 %v2758_v31, %v1534_v27 }
 0x1d2   : > { %v1344_v39 = vadd.f32 %v1342_v12, %v1336_v30  ;;  %v1529_v12 = vstv %s1941_s11  ;;  %v1542_v30 = vpop.permute.xlu0 %1541 }
 0x1d3   : > { %v1530_v47 = vmul.f32 %v2750_v11, %v1529_v12 }
 0x1d4   : > { %v1352_v40 = vadd.f32 %v1350_v37, %v1344_v39 }
 0x1d6   : > { %v1360_v41 = vadd.f32 %v1358_v57, %v1352_v40  ;;  %v1550_v40 = vpop.permute.xlu1 %1549  ;;  %v1558_v17 = vpop.permute.xlu0 %1557 }
 0x1d8   : > { %v1368_v48 = vadd.f32 %v1366_v61, %v1360_v41 }
 0x1da   : > { %v1376_v52 = vadd.f32 %v1374_v43, %v1368_v48  ;;  %v1566_v44 = vpop.permute.xlu1 %1565  ;;  %v1579_v48 = vstv %s1950_s12 }
 0x1db   : > { %v1580_v11 = vmul.f32 %v2783_v56, %v1579_v48  ;;  %v1631_v56 = vstv %s1630_s1 }
 0x1dc   : > { %v1381_v38 = vadd.f32 %v1380_v20, %v1376_v52  ;;  %v1584_v52 = vstv %s1952_s17 }
 0x1dd   : > { %v1585_v31 = vmul.f32 %v2795_v6, %v1584_v52 }
 0x1de   : > { %v1386_v0 = vadd.f32 %v1385_v22, %v1381_v38  ;;  %v1592_v38 = vpop.permute.xlu1 %1591 }
 0x1e0   : > { %v1394_v1 = vadd.f32 %v1392_v49, %v1386_v0  ;;  %v1574_v49 = vpop.permute.xlu0 %1573 }
 0x1e2   : > { %v1402_v58 = vadd.f32 %v1400_v54, %v1394_v1 }
 0x1e4   : > { %v1410_v46 = vadd.f32 %v1408_v36, %v1402_v58  ;;  %v1600_v36 = vpop.permute.xlu0 %1599  ;;  %v1608_v58 = vpop.permute.xlu1 %1607 }
 0x1e6   : > { %v1418_v2 = vadd.f32 %v1416_v59, %v1410_v46 }
 0x1e8   : > { %v1426_v26 = vadd.f32 %v1424_v24, %v1418_v2  ;;  %v1616_v46 = vpop.permute.xlu0 %1615  ;;  %v1624_v45 = vpop.permute.xlu1 %1623 }
 0x1ea   : > { %v1431_v5 = vadd.f32 %v1430_v51, %v1426_v26  ;;  %v1628_v51 = vstv %s1627_s21 }
 0x1ec   : > { %v1436_v9 = vadd.f32 %v1435_v60, %v1431_v5 }
 0x1ee   : > { %v1444_v23 = vadd.f32 %v1442_v3, %v1436_v9 }
 0x1f0   : > { %v1452_v63 = vadd.f32 %v1450_v8, %v1444_v23 }
 0x1f2   : > { %v1460_v7 = vadd.f32 %v1458_v10, %v1452_v63 }
 0x1f4   : > { %v1468_v53 = vadd.f32 %v1466_v29, %v1460_v7 }
 0x1f6   : > { %v1476_v19 = vadd.f32 %v1474_v28, %v1468_v53 }
 0x1f8   : > { %v1481_v55 = vadd.f32 %v1480_v32, %v1476_v19 }
 0x1fa   : > { %v1486_v25 = vadd.f32 %v1485_v21, %v1481_v55 }
 0x1fc   : > { %v1494_v14 = vadd.f32 %v1492_v18, %v1486_v25 }
 0x1fe   : > { %v1502_v34 = vadd.f32 %v1500_v15, %v1494_v14 }
 0x200   : > { %v1510_v35 = vadd.f32 %v1508_v33, %v1502_v34 }
 0x202   : > { %v1518_v37 = vadd.f32 %v1516_v50, %v1510_v35 }
 0x204   : > { %v1526_v57 = vadd.f32 %v1524_v4, %v1518_v37 }
 0x206   : > { %v1531_v39 = vadd.f32 %v1530_v47, %v1526_v57 }
 0x208   : > { %v1536_v61 = vadd.f32 %v1535_v42, %v1531_v39 }
 0x20a   : > { %v1544_v41 = vadd.f32 %v1542_v30, %v1536_v61 }
 0x20c   : > { %v1552_v43 = vadd.f32 %v1550_v40, %v1544_v41 }
 0x20e   : > { %v1560_v20 = vadd.f32 %v1558_v17, %v1552_v43 }
 0x210   : > { %v1568_v22 = vadd.f32 %v1566_v44, %v1560_v20 }
 0x212   : > { %v1576_v54 = vadd.f32 %v1574_v49, %v1568_v22 }
 0x214   : > { %v1581_v0 = vadd.f32 %v1580_v11, %v1576_v54 }
 0x216   : > { %v1586_v1 = vadd.f32 %v1585_v31, %v1581_v0 }
 0x218   : > { %v1594_v59 = vadd.f32 %v1592_v38, %v1586_v1 }
 0x21a   : > { %v1602_v62 = vadd.f32 %v1600_v36, %v1594_v59 }
 0x21c   : > { %v1610_v24 = vadd.f32 %v1608_v58, %v1602_v62 }
 0x21e   : > { %v1618_v2 = vadd.f32 %v1616_v46, %v1610_v24 }
 0x220   : > { %v1626_v3 = vadd.f32 %v1624_v45, %v1618_v2 }
 0x222   : > { %v1629_v26 = vmul.f32 %v1628_v51, %v1626_v3 }
 0x224   : > { %v1632_v60 = vadd.f32 %v1631_v56, %v1629_v26 }
 0x226   : > { %v1633_v6 = vmax.f32 %v1632_v60, 0.0 }
 0x228   : > { %1635 = vst.msk [vmem:[%s211_s23] sm:$0xff] %vm1634_vm0, %v1633_v6 }
 0x229 PF: > { %s17_s19 = sadd.s32 1, %s2019_s19  }
 0x22a   : > { %p14_p1 = scmp.ge.s32.totalorder %s17_s19, 4  }
 0x22c   :  { %16 = sbr.rel (!%p14_p1) target bundleno = 4 (0x4), region = 86 }
 0x233   :  { %1655 = vsyncpa [#allocation5], 1 }
 0x234   :  { %1657 = vsyncpa [#allocation5 + $0x1], 1 }

// kernel: apn_forward.12
= control target key start
LH: loop header
LB: loop body
LE: loop exit
PB: predicated region body
PF: predicated region fallthrough
CT: control target
= control target key end

     0   :  { %s686_s0 = inlined_call_operand.vmem [shape: f32[25], index: 0, kind: input, shape index: {}]   ;;  %s687_s1 = inlined_call_operand.<no memory space> [shape: f32[1], index: 1, kind: input, shape index: {}]   ;;  %s688_s2 = inlined_call_operand.<no memory space> [shape: f32[1], index: 2, kind: input, shape index: {}]   ;;  %s689_s3 = inlined_call_operand.vmem [shape: f32[2,1,8,8], index: 3, kind: input, shape index: {}]   ;;  %s690_s4 = inlined_call_operand.vmem [shape: f32[2,1,4,4], index: 4, kind: output, shape index: {}]  }
   0x1   :  { %9 = sst [smem:[#allocation2]] %s687_s1 }
   0x2   :  { %10 = sst [smem:[#allocation3]] %s688_s2 }
   0x3   :  { %11 = vsyncpa [#allocation5], 0  ;;  %s589_s19 = smov 0  }
   0x4 LB: > { %s468_s20 = sadd.s32 4294967295, %s551_s19   ;;  %p470_p0 = scmp.ge.s32.totalorder %s551_s19, 1  ;;  %s551_s19 = sphi %s589_s19, %s17_s19  }
   0x5   : > { %p137_p1 = scmp.lt.s32.totalorder %s551_s19, 3  ;;  %s150_s22 = sshll.u32 %s686_s0, 4  ;;  %s151_s22 = int_to_ptr.vmem [resolvable:$true] %s150_s22 }
   0x6   : > { %p511_p3 = scmp.eq.s32.totalorder %s468_s20, 0  ;;  %s526_s23 = scalar_lea.vmem %s151_s22, 16 }
   0x7   : > { %p600_p2 = pnand %p470_p0, %p137_p1  ;;  %p527_p6 = scmp.ne.s32.totalorder %s151_s22, %s526_s23 }
   0x8   : > { %p534_p10 = scmp.lt.s32.totalorder %s151_s22, %s151_s22  ;;  %p535_p11 = scmp.lt.s32.totalorder %s526_s23, %s526_s23 }
   0x9   : > { %p507_p4 = pneg %p600_p2 }
   0xa   : > { %p536_p12 = por %p535_p11, %p534_p10 }
   0xb   : > { %p508_p5 = pnand %p511_p3, %p507_p4 }
   0xd   : > { %p528_p7 = pneg %p508_p5 }
   0xf   : > { %p529_p8 = pnand %p528_p7, %p527_p6 }
  0x11   : > { %p530_p9 = pneg %p529_p8 }
  0x13   : > { %p537_p13 = pnand %p536_p12, %p530_p9 }
  0x15   : > { %540 = shalt.err (!%p537_p13)
}
  0x16   : > { %s553_s24 = smov [#allocation4]   ;;  %176 = sbr.rel (%p600_p2) target bundleno = 213 (0xd5), region = 36 }
  0x17   : > { %510 = dma.vmem_to_smem (!%p508_p5), %s151_s22, 16, %s553_s24, [#allocation5]  }
  0x1d   : > { %546 = dma.done.wait (%p511_p3), [#allocation5], 16  }
  0x1e   : > { %548 = vsyncadd (%p511_p3), [#allocation5], 4294967280 }
  0x1f   : > { %182 = sfence }
  0x20   : > { %p201_p0 = scmp.lt.s32.totalorder %s468_s20, 1  ;;  %s477_s25 = sld [smem:[#allocation4 + $0x1]]  ;;  %vm401_vm0 = vcmask 27648  }
  0x21   : > { %s479_s26 = sld [smem:[#allocation4 + $0x3]]  ;;  %s478_s27 = sld [smem:[#allocation4 + $0x2]] }
  0x22   : > { %s693_s20 = smov (!%p201_p0, %s468_s20), 1  ;;  %s480_s6 = sld [smem:[#allocation4 + $0x4]] }
  0x23   : > { %s475_s28 = sshll.u32 %s693_s20, 3  ;;  %s482_s7 = sld [smem:[#allocation4 + $0x6]] }
  0x24   : > { %s617_s5 = scalar_lea.vmem %s689_s3, %s475_s28  ;;  %s483_s8 = sld [smem:[#allocation4 + $0x7]] }
  0x25   : > { %v620_v0 = vld [vmem:[%s617_s5] sm:$0xf]  ;;  %s484_s9 = sld [smem:[#allocation4 + $0x8]]  ;;  %s485_s10 = sld [smem:[#allocation4 + $0x9]]  ;;  %v662_v36 = vld [vmem:[%s617_s5 + $0x4] sm:$0xf] }
  0x26   : > { %v215_v1 = vstv %s477_s25  ;;  %s554_s11 = smov 127   ;;  %s555_s12 = smov 125   ;;  %v628_v8 = vld [vmem:[%s617_s5 + $0x1] sm:$0xf] }
  0x27   : > { %v216_v2 = vmul.f32 %v215_v1, %v620_v0  ;;  %v231_v3 = vstv %s479_s26  ;;  %v223_v5 = vstv %s478_s27  ;;  %s487_s13 = sld [smem:[#allocation4 + $0xb]]  ;;  %s488_s14 = sld [smem:[#allocation4 + $0xc]]  ;;  %v640_v18 = vld [vmem:[%s617_s5 + $0x2] sm:$0xf] }
  0x28   : > { %v232_v4 = vmul.f32 %v231_v3, %v620_v0  ;;  %v224_v6 = vmul.f32 %v223_v5, %v620_v0  ;;  %v239_v7 = vstv %s480_s6  ;;  %s556_s15 = smov 126   ;;  %s557_s16 = smov 124   ;;  %v651_v27 = vld [vmem:[%s617_s5 + $0x3] sm:$0xf] }
  0x29   : > { %218 = vrot.lane.b32.xlu0 %v216_v2, %s554_s11  ;;  %v240_v9 = vmul.f32 %v239_v7, %v620_v0  ;;  %v252_v10 = vstv %s482_s7  ;;  %s489_s17 = sld [smem:[#allocation4 + $0xd]]  ;;  %s490_s18 = sld [smem:[#allocation4 + $0xe]] }
  0x2a   : > { %234 = vrot.lane.b32.xlu1 %v232_v4, %s555_s12  ;;  %v260_v11 = vstv %s483_s8  ;;  %v253_v12 = vmul.f32 %v252_v10, %v628_v8  ;;  %s492_s21 = sld [smem:[#allocation4 + $0x10]]  ;;  %s493_s1 = sld [smem:[#allocation4 + $0x11]] }
  0x2b   : > { %v261_v13 = vmul.f32 %v260_v11, %v628_v8  ;;  %v268_v14 = vstv %s484_s9  ;;  %v276_v15 = vstv %s485_s10  ;;  %s494_s22 = sld [smem:[#allocation4 + $0x12]]  ;;  %s495_s2 = sld [smem:[#allocation4 + $0x13]] }
  0x2c   : > { %v269_v16 = vmul.f32 %v268_v14, %v628_v8  ;;  %v277_v17 = vmul.f32 %v276_v15, %v628_v8  ;;  %s497_s23 = sld [smem:[#allocation4 + $0x15]]  ;;  %s498_s24 = sld [smem:[#allocation4 + $0x16]] }
  0x2d   : > { %226 = vrot.lane.b32.xlu0 %v224_v6, %s556_s15  ;;  %v289_v19 = vstv %s487_s13  ;;  %v297_v20 = vstv %s488_s14  ;;  %s499_s25 = sld [smem:[#allocation4 + $0x17]]  ;;  %s500_s26 = sld [smem:[#allocation4 + $0x18]] }
  0x2e   : > { %242 = vrot.lane.b32.xlu1 %v240_v9, %s557_s16  ;;  %v290_v21 = vmul.f32 %v289_v19, %v640_v18  ;;  %v298_v22 = vmul.f32 %v297_v20, %v640_v18  ;;  %s210_s27 = sld [smem:[#allocation4]]  ;;  %s481_s28 = sld [smem:[#allocation4 + $0x5]] }
  0x2f   : > { %v305_v23 = vstv %s489_s17  ;;  %v313_v24 = vstv %s490_s18  ;;  %s486_s29 = sld [smem:[#allocation4 + $0xa]]  ;;  %s491_s30 = sld [smem:[#allocation4 + $0xf]] }
  0x30   : > { %v306_v25 = vmul.f32 %v305_v23, %v640_v18  ;;  %v314_v26 = vmul.f32 %v313_v24, %v640_v18  ;;  %v326_v28 = vstv %s492_s21  ;;  %v334_v29 = vstv %s493_s1  ;;  %s496_s5 = sld [smem:[#allocation4 + $0x14]]  ;;  %s394_s6 = sld [smem:[#allocation2]] }
  0x31   : > { %255 = vrot.lane.b32.xlu0 %v253_v12, %s554_s11  ;;  %v327_v30 = vmul.f32 %v326_v28, %v651_v27  ;;  %v335_v31 = vmul.f32 %v334_v29, %v651_v27  ;;  %v342_v32 = vstv %s494_s22  ;;  %v350_v33 = vstv %s495_s2  ;;  %s397_s7 = sld [smem:[#allocation3]]  ;;  %s476_s8 = sshll.u32 %s693_s20, 2 }
  0x32   : > { %263 = vrot.lane.b32.xlu1 %v261_v13, %s556_s15  ;;  %v343_v34 = vmul.f32 %v342_v32, %v651_v27  ;;  %v351_v35 = vmul.f32 %v350_v33, %v651_v27  ;;  %v363_v37 = vstv %s497_s23  ;;  %v371_v38 = vstv %s498_s24 }
  0x33   : > { %v364_v39 = vmul.f32 %v363_v37, %v662_v36  ;;  %v372_v40 = vmul.f32 %v371_v38, %v662_v36  ;;  %v379_v41 = vstv %s499_s25  ;;  %v387_v42 = vstv %s500_s26 }
  0x34   : > { %v380_v43 = vmul.f32 %v379_v41, %v662_v36  ;;  %v388_v44 = vmul.f32 %v387_v42, %v662_v36  ;;  %v211_v45 = vstv %s210_s27  ;;  %v248_v51 = vstv %s481_s28 }
  0x35   : > { %271 = vrot.lane.b32.xlu0 %v269_v16, %s555_s12  ;;  %v212_v46 = vmul.f32 %v211_v45, %v620_v0  ;;  %v249_v55 = vmul.f32 %v248_v51, %v628_v8  ;;  %v285_v62 = vstv %s486_s29  ;;  %v322_v8 = vstv %s491_s30 }
  0x36   : > { %279 = vrot.lane.b32.xlu1 %v277_v17, %s557_s16  ;;  %v286_v2 = vmul.f32 %v285_v62, %v640_v18  ;;  %v323_v13 = vmul.f32 %v322_v8, %v651_v27  ;;  %v359_v18 = vstv %s496_s5 }
  0x37   : > { %v360_v24 = vmul.f32 %v359_v18, %v662_v36  ;;  %v398_v37 = vstv %s397_s7 }
  0x39   : > { %292 = vrot.lane.b32.xlu0 %v290_v21, %s554_s11 }
  0x3a   : > { %300 = vrot.lane.b32.xlu1 %v298_v22, %s556_s15 }
  0x3d   : > { %308 = vrot.lane.b32.xlu0 %v306_v25, %s555_s12 }
  0x3e   : > { %316 = vrot.lane.b32.xlu1 %v314_v26, %s557_s16 }
  0x41   : > { %329 = vrot.lane.b32.xlu0 %v327_v30, %s554_s11 }
  0x42   : > { %337 = vrot.lane.b32.xlu1 %v335_v31, %s556_s15 }
  0x45   : > { %345 = vrot.lane.b32.xlu0 %v343_v34, %s555_s12  ;;  %v395_v34 = vstv %s394_s6 }
  0x46   : > { %353 = vrot.lane.b32.xlu1 %v351_v35, %s557_s16 }
  0x49   : > { %366 = vrot.lane.b32.xlu0 %v364_v39, %s554_s11  ;;  %s208_s11 = scalar_lea.vmem %s690_s4, %s476_s8 }
  0x4a   : > { %374 = vrot.lane.b32.xlu1 %v372_v40, %s556_s15 }
  0x4d   : > { %382 = vrot.lane.b32.xlu0 %v380_v43, %s555_s12 }
  0x4e   : > { %390 = vrot.lane.b32.xlu1 %v388_v44, %s557_s16 }
  0x9b   : > { %v219_v47 = vpop.permute.xlu0 %218 }
  0x9c   : > { %v235_v48 = vpop.permute.xlu1 %234  ;;  %v221_v49 = vadd.f32 %v219_v47, %v212_v46 }
  0x9f   : > { %v227_v50 = vpop.permute.xlu0 %226 }
  0xa0   : > { %v229_v52 = vadd.f32 %v227_v50, %v221_v49  ;;  %v243_v53 = vpop.permute.xlu1 %242 }
  0xa2   : > { %v237_v54 = vadd.f32 %v235_v48, %v229_v52 }
  0xa3   : > { %v256_v56 = vpop.permute.xlu0 %255 }
  0xa4   : > { %v245_v57 = vadd.f32 %v243_v53, %v237_v54  ;;  %v264_v58 = vpop.permute.xlu1 %263 }
  0xa6   : > { %v250_v59 = vadd.f32 %v249_v55, %v245_v57 }
  0xa7   : > { %v272_v61 = vpop.permute.xlu0 %271 }
  0xa8   : > { %v258_v60 = vadd.f32 %v256_v56, %v250_v59  ;;  %v280_v0 = vpop.permute.xlu1 %279 }
  0xaa   : > { %v266_v63 = vadd.f32 %v264_v58, %v258_v60 }
  0xab   : > { %v293_v3 = vpop.permute.xlu0 %292 }
  0xac   : > { %v274_v1 = vadd.f32 %v272_v61, %v266_v63  ;;  %v301_v5 = vpop.permute.xlu1 %300 }
  0xae   : > { %v282_v4 = vadd.f32 %v280_v0, %v274_v1 }
  0xaf   : > { %v309_v9 = vpop.permute.xlu0 %308 }
  0xb0   : > { %v287_v6 = vadd.f32 %v286_v2, %v282_v4  ;;  %v317_v11 = vpop.permute.xlu1 %316 }
  0xb2   : > { %v295_v7 = vadd.f32 %v293_v3, %v287_v6 }
  0xb3   : > { %v330_v14 = vpop.permute.xlu0 %329 }
  0xb4   : > { %v303_v10 = vadd.f32 %v301_v5, %v295_v7  ;;  %v338_v16 = vpop.permute.xlu1 %337 }
  0xb6   : > { %v311_v12 = vadd.f32 %v309_v9, %v303_v10 }
  0xb7   : > { %v346_v20 = vpop.permute.xlu0 %345 }
  0xb8   : > { %v319_v15 = vadd.f32 %v317_v11, %v311_v12  ;;  %v354_v22 = vpop.permute.xlu1 %353 }
  0xba   : > { %v324_v17 = vadd.f32 %v323_v13, %v319_v15 }
  0xbb   : > { %v367_v25 = vpop.permute.xlu0 %366 }
  0xbc   : > { %v332_v19 = vadd.f32 %v330_v14, %v324_v17  ;;  %v375_v28 = vpop.permute.xlu1 %374 }
  0xbe   : > { %v340_v21 = vadd.f32 %v338_v16, %v332_v19 }
  0xbf   : > { %v383_v30 = vpop.permute.xlu0 %382 }
  0xc0   : > { %v348_v23 = vadd.f32 %v346_v20, %v340_v21  ;;  %v391_v32 = vpop.permute.xlu1 %390 }
  0xc2   : > { %v356_v26 = vadd.f32 %v354_v22, %v348_v23 }
  0xc4   : > { %v361_v29 = vadd.f32 %v360_v24, %v356_v26 }
  0xc6   : > { %v369_v27 = vadd.f32 %v367_v25, %v361_v29 }
  0xc8   : > { %v377_v31 = vadd.f32 %v375_v28, %v369_v27 }
  0xca   : > { %v385_v33 = vadd.f32 %v383_v30, %v377_v31 }
  0xcc   : > { %v393_v35 = vadd.f32 %v391_v32, %v385_v33 }
  0xce   : > { %v396_v38 = vmul.f32 %v395_v34, %v393_v35 }
  0xd0   : > { %v399_v39 = vadd.f32 %v398_v37, %v396_v38 }
  0xd2   : > { %v400_v36 = vmax.f32 %v399_v39, 0.0 }
  0xd4   : > { %402 = vst.msk [vmem:[%s208_s11] sm:$0xf] %vm401_vm0, %v400_v36 }
  0xd5 PF: > { %s17_s19 = sadd.s32 1, %s551_s19  }
  0xd6   : > { %p14_p1 = scmp.ge.s32.totalorder %s17_s19, 4  }
  0xd8   :  { %16 = sbr.rel (!%p14_p1) target bundleno = 4 (0x4), region = 71 }
  0xdf   :  { %422 = vsyncpa [#allocation5], 1 }
  0xe0   :  { %424 = vsyncpa [#allocation5 + $0x1], 1 }

// kernel: apn_forward.14
= control target key start
LH: loop header
LB: loop body
LE: loop exit
PB: predicated region body
PF: predicated region fallthrough
CT: control target
= control target key end

     0   :  { %vm32_vm0 = vcmask 1043456   ;;  %vm21_vm1 = vcmask 25600   ;;  %v182_v10 = vmov 0.0   ;;  %vm183_vm2 = vmmov 0   ;;  %s234_s0 = inlined_call_operand.vmem [shape: f32[2,4,256], index: 0, kind: input, shape index: {}]   ;;  %s235_s1 = inlined_call_operand.vmem [shape: f32[4,8], index: 1, kind: input, shape index: {}]   ;;  %s236_s2 = inlined_call_operand.vmem [shape: f32[1,8], index: 2, kind: input, shape index: {}]   ;;  %s237_s3 = inlined_call_operand.vmem [shape: f32[1,8], index: 3, kind: input, shape index: {}]   ;;  %s238_s4 = inlined_call_operand.vmem [shape: f32[2,8], index: 4, kind: output, shape index: {}]  }
   0x1   :  { %v24_v0 = vld [vmem:[%s234_s0] sm:$0xff]  ;;  %v25_v1 = vld [vmem:[%s234_s0 + $0x8] sm:$0xff]  ;;  %22 = vst.msk [vmem:[#allocation2] sm:$0x3] %vm21_vm1, %v182_v10  ;;  %173 = vmatprep.subr.mxu0 %v182_v10  ;;  %175 = vmatprep.mubr.msk.f32.mxu0 %vm183_vm2, %v182_v10  ;;  %v45_v12 = vlaneseq  ;;  %vm55_vm3 = vcmask 1041409   ;;  %vm67_vm4 = vcmask 31744  }
   0x2   :  { %v28_v2 = vcombine.high %v24_v0, %v24_v0  ;;  %v33_v3 = vsel %vm32_vm0, %v24_v0, 0.0  ;;  %v29_v4 = vcombine.high %v25_v1, %v25_v1  ;;  %v38_v6 = vsel %vm32_vm0, %v25_v1, 0.0  ;;  %v66_v11 = vld [vmem:[%s235_s1] sm:$0xf] }
   0x3   :  { %174 = vmatpush3.msk.msra.mxu0 %vm32_vm0, %v66_v11  ;;  %v46_v13 = vand.u32 127, %v45_v12  ;;  %v48_v14 = vshrl.u32 %v45_v12, 7  ;;  %v169_v25 = vld [vmem:[%s236_s2] ss:$0 sm:$0xff]  ;;  %vm161_vm5 = vcmask 58368  }
   0x4   :  { %v34_v5 = vsel %vm32_vm0, %v28_v2, 0.0  ;;  %v39_v7 = vsel %vm32_vm0, %v29_v4, 0.0  ;;  %v170_v27 = vld [vmem:[%s237_s3] ss:$0 sm:$0xff] }
   0x5   :  { %v35_v8 = vadd.f32 %v34_v5, %v33_v3  ;;  %v40_v9 = vadd.f32 %v39_v7, %v38_v6  ;;  %v49_v16 = vsub.s32 %v46_v13, %v48_v14 }
   0x7   :  { %36 = vadd.xlane.f32.xlu0 %v35_v8 }
   0x8   :  { %v23_v20 = vld [vmem:[#allocation2] sm:$0x3] }
   0xb   :  { %41 = vadd.xlane.f32.xlu0 %v40_v9 }
  0x94   :  { %v37_v15 = vpop.xlane.xlu0 %36 }
  0x95   :  { %v50_v18 = vrot.slane %v37_v15, %v49_v16 }
  0x98   :  { %v42_v17 = vpop.xlane.xlu0 %41 }
  0x99   :  { %v54_v19 = vrot.slane %v42_v17, %v49_v16 }
  0x9b   :  { %v56_v21 = vsel %vm55_vm3, %v54_v19, %v50_v18 }
  0x9c   :  { %v58_v22 = vadd.f32 %v56_v21, %v23_v20 }
  0x9e   :  { %60 = vst.msk [vmem:[#allocation2] sm:$0x3] %vm21_vm1, %v58_v22 }
  0xa5   :  { %v64_v23 = vld [vmem:[#allocation2] sm:$0x3] }
  0xa6   :  { %v65_v24 = vmul.f32 0.00390625, %v64_v23 }
  0xa8   :  { %176 = vmatmul.mubr.msk.f32.vlgmr.msra.gmra.mrb[0].mxu0 %vm67_vm4, %v65_v24 }
 0x17b   :  { %v140_v26 = vpop.f32.mrb[0].mxu0 }
 0x17c   :  { %v151_v28 = vmul.f32 %v169_v25, %v140_v26  ;;  %v177_v29 = vpop.f32.mrb[1].mxu0 }
 0x17e   :  { %v159_v30 = vadd.f32 %v170_v27, %v151_v28 }
 0x180   :  { %v160_v31 = vmax.f32 %v159_v30, 0.0 }
 0x182   :  { %162 = vst.msk [vmem:[%s238_s4] sm:$0x3] %vm161_vm5, %v160_v31 }

// kernel: apn_forward.13
= control target key start
LH: loop header
LB: loop body
LE: loop exit
PB: predicated region body
PF: predicated region fallthrough
CT: control target
= control target key end

     0   :  { %s957_s0 = inlined_call_operand.vmem [shape: f32[49], index: 0, kind: input, shape index: {}]   ;;  %s958_s1 = inlined_call_operand.<no memory space> [shape: f32[1], index: 1, kind: input, shape index: {}]   ;;  %s959_s2 = inlined_call_operand.<no memory space> [shape: f32[1], index: 2, kind: input, shape index: {}]   ;;  %s960_s3 = inlined_call_operand.vmem [shape: f32[2,1,14,14], index: 3, kind: input, shape index: {}]   ;;  %s961_s4 = inlined_call_operand.vmem [shape: f32[2,1,8,8], index: 4, kind: output, shape index: {}]  }
   0x1   :  { %9 = sst [smem:[#allocation2]] %s958_s1 }
   0x2   :  { %10 = sst [smem:[#allocation3]] %s959_s2 }
   0x3   :  { %11 = vsyncpa [#allocation5], 0  ;;  %s808_s19 = smov 0  }
   0x4 LB: > { %s657_s20 = sadd.s32 4294967295, %s768_s19   ;;  %p659_p0 = scmp.ge.s32.totalorder %s768_s19, 1  ;;  %s768_s19 = sphi %s808_s19, %s17_s19  }
   0x5   : > { %p137_p1 = scmp.lt.s32.totalorder %s768_s19, 3  ;;  %s150_s22 = sshll.u32 %s957_s0, 4  ;;  %s151_s22 = int_to_ptr.vmem [resolvable:$true] %s150_s22 }
   0x6   : > { %p726_p3 = scmp.eq.s32.totalorder %s657_s20, 0  ;;  %s743_s23 = scalar_lea.vmem %s151_s22, 16 }
   0x7   : > { %p819_p2 = pnand %p659_p0, %p137_p1  ;;  %p744_p6 = scmp.ne.s32.totalorder %s151_s22, %s743_s23 }
   0x8   : > { %p751_p10 = scmp.lt.s32.totalorder %s151_s22, %s151_s22  ;;  %p752_p11 = scmp.lt.s32.totalorder %s743_s23, %s743_s23 }
   0x9   : > { %p722_p4 = pneg %p819_p2 }
   0xa   : > { %p753_p12 = por %p752_p11, %p751_p10 }
   0xb   : > { %p723_p5 = pnand %p726_p3, %p722_p4 }
   0xd   : > { %p745_p7 = pneg %p723_p5 }
   0xf   : > { %p746_p8 = pnand %p745_p7, %p744_p6 }
  0x11   : > { %p747_p9 = pneg %p746_p8 }
  0x13   : > { %p754_p13 = pnand %p753_p12, %p747_p9 }
  0x15   : > { %757 = shalt.err (!%p754_p13)
}
  0x16   : > { %s770_s24 = smov [#allocation4]   ;;  %177 = sbr.rel (%p819_p2) target bundleno = 261 (0x105), region = 36 }
  0x17   : > { %725 = dma.vmem_to_smem (!%p723_p5), %s151_s22, 16, %s770_s24, [#allocation5]  }
  0x1d   : > { %763 = dma.done.wait (%p726_p3), [#allocation5], 16  }
  0x1e   : > { %765 = vsyncadd (%p726_p3), [#allocation5], 4294967280 }
  0x1f   : > { %183 = sfence }
  0x20   : > { %p203_p0 = scmp.lt.s32.totalorder %s657_s20, 1  ;;  %s667_s25 = sld [smem:[#allocation4 + $0x1]]  ;;  %vm590_vm0 = vcmask 64512  }
  0x21   : > { %s669_s26 = sld [smem:[#allocation4 + $0x3]]  ;;  %s668_s27 = sld [smem:[#allocation4 + $0x2]] }
  0x22   : > { %s964_s20 = smov (!%p203_p0, %s657_s20), 1  ;;  %s670_s6 = sld [smem:[#allocation4 + $0x4]] }
  0x23   : > { %s717_s28 = sshll.u32 %s964_s20, 4  ;;  %s671_s7 = sld [smem:[#allocation4 + $0x5]] }
  0x24   : > { %s836_s5 = scalar_lea.vmem %s960_s3, %s717_s28  ;;  %s672_s8 = sld [smem:[#allocation4 + $0x6]] }
  0x25   : > { %v839_v0 = vld [vmem:[%s836_s5] sm:$0xff]  ;;  %s674_s9 = sld [smem:[#allocation4 + $0x8]]  ;;  %s771_s10 = smov 127  }
  0x26   : > { %v218_v1 = vstv %s667_s25  ;;  %s675_s11 = sld [smem:[#allocation4 + $0x9]]  ;;  %s772_s12 = smov 125   ;;  %v852_v13 = vld [vmem:[%s836_s5 + $0x1] sm:$0xff] }
  0x27   : > { %v219_v2 = vmul.f32 %v218_v1, %v839_v0  ;;  %v234_v3 = vstv %s669_s26  ;;  %v226_v5 = vstv %s668_s27  ;;  %s676_s13 = sld [smem:[#allocation4 + $0xa]]  ;;  %s677_s14 = sld [smem:[#allocation4 + $0xb]]  ;;  %v867_v26 = vld [vmem:[%s836_s5 + $0x2] sm:$0xff] }
  0x28   : > { %v235_v4 = vmul.f32 %v234_v3, %v839_v0  ;;  %v227_v6 = vmul.f32 %v226_v5, %v839_v0  ;;  %v242_v7 = vstv %s670_s6  ;;  %s773_s15 = smov 126   ;;  %s774_s16 = smov 124   ;;  %v882_v39 = vld [vmem:[%s836_s5 + $0x3] sm:$0xff] }
  0x29   : > { %221 = vrot.lane.b32.xlu0 %v219_v2, %s771_s10  ;;  %v243_v8 = vmul.f32 %v242_v7, %v839_v0  ;;  %v250_v9 = vstv %s671_s7  ;;  %s678_s17 = sld [smem:[#allocation4 + $0xc]]  ;;  %s679_s18 = sld [smem:[#allocation4 + $0xd]]  ;;  %v897_v52 = vld [vmem:[%s836_s5 + $0x4] sm:$0xff] }
  0x2a   : > { %237 = vrot.lane.b32.xlu1 %v235_v4, %s772_s12  ;;  %v251_v10 = vmul.f32 %v250_v9, %v839_v0  ;;  %v258_v11 = vstv %s672_s8  ;;  %s775_s21 = smov 123   ;;  %s776_s1 = smov 122   ;;  %v912_v2 = vld [vmem:[%s836_s5 + $0x5] sm:$0xff] }
  0x2b   : > { %v259_v12 = vmul.f32 %v258_v11, %v839_v0  ;;  %v271_v14 = vstv %s674_s9  ;;  %s681_s22 = sld [smem:[#allocation4 + $0xf]]  ;;  %s682_s2 = sld [smem:[#allocation4 + $0x10]] }
  0x2c   : > { %v279_v15 = vstv %s675_s11  ;;  %v272_v16 = vmul.f32 %v271_v14, %v852_v13  ;;  %s683_s23 = sld [smem:[#allocation4 + $0x11]]  ;;  %s684_s24 = sld [smem:[#allocation4 + $0x12]] }
  0x2d   : > { %229 = vrot.lane.b32.xlu0 %v227_v6, %s773_s15  ;;  %v280_v17 = vmul.f32 %v279_v15, %v852_v13  ;;  %v287_v18 = vstv %s676_s13  ;;  %v295_v19 = vstv %s677_s14  ;;  %s685_s25 = sld [smem:[#allocation4 + $0x13]]  ;;  %s686_s26 = sld [smem:[#allocation4 + $0x14]] }
  0x2e   : > { %245 = vrot.lane.b32.xlu1 %v243_v8, %s774_s16  ;;  %v288_v20 = vmul.f32 %v287_v18, %v852_v13  ;;  %v296_v21 = vmul.f32 %v295_v19, %v852_v13  ;;  %s688_s27 = sld [smem:[#allocation4 + $0x16]]  ;;  %s689_s28 = sld [smem:[#allocation4 + $0x17]] }
  0x2f   : > { %v303_v22 = vstv %s678_s17  ;;  %v311_v23 = vstv %s679_s18  ;;  %s690_s29 = sld [smem:[#allocation4 + $0x18]]  ;;  %s691_s30 = sld [smem:[#allocation4 + $0x19]] }
  0x30   : > { %v304_v24 = vmul.f32 %v303_v22, %v852_v13  ;;  %v312_v25 = vmul.f32 %v311_v23, %v852_v13  ;;  %s692_s6 = sld [smem:[#allocation4 + $0x1a]]  ;;  %s693_s7 = sld [smem:[#allocation4 + $0x1b]] }
  0x31   : > { %253 = vrot.lane.b32.xlu0 %v251_v10, %s775_s21  ;;  %v324_v27 = vstv %s681_s22  ;;  %v332_v28 = vstv %s682_s2  ;;  %s695_s8 = sld [smem:[#allocation4 + $0x1d]]  ;;  %s696_s9 = sld [smem:[#allocation4 + $0x1e]] }
  0x32   : > { %261 = vrot.lane.b32.xlu1 %v259_v12, %s776_s1  ;;  %v325_v29 = vmul.f32 %v324_v27, %v867_v26  ;;  %v333_v30 = vmul.f32 %v332_v28, %v867_v26  ;;  %v340_v31 = vstv %s683_s23  ;;  %v348_v32 = vstv %s684_s24  ;;  %s697_s11 = sld [smem:[#allocation4 + $0x1f]]  ;;  %s698_s13 = sld [smem:[#allocation4 + $0x20]] }
  0x33   : > { %v341_v33 = vmul.f32 %v340_v31, %v867_v26  ;;  %v349_v34 = vmul.f32 %v348_v32, %v867_v26  ;;  %v356_v35 = vstv %s685_s25  ;;  %v364_v36 = vstv %s686_s26  ;;  %s699_s14 = sld [smem:[#allocation4 + $0x21]]  ;;  %s700_s17 = sld [smem:[#allocation4 + $0x22]] }
  0x34   : > { %v357_v37 = vmul.f32 %v356_v35, %v867_v26  ;;  %v365_v38 = vmul.f32 %v364_v36, %v867_v26  ;;  %v377_v40 = vstv %s688_s27  ;;  %v385_v41 = vstv %s689_s28  ;;  %s702_s18 = sld [smem:[#allocation4 + $0x24]]  ;;  %s703_s22 = sld [smem:[#allocation4 + $0x25]] }
  0x35   : > { %274 = vrot.lane.b32.xlu0 %v272_v16, %s771_s10  ;;  %v378_v42 = vmul.f32 %v377_v40, %v882_v39  ;;  %v386_v43 = vmul.f32 %v385_v41, %v882_v39  ;;  %v393_v44 = vstv %s690_s29  ;;  %v401_v45 = vstv %s691_s30  ;;  %s704_s2 = sld [smem:[#allocation4 + $0x26]]  ;;  %s705_s23 = sld [smem:[#allocation4 + $0x27]]  ;;  %v927_v16 = vld [vmem:[%s836_s5 + $0x6] sm:$0xff] }
  0x36   : > { %282 = vrot.lane.b32.xlu1 %v280_v17, %s773_s15  ;;  %v394_v46 = vmul.f32 %v393_v44, %v882_v39  ;;  %v402_v47 = vmul.f32 %v401_v45, %v882_v39  ;;  %v409_v48 = vstv %s692_s6  ;;  %v417_v49 = vstv %s693_s7  ;;  %s706_s24 = sld [smem:[#allocation4 + $0x28]]  ;;  %s707_s25 = sld [smem:[#allocation4 + $0x29]] }
  0x37   : > { %v410_v50 = vmul.f32 %v409_v48, %v882_v39  ;;  %v418_v51 = vmul.f32 %v417_v49, %v882_v39  ;;  %v430_v53 = vstv %s695_s8  ;;  %v438_v54 = vstv %s696_s9  ;;  %s709_s26 = sld [smem:[#allocation4 + $0x2b]]  ;;  %s710_s27 = sld [smem:[#allocation4 + $0x2c]] }
  0x38   : > { %v431_v55 = vmul.f32 %v430_v53, %v897_v52  ;;  %v439_v56 = vmul.f32 %v438_v54, %v897_v52  ;;  %v446_v57 = vstv %s697_s11  ;;  %v454_v58 = vstv %s698_s13  ;;  %s711_s28 = sld [smem:[#allocation4 + $0x2d]]  ;;  %s712_s29 = sld [smem:[#allocation4 + $0x2e]] }
  0x39   : > { %290 = vrot.lane.b32.xlu0 %v288_v20, %s772_s12  ;;  %v447_v59 = vmul.f32 %v446_v57, %v897_v52  ;;  %v455_v60 = vmul.f32 %v454_v58, %v897_v52  ;;  %v462_v61 = vstv %s699_s14  ;;  %v470_v62 = vstv %s700_s17  ;;  %s713_s30 = sld [smem:[#allocation4 + $0x2f]]  ;;  %s714_s6 = sld [smem:[#allocation4 + $0x30]] }
  0x3a   : > { %298 = vrot.lane.b32.xlu1 %v296_v21, %s774_s16  ;;  %v463_v63 = vmul.f32 %v462_v61, %v897_v52  ;;  %v471_v1 = vmul.f32 %v470_v62, %v897_v52  ;;  %v483_v3 = vstv %s702_s18  ;;  %v491_v4 = vstv %s703_s22  ;;  %s213_s5 = sld [smem:[#allocation4]]  ;;  %s666_s9 = sshll.u32 %s964_s20, 3 }
  0x3b   : > { %v484_v5 = vmul.f32 %v483_v3, %v912_v2  ;;  %v492_v6 = vmul.f32 %v491_v4, %v912_v2  ;;  %v499_v7 = vstv %s704_s2  ;;  %v507_v8 = vstv %s705_s23  ;;  %s583_s7 = sld [smem:[#allocation2]]  ;;  %s211_s14 = scalar_lea.vmem %s961_s4, %s666_s9 }
  0x3c   : > { %v500_v9 = vmul.f32 %v499_v7, %v912_v2  ;;  %v508_v10 = vmul.f32 %v507_v8, %v912_v2  ;;  %v515_v11 = vstv %s706_s24  ;;  %v523_v12 = vstv %s707_s25  ;;  %s586_s8 = sld [smem:[#allocation3]] }
  0x3d   : > { %306 = vrot.lane.b32.xlu0 %v304_v24, %s775_s21  ;;  %v516_v14 = vmul.f32 %v515_v11, %v912_v2  ;;  %v524_v15 = vmul.f32 %v523_v12, %v912_v2  ;;  %v536_v17 = vstv %s709_s26  ;;  %v544_v18 = vstv %s710_s27 }
  0x3e   : > { %314 = vrot.lane.b32.xlu1 %v312_v25, %s776_s1  ;;  %v537_v19 = vmul.f32 %v536_v17, %v927_v16  ;;  %v545_v20 = vmul.f32 %v544_v18, %v927_v16  ;;  %v552_v21 = vstv %s711_s28  ;;  %v560_v22 = vstv %s712_s29 }
  0x3f   : > { %v553_v23 = vmul.f32 %v552_v21, %v927_v16  ;;  %v561_v24 = vmul.f32 %v560_v22, %v927_v16  ;;  %v568_v25 = vstv %s713_s30  ;;  %v576_v27 = vstv %s714_s6 }
  0x40   : > { %v569_v28 = vmul.f32 %v568_v25, %v927_v16 }
  0x41   : > { %327 = vrot.lane.b32.xlu0 %v325_v29, %s771_s10  ;;  %v577_v29 = vmul.f32 %v576_v27, %v927_v16 }
  0x42   : > { %335 = vrot.lane.b32.xlu1 %v333_v30, %s773_s15  ;;  %v214_v30 = vstv %s213_s5 }
  0x43   : > { %v215_v31 = vmul.f32 %v214_v30, %v839_v0 }
  0x45   : > { %343 = vrot.lane.b32.xlu0 %v341_v33, %s772_s12 }
  0x46   : > { %351 = vrot.lane.b32.xlu1 %v349_v34, %s774_s16 }
  0x49   : > { %359 = vrot.lane.b32.xlu0 %v357_v37, %s775_s21 }
  0x4a   : > { %367 = vrot.lane.b32.xlu1 %v365_v38, %s776_s1 }
  0x4d   : > { %380 = vrot.lane.b32.xlu0 %v378_v42, %s771_s10 }
  0x4e   : > { %388 = vrot.lane.b32.xlu1 %v386_v43, %s773_s15 }
  0x51   : > { %396 = vrot.lane.b32.xlu0 %v394_v46, %s772_s12 }
  0x52   : > { %404 = vrot.lane.b32.xlu1 %v402_v47, %s774_s16 }
  0x55   : > { %412 = vrot.lane.b32.xlu0 %v410_v50, %s775_s21 }
  0x56   : > { %420 = vrot.lane.b32.xlu1 %v418_v51, %s776_s1 }
  0x59   : > { %433 = vrot.lane.b32.xlu0 %v431_v55, %s771_s10 }
  0x5a   : > { %441 = vrot.lane.b32.xlu1 %v439_v56, %s773_s15 }
  0x5d   : > { %449 = vrot.lane.b32.xlu0 %v447_v59, %s772_s12 }
  0x5e   : > { %457 = vrot.lane.b32.xlu1 %v455_v60, %s774_s16 }
  0x61   : > { %465 = vrot.lane.b32.xlu0 %v463_v63, %s775_s21 }
  0x62   : > { %473 = vrot.lane.b32.xlu1 %v471_v1, %s776_s1 }
  0x65   : > { %486 = vrot.lane.b32.xlu0 %v484_v5, %s771_s10 }
  0x66   : > { %494 = vrot.lane.b32.xlu1 %v492_v6, %s773_s15 }
  0x69   : > { %502 = vrot.lane.b32.xlu0 %v500_v9, %s772_s12 }
  0x6a   : > { %510 = vrot.lane.b32.xlu1 %v508_v10, %s774_s16 }
  0x6d   : > { %518 = vrot.lane.b32.xlu0 %v516_v14, %s775_s21 }
  0x6e   : > { %526 = vrot.lane.b32.xlu1 %v524_v15, %s776_s1 }
  0x71   : > { %539 = vrot.lane.b32.xlu0 %v537_v19, %s771_s10  ;;  %s673_s10 = sld [smem:[#allocation4 + $0x7]] }
  0x72   : > { %547 = vrot.lane.b32.xlu1 %v545_v20, %s773_s15  ;;  %s687_s15 = sld [smem:[#allocation4 + $0x15]] }
  0x75   : > { %555 = vrot.lane.b32.xlu0 %v553_v23, %s772_s12  ;;  %s680_s12 = sld [smem:[#allocation4 + $0xe]] }
  0x76   : > { %563 = vrot.lane.b32.xlu1 %v561_v24, %s774_s16  ;;  %s694_s16 = sld [smem:[#allocation4 + $0x1c]] }
  0x77   : > { %v267_v41 = vstv %s673_s10 }
  0x78   : > { %v268_v45 = vmul.f32 %v267_v41, %v852_v13  ;;  %v373_v9 = vstv %s687_s15 }
  0x79   : > { %571 = vrot.lane.b32.xlu0 %v569_v28, %s775_s21  ;;  %v374_v15 = vmul.f32 %v373_v9, %v882_v39  ;;  %s701_s21 = sld [smem:[#allocation4 + $0x23]] }
  0x7a   : > { %579 = vrot.lane.b32.xlu1 %v577_v29, %s776_s1  ;;  %s708_s1 = sld [smem:[#allocation4 + $0x2a]] }
  0x7b   : > { %v320_v57 = vstv %s680_s12 }
  0x7c   : > { %v321_v61 = vmul.f32 %v320_v57, %v867_v26  ;;  %v426_v27 = vstv %s694_s16 }
  0x7f   : > { %v479_v41 = vstv %s701_s21 }
  0x9b   : > { %v222_v32 = vpop.permute.xlu0 %221 }
  0x9c   : > { %v238_v33 = vpop.permute.xlu1 %237  ;;  %v224_v34 = vadd.f32 %v222_v32, %v215_v31  ;;  %v427_v31 = vmul.f32 %v426_v27, %v897_v52 }
  0x9f   : > { %v230_v35 = vpop.permute.xlu0 %229 }
  0xa0   : > { %v232_v36 = vadd.f32 %v230_v35, %v224_v34  ;;  %v246_v37 = vpop.permute.xlu1 %245 }
  0xa2   : > { %v240_v38 = vadd.f32 %v238_v33, %v232_v36 }
  0xa3   : > { %v254_v40 = vpop.permute.xlu0 %253 }
  0xa4   : > { %v248_v42 = vadd.f32 %v246_v37, %v240_v38  ;;  %v262_v43 = vpop.permute.xlu1 %261 }
  0xa6   : > { %v256_v44 = vadd.f32 %v254_v40, %v248_v42 }
  0xa7   : > { %v275_v46 = vpop.permute.xlu0 %274 }
  0xa8   : > { %v264_v47 = vadd.f32 %v262_v43, %v256_v44  ;;  %v283_v48 = vpop.permute.xlu1 %282 }
  0xaa   : > { %v269_v0 = vadd.f32 %v268_v45, %v264_v47 }
  0xab   : > { %v291_v49 = vpop.permute.xlu0 %290 }
  0xac   : > { %v277_v50 = vadd.f32 %v275_v46, %v269_v0  ;;  %v299_v51 = vpop.permute.xlu1 %298  ;;  %v480_v46 = vmul.f32 %v479_v41, %v912_v2 }
  0xae   : > { %v285_v53 = vadd.f32 %v283_v48, %v277_v50 }
  0xaf   : > { %v307_v54 = vpop.permute.xlu0 %306 }
  0xb0   : > { %v293_v55 = vadd.f32 %v291_v49, %v285_v53  ;;  %v315_v56 = vpop.permute.xlu1 %314 }
  0xb2   : > { %v301_v58 = vadd.f32 %v299_v51, %v293_v55  ;;  %v532_v55 = vstv %s708_s1 }
  0xb3   : > { %v328_v59 = vpop.permute.xlu0 %327 }
  0xb4   : > { %v309_v60 = vadd.f32 %v307_v54, %v301_v58  ;;  %v336_v62 = vpop.permute.xlu1 %335 }
  0xb6   : > { %v317_v13 = vadd.f32 %v315_v56, %v309_v60 }
  0xb7   : > { %v344_v63 = vpop.permute.xlu0 %343 }
  0xb8   : > { %v322_v1 = vadd.f32 %v321_v61, %v317_v13  ;;  %v352_v3 = vpop.permute.xlu1 %351 }
  0xba   : > { %v330_v4 = vadd.f32 %v328_v59, %v322_v1  ;;  %v533_v59 = vmul.f32 %v532_v55, %v927_v16 }
  0xbb   : > { %v360_v5 = vpop.permute.xlu0 %359 }
  0xbc   : > { %v338_v6 = vadd.f32 %v336_v62, %v330_v4  ;;  %v368_v7 = vpop.permute.xlu1 %367 }
  0xbe   : > { %v346_v8 = vadd.f32 %v344_v63, %v338_v6 }
  0xbf   : > { %v381_v10 = vpop.permute.xlu0 %380 }
  0xc0   : > { %v354_v11 = vadd.f32 %v352_v3, %v346_v8  ;;  %v389_v12 = vpop.permute.xlu1 %388  ;;  %v584_v8 = vstv %s583_s7 }
  0xc2   : > { %v362_v14 = vadd.f32 %v360_v5, %v354_v11 }
  0xc3   : > { %v397_v17 = vpop.permute.xlu0 %396 }
  0xc4   : > { %v370_v26 = vadd.f32 %v368_v7, %v362_v14  ;;  %v405_v18 = vpop.permute.xlu1 %404 }
  0xc6   : > { %v375_v19 = vadd.f32 %v374_v15, %v370_v26 }
  0xc7   : > { %v413_v20 = vpop.permute.xlu0 %412 }
  0xc8   : > { %v383_v21 = vadd.f32 %v381_v10, %v375_v19  ;;  %v421_v22 = vpop.permute.xlu1 %420  ;;  %v587_v10 = vstv %s586_s8 }
  0xca   : > { %v391_v23 = vadd.f32 %v389_v12, %v383_v21 }
  0xcb   : > { %v434_v24 = vpop.permute.xlu0 %433 }
  0xcc   : > { %v399_v25 = vadd.f32 %v397_v17, %v391_v23  ;;  %v442_v28 = vpop.permute.xlu1 %441 }
  0xce   : > { %v407_v29 = vadd.f32 %v405_v18, %v399_v25 }
  0xcf   : > { %v450_v32 = vpop.permute.xlu0 %449 }
  0xd0   : > { %v415_v30 = vadd.f32 %v413_v20, %v407_v29  ;;  %v458_v39 = vpop.permute.xlu1 %457 }
  0xd2   : > { %v423_v33 = vadd.f32 %v421_v22, %v415_v30 }
  0xd3   : > { %v466_v36 = vpop.permute.xlu0 %465 }
  0xd4   : > { %v428_v34 = vadd.f32 %v427_v31, %v423_v33  ;;  %v474_v38 = vpop.permute.xlu1 %473 }
  0xd6   : > { %v436_v35 = vadd.f32 %v434_v24, %v428_v34 }
  0xd7   : > { %v487_v42 = vpop.permute.xlu0 %486 }
  0xd8   : > { %v444_v37 = vadd.f32 %v442_v28, %v436_v35  ;;  %v495_v44 = vpop.permute.xlu1 %494 }
  0xda   : > { %v452_v40 = vadd.f32 %v450_v32, %v444_v37 }
  0xdb   : > { %v503_v48 = vpop.permute.xlu0 %502 }
  0xdc   : > { %v460_v43 = vadd.f32 %v458_v39, %v452_v40  ;;  %v511_v0 = vpop.permute.xlu1 %510 }
  0xde   : > { %v468_v45 = vadd.f32 %v466_v36, %v460_v43 }
  0xdf   : > { %v519_v51 = vpop.permute.xlu0 %518 }
  0xe0   : > { %v476_v47 = vadd.f32 %v474_v38, %v468_v45  ;;  %v527_v54 = vpop.permute.xlu1 %526 }
  0xe2   : > { %v481_v52 = vadd.f32 %v480_v46, %v476_v47 }
  0xe3   : > { %v540_v57 = vpop.permute.xlu0 %539 }
  0xe4   : > { %v489_v49 = vadd.f32 %v487_v42, %v481_v52  ;;  %v548_v60 = vpop.permute.xlu1 %547 }
  0xe6   : > { %v497_v50 = vadd.f32 %v495_v44, %v489_v49 }
  0xe7   : > { %v556_v62 = vpop.permute.xlu0 %555 }
  0xe8   : > { %v505_v53 = vadd.f32 %v503_v48, %v497_v50  ;;  %v564_v63 = vpop.permute.xlu1 %563 }
  0xea   : > { %v513_v56 = vadd.f32 %v511_v0, %v505_v53 }
  0xeb   : > { %v572_v4 = vpop.permute.xlu0 %571 }
  0xec   : > { %v521_v58 = vadd.f32 %v519_v51, %v513_v56  ;;  %v580_v6 = vpop.permute.xlu1 %579 }
  0xee   : > { %v529_v61 = vadd.f32 %v527_v54, %v521_v58 }
  0xf0   : > { %v534_v2 = vadd.f32 %v533_v59, %v529_v61 }
  0xf2   : > { %v542_v13 = vadd.f32 %v540_v57, %v534_v2 }
  0xf4   : > { %v550_v1 = vadd.f32 %v548_v60, %v542_v13 }
  0xf6   : > { %v558_v3 = vadd.f32 %v556_v62, %v550_v1 }
  0xf8   : > { %v566_v5 = vadd.f32 %v564_v63, %v558_v3 }
  0xfa   : > { %v574_v7 = vadd.f32 %v572_v4, %v566_v5 }
  0xfc   : > { %v582_v9 = vadd.f32 %v580_v6, %v574_v7 }
  0xfe   : > { %v585_v16 = vmul.f32 %v584_v8, %v582_v9 }
 0x100   : > { %v588_v11 = vadd.f32 %v587_v10, %v585_v16 }
 0x102   : > { %v589_v12 = vmax.f32 %v588_v11, 0.0 }
 0x104   : > { %591 = vst.msk [vmem:[%s211_s14] sm:$0xff] %vm590_vm0, %v589_v12 }
 0x105 PF: > { %s17_s19 = sadd.s32 1, %s768_s19  }
 0x106   : > { %p14_p1 = scmp.ge.s32.totalorder %s17_s19, 4  }
 0x108   :  { %16 = sbr.rel (!%p14_p1) target bundleno = 4 (0x4), region = 71 }
 0x10f   :  { %611 = vsyncpa [#allocation5], 1 }
 0x110   :  { %613 = vsyncpa [#allocation5 + $0x1], 1 }

// kernel: apn_forward.15
= control target key start
LH: loop header
LB: loop body
LE: loop exit
PB: predicated region body
PF: predicated region fallthrough
CT: control target
= control target key end

     0   :  { %s666_s21 = smov 0   ;;  %s668_s22 = smov 0   ;;  %s720_s0 = inlined_call_operand.vmem [shape: bf16[2,4,256], index: 0, kind: input, shape index: {}]   ;;  %s721_s1 = inlined_call_operand.vmem [shape: bf16[8,4], index: 1, kind: input, shape index: {}]   ;;  %s722_s2 = inlined_call_operand.vmem [shape: f32[8,1], index: 2, kind: input, shape index: {}]   ;;  %s723_s3 = inlined_call_operand.vmem [shape: f32[8,1], index: 3, kind: input, shape index: {}]   ;;  %s724_s4 = inlined_call_operand.vmem [shape: f32[2,1,256], index: 4, kind: input, shape index: {}]   ;;  %s725_s5 = inlined_call_operand.vmem [shape: f32[2,8,1], index: 5, kind: input, shape index: {}]   ;;  %s726_s6 = inlined_call_operand.vmem [shape: f32[2,8,256], index: 6, kind: output, shape index: {}]  }
   0x1   :  { %s670_s23 = smov 0  }
   0x2 LB: > { %s28_s24 = sadd.s32 1, %s624_s22  ;;  %p565_p0 = scmp.ge.s32.totalorder %s628_s23, 1  ;;  %s628_s23 = sphi %s670_s23, %s16_s23   ;;  %s624_s22 = sphi %s668_s22, %s728_s22   ;;  %s620_s21 = sphi %s666_s21, %s727_s21  }
   0x3   : > { %p30_p1 = scmp.ge.s32.totalorder %s28_s24, 2  ;;  %p258_p2 = scmp.lt.s32.totalorder %s628_s23, 3 }
   0x5   : > { %s730_s24 = smov (%p30_p1, %s28_s24), 0  ;;  %p259_p3 = pnand %p565_p0, %p258_p2 }
   0x6   : > { %p309_p4 = scmp.lt.s32.totalorder (!%p259_p3), %s620_s21, 1  ;;  %v630_v0 = vmov (!%p259_p3), 0   ;;  %v405_v1 = vld [vmem:[%s722_s2] sm:$0xff] (!%p259_p3)  ;;  %vm357_vm0 = vcmask (!%p259_p3), 1041408   ;;  %vm353_vm1 = vcmask (!%p259_p3), 31744   ;;  %v425_v8 = vlaneseq (!%p259_p3) }
   0x7   : > { %262 = sbr.rel (%p259_p3) target bundleno = 248 (0xf8), region = 44  ;;  %396 = vmatprep.mubr.bf16.mxu0 (!%p259_p3), %v630_v0  ;;  %604 = vset.pattern.permute.xlu0 (!%p259_p3), %v630_v0  ;;  %v413_v2 = vld [vmem:[%s723_s3] sm:$0xff] (!%p259_p3) }
   0x8   : > { %408 = vperm.xlu0 (!%p259_p3), %604, %v405_v1   ;;  %605 = vset.pattern.permute.xlu1 (!%p259_p3), %v630_v0  ;;  %v342_v7 = vld [vmem:[%s721_s1] sm:$0xf] (!%p259_p3)  ;;  %v426_v9 = vshrl.u32 (!%p259_p3), %v425_v8, 7 }
   0xa   : > { %v427_v11 = vsub.s32 (!%p259_p3), 0, %v426_v9  ;;  %v431_v13 = vsub.s32 (!%p259_p3), 1, %v426_v9 }
   0xc   : > { %416 = vperm.xlu0 (!%p259_p3), %604, %v413_v2  }
   0xe   : > { %s732_s21 = smov (!%p309_p4, %s620_s21), 1 }
   0xf   : > { %s577_s29 = sshll.u32 %s732_s21, 2  ;;  %s569_s30 = sshll.u32 %s732_s21, 3 }
  0x10   : > { %s316_s9 = scalar_lea.vmem %s720_s0, %s577_s29  ;;  %s330_s12 = scalar_lea.vmem %s725_s5, %s569_s30 }
  0x11   : > { %v572_v3 = vld.sshfl [vmem:[%s316_s9] sm:$0x33 pattern:$0x76325410]  ;;  %s568_s15 = sshll.u32 %s732_s21, 1  ;;  %s578_s19 = sshll.u32 %s732_s21, 4 }
  0x12   : > { %v437_v4 = vld [vmem:[%s330_s12] sm:$0xff]  ;;  %v352_v5 = vcombine.high %v572_v3, %v572_v3  ;;  %v359_v6 = vsel %vm357_vm0, %v572_v3, 0  ;;  %s325_s18 = scalar_lea.vmem %s724_s4, %s568_s15  ;;  %s339_s26 = scalar_lea.vmem %s726_s6, %s578_s19 }
  0x13   : > { %440 = vperm.xlu1 %605, %v437_v4   ;;  %v423_v14 = vld [vmem:[%s325_s18] sm:$0x3] }
  0x14   : > { %573 = vmatprep.subr.msk.bf16.mxu0 %vm357_vm0, %v352_v5  ;;  %v428_v22 = vrot.slane %v423_v14, %v427_v11  ;;  %v432_v24 = vrot.slane %v423_v14, %v431_v13 }
  0x15   : > { %365 = vmatpush1.bf16.msra.mxu0 %v359_v6 }
  0x18   : > { %574 = vmatmul.mubr.msk.bf16.vlgmr.msra.gmra.mrb[0].mxu0 %vm353_vm1, %v342_v7 }
  0x87   : > { %v409_v10 = vpop.permute.xlu0 %408 }
  0x8b   : > { %v417_v17 = vpop.permute.xlu0 %416 }
  0x92   : > { %v441_v27 = vpop.permute.xlu1 %440 }
  0xeb   : > { %v398_v12 = vpop.f32.mrb[0].mxu0 }
  0xec   : > { %v411_v15 = vmul.f32 %v409_v10, %v398_v12  ;;  %v400_v16 = vpop.f32.mrb[1].mxu0 }
  0xed   : > { %v412_v18 = vmul.f32 %v409_v10, %v400_v16  ;;  %v402_v19 = vpop.f32.mrb[2].mxu0 }
  0xee   : > { %v419_v20 = vadd.f32 %v417_v17, %v411_v15  ;;  %v403_v21 = vpop.f32.mrb[3].mxu0 }
  0xef   : > { %v420_v23 = vadd.f32 %v417_v17, %v412_v18 }
  0xf0   : > { %v421_v25 = vmax.f32 %v419_v20, 0.0 }
  0xf1   : > { %v422_v26 = vmax.f32 %v420_v23, 0.0 }
  0xf2   : > { %v435_v28 = vmul.f32 %v428_v22, %v421_v25 }
  0xf3   : > { %v436_v29 = vmul.f32 %v432_v24, %v422_v26 }
  0xf4   : > { %v443_v30 = vadd.f32 %v441_v27, %v435_v28 }
  0xf5   : > { %v444_v31 = vadd.f32 %v441_v27, %v436_v29 }
  0xf6   : > { %445 = vst [vmem:[%s339_s26] sm:$0xff] %v443_v30 }
  0xf7   : > { %446 = vst [vmem:[%s339_s26 + $0x8] sm:$0xff] %v444_v31 }
  0xf8 PF: > { %s16_s23 = sadd.s32 1, %s628_s23   ;;  %s727_s21 = smov %s624_s22 }
  0xf9   : > { %p13_p5 = scmp.ge.s32.totalorder %s16_s23, 4   ;;  %s728_s22 = smov %s730_s24 }
  0xfb   :  { %15 = sbr.rel (!%p13_p5) target bundleno = 2 (0x2), region = 80 }

</bundles_post_ra>
